<compile_context>
chip_gen: v5e
topology: v5e:2x2
jax: 0.10.0
libtpu: 0.0.40
codegen_flags: <defaults>
</compile_context>

<pallas_src>
import jax
import jax.numpy as jnp
from jax import lax
from jax.experimental import pallas as pl
from jax.experimental.pallas import tpu as pltpu


# ----------------------------- Pallas kernels ------------------------------ #

def _conv_kernel(x_ref, w1_ref, b1_ref, w2_ref, b2_ref, o_ref):
    """Fused conv1 (3x300) + conv2 (2x1); channel-major (16, 512) per sample.

    x_ref : (Bs, 1, 500, 300)  raw NCHW input block (no wrapper transpose)
    w1_ref: (24, 300)  conv1 rows stacked at sublane offsets 0/8/16 (zeros pad)
    w2_ref: (32, 6)    conv2 rows stacked at sublane offsets 0/16
    o_ref : (Bs, 16, 512)  lane-padded channel-major features
    """
    Bs = x_ref.shape[0]
    H = x_ref.shape[2]            # 500
    H1 = H - 2                    # 498 (conv1 output rows)
    H2 = H1 - 1                   # 497 (conv2 output rows)
    C2 = o_ref.shape[1]           # 16
    H2P = o_ref.shape[2]          # 512 (lane-padded)

    zpad = jnp.zeros((C2, H2P - H2), jnp.float32)   # hoisted out of the loop

    for s in range(Bs):           # static unroll, Bs <= 8
        x = x_ref[s, 0]           # (500, 300), VMEM resident

        # conv1: one MXU pass contracting kw (last axis of both operands),
        # then shift-add the three small (6, 500) row-results.
        p = lax.dot_general(w1_ref[...], x, (((1,), (1,)), ((), ())),
                            preferred_element_type=jnp.float32)     # (24, 500)
        out1 = (p[0:6, 0:H1] + p[8:14, 1:H1 + 1] + p[16:22, 2:H1 + 2]
                + b1_ref[...])                                       # (6, 498)

        # conv2: one MXU pass over 6 input channels, shift-add the two rows.
        q = jnp.dot(w2_ref[...], out1,
                    preferred_element_type=jnp.float32)              # (32, 498)
        out2 = q[0:C2, 0:H2] + q[C2:2 * C2, 1:H2 + 1] + b2_ref[...]  # (16, 497)

        # single lane-dense (16, 512) store, zero tail in-register.
        o_ref[s] = jnp.concatenate([out2, zpad], axis=1)


def _fc_split_kernel(feat_ref, w1_ref, b1_ref, w2_ref, w3_ref, o_ref, h1_acc):
    """Half of fc1 (K-tiled, bf16 x bf16 -> f32) fused with fc2+fc3 partials.

    grid = (half h [parallel], k-tile [arbitrary]).  Each half h owns fc1
    output columns [h*512, (h+1)*512) and produces partial (B, 72) logits.
    """
    @pl.when(pl.program_id(1) == 0)
    def _init():
        h1_acc[...] = jnp.zeros_like(h1_acc)

    a = feat_ref[...].astype(jnp.bfloat16)                    # (B, tk)
    h1_acc[...] += jnp.dot(a, w1_ref[...],
                           preferred_element_type=jnp.float32)

    @pl.when(pl.program_id(1) == pl.num_programs(1) - 1)
    def _finalize():
        h1 = h1_acc[...] + b1_ref[...]                        # (B, 512) half
        h2 = jnp.dot(h1.astype(jnp.bfloat16), w2_ref[...],
                     preferred_element_type=jnp.float32)      # (B, 512), no b2
        part = jnp.dot(h2.astype(jnp.bfloat16), w3_ref[...],
                       preferred_element_type=jnp.float32)    # (B, 72) partial
        o_ref[0] = part


def _combine_softmax_kernel(part_ref, c3_ref, o_ref):
    """logits = part[0] + part[1] + (b2 @ W3^T + b3); softmax over 72."""
    logits = part_ref[0] + part_ref[1] + c3_ref[...]          # (B, 72)
    m = jnp.max(logits, axis=-1, keepdims=True)
    e = jnp.exp(logits - m)
    o_ref[...] = e / jnp.sum(e, axis=-1, keepdims=True)


# ----------------------------- pallas_call wrappers ------------------------ #

def _pick_bs(n):
    """Samples per conv grid step: amortize step overhead for larger batches,
    keep 1 sample/step for tiny batches so v7x megacore gets one per core."""
    for bs in (8, 4, 2):
        if n % bs == 0 and n // bs >= 2:
            return bs
    return 1


def conv_features(x, w1s, b1c, w2s, b2c):
    """x: (N, 1, 500, 300) NCHW -> channel-major lane-padded (N, 16, 512)."""
    N = x.shape[0]
    Bs = _pick_bs(N)
    H2P = 512
    return pl.pallas_call(
        _conv_kernel,
        out_shape=jax.ShapeDtypeStruct((N, 16, H2P), jnp.float32),
        grid_spec=pltpu.PrefetchScalarGridSpec(
            num_scalar_prefetch=0,
            grid=(N // Bs,),
            in_specs=[
                pl.BlockSpec((Bs, 1, x.shape[2], x.shape[3]),
                             lambda n: (n, 0, 0, 0)),
                pl.BlockSpec((24, 300), lambda n: (0, 0)),
                pl.BlockSpec((6, 1), lambda n: (0, 0)),
                pl.BlockSpec((32, 6), lambda n: (0, 0)),
                pl.BlockSpec((16, 1), lambda n: (0, 0)),
            ],
            out_specs=pl.BlockSpec((Bs, 16, H2P), lambda n: (n, 0, 0)),
        ),
        compiler_params=pltpu.CompilerParams(
            dimension_semantics=("parallel",)),
    )(x, w1s, b1c, w2s, b2c)


def fc_partial_logits(feat, fw1, fb1, fw2, fw3, tk=4096):
    """(feat @ fw1 + fb1) @ fw2 @ fw3, split over fc1's column halves.

    Returns partial logits of shape (2, B, 72); the two halves plus the
    combined bias (b2 @ W3^T + b3) sum to the true logits.
    """
    B, K = feat.shape
    N1 = fw1.shape[1]          # 1024 (padded fc1 width)
    NH = N1 // 2               # 512 per half
    N2 = fw2.shape[1]          # 512 (padded fc2 width)
    N3 = fw3.shape[1]          # 72
    assert K % tk == 0 and N1 % 2 == 0
    nk = K // tk
    return pl.pallas_call(
        _fc_split_kernel,
        out_shape=jax.ShapeDtypeStruct((2, B, N3), jnp.float32),
        grid_spec=pltpu.PrefetchScalarGridSpec(
            num_scalar_prefetch=0,
            grid=(2, nk),
            in_specs=[
                pl.BlockSpec((B, tk), lambda h, k: (0, k)),
                pl.BlockSpec((tk, NH), lambda h, k: (k, h)),
                pl.BlockSpec((1, NH), lambda h, k: (0, h)),
                pl.BlockSpec((NH, N2), lambda h, k: (h, 0)),
                pl.BlockSpec((N2, N3), lambda h, k: (0, 0)),
            ],
            out_specs=pl.BlockSpec((1, B, N3), lambda h, k: (h, 0, 0)),
            scratch_shapes=[pltpu.VMEM((B, NH), jnp.float32)],
        ),
        compiler_params=pltpu.CompilerParams(
            dimension_semantics=("parallel", "arbitrary"),
            vmem_limit_bytes=32 * 1024 * 1024),
    )(feat, fw1, fb1, fw2, fw3)


def combine_softmax(part, c3):
    """part: (2, B, 72) partial logits, c3: (1, 72) combined bias -> (B, 72)."""
    _, B, N3 = part.shape
    return pl.pallas_call(
        _combine_softmax_kernel,
        out_shape=jax.ShapeDtypeStruct((B, N3), jnp.float32),
        grid_spec=pltpu.PrefetchScalarGridSpec(
            num_scalar_prefetch=0,
            grid=(1,),
            in_specs=[
                pl.BlockSpec((2, B, N3), lambda i: (0, 0, 0)),
                pl.BlockSpec((1, N3), lambda i: (0, 0)),
            ],
            out_specs=pl.BlockSpec((B, N3), lambda i: (0, 0)),
        ),
    )(part, c3)


# ------------------------------ Model glue --------------------------------- #

def init_params(key):
    """Deterministic PyTorch-style (uniform +/-1/sqrt(fan_in)) initialization."""
    ks = jax.random.split(key, 10)

    def u(k, shape, fan_in):
        bound = 1.0 / jnp.sqrt(jnp.float32(fan_in))
        return jax.random.uniform(k, shape, jnp.float32, -bound, bound)

    return dict(
        conv1_w=u(ks[0], (6, 1, 3, 300), 1 * 3 * 300),
        conv1_b=u(ks[1], (6,), 1 * 3 * 300),
        conv2_w=u(ks[2], (16, 6, 2, 1), 6 * 2 * 1),
        conv2_b=u(ks[3], (16,), 6 * 2 * 1),
        fc1_w=u(ks[4], (1000, 7952), 7952),
        fc1_b=u(ks[5], (1000,), 7952),
        fc2_w=u(ks[6], (500, 1000), 1000),
        fc2_b=u(ks[7], (500,), 1000),
        fc3_w=u(ks[8], (72, 500), 500),
        fc3_b=u(ks[9], (72,), 500),
    )


def prepare_params(params):
    """One-time (outside the hot path) re-layout / padding / bf16 cast."""
    C2, H2, H2P = 16, 497, 512

    # conv1: stack the 3 kernel rows at sublane offsets 0/8/16 -> (24, 300).
    w1 = params["conv1_w"][:, 0]                        # (6, 3, 300)
    w1s = jnp.zeros((24, 300), jnp.float32)
    for k in range(3):
        w1s = w1s.at[8 * k:8 * k + 6].set(w1[:, k, :])
    b1c = params["conv1_b"].reshape(6, 1)

    # conv2: stack the 2 kernel rows at sublane offsets 0/16 -> (32, 6).
    w2 = params["conv2_w"][:, :, :, 0]                  # (16, 6, 2)
    w2s = jnp.concatenate([w2[:, :, 0], w2[:, :, 1]], axis=0)   # (32, 6)
    b2c = params["conv2_b"].reshape(16, 1)

    # fc1: (1000, 7952) -> (8192, 1024) bf16, row index = c*512 + h so it lines
    # up with the lane-padded channel-major conv features; pads are zero.
    fw1 = params["fc1_w"].reshape(1000, C2, H2)
    fw1 = jnp.pad(fw1, ((0, 24), (0, 0), (0, H2P - H2)))
    fw1 = fw1.transpose(1, 2, 0).reshape(C2 * H2P, 1024).astype(jnp.bfloat16)
    fb1 = jnp.pad(params["fc1_b"], (0, 24)).reshape(1, 1024)

    # fc2: (500, 1000) -> (1024, 512) bf16, zero-padded rows/cols.
    fw2f = jnp.pad(params["fc2_w"], ((0, 12), (0, 24))).T        # (1024, 512) f32
    fw2 = fw2f.astype(jnp.bfloat16)

    # fc3: (72, 500) -> (512, 72) bf16, zero-padded rows.
    fw3f = jnp.pad(params["fc3_w"], ((0, 0), (0, 12))).T         # (512, 72) f32
    fw3 = fw3f.astype(jnp.bfloat16)

    # combined fc2/fc3 bias, applied once in the combine kernel (f32 exact).
    fb2 = jnp.pad(params["fc2_b"], (0, 12)).reshape(1, 512)
    c3 = (fb2 @ fw3f + params["fc3_b"].reshape(1, 72)).astype(jnp.float32)

    return dict(w1s=w1s, b1c=b1c, w2s=w2s, b2c=b2c,
                fw1=fw1, fb1=fb1, fw2=fw2, fw3=fw3, c3=c3)


def cnn_forward(prep, x):
    N = x.shape[0]
    # x goes in raw (N, 1, 500, 300); the conv kernel contracts kw in place.
    feat = conv_features(x, prep["w1s"], prep["b1c"],
                         prep["w2s"], prep["b2c"])               # (N, 16, 512)
    feat = feat.reshape(N, -1)                                   # free bitcast
    part = fc_partial_logits(feat, prep["fw1"], prep["fb1"],
                             prep["fw2"], prep["fw3"])           # (2, N, 72)
    return combine_softmax(part, prep["c3"])                     # (N, 72)


def cnn_reference(params, x):
    """Pure-JAX (f32) reference matching the PyTorch module exactly."""
    dn = ("NCHW", "OIHW", "NCHW")
    y = lax.conv_general_dilated(x, params["conv1_w"], (1, 1), "VALID",
                                 dimension_numbers=dn)
    y = y + params["conv1_b"][None, :, None, None]
    y = lax.conv_general_dilated(y, params["conv2_w"], (1, 1), "VALID",
                                 dimension_numbers=dn)
    y = y + params["conv2_b"][None, :, None, None]
    f = y.reshape(y.shape[0], -1)
    f = f @ params["fc1_w"].T + params["fc1_b"]
    f = f @ params["fc2_w"].T + params["fc2_b"]
    f = f @ params["fc3_w"].T + params["fc3_b"]
    return jax.nn.softmax(f, axis=1)


if __name__ == "__main__":
    key = jax.random.PRNGKey(0)
    pkey, xkey, xkey2 = jax.random.split(key, 3)
    params = init_params(pkey)
    prep = prepare_params(params)          # once, outside the jitted forward

    fwd = jax.jit(cnn_forward)

    # fc1 expects 7952 = 16 * 497 features -> input must be (N, 1, 500, 300).
    x = jax.random.normal(xkey, (2, 1, 500, 300), jnp.float32)
    out = jax.block_until_ready(fwd(prep, x))
    assert out.shape == (2, 72)
    assert jnp.allclose(jnp.sum(out, axis=1), 1.0, atol=1e-4)
    ref = cnn_reference(params, x)
    assert jnp.allclose(out, ref, rtol=2e-2, atol=2e-3), float(
        jnp.max(jnp.abs(out - ref)))

    # Also exercise the multi-sample conv block path (Bs=4, grid of 2 blocks).
    x8 = jax.random.normal(xkey2, (8, 1, 500, 300), jnp.float32)
    out8 = jax.block_until_ready(fwd(prep, x8))
    ref8 = cnn_reference(params, x8)
    assert out8.shape == (8, 72)
    assert jnp.allclose(out8, ref8, rtol=2e-2, atol=2e-3), float(
        jnp.max(jnp.abs(out8 - ref8)))

    print("KERNEL_OK")
</pallas_src>

<mosaic_0001>
module attributes {stable_mosaic.version = 11 : i64} {
  func.func @_conv_kernel(%arg0: i32, %arg1: memref<1x1x500x300xf32, #tpu.memory_space<vmem>>, %arg2: memref<24x300xf32, #tpu.memory_space<vmem>>, %arg3: memref<6x1xf32, #tpu.memory_space<vmem>>, %arg4: memref<32x6xf32, #tpu.memory_space<vmem>>, %arg5: memref<16x1xf32, #tpu.memory_space<vmem>>, %arg6: memref<1x16x512xf32, #tpu.memory_space<vmem>>) attributes {dimension_semantics = [#tpu.dimension_semantics<parallel>], iteration_bounds = array<i64: 2>, scalar_prefetch = 0 : i64, scratch_operands = 0 : i64, tpu.core_type = #tpu.core_type<tc>, window_params = [{transform_indices = @transform_0, window_bounds = array<i64: 1, 1, 500, 300>}, {pipeline_mode = #tpu.pipeline_mode<synchronous>, transform_indices = @transform_1, window_bounds = array<i64: 24, 300>}, {pipeline_mode = #tpu.pipeline_mode<synchronous>, transform_indices = @transform_2, window_bounds = array<i64: 6, 1>}, {pipeline_mode = #tpu.pipeline_mode<synchronous>, transform_indices = @transform_3, window_bounds = array<i64: 32, 6>}, {pipeline_mode = #tpu.pipeline_mode<synchronous>, transform_indices = @transform_4, window_bounds = array<i64: 16, 1>}, {transform_indices = @transform_5, window_bounds = array<i64: 1, 16, 512>}]} {
    %cst = arith.constant 0.000000e+00 : f32
    %0 = vector.broadcast %cst : f32 to vector<16x15xf32>
    %c0 = arith.constant 0 : index
    %c0_0 = arith.constant 0 : index
    %c0_1 = arith.constant 0 : index
    %c0_2 = arith.constant 0 : index
    %1 = vector.load %arg1[%c0, %c0_0, %c0_1, %c0_2] : memref<1x1x500x300xf32, #tpu.memory_space<vmem>>, vector<1x1x500x300xf32>
    %2 = vector.shape_cast %1 : vector<1x1x500x300xf32> to vector<500x300xf32>
    %c0_3 = arith.constant 0 : index
    %c0_4 = arith.constant 0 : index
    %3 = vector.load %arg2[%c0_3, %c0_4] : memref<24x300xf32, #tpu.memory_space<vmem>>, vector<24x300xf32>
    %cst_5 = arith.constant dense<0.000000e+00> : vector<24x500xf32>
    %4 = tpu.matmul %3, %2, %cst_5 {dimension_numbers = #tpu.dot_dimension_numbers<[1], [1], [0], [0], [0, 0, 1, 0], [], []>} : vector<24x300xf32>, vector<500x300xf32>, vector<24x500xf32> -> vector<24x500xf32>
    %5 = vector.extract_strided_slice %4 {offsets = [0, 0], sizes = [6, 498], strides = [1, 1]} : vector<24x500xf32> to vector<6x498xf32>
    %6 = vector.extract_strided_slice %4 {offsets = [8, 1], sizes = [6, 498], strides = [1, 1]} : vector<24x500xf32> to vector<6x498xf32>
    %7 = arith.addf %5, %6 : vector<6x498xf32>
    %8 = vector.extract_strided_slice %4 {offsets = [16, 2], sizes = [6, 498], strides = [1, 1]} : vector<24x500xf32> to vector<6x498xf32>
    %9 = arith.addf %7, %8 : vector<6x498xf32>
    %c0_6 = arith.constant 0 : index
    %c0_7 = arith.constant 0 : index
    %10 = vector.load %arg3[%c0_6, %c0_7] : memref<6x1xf32, #tpu.memory_space<vmem>>, vector<6x1xf32>
    %11 = vector.broadcast %10 : vector<6x1xf32> to vector<6x498xf32>
    %12 = arith.addf %9, %11 : vector<6x498xf32>
    %c0_8 = arith.constant 0 : index
    %c0_9 = arith.constant 0 : index
    %13 = vector.load %arg4[%c0_8, %c0_9] : memref<32x6xf32, #tpu.memory_space<vmem>>, vector<32x6xf32>
    %cst_10 = arith.constant dense<0.000000e+00> : vector<32x498xf32>
    %14 = tpu.matmul %13, %12, %cst_10 {dimension_numbers = #tpu.dot_dimension_numbers<[1], [0], [0], [1], [0, 0, 1, 1], [], []>} : vector<32x6xf32>, vector<6x498xf32>, vector<32x498xf32> -> vector<32x498xf32>
    %15 = vector.extract_strided_slice %14 {offsets = [0, 0], sizes = [16, 497], strides = [1, 1]} : vector<32x498xf32> to vector<16x497xf32>
    %16 = vector.extract_strided_slice %14 {offsets = [16, 1], sizes = [16, 497], strides = [1, 1]} : vector<32x498xf32> to vector<16x497xf32>
    %17 = arith.addf %15, %16 : vector<16x497xf32>
    %c0_11 = arith.constant 0 : index
    %c0_12 = arith.constant 0 : index
    %18 = vector.load %arg5[%c0_11, %c0_12] : memref<16x1xf32, #tpu.memory_space<vmem>>, vector<16x1xf32>
    %19 = vector.broadcast %18 : vector<16x1xf32> to vector<16x497xf32>
    %20 = arith.addf %17, %19 : vector<16x497xf32>
    %21 = tpu.concatenate %20, %0 in 1 : vector<16x497xf32>, vector<16x15xf32> -> vector<16x512xf32>
    %c0_13 = arith.constant 0 : index
    %c0_14 = arith.constant 0 : index
    %c0_15 = arith.constant 0 : index
    %22 = vector.load %arg6[%c0_13, %c0_14, %c0_15] : memref<1x16x512xf32, #tpu.memory_space<vmem>>, vector<1x16x512xf32>
    %23 = vector.shape_cast %22 : vector<1x16x512xf32> to vector<16x512xf32>
    %24 = vector.shape_cast %21 : vector<16x512xf32> to vector<1x16x512xf32>
    tpu.vector_store %arg6[%c0_13, %c0_14, %c0_15], %24 {strides = array<i32>} : memref<1x16x512xf32, #tpu.memory_space<vmem>>, vector<1x16x512xf32>,
    return
  }
  func.func @transform_0(%arg0: i32) -> (i32, i32, i32, i32) {
    %c0_i32 = arith.constant 0 : i32
    %c0_i32_0 = arith.constant 0 : i32
    %c0_i32_1 = arith.constant 0 : i32
    %c0_i32_2 = arith.constant 0 : i32
    return %arg0, %c0_i32, %c0_i32_0, %c0_i32_1 : i32, i32, i32, i32
  }
  func.func @transform_1(%arg0: i32) -> (i32, i32) {
    %c0_i32 = arith.constant 0 : i32
    %c0_i32_0 = arith.constant 0 : i32
    %c0_i32_1 = arith.constant 0 : i32
    return %c0_i32, %c0_i32_0 : i32, i32
  }
  func.func @transform_2(%arg0: i32) -> (i32, i32) {
    %c0_i32 = arith.constant 0 : i32
    %c0_i32_0 = arith.constant 0 : i32
    %c0_i32_1 = arith.constant 0 : i32
    return %c0_i32, %c0_i32_0 : i32, i32
  }
  func.func @transform_3(%arg0: i32) -> (i32, i32) {
    %c0_i32 = arith.constant 0 : i32
    %c0_i32_0 = arith.constant 0 : i32
    %c0_i32_1 = arith.constant 0 : i32
    return %c0_i32, %c0_i32_0 : i32, i32
  }
  func.func @transform_4(%arg0: i32) -> (i32, i32) {
    %c0_i32 = arith.constant 0 : i32
    %c0_i32_0 = arith.constant 0 : i32
    %c0_i32_1 = arith.constant 0 : i32
    return %c0_i32, %c0_i32_0 : i32, i32
  }
  func.func @transform_5(%arg0: i32) -> (i32, i32, i32) {
    %c0_i32 = arith.constant 0 : i32
    %c0_i32_0 = arith.constant 0 : i32
    %c0_i32_1 = arith.constant 0 : i32
    return %arg0, %c0_i32, %c0_i32_0 : i32, i32, i32
  }
}

module attributes {stable_mosaic.version = 11 : i64} {
  func.func @_fc_split_kernel(%arg0: i32, %arg1: i32, %arg2: memref<2x4096xf32, #tpu.memory_space<vmem>>, %arg3: memref<4096x512xbf16, #tpu.memory_space<vmem>>, %arg4: memref<1x512xf32, #tpu.memory_space<vmem>>, %arg5: memref<512x512xbf16, #tpu.memory_space<vmem>>, %arg6: memref<512x72xbf16, #tpu.memory_space<vmem>>, %arg7: memref<1x2x72xf32, #tpu.memory_space<vmem>>, %arg8: memref<2x512xf32, #tpu.memory_space<vmem>>) attributes {dimension_semantics = [#tpu.dimension_semantics<parallel>, #tpu.dimension_semantics<arbitrary>], iteration_bounds = array<i64: 2, 2>, scalar_prefetch = 0 : i64, scratch_operands = 1 : i64, tpu.core_type = #tpu.core_type<tc>, window_params = [{transform_indices = @transform_0, window_bounds = array<i64: 2, 4096>}, {transform_indices = @transform_1, window_bounds = array<i64: 4096, 512>}, {transform_indices = @transform_2, window_bounds = array<i64: 1, 512>}, {transform_indices = @transform_3, window_bounds = array<i64: 512, 512>}, {pipeline_mode = #tpu.pipeline_mode<synchronous>, transform_indices = @transform_4, window_bounds = array<i64: 512, 72>}, {transform_indices = @transform_5, window_bounds = array<i64: 1, 2, 72>}]} {
    %c0_i32 = arith.constant 0 : i32
    %0 = arith.cmpi eq, %arg1, %c0_i32 : i32
    %1 = arith.extui %0 : i1 to i32
    %c0_i32_0 = arith.constant 0 : i32
    %2 = arith.cmpi ne, %1, %c0_i32_0 : i32
    scf.if %2 {
      %cst_9 = arith.constant 0.000000e+00 : f32
      %13 = vector.broadcast %cst_9 : f32 to vector<2x512xf32>
      %c0_10 = arith.constant 0 : index
      %c0_11 = arith.constant 0 : index
      %14 = vector.load %arg8[%c0_10, %c0_11] : memref<2x512xf32, #tpu.memory_space<vmem>>, vector<2x512xf32>
      tpu.vector_store %arg8[%c0_10, %c0_11], %13 {strides = array<i32>} : memref<2x512xf32, #tpu.memory_space<vmem>>, vector<2x512xf32>,
    } else {
    }
    %c0 = arith.constant 0 : index
    %c0_1 = arith.constant 0 : index
    %3 = vector.load %arg2[%c0, %c0_1] : memref<2x4096xf32, #tpu.memory_space<vmem>>, vector<2x4096xf32>
    %4 = arith.truncf %3 : vector<2x4096xf32> to vector<2x4096xbf16>
    %c0_2 = arith.constant 0 : index
    %c0_3 = arith.constant 0 : index
    %5 = vector.load %arg8[%c0_2, %c0_3] : memref<2x512xf32, #tpu.memory_space<vmem>>, vector<2x512xf32>
    %c0_4 = arith.constant 0 : index
    %c0_5 = arith.constant 0 : index
    %6 = vector.load %arg3[%c0_4, %c0_5] : memref<4096x512xbf16, #tpu.memory_space<vmem>>, vector<4096x512xbf16>
    %cst = arith.constant dense<0.000000e+00> : vector<2x512xf32>
    %7 = tpu.matmul %4, %6, %cst {dimension_numbers = #tpu.dot_dimension_numbers<[1], [0], [0], [1], [0, 0, 1, 1], [], []>} : vector<2x4096xbf16>, vector<4096x512xbf16>, vector<2x512xf32> -> vector<2x512xf32>
    %8 = arith.addf %5, %7 : vector<2x512xf32>
    %c0_6 = arith.constant 0 : index
    %c0_7 = arith.constant 0 : index
    %9 = vector.load %arg8[%c0_6, %c0_7] : memref<2x512xf32, #tpu.memory_space<vmem>>, vector<2x512xf32>
    tpu.vector_store %arg8[%c0_6, %c0_7], %8 {strides = array<i32>} : memref<2x512xf32, #tpu.memory_space<vmem>>, vector<2x512xf32>,
    %c1_i32 = arith.constant 1 : i32
    %10 = arith.cmpi eq, %arg1, %c1_i32 : i32
    %11 = arith.extui %10 : i1 to i32
    %c0_i32_8 = arith.constant 0 : i32
    %12 = arith.cmpi ne, %11, %c0_i32_8 : i32
    scf.if %12 {
      %c0_9 = arith.constant 0 : index
      %c0_10 = arith.constant 0 : index
      %13 = vector.load %arg8[%c0_9, %c0_10] : memref<2x512xf32, #tpu.memory_space<vmem>>, vector<2x512xf32>
      %c0_11 = arith.constant 0 : index
      %c0_12 = arith.constant 0 : index
      %14 = vector.load %arg4[%c0_11, %c0_12] : memref<1x512xf32, #tpu.memory_space<vmem>>, vector<1x512xf32>
      %15 = vector.broadcast %14 : vector<1x512xf32> to vector<2x512xf32>
      %16 = arith.addf %13, %15 : vector<2x512xf32>
      %17 = arith.truncf %16 : vector<2x512xf32> to vector<2x512xbf16>
      %c0_13 = arith.constant 0 : index
      %c0_14 = arith.constant 0 : index
      %18 = vector.load %arg5[%c0_13, %c0_14] : memref<512x512xbf16, #tpu.memory_space<vmem>>, vector<512x512xbf16>
      %cst_15 = arith.constant dense<0.000000e+00> : vector<2x512xf32>
      %19 = tpu.matmul %17, %18, %cst_15 {dimension_numbers = #tpu.dot_dimension_numbers<[1], [0], [0], [1], [0, 0, 1, 1], [], []>} : vector<2x512xbf16>, vector<512x512xbf16>, vector<2x512xf32> -> vector<2x512xf32>
      %20 = arith.truncf %19 : vector<2x512xf32> to vector<2x512xbf16>
      %c0_16 = arith.constant 0 : index
      %c0_17 = arith.constant 0 : index
      %21 = vector.load %arg6[%c0_16, %c0_17] : memref<512x72xbf16, #tpu.memory_space<vmem>>, vector<512x72xbf16>
      %cst_18 = arith.constant dense<0.000000e+00> : vector<2x72xf32>
      %22 = tpu.matmul %20, %21, %cst_18 {dimension_numbers = #tpu.dot_dimension_numbers<[1], [0], [0], [1], [0, 0, 1, 1], [], []>} : vector<2x512xbf16>, vector<512x72xbf16>, vector<2x72xf32> -> vector<2x72xf32>
      %c0_19 = arith.constant 0 : index
      %c0_20 = arith.constant 0 : index
      %c0_21 = arith.constant 0 : index
      %23 = vector.load %arg7[%c0_19, %c0_20, %c0_21] : memref<1x2x72xf32, #tpu.memory_space<vmem>>, vector<1x2x72xf32>
      %24 = vector.shape_cast %23 : vector<1x2x72xf32> to vector<2x72xf32>
      %25 = vector.shape_cast %22 : vector<2x72xf32> to vector<1x2x72xf32>
      tpu.vector_store %arg7[%c0_19, %c0_20, %c0_21], %25 {strides = array<i32>} : memref<1x2x72xf32, #tpu.memory_space<vmem>>, vector<1x2x72xf32>,
    } else {
    }
    return
  }
  func.func @transform_0(%arg0: i32, %arg1: i32) -> (i32, i32) {
    %c0_i32 = arith.constant 0 : i32
    %c0_i32_0 = arith.constant 0 : i32
    return %c0_i32, %arg1 : i32, i32
  }
  func.func @transform_1(%arg0: i32, %arg1: i32) -> (i32, i32) {
    %c0_i32 = arith.constant 0 : i32
    return %arg1, %arg0 : i32, i32
  }
  func.func @transform_2(%arg0: i32, %arg1: i32) -> (i32, i32) {
    %c0_i32 = arith.constant 0 : i32
    %c0_i32_0 = arith.constant 0 : i32
    return %c0_i32, %arg0 : i32, i32
  }
  func.func @transform_3(%arg0: i32, %arg1: i32) -> (i32, i32) {
    %c0_i32 = arith.constant 0 : i32
    %c0_i32_0 = arith.constant 0 : i32
    return %arg0, %c0_i32 : i32, i32
  }
  func.func @transform_4(%arg0: i32, %arg1: i32) -> (i32, i32) {
    %c0_i32 = arith.constant 0 : i32
    %c0_i32_0 = arith.constant 0 : i32
    %c0_i32_1 = arith.constant 0 : i32
    return %c0_i32, %c0_i32_0 : i32, i32
  }
  func.func @transform_5(%arg0: i32, %arg1: i32) -> (i32, i32, i32) {
    %c0_i32 = arith.constant 0 : i32
    %c0_i32_0 = arith.constant 0 : i32
    %c0_i32_1 = arith.constant 0 : i32
    return %arg0, %c0_i32, %c0_i32_0 : i32, i32, i32
  }
}

module attributes {stable_mosaic.version = 11 : i64} {
  func.func @_combine_softmax_kernel(%arg0: i32, %arg1: memref<2x2x72xf32, #tpu.memory_space<vmem>>, %arg2: memref<1x72xf32, #tpu.memory_space<vmem>>, %arg3: memref<2x72xf32, #tpu.memory_space<vmem>>) attributes {dimension_semantics = [#tpu.dimension_semantics<arbitrary>], iteration_bounds = array<i64: 1>, scalar_prefetch = 0 : i64, scratch_operands = 0 : i64, tpu.core_type = #tpu.core_type<tc>, window_params = [{pipeline_mode = #tpu.pipeline_mode<synchronous>, transform_indices = @transform_0, window_bounds = array<i64: 2, 2, 72>}, {pipeline_mode = #tpu.pipeline_mode<synchronous>, transform_indices = @transform_1, window_bounds = array<i64: 1, 72>}, {pipeline_mode = #tpu.pipeline_mode<synchronous>, transform_indices = @transform_2, window_bounds = array<i64: 2, 72>}]} {
    %c0 = arith.constant 0 : index
    %c0_0 = arith.constant 0 : index
    %c0_1 = arith.constant 0 : index
    %0 = vector.load %arg1[%c0, %c0_0, %c0_1] : memref<2x2x72xf32, #tpu.memory_space<vmem>>, vector<1x2x72xf32>
    %1 = vector.shape_cast %0 : vector<1x2x72xf32> to vector<2x72xf32>
    %c1 = arith.constant 1 : index
    %c0_2 = arith.constant 0 : index
    %c0_3 = arith.constant 0 : index
    %2 = vector.load %arg1[%c1, %c0_2, %c0_3] : memref<2x2x72xf32, #tpu.memory_space<vmem>>, vector<1x2x72xf32>
    %3 = vector.shape_cast %2 : vector<1x2x72xf32> to vector<2x72xf32>
    %4 = arith.addf %1, %3 : vector<2x72xf32>
    %c0_4 = arith.constant 0 : index
    %c0_5 = arith.constant 0 : index
    %5 = vector.load %arg2[%c0_4, %c0_5] : memref<1x72xf32, #tpu.memory_space<vmem>>, vector<1x72xf32>
    %6 = vector.broadcast %5 : vector<1x72xf32> to vector<2x72xf32>
    %7 = arith.addf %4, %6 : vector<2x72xf32>
    %cst = arith.constant dense<0xFF800000> : vector<2xf32>
    %8 = vector.multi_reduction <maximumf>, %7, %cst [1] : vector<2x72xf32> to vector<2xf32>
    %9 = vector.shape_cast %8 : vector<2xf32> to vector<2x1xf32>
    %10 = vector.broadcast %9 : vector<2x1xf32> to vector<2x72xf32>
    %11 = arith.subf %7, %10 : vector<2x72xf32>
    %12 = math.exp %11 : vector<2x72xf32>
    %cst_6 = arith.constant dense<0.000000e+00> : vector<2xf32>
    %13 = vector.multi_reduction <add>, %12, %cst_6 [1] : vector<2x72xf32> to vector<2xf32>
    %14 = vector.shape_cast %13 : vector<2xf32> to vector<2x1xf32>
    %15 = vector.broadcast %14 : vector<2x1xf32> to vector<2x72xf32>
    %16 = arith.divf %12, %15 : vector<2x72xf32>
    %c0_7 = arith.constant 0 : index
    %c0_8 = arith.constant 0 : index
    %17 = vector.load %arg3[%c0_7, %c0_8] : memref<2x72xf32, #tpu.memory_space<vmem>>, vector<2x72xf32>
    tpu.vector_store %arg3[%c0_7, %c0_8], %16 {strides = array<i32>} : memref<2x72xf32, #tpu.memory_space<vmem>>, vector<2x72xf32>,
    return
  }
  func.func @transform_0(%arg0: i32) -> (i32, i32, i32) {
    %c0_i32 = arith.constant 0 : i32
    %c0_i32_0 = arith.constant 0 : i32
    %c0_i32_1 = arith.constant 0 : i32
    %c0_i32_2 = arith.constant 0 : i32
    return %c0_i32, %c0_i32_0, %c0_i32_1 : i32, i32, i32
  }
  func.func @transform_1(%arg0: i32) -> (i32, i32) {
    %c0_i32 = arith.constant 0 : i32
    %c0_i32_0 = arith.constant 0 : i32
    %c0_i32_1 = arith.constant 0 : i32
    return %c0_i32, %c0_i32_0 : i32, i32
  }
  func.func @transform_2(%arg0: i32) -> (i32, i32) {
    %c0_i32 = arith.constant 0 : i32
    %c0_i32_0 = arith.constant 0 : i32
    %c0_i32_1 = arith.constant 0 : i32
    return %c0_i32, %c0_i32_0 : i32, i32
  }
}

</mosaic_0001>

<bundles_post_ra>
// kernel: cnn_forward.5
= control target key start
LH: loop header
LB: loop body
LE: loop exit
PB: predicated region body
PF: predicated region fallthrough
CT: control target
= control target key end

     0   :  { %s127_s0 = inlined_call_operand.vmem [shape: f32[2,2,72], index: 0, kind: input, shape index: {}]   ;;  %s128_s1 = inlined_call_operand.vmem [shape: f32[1,72], index: 1, kind: input, shape index: {}]   ;;  %s129_s2 = inlined_call_operand.hbm [shape: f32[2,72], index: 2, kind: output, shape index: {}]  }
   0x1   :  { %v12_v0 = vld [vmem:[%s127_s0] sm:$0x3]  ;;  %v63_v1 = vld [vmem:[%s127_s0 + $0x2] sm:$0x3] }
   0x2   :  { %v15_v2 = vadd.f32 %v63_v1, %v12_v0  ;;  %v65_v3 = vld [vmem:[%s128_s1] ss:$0 sm:$0xff] }
   0x3   :  { %7 = vsyncpa [#allocation3], 0  ;;  %vm21_vm0 = vcmask 582656   ;;  %s96_s0 = smov [#allocation2]   ;;  %s54_s17 = sshll.u32 %s129_s2, 4  ;;  %s55_s17 = int_to_ptr.hbm [resolvable:$true] %s54_s17 }
   0x4   :  { %v20_v4 = vadd.f32 %v65_v3, %v15_v2  ;;  %s52_s1 = sshll.u32 %s96_s0, 4  ;;  %s53_s1 = int_to_ptr.vmem [resolvable:$true] %s52_s1 }
   0x6   :  { %v22_v5 = vsel %vm21_vm0, %v20_v4, -inf }
   0x7   :  { %23 = vmax.xlane.f32.xlu0 %v22_v5 }
  0x7a   :  { %v24_v6 = vpop.xlane.xlu0 %23 }
  0x7b   :  { %v25_v7 = vsub.f32 %v20_v4, %v24_v6 }
  0x7d   :  { %v26_v8 = vmul.f32 1.442695, %v25_v7 }
  0x7f   :  { %66 = vpow2.f32 %v26_v8 }
  0x85   :  { %v67_v9 = vpop.eup %66 }
  0x86   :  { %v28_v10 = vsel %vm21_vm0, %v67_v9, 0.0 }
  0x87   :  { %29 = vadd.xlane.f32.xlu0 %v28_v10 }
  0xfa   :  { %v30_v11 = vpop.xlane.xlu0 %29 }
  0xfb   :  { %68 = vrcp.f32 %v30_v11  ;;  %v42_v15 = vand.u32 2147483648, %v30_v11  ;;  %v40_v17 = vand.u32 2147483647, %v30_v11  ;;  %vm36_vm2 = vweird.f32 %v30_v11 }
  0xfd   :  { %v43_v19 = vor.u32 1.1754944e-38, %v42_v15  ;;  %vm41_vm4 = vcmp.eq.f32.partialorder %v40_v17, 8.507059e+37 }
 0x101   :  { %v69_v12 = vpop.eup %68 }
 0x102   :  { %v32_v13 = vmul.f32 %v69_v12, %v30_v11  ;;  %vm37_vm1 = vweird.f32 %v69_v12 }
 0x103   :  { %vm38_vm3 = vmor %vm36_vm2, %vm37_vm1 }
 0x104   :  { %v33_v14 = vsub.f32 1.0, %v32_v13 }
 0x106   :  { %v34_v16 = vmul.f32 %v69_v12, %v33_v14 }
 0x108   :  { %v35_v18 = vadd.f32 %v69_v12, %v34_v16 }
 0x10a   :  { %v39_v20 = vsel %vm38_vm3, %v69_v12, %v35_v18 }
 0x10b   :  { %v44_v21 = vsel %vm41_vm4, %v43_v19, %v39_v20 }
 0x10c   :  { %v45_v22 = vmul.f32 %v67_v9, %v44_v21 }
 0x10e   :  { %46 = vst.msk [vmem:[#allocation2] sm:$0x3] %vm21_vm0, %v45_v22 }
 0x10f   :  { %57 = dma.vmem_to_hbm [thread:$0]  %s53_s1, 32, %s55_s17, [#allocation3]  }
 0x110   :  { %94 = dma.done.wait [#allocation3], 32  }
 0x111   :  { %95 = vsyncadd [#allocation3], 4294967264 }
 0x112   :  { %62 = vsyncpa [#allocation3], 1 }

// kernel: cnn_forward.3
= control target key start
LH: loop header
LB: loop body
LE: loop exit
PB: predicated region body
PF: predicated region fallthrough
CT: control target
= control target key end

     0   :  { %s1431_s18 = smov 0   ;;  %s1882_s0 = inlined_call_operand.vmem [shape: f32[2,1,500,300], index: 0, kind: input, shape index: {}]   ;;  %s1883_s1 = inlined_call_operand.vmem [shape: f32[24,300], index: 1, kind: input, shape index: {}]   ;;  %s1884_s2 = inlined_call_operand.vmem [shape: f32[6,1], index: 2, kind: input, shape index: {}]   ;;  %s1885_s3 = inlined_call_operand.vmem [shape: f32[32,6], index: 3, kind: input, shape index: {}]   ;;  %s1886_s4 = inlined_call_operand.vmem [shape: f32[16,1], index: 4, kind: input, shape index: {}]   ;;  %s1887_s5 = inlined_call_operand.vmem [shape: f32[2,16,512], index: 5, kind: output, shape index: {}]  }
   0x1 LB: > { %s1270_s19 = sadd.s32 4294967295, %s1396_s18   ;;  %p1274_p0 = scmp.ge.s32.totalorder %s1396_s18, 1  ;;  %s1396_s18 = sphi %s1431_s18, %s15_s18  }
   0x2   : > { %p187_p1 = scmp.lt.s32.totalorder %s1396_s18, 3 }
   0x4   : > { %p188_p2 = pnand %p1274_p0, %p187_p1 }
   0x5   : > { %p215_p3 = scmp.lt.s32.totalorder (!%p188_p2), %s1270_s19, 1  ;;  %s1398_s17 = smov (!%p188_p2), 127  }
   0x6   : > { %191 = sbr.rel (%p188_p2) target bundleno = 765 (0x2fd), region = 40 }
   0xb   : > { %s1889_s19 = smov (!%p215_p3, %s1270_s19), 1  ;;  %vm423_vm0 = vcmask 359424   ;;  %vm946_vm1 = vcmask 1039360   ;;  %vm970_vm2 = vcmask 1031168   ;;  %vm1009_vm3 = vcmask 1045504  }
   0xc   : > { %s1376_s20 = smul.u32 1512, %s1889_s19  ;;  %vm996_vm4 = vcmask 48128   ;;  %s1375_s10 = sshll.u32 %s1889_s19, 6  ;;  %vm1204_vm5 = vcmask 924672  }
   0xd   : > { %s224_s13 = scalar_lea.vmem %s1887_s5, %s1375_s10 }
   0xe   : > { %s1445_s23 = scalar_lea.vmem %s1882_s0, %s1376_s20  ;;  %s1399_s20 = smov 126  }
   0xf   : > { %v270_v0 = vld [vmem:[%s1445_s23 + $0x168] sm:$0xff]  ;;  %v272_v1 = vld [vmem:[%s1445_s23 + $0x178] sm:$0xff]  ;;  %v271_v3 = vld [vmem:[%s1445_s23 + $0x170] sm:$0xff] }
  0x10   : > { %v318_v2 = vld [vmem:[%s1445_s23 + $0x2e8] sm:$0xff]  ;;  %622 = vmatpush.xpose.msra.mxu0 %v270_v0  ;;  %1278 = vmatpush.xpose.msk.msra.mxu2 %vm423_vm0, %v272_v1  ;;  %v267_v4 = vld [vmem:[%s1445_s23 + $0x150] sm:$0xff]  ;;  %v269_v5 = vld [vmem:[%s1445_s23 + $0x160] sm:$0xff] }
  0x11   : > { %700 = vmatpush.xpose.msra.mxu3 %v318_v2  ;;  %648 = vmatpush.xpose.msra.mxu1 %v271_v3  ;;  %v315_v6 = vld [vmem:[%s1445_s23 + $0x2d0] sm:$0xff]  ;;  %v268_v7 = vld [vmem:[%s1445_s23 + $0x158] sm:$0xff]  ;;  %v266_v9 = vld [vmem:[%s1445_s23 + $0x148] sm:$0xff] }
  0x12   : > { %v264_v8 = vld [vmem:[%s1445_s23 + $0x138] sm:$0xff]  ;;  %v265_v11 = vld [vmem:[%s1445_s23 + $0x140] sm:$0xff]  ;;  %v263_v13 = vld [vmem:[%s1445_s23 + $0x130] sm:$0xff] }
  0x13   : > { %v312_v10 = vld [vmem:[%s1445_s23 + $0x2b8] sm:$0xff]  ;;  %v261_v12 = vld [vmem:[%s1445_s23 + $0x120] sm:$0xff]  ;;  %v262_v15 = vld [vmem:[%s1445_s23 + $0x128] sm:$0xff] }
  0x14   : > { %623 = vmatpush.xpose.msra.mxu0 %v267_v4  ;;  %1279 = vmatpush.xpose.msk.msra.mxu2 %vm423_vm0, %v269_v5  ;;  %v309_v14 = vld [vmem:[%s1445_s23 + $0x2a0] sm:$0xff]  ;;  %v258_v16 = vld [vmem:[%s1445_s23 + $0x108] sm:$0xff]  ;;  %v260_v17 = vld [vmem:[%s1445_s23 + $0x118] sm:$0xff] }
  0x15   : > { %701 = vmatpush.xpose.msra.mxu3 %v315_v6  ;;  %649 = vmatpush.xpose.msra.mxu1 %v268_v7  ;;  %v306_v18 = vld [vmem:[%s1445_s23 + $0x288] sm:$0xff]  ;;  %v259_v19 = vld [vmem:[%s1445_s23 + $0x110] sm:$0xff]  ;;  %v257_v21 = vld [vmem:[%s1445_s23 + $0x100] sm:$0xff] }
  0x16   : > { %v255_v20 = vld [vmem:[%s1445_s23 + $0xf0] sm:$0xff]  ;;  %v256_v23 = vld [vmem:[%s1445_s23 + $0xf8] sm:$0xff]  ;;  %v254_v25 = vld [vmem:[%s1445_s23 + $0xe8] sm:$0xff] }
  0x17   : > { %v303_v22 = vld [vmem:[%s1445_s23 + $0x270] sm:$0xff]  ;;  %v252_v24 = vld [vmem:[%s1445_s23 + $0xd8] sm:$0xff]  ;;  %v253_v27 = vld [vmem:[%s1445_s23 + $0xe0] sm:$0xff] }
  0x18   : > { %624 = vmatpush.xpose.msra.mxu0 %v264_v8  ;;  %1280 = vmatpush.xpose.msk.msra.mxu2 %vm423_vm0, %v266_v9  ;;  %v300_v26 = vld [vmem:[%s1445_s23 + $0x258] sm:$0xff]  ;;  %v249_v28 = vld [vmem:[%s1445_s23 + $0xc0] sm:$0xff]  ;;  %v251_v29 = vld [vmem:[%s1445_s23 + $0xd0] sm:$0xff] }
  0x19   : > { %702 = vmatpush.xpose.msra.mxu3 %v312_v10  ;;  %650 = vmatpush.xpose.msra.mxu1 %v265_v11  ;;  %v297_v30 = vld [vmem:[%s1445_s23 + $0x240] sm:$0xff]  ;;  %v250_v31 = vld [vmem:[%s1445_s23 + $0xc8] sm:$0xff]  ;;  %v248_v33 = vld [vmem:[%s1445_s23 + $0xb8] sm:$0xff] }
  0x1a   : > { %v246_v32 = vld [vmem:[%s1445_s23 + $0xa8] sm:$0xff]  ;;  %v247_v35 = vld [vmem:[%s1445_s23 + $0xb0] sm:$0xff]  ;;  %v245_v37 = vld [vmem:[%s1445_s23 + $0xa0] sm:$0xff] }
  0x1b   : > { %v294_v34 = vld [vmem:[%s1445_s23 + $0x228] sm:$0xff]  ;;  %v243_v36 = vld [vmem:[%s1445_s23 + $0x90] sm:$0xff]  ;;  %v244_v39 = vld [vmem:[%s1445_s23 + $0x98] sm:$0xff] }
  0x1c   : > { %625 = vmatpush.xpose.msra.mxu0 %v261_v12  ;;  %1281 = vmatpush.xpose.msk.msra.mxu2 %vm423_vm0, %v263_v13  ;;  %v291_v38 = vld [vmem:[%s1445_s23 + $0x210] sm:$0xff]  ;;  %v240_v40 = vld [vmem:[%s1445_s23 + $0x78] sm:$0xff]  ;;  %v242_v41 = vld [vmem:[%s1445_s23 + $0x88] sm:$0xff] }
  0x1d   : > { %703 = vmatpush.xpose.msra.mxu3 %v309_v14  ;;  %651 = vmatpush.xpose.msra.mxu1 %v262_v15  ;;  %v288_v42 = vld [vmem:[%s1445_s23 + $0x1f8] sm:$0xff]  ;;  %v241_v43 = vld [vmem:[%s1445_s23 + $0x80] sm:$0xff]  ;;  %v239_v45 = vld [vmem:[%s1445_s23 + $0x70] sm:$0xff] }
  0x1e   : > { %v237_v44 = vld [vmem:[%s1445_s23 + $0x60] sm:$0xff]  ;;  %v238_v47 = vld [vmem:[%s1445_s23 + $0x68] sm:$0xff]  ;;  %v236_v49 = vld [vmem:[%s1445_s23 + $0x58] sm:$0xff] }
  0x1f   : > { %v285_v46 = vld [vmem:[%s1445_s23 + $0x1e0] sm:$0xff]  ;;  %v234_v48 = vld [vmem:[%s1445_s23 + $0x48] sm:$0xff]  ;;  %v235_v51 = vld [vmem:[%s1445_s23 + $0x50] sm:$0xff] }
  0x20   : > { %626 = vmatpush.xpose.msra.mxu0 %v258_v16  ;;  %1282 = vmatpush.xpose.msk.msra.mxu2 %vm423_vm0, %v260_v17  ;;  %v282_v50 = vld [vmem:[%s1445_s23 + $0x1c8] sm:$0xff]  ;;  %v231_v52 = vld [vmem:[%s1445_s23 + $0x30] sm:$0xff]  ;;  %v233_v53 = vld [vmem:[%s1445_s23 + $0x40] sm:$0xff] }
  0x21   : > { %704 = vmatpush.xpose.msra.mxu3 %v306_v18  ;;  %652 = vmatpush.xpose.msra.mxu1 %v259_v19  ;;  %v279_v54 = vld [vmem:[%s1445_s23 + $0x1b0] sm:$0xff]  ;;  %v232_v55 = vld [vmem:[%s1445_s23 + $0x38] sm:$0xff]  ;;  %v230_v57 = vld [vmem:[%s1445_s23 + $0x28] sm:$0xff] }
  0x22   : > { %v228_v56 = vld [vmem:[%s1445_s23 + $0x18] sm:$0xff]  ;;  %v229_v59 = vld [vmem:[%s1445_s23 + $0x20] sm:$0xff]  ;;  %v227_v61 = vld [vmem:[%s1445_s23 + $0x10] sm:$0xff] }
  0x23   : > { %v276_v58 = vld [vmem:[%s1445_s23 + $0x198] sm:$0xff]  ;;  %v225_v60 = vld [vmem:[%s1445_s23] sm:$0xff]  ;;  %v319_v62 = vld [vmem:[%s1445_s23 + $0x2f0] sm:$0xff] }
  0x24   : > { %627 = vmatpush.xpose.msra.mxu0 %v255_v20  ;;  %1283 = vmatpush.xpose.msk.msra.mxu2 %vm423_vm0, %v257_v21  ;;  %v366_v63 = vld [vmem:[%s1445_s23 + $0x468] sm:$0xff]  ;;  %v273_v0 = vld [vmem:[%s1445_s23 + $0x180] sm:$0xff]  ;;  %v367_v2 = vld [vmem:[%s1445_s23 + $0x470] sm:$0xff] }
  0x25   : > { %705 = vmatpush.xpose.msra.mxu3 %v303_v22  ;;  %653 = vmatpush.xpose.msra.mxu1 %v256_v23  ;;  %v226_v1 = vld [vmem:[%s1445_s23 + $0x8] sm:$0xff]  ;;  %v320_v3 = vld [vmem:[%s1445_s23 + $0x2f8] sm:$0xff]  ;;  %v363_v5 = vld [vmem:[%s1445_s23 + $0x450] sm:$0xff] }
  0x26   : > { %v316_v4 = vld [vmem:[%s1445_s23 + $0x2d8] sm:$0xff]  ;;  %v317_v7 = vld [vmem:[%s1445_s23 + $0x2e0] sm:$0xff]  ;;  %v314_v11 = vld [vmem:[%s1445_s23 + $0x2c8] sm:$0xff] }
  0x27   : > { %v364_v6 = vld [vmem:[%s1445_s23 + $0x458] sm:$0xff]  ;;  %v313_v8 = vld [vmem:[%s1445_s23 + $0x2c0] sm:$0xff]  ;;  %v310_v12 = vld [vmem:[%s1445_s23 + $0x2a8] sm:$0xff] }
  0x28   : > { %628 = vmatpush.xpose.msra.mxu0 %v252_v24  ;;  %1284 = vmatpush.xpose.msk.msra.mxu2 %vm423_vm0, %v254_v25  ;;  %v360_v9 = vld [vmem:[%s1445_s23 + $0x438] sm:$0xff]  ;;  %v361_v10 = vld [vmem:[%s1445_s23 + $0x440] sm:$0xff]  ;;  %v358_v14 = vld [vmem:[%s1445_s23 + $0x428] sm:$0xff] }
  0x29   : > { %706 = vmatpush.xpose.msra.mxu3 %v300_v26  ;;  %654 = vmatpush.xpose.msra.mxu1 %v253_v27  ;;  %v357_v13 = vld [vmem:[%s1445_s23 + $0x420] sm:$0xff]  ;;  %v311_v15 = vld [vmem:[%s1445_s23 + $0x2b0] sm:$0xff]  ;;  %v354_v18 = vld [vmem:[%s1445_s23 + $0x408] sm:$0xff] }
  0x2a   : > { %v1549_v16 = vld [vmem:[%s1883_s1] sm:$0xff]  ;;  %v307_v17 = vld [vmem:[%s1445_s23 + $0x290] sm:$0xff]  ;;  %v1559_v19 = vld [vmem:[%s1883_s1 + $0x8] sm:$0xff] }
  0x2b   : > { %v355_v20 = vld [vmem:[%s1445_s23 + $0x410] sm:$0xff]  ;;  %v308_v21 = vld [vmem:[%s1445_s23 + $0x298] sm:$0xff]  ;;  %v305_v25 = vld [vmem:[%s1445_s23 + $0x280] sm:$0xff] }
  0x2c   : > { %629 = vmatpush.xpose.msra.mxu0 %v249_v28  ;;  %1285 = vmatpush.xpose.msk.msra.mxu2 %vm423_vm0, %v251_v29  ;;  %v304_v22 = vld [vmem:[%s1445_s23 + $0x278] sm:$0xff]  ;;  %v351_v23 = vld [vmem:[%s1445_s23 + $0x3f0] sm:$0xff]  ;;  %v301_v27 = vld [vmem:[%s1445_s23 + $0x260] sm:$0xff] }
  0x2d   : > { %707 = vmatpush.xpose.msra.mxu3 %v297_v30  ;;  %655 = vmatpush.xpose.msra.mxu1 %v250_v31  ;;  %v352_v24 = vld [vmem:[%s1445_s23 + $0x3f8] sm:$0xff]  ;;  %v1582_v29 = vld [vmem:[%s1883_s1 + $0x20] sm:$0xff]  ;;  %v302_v31 = vld [vmem:[%s1445_s23 + $0x268] sm:$0xff] }
  0x2e   : > { %v1572_v26 = vld [vmem:[%s1883_s1 + $0x18] sm:$0xff]  ;;  %v349_v30 = vld [vmem:[%s1445_s23 + $0x3e0] sm:$0xff] }
  0x2f   : > { %v348_v28 = vld [vmem:[%s1445_s23 + $0x3d8] sm:$0xff] }
  0x30   : > { %630 = vmatpush.xpose.msra.mxu0 %v246_v32  ;;  %1286 = vmatpush.xpose.msk.msra.mxu2 %vm423_vm0, %v248_v33  ;;  %v298_v32 = vld [vmem:[%s1445_s23 + $0x248] sm:$0xff]  ;;  %v345_v33 = vld [vmem:[%s1445_s23 + $0x3c0] sm:$0xff] }
  0x31   : > { %708 = vmatpush.xpose.msra.mxu3 %v294_v34  ;;  %656 = vmatpush.xpose.msra.mxu1 %v247_v35  ;;  %v346_v34 = vld [vmem:[%s1445_s23 + $0x3c8] sm:$0xff]  ;;  %v299_v35 = vld [vmem:[%s1445_s23 + $0x250] sm:$0xff] }
  0x34   : > { %631 = vmatpush.xpose.msra.mxu0 %v243_v36  ;;  %1287 = vmatpush.xpose.msk.msra.mxu2 %vm423_vm0, %v245_v37  ;;  %v1595_v36 = vld [vmem:[%s1883_s1 + $0x30] sm:$0xff] }
  0x35   : > { %709 = vmatpush.xpose.msra.mxu3 %v291_v38  ;;  %657 = vmatpush.xpose.msra.mxu1 %v244_v39  ;;  %v1600_v37 = vld [vmem:[%s1883_s1 + $0x10] sm:$0xff]  ;;  %v342_v39 = vld [vmem:[%s1445_s23 + $0x3a8] sm:$0xff] }
  0x36   : > { %v295_v38 = vld [vmem:[%s1445_s23 + $0x230] sm:$0xff] }
  0x38   : > { %632 = vmatpush.xpose.msra.mxu0 %v240_v40  ;;  %1288 = vmatpush.xpose.msk.msra.mxu2 %vm423_vm0, %v242_v41  ;;  %v1611_v40 = vld [vmem:[%s1883_s1 + $0x38] sm:$0xff]  ;;  %v343_v41 = vld [vmem:[%s1445_s23 + $0x3b0] sm:$0xff] }
  0x39   : > { %710 = vmatpush.xpose.msra.mxu3 %v288_v42  ;;  %658 = vmatpush.xpose.msra.mxu1 %v241_v43  ;;  %v296_v42 = vld [vmem:[%s1445_s23 + $0x238] sm:$0xff] }
  0x3a   : > { %v292_v43 = vld [vmem:[%s1445_s23 + $0x218] sm:$0xff] }
  0x3c   : > { %633 = vmatpush.xpose.msra.mxu0 %v237_v44  ;;  %1289 = vmatpush.xpose.msk.msra.mxu2 %vm423_vm0, %v239_v45  ;;  %v339_v44 = vld [vmem:[%s1445_s23 + $0x390] sm:$0xff]  ;;  %v340_v45 = vld [vmem:[%s1445_s23 + $0x398] sm:$0xff] }
  0x3d   : > { %711 = vmatpush.xpose.msra.mxu3 %v285_v46  ;;  %659 = vmatpush.xpose.msra.mxu1 %v238_v47  ;;  %v293_v46 = vld [vmem:[%s1445_s23 + $0x220] sm:$0xff] }
  0x3e   : > { %v289_v47 = vld [vmem:[%s1445_s23 + $0x200] sm:$0xff] }
  0x40   : > { %634 = vmatpush.xpose.msra.mxu0 %v234_v48  ;;  %1290 = vmatpush.xpose.msk.msra.mxu2 %vm423_vm0, %v236_v49  ;;  %v336_v48 = vld [vmem:[%s1445_s23 + $0x378] sm:$0xff]  ;;  %v337_v49 = vld [vmem:[%s1445_s23 + $0x380] sm:$0xff] }
  0x41   : > { %712 = vmatpush.xpose.msra.mxu3 %v282_v50  ;;  %660 = vmatpush.xpose.msra.mxu1 %v235_v51  ;;  %v290_v50 = vld [vmem:[%s1445_s23 + $0x208] sm:$0xff] }
  0x42   : > { %v286_v51 = vld [vmem:[%s1445_s23 + $0x1e8] sm:$0xff] }
  0x44   : > { %635 = vmatpush.xpose.msra.mxu0 %v231_v52  ;;  %1291 = vmatpush.xpose.msk.msra.mxu2 %vm423_vm0, %v233_v53  ;;  %v333_v52 = vld [vmem:[%s1445_s23 + $0x360] sm:$0xff]  ;;  %v334_v53 = vld [vmem:[%s1445_s23 + $0x368] sm:$0xff] }
  0x45   : > { %713 = vmatpush.xpose.msra.mxu3 %v279_v54  ;;  %661 = vmatpush.xpose.msra.mxu1 %v232_v55  ;;  %v287_v54 = vld [vmem:[%s1445_s23 + $0x1f0] sm:$0xff] }
  0x46   : > { %v283_v55 = vld [vmem:[%s1445_s23 + $0x1d0] sm:$0xff] }
  0x48   : > { %636 = vmatpush.xpose.msra.mxu0 %v228_v56  ;;  %1292 = vmatpush.xpose.msk.msra.mxu2 %vm423_vm0, %v230_v57  ;;  %v330_v56 = vld [vmem:[%s1445_s23 + $0x348] sm:$0xff]  ;;  %v331_v57 = vld [vmem:[%s1445_s23 + $0x350] sm:$0xff] }
  0x49   : > { %714 = vmatpush.xpose.msra.mxu3 %v276_v58  ;;  %662 = vmatpush.xpose.msra.mxu1 %v229_v59  ;;  %v284_v58 = vld [vmem:[%s1445_s23 + $0x1d8] sm:$0xff]  ;;  %v1640_v59 = vld [vmem:[%s1883_s1 + $0x28] sm:$0xff] }
  0x4c   : > { %637 = vmatpush.xpose.msra.mxu0 %v225_v60  ;;  %1293 = vmatpush.xpose.msk.msra.mxu2 %vm423_vm0, %v227_v61  ;;  %v280_v60 = vld [vmem:[%s1445_s23 + $0x1b8] sm:$0xff]  ;;  %v327_v61 = vld [vmem:[%s1445_s23 + $0x330] sm:$0xff] }
  0x4d   : > { %715 = vmatpush.xpose.msra.mxu3 %v273_v0  ;;  %663 = vmatpush.xpose.msra.mxu1 %v226_v1  ;;  %v277_v0 = vld [vmem:[%s1445_s23 + $0x1a0] sm:$0xff]  ;;  %v324_v1 = vld [vmem:[%s1445_s23 + $0x318] sm:$0xff] }
  0x4f   : > { %638 = vmatmul.f32.vlgmr.msra.gmra.mxu0 %v1549_v16  ;;  %1294 = vmatmul.msk.f32.vlgmr.msra.gmra.mxu2 %vm423_vm0, %v1600_v37 }
  0x50   : > { %726 = vmatpush.xpose.msrb.mxu0 %v319_v62  ;;  %778 = vmatpush.xpose.msrb.mxu2 %v366_v63  ;;  %v328_v62 = vld [vmem:[%s1445_s23 + $0x338] sm:$0xff]  ;;  %v281_v63 = vld [vmem:[%s1445_s23 + $0x1c0] sm:$0xff] }
  0x51   : > { %804 = vmatpush.xpose.msrb.mxu3 %v367_v2  ;;  %1297 = vmatpush.xpose.msk.msrb.mxu1 %vm423_vm0, %v320_v3  ;;  %v325_v2 = vld [vmem:[%s1445_s23 + $0x320] sm:$0xff]  ;;  %v278_v3 = vld [vmem:[%s1445_s23 + $0x1a8] sm:$0xff] }
  0x52   : > { %716 = vmatmul.f32.vlgmr.msra.gmra.mxu3 %v1549_v16  ;;  %664 = vmatmul.f32.vlgmr.msra.gmra.mxu1 %v1559_v19 }
  0x54   : > { %727 = vmatpush.xpose.msrb.mxu0 %v316_v4  ;;  %779 = vmatpush.xpose.msrb.mxu2 %v363_v5  ;;  %v1657_v4 = vld [vmem:[%s1883_s1 + $0x40] sm:$0xff]  ;;  %v274_v5 = vld [vmem:[%s1445_s23 + $0x188] sm:$0xff] }
  0x55   : > { %805 = vmatpush.xpose.msrb.mxu3 %v364_v6  ;;  %1298 = vmatpush.xpose.msk.msrb.mxu1 %vm423_vm0, %v317_v7  ;;  %v321_v6 = vld [vmem:[%s1445_s23 + $0x300] sm:$0xff]  ;;  %v368_v7 = vld [vmem:[%s1445_s23 + $0x478] sm:$0xff] }
  0x57   : > { %641 = vmatmul.f32.gmra.mxu0 %v1572_v26  ;;  %1295 = vmatmul.msk.f32.gmra.mxu2 %vm423_vm0, %v1640_v59 }
  0x58   : > { %728 = vmatpush.xpose.msrb.mxu0 %v313_v8  ;;  %780 = vmatpush.xpose.msrb.mxu2 %v360_v9  ;;  %v412_v8 = vld [vmem:[%s1445_s23 + $0x5d8] sm:$0xf]  ;;  %v322_v9 = vld [vmem:[%s1445_s23 + $0x308] sm:$0xff] }
  0x59   : > { %806 = vmatpush.xpose.msrb.mxu3 %v361_v10  ;;  %1299 = vmatpush.xpose.msk.msrb.mxu1 %vm423_vm0, %v314_v11  ;;  %v275_v10 = vld [vmem:[%s1445_s23 + $0x190] sm:$0xff]  ;;  %v413_v11 = vld [vmem:[%s1445_s23 + $0x5e0] sm:$0xf] }
  0x5a   : > { %719 = vmatmul.f32.gmra.mxu3 %v1572_v26  ;;  %667 = vmatmul.f32.gmra.mxu1 %v1582_v29 }
  0x5c   : > { %729 = vmatpush.xpose.msrb.mxu0 %v310_v12  ;;  %781 = vmatpush.xpose.msrb.mxu2 %v357_v13  ;;  %v411_v12 = vld [vmem:[%s1445_s23 + $0x5d0] sm:$0xf]  ;;  %v365_v13 = vld [vmem:[%s1445_s23 + $0x460] sm:$0xff] }
  0x5d   : > { %807 = vmatpush.xpose.msrb.mxu3 %v358_v14  ;;  %1300 = vmatpush.xpose.msk.msrb.mxu1 %vm423_vm0, %v311_v15  ;;  %v409_v14 = vld [vmem:[%s1445_s23 + $0x5c0] sm:$0xff]  ;;  %v410_v15 = vld [vmem:[%s1445_s23 + $0x5c8] sm:$0xff] }
  0x5f   : > { %644 = vmatmul.f32.gmra.mxu0 %v1595_v36  ;;  %1296 = vmatmul.msk.f32.gmra.mxu2 %vm423_vm0, %v1657_v4 }
  0x60   : > { %730 = vmatpush.xpose.msrb.mxu0 %v307_v17  ;;  %782 = vmatpush.xpose.msrb.mxu2 %v354_v18  ;;  %v408_v17 = vld [vmem:[%s1445_s23 + $0x5b8] sm:$0xff]  ;;  %v362_v18 = vld [vmem:[%s1445_s23 + $0x448] sm:$0xff] }
  0x61   : > { %808 = vmatpush.xpose.msrb.mxu3 %v355_v20  ;;  %1301 = vmatpush.xpose.msk.msrb.mxu1 %vm423_vm0, %v308_v21  ;;  %v406_v20 = vld [vmem:[%s1445_s23 + $0x5a8] sm:$0xff]  ;;  %v407_v21 = vld [vmem:[%s1445_s23 + $0x5b0] sm:$0xff] }
  0x62   : > { %670 = vmatmul.f32.gmra.mxu1 %v1611_v40  ;;  %722 = vmatmul.f32.gmra.mxu3 %v1595_v36 }
  0x64   : > { %731 = vmatpush.xpose.msrb.mxu0 %v304_v22  ;;  %783 = vmatpush.xpose.msrb.mxu2 %v351_v23  ;;  %v405_v22 = vld [vmem:[%s1445_s23 + $0x5a0] sm:$0xff]  ;;  %v359_v23 = vld [vmem:[%s1445_s23 + $0x430] sm:$0xff] }
  0x65   : > { %809 = vmatpush.xpose.msrb.mxu3 %v352_v24  ;;  %1302 = vmatpush.xpose.msk.msrb.mxu1 %vm423_vm0, %v305_v25  ;;  %v403_v24 = vld [vmem:[%s1445_s23 + $0x590] sm:$0xff]  ;;  %v404_v25 = vld [vmem:[%s1445_s23 + $0x598] sm:$0xff] }
  0x68   : > { %732 = vmatpush.xpose.msrb.mxu0 %v301_v27  ;;  %784 = vmatpush.xpose.msrb.mxu2 %v348_v28  ;;  %v402_v27 = vld [vmem:[%s1445_s23 + $0x588] sm:$0xff]  ;;  %v356_v28 = vld [vmem:[%s1445_s23 + $0x418] sm:$0xff] }
  0x69   : > { %810 = vmatpush.xpose.msrb.mxu3 %v349_v30  ;;  %1303 = vmatpush.xpose.msk.msrb.mxu1 %vm423_vm0, %v302_v31  ;;  %v400_v30 = vld [vmem:[%s1445_s23 + $0x578] sm:$0xff]  ;;  %v401_v31 = vld [vmem:[%s1445_s23 + $0x580] sm:$0xff] }
  0x6c   : > { %733 = vmatpush.xpose.msrb.mxu0 %v298_v32  ;;  %785 = vmatpush.xpose.msrb.mxu2 %v345_v33  ;;  %v399_v32 = vld [vmem:[%s1445_s23 + $0x570] sm:$0xff]  ;;  %v353_v33 = vld [vmem:[%s1445_s23 + $0x400] sm:$0xff] }
  0x6d   : > { %811 = vmatpush.xpose.msrb.mxu3 %v346_v34  ;;  %1304 = vmatpush.xpose.msk.msrb.mxu1 %vm423_vm0, %v299_v35  ;;  %v397_v34 = vld [vmem:[%s1445_s23 + $0x560] sm:$0xff]  ;;  %v398_v35 = vld [vmem:[%s1445_s23 + $0x568] sm:$0xff] }
  0x70   : > { %734 = vmatpush.xpose.msrb.mxu0 %v295_v38  ;;  %786 = vmatpush.xpose.msrb.mxu2 %v342_v39  ;;  %v396_v38 = vld [vmem:[%s1445_s23 + $0x558] sm:$0xff]  ;;  %v350_v39 = vld [vmem:[%s1445_s23 + $0x3e8] sm:$0xff] }
  0x71   : > { %812 = vmatpush.xpose.msrb.mxu3 %v343_v41  ;;  %1305 = vmatpush.xpose.msk.msrb.mxu1 %vm423_vm0, %v296_v42  ;;  %v394_v41 = vld [vmem:[%s1445_s23 + $0x548] sm:$0xff]  ;;  %v395_v42 = vld [vmem:[%s1445_s23 + $0x550] sm:$0xff] }
  0x74   : > { %735 = vmatpush.xpose.msrb.mxu0 %v292_v43  ;;  %787 = vmatpush.xpose.msrb.mxu2 %v339_v44  ;;  %v393_v43 = vld [vmem:[%s1445_s23 + $0x540] sm:$0xff]  ;;  %v347_v44 = vld [vmem:[%s1445_s23 + $0x3d0] sm:$0xff] }
  0x75   : > { %813 = vmatpush.xpose.msrb.mxu3 %v340_v45  ;;  %1306 = vmatpush.xpose.msk.msrb.mxu1 %vm423_vm0, %v293_v46  ;;  %v391_v45 = vld [vmem:[%s1445_s23 + $0x530] sm:$0xff]  ;;  %v392_v46 = vld [vmem:[%s1445_s23 + $0x538] sm:$0xff] }
  0x78   : > { %736 = vmatpush.xpose.msrb.mxu0 %v289_v47  ;;  %788 = vmatpush.xpose.msrb.mxu2 %v336_v48  ;;  %v390_v47 = vld [vmem:[%s1445_s23 + $0x528] sm:$0xff]  ;;  %v344_v48 = vld [vmem:[%s1445_s23 + $0x3b8] sm:$0xff] }
  0x79   : > { %814 = vmatpush.xpose.msrb.mxu3 %v337_v49  ;;  %1307 = vmatpush.xpose.msk.msrb.mxu1 %vm423_vm0, %v290_v50  ;;  %v388_v49 = vld [vmem:[%s1445_s23 + $0x518] sm:$0xff]  ;;  %v389_v50 = vld [vmem:[%s1445_s23 + $0x520] sm:$0xff] }
  0x7c   : > { %737 = vmatpush.xpose.msrb.mxu0 %v286_v51  ;;  %789 = vmatpush.xpose.msrb.mxu2 %v333_v52  ;;  %v387_v51 = vld [vmem:[%s1445_s23 + $0x510] sm:$0xff]  ;;  %v341_v52 = vld [vmem:[%s1445_s23 + $0x3a0] sm:$0xff] }
  0x7d   : > { %815 = vmatpush.xpose.msrb.mxu3 %v334_v53  ;;  %1308 = vmatpush.xpose.msk.msrb.mxu1 %vm423_vm0, %v287_v54  ;;  %v385_v53 = vld [vmem:[%s1445_s23 + $0x500] sm:$0xff]  ;;  %v386_v54 = vld [vmem:[%s1445_s23 + $0x508] sm:$0xff] }
  0x80   : > { %738 = vmatpush.xpose.msrb.mxu0 %v283_v55  ;;  %790 = vmatpush.xpose.msrb.mxu2 %v330_v56  ;;  %v384_v55 = vld [vmem:[%s1445_s23 + $0x4f8] sm:$0xff]  ;;  %v338_v56 = vld [vmem:[%s1445_s23 + $0x388] sm:$0xff] }
  0x81   : > { %816 = vmatpush.xpose.msrb.mxu3 %v331_v57  ;;  %1309 = vmatpush.xpose.msk.msrb.mxu1 %vm423_vm0, %v284_v58  ;;  %v382_v57 = vld [vmem:[%s1445_s23 + $0x4e8] sm:$0xff]  ;;  %v383_v58 = vld [vmem:[%s1445_s23 + $0x4f0] sm:$0xff] }
  0x84   : > { %739 = vmatpush.xpose.msrb.mxu0 %v280_v60  ;;  %791 = vmatpush.xpose.msrb.mxu2 %v327_v61  ;;  %v381_v60 = vld [vmem:[%s1445_s23 + $0x4e0] sm:$0xff]  ;;  %v335_v61 = vld [vmem:[%s1445_s23 + $0x370] sm:$0xff] }
  0x85   : > { %817 = vmatpush.xpose.msrb.mxu3 %v328_v62  ;;  %1310 = vmatpush.xpose.msk.msrb.mxu1 %vm423_vm0, %v281_v63  ;;  %v379_v62 = vld [vmem:[%s1445_s23 + $0x4d0] sm:$0xff]  ;;  %v380_v63 = vld [vmem:[%s1445_s23 + $0x4d8] sm:$0xff] }
  0x88   : > { %740 = vmatpush.xpose.msrb.mxu0 %v277_v0  ;;  %792 = vmatpush.xpose.msrb.mxu2 %v324_v1  ;;  %v378_v0 = vld [vmem:[%s1445_s23 + $0x4c8] sm:$0xff]  ;;  %v332_v1 = vld [vmem:[%s1445_s23 + $0x358] sm:$0xff] }
  0x89   : > { %818 = vmatpush.xpose.msrb.mxu3 %v325_v2  ;;  %1311 = vmatpush.xpose.msk.msrb.mxu1 %vm423_vm0, %v278_v3  ;;  %v376_v2 = vld [vmem:[%s1445_s23 + $0x4b8] sm:$0xff]  ;;  %v377_v3 = vld [vmem:[%s1445_s23 + $0x4c0] sm:$0xff] }
  0x8c   : > { %741 = vmatpush.xpose.msrb.mxu0 %v274_v5  ;;  %793 = vmatpush.xpose.msrb.mxu2 %v321_v6  ;;  %v375_v5 = vld [vmem:[%s1445_s23 + $0x4b0] sm:$0xff]  ;;  %v329_v6 = vld [vmem:[%s1445_s23 + $0x340] sm:$0xff] }
  0x8d   : > { %819 = vmatpush.xpose.msrb.mxu3 %v322_v9  ;;  %1312 = vmatpush.xpose.msk.msrb.mxu1 %vm423_vm0, %v275_v10  ;;  %v372_v9 = vld [vmem:[%s1445_s23 + $0x498] sm:$0xff]  ;;  %v326_v10 = vld [vmem:[%s1445_s23 + $0x328] sm:$0xff] }
  0x8f   : > { %742 = vmatmul.f32.vlgmr.msrb.gmra.mxu0 %v1559_v19  ;;  %794 = vmatmul.f32.vlgmr.msrb.gmra.mxu2 %v1549_v16 }
  0x90   : > { %1316 = vmatpush.xpose.msk.msra.mxu0 %vm423_vm0, %v368_v7  ;;  %883 = vmatpush.xpose.msra.mxu2 %v412_v8  ;;  %v373_v7 = vld [vmem:[%s1445_s23 + $0x4a0] sm:$0xff]  ;;  %v374_v8 = vld [vmem:[%s1445_s23 + $0x4a8] sm:$0xff] }
  0x91   : > { %1335 = vmatpush.xpose.msk.msra.mxu3 %vm423_vm0, %v413_v11  ;;  %857 = vmatpush.xpose.msra.mxu1 %v411_v12  ;;  %v370_v11 = vld [vmem:[%s1445_s23 + $0x488] sm:$0xff]  ;;  %v371_v12 = vld [vmem:[%s1445_s23 + $0x490] sm:$0xff] }
  0x92   : > { %1313 = vmatmul.msk.f32.vlgmr.msrb.gmra.mxu1 %vm423_vm0, %v1600_v37  ;;  %820 = vmatmul.f32.vlgmr.msrb.gmra.mxu3 %v1559_v19 }
  0x94   : > { %1317 = vmatpush.xpose.msk.msra.mxu0 %vm423_vm0, %v365_v13  ;;  %884 = vmatpush.xpose.msra.mxu2 %v409_v14  ;;  %v369_v13 = vld [vmem:[%s1445_s23 + $0x480] sm:$0xff]  ;;  %v323_v14 = vld [vmem:[%s1445_s23 + $0x310] sm:$0xff] }
  0x95   : > { %1336 = vmatpush.xpose.msk.msra.mxu3 %vm423_vm0, %v410_v15  ;;  %858 = vmatpush.xpose.msra.mxu1 %v408_v17 }
  0x97   : > { %745 = vmatmul.f32.gmra.mxu0 %v1582_v29  ;;  %797 = vmatmul.f32.gmra.mxu2 %v1572_v26 }
  0x98   : > { %1318 = vmatpush.xpose.msk.msra.mxu0 %vm423_vm0, %v362_v18  ;;  %885 = vmatpush.xpose.msra.mxu2 %v406_v20 }
  0x99   : > { %1337 = vmatpush.xpose.msk.msra.mxu3 %vm423_vm0, %v407_v21  ;;  %859 = vmatpush.xpose.msra.mxu1 %v405_v22 }
  0x9a   : > { %1314 = vmatmul.msk.f32.gmra.mxu1 %vm423_vm0, %v1640_v59  ;;  %823 = vmatmul.f32.gmra.mxu3 %v1582_v29 }
  0x9c   : > { %1319 = vmatpush.xpose.msk.msra.mxu0 %vm423_vm0, %v359_v23  ;;  %886 = vmatpush.xpose.msra.mxu2 %v403_v24 }
  0x9d   : > { %1338 = vmatpush.xpose.msk.msra.mxu3 %vm423_vm0, %v404_v25  ;;  %860 = vmatpush.xpose.msra.mxu1 %v402_v27 }
  0x9f   : > { %748 = vmatmul.f32.gmra.mxu0 %v1611_v40  ;;  %800 = vmatmul.f32.gmra.mxu2 %v1595_v36 }
  0xa0   : > { %1320 = vmatpush.xpose.msk.msra.mxu0 %vm423_vm0, %v356_v28  ;;  %887 = vmatpush.xpose.msra.mxu2 %v400_v30 }
  0xa1   : > { %1339 = vmatpush.xpose.msk.msra.mxu3 %vm423_vm0, %v401_v31  ;;  %861 = vmatpush.xpose.msra.mxu1 %v399_v32 }
  0xa2   : > { %1315 = vmatmul.msk.f32.gmra.mxu1 %vm423_vm0, %v1657_v4  ;;  %826 = vmatmul.f32.gmra.mxu3 %v1611_v40 }
  0xa4   : > { %1321 = vmatpush.xpose.msk.msra.mxu0 %vm423_vm0, %v353_v33  ;;  %888 = vmatpush.xpose.msra.mxu2 %v397_v34 }
  0xa5   : > { %1340 = vmatpush.xpose.msk.msra.mxu3 %vm423_vm0, %v398_v35  ;;  %862 = vmatpush.xpose.msra.mxu1 %v396_v38 }
  0xa8   : > { %1322 = vmatpush.xpose.msk.msra.mxu0 %vm423_vm0, %v350_v39  ;;  %889 = vmatpush.xpose.msra.mxu2 %v394_v41 }
  0xa9   : > { %1341 = vmatpush.xpose.msk.msra.mxu3 %vm423_vm0, %v395_v42  ;;  %863 = vmatpush.xpose.msra.mxu1 %v393_v43 }
  0xac   : > { %1323 = vmatpush.xpose.msk.msra.mxu0 %vm423_vm0, %v347_v44  ;;  %890 = vmatpush.xpose.msra.mxu2 %v391_v45 }
  0xad   : > { %1342 = vmatpush.xpose.msk.msra.mxu3 %vm423_vm0, %v392_v46  ;;  %864 = vmatpush.xpose.msra.mxu1 %v390_v47  ;;  %v1400_v46 = vmov 0  }
  0xae   : > { %1388 = vset.pattern.permute.xlu0 %v1400_v46  ;;  %1389 = vset.pattern.permute.xlu1 %v1400_v46 }
  0xb0   : > { %1324 = vmatpush.xpose.msk.msra.mxu0 %vm423_vm0, %v344_v48  ;;  %891 = vmatpush.xpose.msra.mxu2 %v388_v49 }
  0xb1   : > { %1343 = vmatpush.xpose.msk.msra.mxu3 %vm423_vm0, %v389_v50  ;;  %865 = vmatpush.xpose.msra.mxu1 %v387_v51 }
  0xb4   : > { %1325 = vmatpush.xpose.msk.msra.mxu0 %vm423_vm0, %v341_v52  ;;  %892 = vmatpush.xpose.msra.mxu2 %v385_v53 }
  0xb5   : > { %1344 = vmatpush.xpose.msk.msra.mxu3 %vm423_vm0, %v386_v54  ;;  %866 = vmatpush.xpose.msra.mxu1 %v384_v55 }
  0xb8   : > { %1326 = vmatpush.xpose.msk.msra.mxu0 %vm423_vm0, %v338_v56  ;;  %893 = vmatpush.xpose.msra.mxu2 %v382_v57 }
  0xb9   : > { %1345 = vmatpush.xpose.msk.msra.mxu3 %vm423_vm0, %v383_v58  ;;  %867 = vmatpush.xpose.msra.mxu1 %v381_v60 }
  0xbc   : > { %1327 = vmatpush.xpose.msk.msra.mxu0 %vm423_vm0, %v335_v61  ;;  %894 = vmatpush.xpose.msra.mxu2 %v379_v62 }
  0xbd   : > { %1346 = vmatpush.xpose.msk.msra.mxu3 %vm423_vm0, %v380_v63  ;;  %868 = vmatpush.xpose.msra.mxu1 %v378_v0 }
  0xc0   : > { %1328 = vmatpush.xpose.msk.msra.mxu0 %vm423_vm0, %v332_v1  ;;  %895 = vmatpush.xpose.msra.mxu2 %v376_v2 }
  0xc1   : > { %1347 = vmatpush.xpose.msk.msra.mxu3 %vm423_vm0, %v377_v3  ;;  %869 = vmatpush.xpose.msra.mxu1 %v375_v5  ;;  %v982_v3 = vld [vmem:[%s1884_s2] sm:$0x3f] }
  0xc4   : > { %1329 = vmatpush.xpose.msk.msra.mxu0 %vm423_vm0, %v329_v6  ;;  %896 = vmatpush.xpose.msra.mxu2 %v373_v7 }
  0xc5   : > { %1348 = vmatpush.xpose.msk.msra.mxu3 %vm423_vm0, %v374_v8  ;;  %870 = vmatpush.xpose.msra.mxu1 %v372_v9 }
  0xc8   : > { %1330 = vmatpush.xpose.msk.msra.mxu0 %vm423_vm0, %v326_v10  ;;  %897 = vmatpush.xpose.msra.mxu2 %v370_v11 }
  0xc9   : > { %1349 = vmatpush.xpose.msk.msra.mxu3 %vm423_vm0, %v371_v12  ;;  %871 = vmatpush.xpose.msra.mxu1 %v369_v13 }
  0xcb   : > { %898 = vmatmul.f32.vlgmr.msra.gmra.mxu2 %v1559_v19 }
  0xcc   : > { %1331 = vmatpush.xpose.msk.msra.mxu0 %vm423_vm0, %v323_v14  ;;  %1350 = vmatmul.msk.f32.vlgmr.msra.gmra.mxu3 %vm423_vm0, %v1600_v37 }
  0xcd   : > { %872 = vmatmul.f32.vlgmr.msra.gmra.mxu1 %v1549_v16  ;;  %v639_v16 = vpop.f32.mrf.mxu0 }
  0xcf   : > { %1332 = vmatmul.msk.f32.vlgmr.msra.gmra.mxu0 %vm423_vm0, %v1600_v37  ;;  %v665_v19 = vpop.f32.mrf.mxu1 }
  0xd3   : > { %901 = vmatmul.f32.gmra.mxu2 %v1582_v29  ;;  %v666_v29 = vadd.f32 %v665_v19, %v639_v16 }
  0xd4   : > { %1351 = vmatmul.msk.f32.gmra.mxu3 %vm423_vm0, %v1640_v59 }
  0xd5   : > { %875 = vmatmul.f32.gmra.mxu1 %v1572_v26  ;;  %v642_v37 = vpop.f32.mrf.mxu0  ;;  %v717_v21 = vpop.f32.mrf.mxu3 }
  0xd7   : > { %1333 = vmatmul.msk.f32.gmra.mxu0 %vm423_vm0, %v1640_v59  ;;  %v668_v15 = vpop.f32.mrf.mxu1 }
  0xd8   : > { %v1792_v17 = vadd.f32 %v668_v15, %v642_v37 }
  0xdb   : > { %904 = vmatmul.f32.gmra.mxu2 %v1611_v40  ;;  %v691_v40 = vpop.f32.mrf.mxu2 }
  0xdc   : > { %1352 = vmatmul.msk.f32.gmra.mxu3 %vm423_vm0, %v1657_v4  ;;  %v1796_v20 = vadd.f32 %v691_v40, %v666_v29 }
  0xdd   : > { %878 = vmatmul.f32.gmra.mxu1 %v1595_v36  ;;  %v645_v26 = vpop.f32.mrf.mxu0  ;;  %v720_v22 = vpop.f32.mrf.mxu3 }
  0xdf   : > { %1334 = vmatmul.msk.f32.gmra.mxu0 %vm423_vm0, %v1657_v4  ;;  %v671_v18 = vpop.f32.mrf.mxu1 }
  0xe0   : > { %v1794_v59 = vadd.f32 %v671_v18, %v645_v26 }
  0xe3   : > { %v694_v36 = vpop.f32.mrf.mxu2 }
  0xe4   : > { %v695_v10 = vadd.f32 %v694_v36, %v1792_v17 }
  0xe5   : > { %v723_v25 = vpop.f32.mrf.mxu3 }
  0xeb   : > { %v697_v23 = vpop.f32.mrf.mxu2 }
  0xec   : > { %v698_v12 = vadd.f32 %v697_v23, %v1794_v59 }
 0x10c   : > { %v743_v24 = vpop.f32.mrf.mxu0 }
 0x10d   : > { %v744_v4 = vadd.f32 %v743_v24, %v717_v21 }
 0x10f   : > { %v769_v27 = vpop.f32.mrf.mxu1 }
 0x110   : > { %v1798_v28 = vadd.f32 %v769_v27, %v744_v4  ;;  %v992_v27 = vld [vmem:[%s1885_s3] sm:$0xff] }
 0x112   : > { %v795_v31 = vpop.f32.mrf.mxu2 }
 0x114   : > { %v746_v30 = vpop.f32.mrf.mxu0 }
 0x115   : > { %v747_v32 = vadd.f32 %v746_v30, %v720_v22  ;;  %v821_v34 = vpop.f32.mrf.mxu3 }
 0x116   : > { %v822_v38 = vadd.f32 %v821_v34, %v795_v31 }
 0x117   : > { %v772_v33 = vpop.f32.mrf.mxu1 }
 0x118   : > { %v773_v35 = vadd.f32 %v772_v33, %v747_v32 }
 0x11a   : > { %940 = vrot.lane.b32.xlu0 %v773_v35, %s1398_s17  ;;  %v798_v44 = vpop.f32.mrf.mxu2 }
 0x11c   : > { %v749_v39 = vpop.f32.mrf.mxu0 }
 0x11d   : > { %v750_v41 = vadd.f32 %v749_v39, %v723_v25  ;;  %v824_v45 = vpop.f32.mrf.mxu3 }
 0x11e   : > { %v825_v56 = vadd.f32 %v824_v45, %v798_v44 }
 0x11f   : > { %v775_v42 = vpop.f32.mrf.mxu1 }
 0x120   : > { %v776_v43 = vadd.f32 %v775_v42, %v750_v41  ;;  %v995_v41 = vld [vmem:[%s1885_s3 + $0x18] sm:$0xff] }
 0x122   : > { %964 = vrot.lane.b32.xlu1 %v776_v43, %s1399_s20  ;;  %v801_v47 = vpop.f32.mrf.mxu2 }
 0x125   : > { %v827_v48 = vpop.f32.mrf.mxu3 }
 0x126   : > { %v828_v1 = vadd.f32 %v827_v48, %v801_v47 }
 0x14a   : > { %v873_v49 = vpop.f32.mrf.mxu1 }
 0x14c   : > { %v847_v50 = vpop.f32.mrf.mxu0 }
 0x14d   : > { %v848_v51 = vadd.f32 %v847_v50, %v822_v38  ;;  %v993_v38 = vld [vmem:[%s1885_s3 + $0x8] sm:$0xff] }
 0x14e   : > { %v899_v52 = vpop.f32.mrf.mxu2 }
 0x14f   : > { %v900_v53 = vadd.f32 %v899_v52, %v873_v49  ;;  %v925_v54 = vpop.f32.mrf.mxu3 }
 0x151   : > { %v926_v55 = vadd.f32 %v925_v54, %v900_v53 }
 0x152   : > { %v876_v58 = vpop.f32.mrf.mxu1 }
 0x154   : > { %v850_v57 = vpop.f32.mrf.mxu0 }
 0x155   : > { %v851_v60 = vadd.f32 %v850_v57, %v825_v56  ;;  %v1184_v56 = vld [vmem:[%s1886_s4] sm:$0xff] }
 0x156   : > { %v902_v61 = vpop.f32.mrf.mxu2 }
 0x157   : > { %v903_v62 = vadd.f32 %v902_v61, %v876_v58  ;;  %942 = vrot.lane.b32.xlu0 %v851_v60, %s1398_s17  ;;  %v928_v63 = vpop.f32.mrf.mxu3  ;;  %v1185_v60 = vld [vmem:[%s1886_s4 + $0x8] sm:$0xff] }
 0x159   : > { %v929_v0 = vadd.f32 %v928_v63, %v903_v62 }
 0x15a   : > { %v879_v5 = vpop.f32.mrf.mxu1 }
 0x15b   : > { %944 = vrot.lane.b32.xlu1 %v929_v0, %s1398_s17 }
 0x15c   : > { %v853_v2 = vpop.f32.mrf.mxu0 }
 0x15d   : > { %v854_v6 = vadd.f32 %v853_v2, %v828_v1 }
 0x15e   : > { %v905_v7 = vpop.f32.mrf.mxu2 }
 0x15f   : > { %966 = vrot.lane.b32.xlu2 %v854_v6, %s1399_s20  ;;  %985 = vperm.xlu0 %1388, %v982_v3   ;;  %v906_v8 = vadd.f32 %v905_v7, %v879_v5  ;;  %v931_v9 = vpop.f32.mrf.mxu3 }
 0x161   : > { %v932_v11 = vadd.f32 %v931_v9, %v906_v8 }
 0x163   : > { %938 = vrot.lane.b32.xlu1 %v695_v10, %s1398_s17 }
 0x167   : > { %968 = vrot.lane.b32.xlu2 %v932_v11, %s1399_s20 }
 0x16f   : > { %962 = vrot.lane.b32.xlu2 %v698_v12, %s1399_s20 }
 0x18c   : > { %v941_v13 = vpop.permute.xlu0 %940 }
 0x194   : > { %v965_v16 = vpop.permute.xlu1 %964 }
 0x1b9   : > { %v967_v14 = vpop.permute.xlu2 %966 }
 0x1ba   : > { %v972_v40 = vsel %vm970_vm2, %v965_v16, %v967_v14 }
 0x1c1   : > { %v969_v37 = vpop.permute.xlu2 %968 }
 0x1c2   : > { %v973_v21 = vsel %vm970_vm2, %v967_v14, %v969_v37 }
 0x1c9   : > { %v943_v19 = vpop.permute.xlu0 %942  ;;  %v963_v30 = vpop.permute.xlu2 %962 }
 0x1ca   : > { %v948_v29 = vsel %vm946_vm1, %v941_v13, %v943_v19  ;;  %v971_v34 = vsel %vm970_vm2, %v963_v30, %v965_v16 }
 0x1cb   : > { %v955_v15 = vadd.f32 %v948_v29, %v1798_v28 }
 0x1cd   : > { %v945_v17 = vpop.permute.xlu1 %944  ;;  %v979_v22 = vadd.f32 %v972_v40, %v955_v15 }
 0x1ce   : > { %v949_v26 = vsel %vm946_vm1, %v943_v19, %v945_v17  ;;  %v957_v18 = vadd.f32 %v945_v17, %v926_v55 }
 0x1cf   : > { %v956_v59 = vadd.f32 %v949_v26, %v848_v51 }
 0x1d0   : > { %v981_v36 = vadd.f32 %v969_v37, %v957_v18 }
 0x1d1   : > { %v980_v23 = vadd.f32 %v973_v21, %v956_v59  ;;  %v986_v24 = vpop.permute.xlu0 %985 }
 0x1d2   : > { %v989_v25 = vadd.f32 %v986_v24, %v979_v22  ;;  %v991_v4 = vadd.f32 %v986_v24, %v981_v36 }
 0x1d3   : > { %v990_v28 = vadd.f32 %v986_v24, %v980_v23 }
 0x1d4   : > { %1358 = vmatpush.msk.msrb.mxu2 %vm1009_vm3, %v989_v25  ;;  %1368 = vmatpush.msk.msrb.mxu0 %vm1009_vm3, %v991_v4 }
 0x1d5   : > { %v939_v31 = vpop.permute.xlu1 %938  ;;  %1363 = vmatpush.msk.msrb.mxu3 %vm1009_vm3, %v990_v28  ;;  %1359 = vmatmul.msk.f32.vlgmr.msrb.gmra.mxu2 %vm996_vm4, %v992_v27 }
 0x1d6   : > { %v947_v32 = vsel %vm946_vm1, %v939_v31, %v941_v13  ;;  %1364 = vmatmul.msk.f32.vlgmr.msrb.gmra.mxu3 %vm996_vm4, %v992_v27  ;;  %1369 = vmatmul.msk.f32.vlgmr.msrb.gmra.mxu0 %vm996_vm4, %v992_v27 }
 0x1d7   : > { %v954_v33 = vadd.f32 %v947_v32, %v1796_v20  ;;  %v994_v20 = vld [vmem:[%s1885_s3 + $0x10] sm:$0xff] }
 0x1d9   : > { %v978_v35 = vadd.f32 %v971_v34, %v954_v33 }
 0x1db   : > { %v988_v39 = vadd.f32 %v986_v24, %v978_v35 }
 0x1dd   : > { %1353 = vmatpush.msk.msrb.mxu1 %vm1009_vm3, %v988_v39  ;;  %1360 = vmatmul.msk.f32.gmra.mxu2 %vm996_vm4, %v993_v38 }
 0x1de   : > { %1354 = vmatmul.msk.f32.vlgmr.msrb.gmra.mxu1 %vm996_vm4, %v992_v27  ;;  %1365 = vmatmul.msk.f32.gmra.mxu3 %vm996_vm4, %v993_v38 }
 0x1df   : > { %1370 = vmatmul.msk.f32.gmra.mxu0 %vm996_vm4, %v993_v38 }
 0x1e5   : > { %1361 = vmatmul.msk.f32.gmra.mxu2 %vm996_vm4, %v994_v20 }
 0x1e6   : > { %1355 = vmatmul.msk.f32.gmra.mxu1 %vm996_vm4, %v993_v38  ;;  %1366 = vmatmul.msk.f32.gmra.mxu3 %vm996_vm4, %v994_v20 }
 0x1e7   : > { %1371 = vmatmul.msk.f32.gmra.mxu0 %vm996_vm4, %v994_v20 }
 0x1ed   : > { %1362 = vmatmul.msk.f32.gmra.mxu2 %vm996_vm4, %v995_v41 }
 0x1ee   : > { %1356 = vmatmul.msk.f32.gmra.mxu1 %vm996_vm4, %v994_v20  ;;  %1367 = vmatmul.msk.f32.gmra.mxu3 %vm996_vm4, %v995_v41 }
 0x1ef   : > { %1372 = vmatmul.msk.f32.gmra.mxu0 %vm996_vm4, %v995_v41 }
 0x1f6   : > { %1357 = vmatmul.msk.f32.gmra.mxu1 %vm996_vm4, %v995_v41 }
 0x253   : > { %v1126_v45 = vpop.f32.mrf.mxu0 }
 0x258   : > { %v1068_v42 = vpop.f32.mrf.mxu2 }
 0x259   : > { %v1097_v43 = vpop.f32.mrf.mxu3 }
 0x25b   : > { %v1039_v44 = vpop.f32.mrf.mxu1 }
 0x25c   : > { %v1129_v49 = vpop.f32.mrf.mxu0 }
 0x260   : > { %v1071_v46 = vpop.f32.mrf.mxu2 }
 0x261   : > { %v1100_v47 = vpop.f32.mrf.mxu3 }
 0x263   : > { %v1042_v48 = vpop.f32.mrf.mxu1 }
 0x264   : > { %v1132_v54 = vpop.f32.mrf.mxu0 }
 0x268   : > { %v1074_v50 = vpop.f32.mrf.mxu2 }
 0x269   : > { %v1103_v51 = vpop.f32.mrf.mxu3 }
 0x26a   : > { %1150 = vrot.lane.b32.xlu0 %v1103_v51, %s1398_s17 }
 0x26b   : > { %v1045_v52 = vpop.f32.mrf.mxu1 }
 0x26c   : > { %1146 = vrot.lane.b32.xlu1 %v1045_v52, %s1398_s17  ;;  %v1135_v58 = vpop.f32.mrf.mxu0 }
 0x270   : > { %v1077_v53 = vpop.f32.mrf.mxu2 }
 0x271   : > { %v1106_v57 = vpop.f32.mrf.mxu3 }
 0x272   : > { %1156 = vrot.lane.b32.xlu0 %v1077_v53, %s1398_s17 }
 0x273   : > { %v1048_v55 = vpop.f32.mrf.mxu1 }
 0x274   : > { %1152 = vrot.lane.b32.xlu1 %v1132_v54, %s1398_s17  ;;  %1154 = vrot.lane.b32.xlu2 %v1048_v55, %s1398_s17 }
 0x27a   : > { %1188 = vperm.xlu0 %1388, %v1184_v56  }
 0x27c   : > { %1158 = vrot.lane.b32.xlu1 %v1106_v57, %s1398_s17  ;;  %1148 = vrot.lane.b32.xlu2 %v1074_v50, %s1398_s17 }
 0x284   : > { %1193 = vperm.xlu1 %1389, %v1185_v60   ;;  %1160 = vrot.lane.b32.xlu2 %v1135_v58, %s1398_s17 }
 0x2ce   : > { %v1155_v62 = vpop.permute.xlu2 %1154 }
 0x2d6   : > { %v1149_v2 = vpop.permute.xlu2 %1148 }
 0x2dc   : > { %v1151_v61 = vpop.permute.xlu0 %1150 }
 0x2dd   : > { %v1163_v3 = vsel %vm946_vm1, %v1149_v2, %v1151_v61 }
 0x2de   : > { %v1147_v63 = vpop.permute.xlu1 %1146  ;;  %v1177_v7 = vadd.f32 %v1163_v3, %v1068_v42  ;;  %v1161_v37 = vpop.permute.xlu2 %1160 }
 0x2df   : > { %v1162_v5 = vsel %vm946_vm1, %v1147_v63, %v1149_v2  ;;  %v1183_v18 = vadd.f32 %v1161_v37, %v1129_v49 }
 0x2e0   : > { %v1176_v8 = vadd.f32 %v1162_v5, %v1039_v44 }
 0x2e4   : > { %v1157_v0 = vpop.permute.xlu0 %1156 }
 0x2e5   : > { %v1165_v15 = vsel %vm946_vm1, %v1155_v62, %v1157_v0 }
 0x2e6   : > { %v1153_v1 = vpop.permute.xlu1 %1152  ;;  %v1180_v40 = vadd.f32 %v1165_v15, %v1042_v48 }
 0x2e7   : > { %v1164_v6 = vsel %vm946_vm1, %v1151_v61, %v1153_v1  ;;  %v1179_v10 = vadd.f32 %v1153_v1, %v1126_v45 }
 0x2e8   : > { %v1178_v9 = vadd.f32 %v1164_v6, %v1097_v43 }
 0x2ec   : > { %v1189_v11 = vpop.permute.xlu0 %1188 }
 0x2ed   : > { %v1196_v12 = vadd.f32 %v1189_v11, %v1176_v8  ;;  %v1197_v13 = vadd.f32 %v1189_v11, %v1177_v7  ;;  %v1198_v14 = vadd.f32 %v1189_v11, %v1178_v9  ;;  %v1199_v16 = vadd.f32 %v1189_v11, %v1179_v10 }
 0x2ee   : > { %v1159_v19 = vpop.permute.xlu1 %1158 }
 0x2ef   : > { %v1205_v29 = vsel %vm1204_vm5, %v1199_v16, 0.0  ;;  %1207 = vst [vmem:[%s224_s13] sm:$0xff] %v1196_v12  ;;  %v1166_v17 = vsel %vm946_vm1, %v1157_v0, %v1159_v19  ;;  %v1167_v26 = vsel %vm946_vm1, %v1159_v19, %v1161_v37 }
 0x2f0   : > { %1208 = vst [vmem:[%s224_s13 + $0x8] sm:$0xff] %v1197_v13  ;;  %v1181_v59 = vadd.f32 %v1166_v17, %v1071_v46  ;;  %v1182_v21 = vadd.f32 %v1167_v26, %v1100_v47 }
 0x2f1   : > { %1209 = vst [vmem:[%s224_s13 + $0x10] sm:$0xff] %v1198_v14 }
 0x2f2   : > { %1210 = vst [vmem:[%s224_s13 + $0x18] sm:$0xff] %v1205_v29 }
 0x2f6   : > { %v1194_v22 = vpop.permute.xlu1 %1193 }
 0x2f7   : > { %v1200_v36 = vadd.f32 %v1194_v22, %v1180_v40  ;;  %v1201_v23 = vadd.f32 %v1194_v22, %v1181_v59  ;;  %v1202_v24 = vadd.f32 %v1194_v22, %v1182_v21  ;;  %v1203_v25 = vadd.f32 %v1194_v22, %v1183_v18 }
 0x2f9   : > { %v1206_v4 = vsel %vm1204_vm5, %v1203_v25, 0.0  ;;  %1211 = vst [vmem:[%s224_s13 + $0x20] sm:$0xff] %v1200_v36 }
 0x2fa   : > { %1212 = vst [vmem:[%s224_s13 + $0x28] sm:$0xff] %v1201_v23 }
 0x2fb   : > { %1213 = vst [vmem:[%s224_s13 + $0x30] sm:$0xff] %v1202_v24 }
 0x2fc   : > { %1214 = vst [vmem:[%s224_s13 + $0x38] sm:$0xff] %v1206_v4 }
 0x2fd PF: > { %s15_s18 = sadd.s32 1, %s1396_s18  }
 0x2fe   : > { %p12_p4 = scmp.ge.s32.totalorder %s15_s18, 4  }
 0x300   :  { %14 = sbr.rel (!%p12_p4) target bundleno = 1 (0x1), region = 70 }

// kernel: cnn_forward.4
= control target key start
LH: loop header
LB: loop body
LE: loop exit
PB: predicated region body
PF: predicated region fallthrough
CT: control target
= control target key end

     0   :  { %10 = vsyncpa [#allocation4], 0  ;;  %s18751_s0 = inlined_call_operand.vmem [shape: f32[2,8192], index: 0, kind: input, shape index: {}]   ;;  %s18752_s1 = inlined_call_operand.hbm [shape: bf16[8192,1024], index: 1, kind: input, shape index: {}]   ;;  %s18753_s2 = inlined_call_operand.vmem [shape: f32[1,1024], index: 2, kind: input, shape index: {}]   ;;  %s18754_s3 = inlined_call_operand.vmem [shape: bf16[1024,512], index: 3, kind: input, shape index: {}]   ;;  %s18755_s4 = inlined_call_operand.vmem [shape: bf16[512,72], index: 4, kind: input, shape index: {}]   ;;  %s18756_s5 = inlined_call_operand.vmem [shape: f32[2,2,72], index: 5, kind: output, shape index: {}]  }
   0x1   :  { %12 = vsyncpa [#allocation4 + $0x1], 0  ;;  %s15867_s18 = smov 0   ;;  %s15869_s19 = smov 0  }
   0x2   :  { %s15871_s20 = smov 0   ;;  %s15873_s21 = smov 0  }
   0x3   :  { %s15875_s22 = smov 0   ;;  %s15877_s23 = smov 0  }
   0x4   :  { %s15879_s24 = smov 0   ;;  %s15881_s25 = smov 0  }
   0x5 LB: > { %18760 = sst [smem:[#allocation6_spill]] %s15827_s24  ;;  %s9716_s26 = sadd.s32 4294967295, %s15831_s25   ;;  %s15831_s25 = sphi %s15881_s25, %s18_s25   ;;  %s15827_s24 = sphi %s15879_s24, %s18767_s24   ;;  %s15823_s23 = sphi %s15877_s23, %s18772_s23   ;;  %s15819_s22 = sphi %s15875_s22, %s18765_s22   ;;  %s15815_s21 = sphi %s15873_s21, %s18771_s21   ;;  %s15811_s20 = sphi %s15871_s20, %s18770_s20   ;;  %s15807_s19 = sphi %s15869_s19, %s18769_s19   ;;  %s15803_s18 = sphi %s15867_s18, %s18768_s18  }
   0x6   : > { %s27_s27 = sadd.s32 1, %s15823_s23  ;;  %s30_s28 = sadd.s32 1, %s15827_s24 }
   0x7   : > { %p28_p0 = scmp.ge.s32.totalorder %s27_s27, 2  ;;  %s65_s29 = sadd.s32 1, %s15811_s20 }
   0x8   : > { %p72_p1 = scmp.ne.s32.totalorder %s15811_s20, %s15807_s19  ;;  %p73_p2 = scmp.eq.s32.totalorder %s15831_s25, 0 }
   0x9   : > { %s18774_s27 = smov (%p28_p0, %s27_s27), 0  ;;  %s18776_s28 = smov (!%p28_p0, %s30_s28), %s15827_s24 }
   0xa   : > { %18761 = sst [smem:[#allocation7_spill]] %s18774_s27  ;;  %s60_s30 = ssub.s32 %s15823_s23, %s18774_s27 }
   0xb   : > { %p32_p3 = scmp.ge.s32.totalorder %s18776_s28, 2  ;;  %p78_p4 = scmp.ne.s32.totalorder %s15807_s19, %s15803_s18 }
   0xc   : > { %p15918_p5 = por %p73_p2, %p72_p1  ;;  %p79_p6 = scmp.eq.s32.totalorder %s9716_s26, 0 }
   0xd   : > { %s18778_s28 = smov (%p32_p3, %s18776_s28), 0  ;;  %p15666_p8 = scmp.lt.s32.totalorder %s15831_s25, 4 }
   0xe   : > { %18763 = sst [smem:[#allocation8_spill]] %s18778_s28  ;;  %p15924_p7 = por %p79_p6, %p78_p4 }
   0xf   : > { %s61_s8 = ssub.s32 %s15827_s24, %s18778_s28  ;;  %s213_s10 = sand.u32 1, %s15811_s20  }
  0x10   : > { %s62_s9 = sor.u32 %s61_s8, %s60_s30  ;;  %s9720_s11 = sshll.u32 %s213_s10, 13 }
  0x11   : > { %p63_p9 = scmp.eq.s32.totalorder %s62_s9, 0  ;;  %s9722_s12 = sshll.u32 %s15827_s24, 2 }
  0x12   : > { %s14474_s14 = sshll.u32 %s15823_s23, 12  ;;  %s217_s16 = scalar_lea.vmem [#allocation3], %s9720_s11 }
  0x13   : > { %s15934_s13 = scalar_select %p63_p9, %s15811_s20, %s65_s29  }
  0x14   : > { %s223_s15 = sadd.s32 %s14474_s14, %s9722_s12  ;;  %s228_s17 = sshll.u32 %s217_s16, 4  ;;  %s229_s17 = int_to_ptr.vmem [resolvable:$true] %s228_s17 }
  0x15   : > { %s9724_s18 = sshll.u32 %s223_s15, 2  ;;  %p15663_p10 = pnand %p15666_p8, %p15918_p5 }
  0x16   : > { %s225_s28 = scalar_lea.hbm %s18752_s1, %s9724_s18  ;;  %s214_s8 = scalar_lea.sflag [#allocation4], %s213_s10 }
  0x17   : > { %s226_s30 = sshll.u32 %s225_s28, 4  ;;  %s15833_s29 = smov 512   ;;  %s227_s30 = int_to_ptr.hbm [resolvable:$true] %s226_s30 }
  0x18   : > { %s15834_s9 = smov 256   ;;  %s15835_s24 = smov 16  }
  0x19   : > { %15665 = dma.hbm_to_vmem [thread:$0]  (!%p15663_p10), %s227_s30, 131072, %s229_s17, %s214_s8, %s15833_s29, %s15834_s9, %s15835_s24  }
  0x1a   : > { %p9725_p11 = scmp.ge.s32.totalorder %s15831_s25, 1  ;;  %p254_p12 = scmp.lt.s32.totalorder %s15831_s25, 5 }
  0x1c   : > { %p255_p13 = pnand %p9725_p11, %p254_p12 }
  0x1d   : > { %s260_s11 = sand.u32 (!%p255_p13), 1, %s15807_s19  }
  0x1e   : > { %258 = sbr.rel (%p255_p13) target bundleno = 1650 (0x672), region = 40  ;;  %s9726_s12 = sshll.u32 (!%p255_p13), %s260_s11, 13 }
  0x1f   : > { %s261_s27 = scalar_lea.sflag (!%p255_p13), [#allocation4], %s260_s11  ;;  %s15947_s14 = scalar_lea.vmem (!%p255_p13), [#allocation3], %s9726_s12 }
  0x23   : > { %15798 = dma.done.wait (%p15924_p7), %s261_s27, 131072  }
  0x24   : > { %15800 = vsyncadd (%p15924_p7), %s261_s27, 4294836224  ;;  %s9727_s24 = sshll.u32 %s15815_s21, 5  ;;  %s9729_s28 = sshll.u32 %s15819_s22, 2 }
  0x25   : > { %p307_p0 = scmp.lt.s32.totalorder %s9727_s24, 63  ;;  %p315_p1 = scmp.lt.s32.totalorder %s9729_s28, 7 }
  0x26   : > { %s9730_s6 = sshll.u32 %s15819_s22, 6  ;;  %p326_p2 = scmp.lt.s32.totalorder %s15819_s22, 1 }
  0x27   : > { %s18780_s24 = smov (!%p307_p0, %s9727_s24), 63  ;;  %s18782_s28 = smov (!%p315_p1, %s9729_s28), 7 }
  0x28   : > { %s9728_s10 = sshll.u32 %s18780_s24, 1  ;;  %p320_p3 = scmp.lt.s32.totalorder %s9730_s6, 127 }
  0x29   : > { %s15962_s16 = scalar_lea.vmem %s18751_s0, %s9728_s10  ;;  %s317_s26 = scalar_lea.vmem %s18753_s2, %s18782_s28 }
  0x2a   : > { %s18784_s6 = smov (!%p320_p3, %s9730_s6), 127  ;;  %s18786_s22 = smov (!%p326_p2, %s15819_s22), 1 }
  0x2b   : > { %s14475_s30 = sshll.u32 %s18784_s6, 4  ;;  %s9733_s11 = sshll.u32 %s18786_s22, 1 }
  0x2c   : > { %s15972_s9 = scalar_lea.vmem %s18754_s3, %s14475_s30  ;;  %s15977_s24 = scalar_lea.vmem %s18756_s5, %s9733_s11 }
  0x2d   : > { %p9734_p4 = scmp.ne.s32.totalorder %s15815_s21, 0 }
  0x2f   : > { %333 = sbr.rel (%p9734_p4) target bundleno = 54 (0x36), region = 48 }
  0x34   : > { %v15836_v0 = vmov 0.0  }
  0x35   : > { %334 = vst [vmem:[#allocation2] sm:$0xff] %v15836_v0 }
  0x36 PF: > { %v9849_v1 = vld [vmem:[%s15947_s14 + $0xe0] sm:$0xf]  ;;  %v14506_v2 = vld [vmem:[%s15947_s14 + $0xec] sm:$0xf0]  ;;  %vm8272_vm0 = vcmask 1041408   ;;  %vm8274_vm1 = vcmask 1045508  }
  0x37   : > { %v9977_v3 = vld [vmem:[%s15947_s14 + $0x1e0] sm:$0xf]  ;;  %v9850_v4 = vor.u32 %v14506_v2, %v9849_v1  ;;  %v14538_v5 = vld [vmem:[%s15947_s14 + $0x1ec] sm:$0xf0]  ;;  %vm8276_vm2 = vcmask 1043456   ;;  %p13831_p5 = scmp.ne.s32.totalorder %s15815_s21, 1 }
  0x38   : > { %v10105_v6 = vld [vmem:[%s15947_s14 + $0x2e0] sm:$0xf]  ;;  %v14570_v7 = vld [vmem:[%s15947_s14 + $0x2ec] sm:$0xf0]  ;;  %v9978_v8 = vor.u32 %v14538_v5, %v9977_v3 }
  0x39   : > { %v10106_v9 = vor.u32 %v14570_v7, %v10105_v6  ;;  %v10233_v10 = vld [vmem:[%s15947_s14 + $0x3e0] sm:$0xf]  ;;  %v14602_v11 = vld [vmem:[%s15947_s14 + $0x3ec] sm:$0xf0]  ;;  %6601 = vmatpush.bf16.msra.mxu0 %v9850_v4 }
  0x3a   : > { %v9833_v12 = vld [vmem:[%s15947_s14 + $0xc0] sm:$0xf]  ;;  %v10234_v13 = vor.u32 %v14602_v11, %v10233_v10  ;;  %v14502_v14 = vld [vmem:[%s15947_s14 + $0xcc] sm:$0xf0]  ;;  %6614 = vmatpush.bf16.msra.mxu1 %v9978_v8 }
  0x3b   : > { %v9961_v15 = vld [vmem:[%s15947_s14 + $0x1c0] sm:$0xf]  ;;  %v14534_v16 = vld [vmem:[%s15947_s14 + $0x1cc] sm:$0xf0]  ;;  %6627 = vmatpush.bf16.msra.mxu2 %v10106_v9  ;;  %v9834_v17 = vor.u32 %v14502_v14, %v9833_v12 }
  0x3c   : > { %v9962_v18 = vor.u32 %v14534_v16, %v9961_v15  ;;  %v10089_v19 = vld [vmem:[%s15947_s14 + $0x2c0] sm:$0xf]  ;;  %v14566_v20 = vld [vmem:[%s15947_s14 + $0x2cc] sm:$0xf0]  ;;  %6640 = vmatpush.bf16.msra.mxu3 %v10234_v13 }
  0x3d   : > { %v10217_v21 = vld [vmem:[%s15947_s14 + $0x3c0] sm:$0xf]  ;;  %v10090_v22 = vor.u32 %v14566_v20, %v10089_v19  ;;  %v14598_v23 = vld [vmem:[%s15947_s14 + $0x3cc] sm:$0xf0]  ;;  %6602 = vmatpush.bf16.msra.mxu0 %v9834_v17 }
  0x3e   : > { %v9817_v24 = vld [vmem:[%s15947_s14 + $0xa0] sm:$0xf]  ;;  %v14498_v25 = vld [vmem:[%s15947_s14 + $0xac] sm:$0xf0]  ;;  %v10218_v26 = vor.u32 %v14598_v23, %v10217_v21  ;;  %6615 = vmatpush.bf16.msra.mxu1 %v9962_v18 }
  0x3f   : > { %v9945_v27 = vld [vmem:[%s15947_s14 + $0x1a0] sm:$0xf]  ;;  %v14530_v28 = vld [vmem:[%s15947_s14 + $0x1ac] sm:$0xf0]  ;;  %v9818_v30 = vor.u32 %v14498_v25, %v9817_v24  ;;  %6628 = vmatpush.bf16.msra.mxu2 %v10090_v22 }
  0x40   : > { %v10073_v29 = vld [vmem:[%s15947_s14 + $0x2a0] sm:$0xf]  ;;  %v14562_v31 = vld [vmem:[%s15947_s14 + $0x2ac] sm:$0xf0]  ;;  %v9946_v34 = vor.u32 %v14530_v28, %v9945_v27  ;;  %6641 = vmatpush.bf16.msra.mxu3 %v10218_v26 }
  0x41   : > { %v10201_v32 = vld [vmem:[%s15947_s14 + $0x3a0] sm:$0xf]  ;;  %v14594_v33 = vld [vmem:[%s15947_s14 + $0x3ac] sm:$0xf0]  ;;  %v10074_v35 = vor.u32 %v14562_v31, %v10073_v29  ;;  %6603 = vmatpush.bf16.msra.mxu0 %v9818_v30 }
  0x42   : > { %v9801_v36 = vld [vmem:[%s15947_s14 + $0x80] sm:$0xf]  ;;  %v14494_v37 = vld [vmem:[%s15947_s14 + $0x8c] sm:$0xf0]  ;;  %v10202_v39 = vor.u32 %v14594_v33, %v10201_v32  ;;  %6616 = vmatpush.bf16.msra.mxu1 %v9946_v34 }
  0x43   : > { %v9929_v38 = vld [vmem:[%s15947_s14 + $0x180] sm:$0xf]  ;;  %v14526_v40 = vld [vmem:[%s15947_s14 + $0x18c] sm:$0xf0]  ;;  %v9802_v45 = vor.u32 %v14494_v37, %v9801_v36  ;;  %6629 = vmatpush.bf16.msra.mxu2 %v10074_v35 }
  0x44   : > { %v10057_v41 = vld [vmem:[%s15947_s14 + $0x280] sm:$0xf]  ;;  %v14558_v42 = vld [vmem:[%s15947_s14 + $0x28c] sm:$0xf0]  ;;  %v9930_v46 = vor.u32 %v14526_v40, %v9929_v38  ;;  %6642 = vmatpush.bf16.msra.mxu3 %v10202_v39 }
  0x45   : > { %v10185_v43 = vld [vmem:[%s15947_s14 + $0x380] sm:$0xf]  ;;  %v14590_v44 = vld [vmem:[%s15947_s14 + $0x38c] sm:$0xf0]  ;;  %v10058_v47 = vor.u32 %v14558_v42, %v10057_v41  ;;  %6604 = vmatpush.bf16.msra.mxu0 %v9802_v45 }
  0x46   : > { %v9785_v48 = vld [vmem:[%s15947_s14 + $0x60] sm:$0xf]  ;;  %v14490_v49 = vld [vmem:[%s15947_s14 + $0x6c] sm:$0xf0]  ;;  %v10186_v51 = vor.u32 %v14590_v44, %v10185_v43  ;;  %6617 = vmatpush.bf16.msra.mxu1 %v9930_v46 }
  0x47   : > { %v9913_v50 = vld [vmem:[%s15947_s14 + $0x160] sm:$0xf]  ;;  %v14522_v52 = vld [vmem:[%s15947_s14 + $0x16c] sm:$0xf0]  ;;  %v9786_v57 = vor.u32 %v14490_v49, %v9785_v48  ;;  %6630 = vmatpush.bf16.msra.mxu2 %v10058_v47 }
  0x48   : > { %v10041_v53 = vld [vmem:[%s15947_s14 + $0x260] sm:$0xf]  ;;  %v14554_v54 = vld [vmem:[%s15947_s14 + $0x26c] sm:$0xf0]  ;;  %v9914_v58 = vor.u32 %v14522_v52, %v9913_v50  ;;  %6643 = vmatpush.bf16.msra.mxu3 %v10186_v51 }
  0x49   : > { %v10169_v55 = vld [vmem:[%s15947_s14 + $0x360] sm:$0xf]  ;;  %v14586_v56 = vld [vmem:[%s15947_s14 + $0x36c] sm:$0xf0]  ;;  %v10042_v59 = vor.u32 %v14554_v54, %v10041_v53  ;;  %6605 = vmatpush.bf16.msra.mxu0 %v9786_v57 }
  0x4a   : > { %v9769_v60 = vld [vmem:[%s15947_s14 + $0x40] sm:$0xf]  ;;  %v14486_v61 = vld [vmem:[%s15947_s14 + $0x4c] sm:$0xf0]  ;;  %v10170_v63 = vor.u32 %v14586_v56, %v10169_v55  ;;  %6618 = vmatpush.bf16.msra.mxu1 %v9914_v58 }
  0x4b   : > { %v9897_v62 = vld [vmem:[%s15947_s14 + $0x140] sm:$0xf]  ;;  %v14518_v0 = vld [vmem:[%s15947_s14 + $0x14c] sm:$0xf0]  ;;  %v9770_v5 = vor.u32 %v14486_v61, %v9769_v60  ;;  %6631 = vmatpush.bf16.msra.mxu2 %v10042_v59 }
  0x4c   : > { %v10025_v1 = vld [vmem:[%s15947_s14 + $0x240] sm:$0xf]  ;;  %v14550_v2 = vld [vmem:[%s15947_s14 + $0x24c] sm:$0xf0]  ;;  %v9898_v6 = vor.u32 %v14518_v0, %v9897_v62  ;;  %6644 = vmatpush.bf16.msra.mxu3 %v10170_v63 }
  0x4d   : > { %v10153_v3 = vld [vmem:[%s15947_s14 + $0x340] sm:$0xf]  ;;  %v14582_v4 = vld [vmem:[%s15947_s14 + $0x34c] sm:$0xf0]  ;;  %v10026_v7 = vor.u32 %v14550_v2, %v10025_v1  ;;  %6606 = vmatpush.bf16.msra.mxu0 %v9770_v5 }
  0x4e   : > { %v9753_v8 = vld [vmem:[%s15947_s14 + $0x20] sm:$0xf]  ;;  %v14482_v9 = vld [vmem:[%s15947_s14 + $0x2c] sm:$0xf0]  ;;  %v10154_v11 = vor.u32 %v14582_v4, %v10153_v3  ;;  %6619 = vmatpush.bf16.msra.mxu1 %v9898_v6 }
  0x4f   : > { %v9881_v10 = vld [vmem:[%s15947_s14 + $0x120] sm:$0xf]  ;;  %v14514_v12 = vld [vmem:[%s15947_s14 + $0x12c] sm:$0xf0]  ;;  %v9754_v17 = vor.u32 %v14482_v9, %v9753_v8  ;;  %6632 = vmatpush.bf16.msra.mxu2 %v10026_v7 }
  0x50   : > { %v10009_v13 = vld [vmem:[%s15947_s14 + $0x220] sm:$0xf]  ;;  %v14546_v14 = vld [vmem:[%s15947_s14 + $0x22c] sm:$0xf0]  ;;  %v9882_v20 = vor.u32 %v14514_v12, %v9881_v10  ;;  %6645 = vmatpush.bf16.msra.mxu3 %v10154_v11 }
  0x51   : > { %v10137_v15 = vld [vmem:[%s15947_s14 + $0x320] sm:$0xf]  ;;  %v14578_v16 = vld [vmem:[%s15947_s14 + $0x32c] sm:$0xf0]  ;;  %v10010_v21 = vor.u32 %v14546_v14, %v10009_v13  ;;  %6607 = vmatpush.bf16.msra.mxu0 %v9754_v17 }
  0x52   : > { %v9737_v18 = vld [vmem:[%s15947_s14] sm:$0xf]  ;;  %v14478_v19 = vld [vmem:[%s15947_s14 + $0xc] sm:$0xf0]  ;;  %v10138_v25 = vor.u32 %v14578_v16, %v10137_v15  ;;  %6620 = vmatpush.bf16.msra.mxu1 %v9882_v20 }
  0x53   : > { %v9865_v22 = vld [vmem:[%s15947_s14 + $0x100] sm:$0xf]  ;;  %v14510_v23 = vld [vmem:[%s15947_s14 + $0x10c] sm:$0xf0]  ;;  %v9738_v32 = vor.u32 %v14478_v19, %v9737_v18  ;;  %6633 = vmatpush.bf16.msra.mxu2 %v10010_v21 }
  0x54   : > { %v9993_v24 = vld [vmem:[%s15947_s14 + $0x200] sm:$0xf]  ;;  %v14542_v26 = vld [vmem:[%s15947_s14 + $0x20c] sm:$0xf0]  ;;  %v9866_v36 = vor.u32 %v14510_v23, %v9865_v22  ;;  %6646 = vmatpush.bf16.msra.mxu3 %v10138_v25 }
  0x55   : > { %v10121_v27 = vld [vmem:[%s15947_s14 + $0x300] sm:$0xf]  ;;  %v14574_v28 = vld [vmem:[%s15947_s14 + $0x30c] sm:$0xf0]  ;;  %v9994_v37 = vor.u32 %v14542_v26, %v9993_v24  ;;  %6608 = vmatpush.bf16.msra.mxu0 %v9738_v32 }
  0x56   : > { %v10361_v29 = vld [vmem:[%s15947_s14 + $0x4e0] sm:$0xf]  ;;  %v14634_v30 = vld [vmem:[%s15947_s14 + $0x4ec] sm:$0xf0]  ;;  %v10122_v40 = vor.u32 %v14574_v28, %v10121_v27  ;;  %6621 = vmatpush.bf16.msra.mxu1 %v9866_v36 }
  0x57   : > { %v10489_v31 = vld [vmem:[%s15947_s14 + $0x5e0] sm:$0xf]  ;;  %v14666_v33 = vld [vmem:[%s15947_s14 + $0x5ec] sm:$0xf0]  ;;  %v10362_v41 = vor.u32 %v14634_v30, %v10361_v29  ;;  %6634 = vmatpush.bf16.msra.mxu2 %v9994_v37 }
  0x58   : > { %v10617_v34 = vld [vmem:[%s15947_s14 + $0x6e0] sm:$0xf]  ;;  %v14698_v35 = vld [vmem:[%s15947_s14 + $0x6ec] sm:$0xf0]  ;;  %v10490_v42 = vor.u32 %v14666_v33, %v10489_v31  ;;  %6647 = vmatpush.bf16.msra.mxu3 %v10122_v40 }
  0x59   : > { %v10745_v38 = vld [vmem:[%s15947_s14 + $0x7e0] sm:$0xf]  ;;  %v14730_v39 = vld [vmem:[%s15947_s14 + $0x7ec] sm:$0xf0]  ;;  %v10618_v43 = vor.u32 %v14698_v35, %v10617_v34  ;;  %6653 = vmatpush.bf16.msrb.mxu0 %v10362_v41 }
  0x5a   : > { %v10345_v44 = vld [vmem:[%s15947_s14 + $0x4c0] sm:$0xf]  ;;  %v14630_v45 = vld [vmem:[%s15947_s14 + $0x4cc] sm:$0xf0]  ;;  %v10746_v47 = vor.u32 %v14730_v39, %v10745_v38  ;;  %6666 = vmatpush.bf16.msrb.mxu1 %v10490_v42 }
  0x5b   : > { %v10473_v46 = vld [vmem:[%s15947_s14 + $0x5c0] sm:$0xf]  ;;  %v14662_v48 = vld [vmem:[%s15947_s14 + $0x5cc] sm:$0xf0]  ;;  %v10346_v53 = vor.u32 %v14630_v45, %v10345_v44  ;;  %6679 = vmatpush.bf16.msrb.mxu2 %v10618_v43 }
  0x5c   : > { %v10601_v49 = vld [vmem:[%s15947_s14 + $0x6c0] sm:$0xf]  ;;  %v14694_v50 = vld [vmem:[%s15947_s14 + $0x6cc] sm:$0xf0]  ;;  %v10474_v56 = vor.u32 %v14662_v48, %v10473_v46  ;;  %6692 = vmatpush.bf16.msrb.mxu3 %v10746_v47 }
  0x5d   : > { %v10729_v51 = vld [vmem:[%s15947_s14 + $0x7c0] sm:$0xf]  ;;  %v14726_v52 = vld [vmem:[%s15947_s14 + $0x7cc] sm:$0xf0]  ;;  %v10602_v57 = vor.u32 %v14694_v50, %v10601_v49  ;;  %6654 = vmatpush.bf16.msrb.mxu0 %v10346_v53 }
  0x5e   : > { %v10329_v54 = vld [vmem:[%s15947_s14 + $0x4a0] sm:$0xf]  ;;  %v14626_v55 = vld [vmem:[%s15947_s14 + $0x4ac] sm:$0xf0]  ;;  %v10730_v61 = vor.u32 %v14726_v52, %v10729_v51  ;;  %6667 = vmatpush.bf16.msrb.mxu1 %v10474_v56 }
  0x5f   : > { %v10457_v58 = vld [vmem:[%s15947_s14 + $0x5a0] sm:$0xf]  ;;  %v14658_v59 = vld [vmem:[%s15947_s14 + $0x5ac] sm:$0xf0]  ;;  %v10330_v2 = vor.u32 %v14626_v55, %v10329_v54  ;;  %6680 = vmatpush.bf16.msrb.mxu2 %v10602_v57 }
  0x60   : > { %v335_v60 = vld [vmem:[%s15962_s16] sm:$0xff]  ;;  %v10585_v62 = vld [vmem:[%s15947_s14 + $0x6a0] sm:$0xf]  ;;  %v10458_v4 = vor.u32 %v14658_v59, %v10457_v58  ;;  %6693 = vmatpush.bf16.msrb.mxu3 %v10730_v61  ;;  %v336_v58 = vld [vmem:[%s15962_s16 + $0x8] sm:$0xff] }
  0x61   : > { %v14690_v63 = vld [vmem:[%s15947_s14 + $0x6ac] sm:$0xf0]  ;;  %351 = vst [vmem:[#allocation1] ss:$4 sm:$0xff] %v335_v60  ;;  %v10713_v0 = vld [vmem:[%s15947_s14 + $0x7a0] sm:$0xf]  ;;  %6655 = vmatpush.bf16.msrb.mxu0 %v10330_v2 }
  0x62   : > { %v14722_v1 = vld [vmem:[%s15947_s14 + $0x7ac] sm:$0xf0]  ;;  %v10313_v3 = vld [vmem:[%s15947_s14 + $0x480] sm:$0xf]  ;;  %v10586_v5 = vor.u32 %v14690_v63, %v10585_v62  ;;  %6668 = vmatpush.bf16.msrb.mxu1 %v10458_v4  ;;  %353 = vst [vmem:[#allocation1 + $0x20] ss:$4 sm:$0xff] %v336_v58 }
  0x63   : > { %v14622_v6 = vld [vmem:[%s15947_s14 + $0x48c] sm:$0xf0]  ;;  %v10441_v7 = vld [vmem:[%s15947_s14 + $0x580] sm:$0xf]  ;;  %v10714_v9 = vor.u32 %v14722_v1, %v10713_v0 }
  0x64   : > { %v14654_v8 = vld [vmem:[%s15947_s14 + $0x58c] sm:$0xf0]  ;;  %v10569_v10 = vld [vmem:[%s15947_s14 + $0x680] sm:$0xf]  ;;  %v10314_v16 = vor.u32 %v14622_v6, %v10313_v3  ;;  %6681 = vmatpush.bf16.msrb.mxu2 %v10586_v5 }
  0x65   : > { %v14686_v11 = vld [vmem:[%s15947_s14 + $0x68c] sm:$0xf0]  ;;  %v10697_v12 = vld [vmem:[%s15947_s14 + $0x780] sm:$0xf]  ;;  %v10442_v22 = vor.u32 %v14654_v8, %v10441_v7  ;;  %6694 = vmatpush.bf16.msrb.mxu3 %v10714_v9 }
  0x66   : > { %v14718_v13 = vld [vmem:[%s15947_s14 + $0x78c] sm:$0xf0]  ;;  %v10297_v14 = vld [vmem:[%s15947_s14 + $0x460] sm:$0xf]  ;;  %v10570_v23 = vor.u32 %v14686_v11, %v10569_v10  ;;  %6656 = vmatpush.bf16.msrb.mxu0 %v10314_v16 }
  0x67   : > { %v14618_v15 = vld [vmem:[%s15947_s14 + $0x46c] sm:$0xf0]  ;;  %v10425_v17 = vld [vmem:[%s15947_s14 + $0x560] sm:$0xf]  ;;  %v10698_v26 = vor.u32 %v14718_v13, %v10697_v12  ;;  %6669 = vmatpush.bf16.msrb.mxu1 %v10442_v22 }
  0x68   : > { %v14650_v18 = vld [vmem:[%s15947_s14 + $0x56c] sm:$0xf0]  ;;  %v10553_v19 = vld [vmem:[%s15947_s14 + $0x660] sm:$0xf]  ;;  %v10298_v35 = vor.u32 %v14618_v15, %v10297_v14  ;;  %6682 = vmatpush.bf16.msrb.mxu2 %v10570_v23 }
  0x69   : > { %v14682_v20 = vld [vmem:[%s15947_s14 + $0x66c] sm:$0xf0]  ;;  %v337_v21 = vld [vmem:[%s15962_s16 + $0x10] sm:$0xff]  ;;  %v357_v29 = vld.sshfl [vmem:[#allocation1 + $0x18] sm:$0xff pattern:$0x73625140]  ;;  %v10426_v36 = vor.u32 %v14650_v18, %v10425_v17  ;;  %6695 = vmatpush.bf16.msrb.mxu3 %v10698_v26 }
  0x6a   : > { %v356_v24 = vld.sshfl [vmem:[#allocation1 + $0x10] sm:$0xff pattern:$0x73625140]  ;;  %v354_v25 = vld.sshfl [vmem:[#allocation1] sm:$0xff pattern:$0x73625140]  ;;  %v16090_v33 = vpack.c.bf16 %v357_v29, %v357_v29  ;;  %v10554_v37 = vor.u32 %v14682_v20, %v10553_v19  ;;  %6657 = vmatpush.bf16.msrb.mxu0 %v10298_v35 }
  0x6b   : > { %v16084_v27 = vpack.c.bf16 %v356_v24, %v356_v24  ;;  %v16086_v28 = vpack.c.bf16 %v354_v25, %v354_v25  ;;  %v355_v30 = vld.sshfl [vmem:[#allocation1 + $0x8] sm:$0xff pattern:$0x73625140]  ;;  %v10681_v31 = vld [vmem:[%s15947_s14 + $0x760] sm:$0xf]  ;;  %6670 = vmatpush.bf16.msrb.mxu1 %v10426_v36 }
  0x6c   : > { %v14714_v32 = vld [vmem:[%s15947_s14 + $0x76c] sm:$0xf0]  ;;  %362 = vst [vmem:[#allocation1] ss:$4 sm:$0xff] %v337_v21  ;;  %v16092_v34 = vpack.c.bf16 %v355_v30, %v355_v30  ;;  %v10281_v38 = vld [vmem:[%s15947_s14 + $0x440] sm:$0xf]  ;;  %6648 = vmatmul.bf16.vlgmr.msra.gmra.mxu3 %v16090_v33  ;;  %6683 = vmatpush.bf16.msrb.mxu2 %v10554_v37 }
  0x6d   : > { %6635 = vmatmul.bf16.vlgmr.msra.gmra.mxu2 %v16084_v27  ;;  %v14614_v39 = vld [vmem:[%s15947_s14 + $0x44c] sm:$0xf0]  ;;  %v10409_v40 = vld [vmem:[%s15947_s14 + $0x540] sm:$0xf]  ;;  %v10682_v41 = vor.u32 %v14714_v32, %v10681_v31  ;;  %6609 = vmatmul.bf16.vlgmr.msra.gmra.mxu0 %v16086_v28  ;;  %v338_v21 = vld [vmem:[%s15962_s16 + $0x18] sm:$0xff] }
  0x6e   : > { %v14646_v42 = vld [vmem:[%s15947_s14 + $0x54c] sm:$0xf0]  ;;  %v10537_v43 = vld [vmem:[%s15947_s14 + $0x640] sm:$0xf]  ;;  %6622 = vmatmul.bf16.vlgmr.msra.gmra.mxu1 %v16092_v34  ;;  %v10282_v47 = vor.u32 %v14614_v39, %v10281_v38 }
  0x6f   : > { %v14678_v44 = vld [vmem:[%s15947_s14 + $0x64c] sm:$0xf0]  ;;  %v10665_v45 = vld [vmem:[%s15947_s14 + $0x740] sm:$0xf]  ;;  %v10410_v50 = vor.u32 %v14646_v42, %v10409_v40  ;;  %6696 = vmatpush.bf16.msrb.mxu3 %v10682_v41 }
  0x70   : > { %v14710_v46 = vld [vmem:[%s15947_s14 + $0x74c] sm:$0xf0]  ;;  %v10265_v48 = vld [vmem:[%s15947_s14 + $0x420] sm:$0xf]  ;;  %v10538_v51 = vor.u32 %v14678_v44, %v10537_v43  ;;  %6658 = vmatpush.bf16.msrb.mxu0 %v10282_v47 }
  0x71   : > { %v14610_v49 = vld [vmem:[%s15947_s14 + $0x42c] sm:$0xf0]  ;;  %v10393_v52 = vld [vmem:[%s15947_s14 + $0x520] sm:$0xf]  ;;  %v10666_v55 = vor.u32 %v14710_v46, %v10665_v45  ;;  %6671 = vmatpush.bf16.msrb.mxu1 %v10410_v50 }
  0x72   : > { %v14642_v53 = vld [vmem:[%s15947_s14 + $0x52c] sm:$0xf0]  ;;  %v10521_v54 = vld [vmem:[%s15947_s14 + $0x620] sm:$0xf]  ;;  %v10266_v61 = vor.u32 %v14610_v49, %v10265_v48  ;;  %6684 = vmatpush.bf16.msrb.mxu2 %v10538_v51 }
  0x73   : > { %v14674_v56 = vld [vmem:[%s15947_s14 + $0x62c] sm:$0xf0]  ;;  %v10649_v57 = vld [vmem:[%s15947_s14 + $0x720] sm:$0xf]  ;;  %v10394_v1 = vor.u32 %v14642_v53, %v10393_v52  ;;  %6697 = vmatpush.bf16.msrb.mxu3 %v10666_v55 }
  0x74   : > { %v14706_v59 = vld [vmem:[%s15947_s14 + $0x72c] sm:$0xf0]  ;;  %v10249_v60 = vld [vmem:[%s15947_s14 + $0x400] sm:$0xf]  ;;  %v10522_v2 = vor.u32 %v14674_v56, %v10521_v54  ;;  %6659 = vmatpush.bf16.msrb.mxu0 %v10266_v61 }
  0x75   : > { %v14606_v62 = vld [vmem:[%s15947_s14 + $0x40c] sm:$0xf0]  ;;  %v10377_v63 = vld [vmem:[%s15947_s14 + $0x500] sm:$0xf]  ;;  %v10650_v6 = vor.u32 %v14706_v59, %v10649_v57  ;;  %6672 = vmatpush.bf16.msrb.mxu1 %v10394_v1 }
  0x76   : > { %v14638_v0 = vld [vmem:[%s15947_s14 + $0x50c] sm:$0xf0]  ;;  %v10505_v3 = vld [vmem:[%s15947_s14 + $0x600] sm:$0xf]  ;;  %v10250_v13 = vor.u32 %v14606_v62, %v10249_v60  ;;  %6685 = vmatpush.bf16.msrb.mxu2 %v10522_v2 }
  0x77   : > { %v14670_v4 = vld [vmem:[%s15947_s14 + $0x60c] sm:$0xf0]  ;;  %v10633_v5 = vld [vmem:[%s15947_s14 + $0x700] sm:$0xf]  ;;  %v10378_v17 = vor.u32 %v14638_v0, %v10377_v63  ;;  %6698 = vmatpush.bf16.msrb.mxu3 %v10650_v6 }
  0x78   : > { %v14702_v7 = vld [vmem:[%s15947_s14 + $0x70c] sm:$0xf0]  ;;  %v10873_v8 = vld [vmem:[%s15947_s14 + $0x8e0] sm:$0xf]  ;;  %v10506_v18 = vor.u32 %v14670_v4, %v10505_v3  ;;  %6660 = vmatpush.bf16.msrb.mxu0 %v10250_v13 }
  0x79   : > { %v14762_v9 = vld [vmem:[%s15947_s14 + $0x8ec] sm:$0xf0]  ;;  %v11001_v10 = vld [vmem:[%s15947_s14 + $0x9e0] sm:$0xf]  ;;  %v10634_v22 = vor.u32 %v14702_v7, %v10633_v5  ;;  %6673 = vmatpush.bf16.msrb.mxu1 %v10378_v17 }
  0x7a   : > { %v14794_v11 = vld [vmem:[%s15947_s14 + $0x9ec] sm:$0xf0]  ;;  %v11129_v12 = vld [vmem:[%s15947_s14 + $0xae0] sm:$0xf]  ;;  %v10874_v23 = vor.u32 %v14762_v9, %v10873_v8  ;;  %6686 = vmatpush.bf16.msrb.mxu2 %v10506_v18 }
  0x7b   : > { %v14826_v14 = vld [vmem:[%s15947_s14 + $0xaec] sm:$0xf0]  ;;  %v11257_v15 = vld [vmem:[%s15947_s14 + $0xbe0] sm:$0xf]  ;;  %v11002_v30 = vor.u32 %v14794_v11, %v11001_v10  ;;  %6699 = vmatpush.bf16.msrb.mxu3 %v10634_v22 }
  0x7c   : > { %v14858_v16 = vld [vmem:[%s15947_s14 + $0xbec] sm:$0xf0]  ;;  %v10857_v19 = vld [vmem:[%s15947_s14 + $0x8c0] sm:$0xf]  ;;  %v11130_v31 = vor.u32 %v14826_v14, %v11129_v12  ;;  %6705 = vmatpush.bf16.msra.mxu0 %v10874_v23 }
  0x7d   : > { %v14758_v20 = vld [vmem:[%s15947_s14 + $0x8cc] sm:$0xf0]  ;;  %v10985_v24 = vld [vmem:[%s15947_s14 + $0x9c0] sm:$0xf]  ;;  %v11258_v36 = vor.u32 %v14858_v16, %v11257_v15  ;;  %6718 = vmatpush.bf16.msra.mxu1 %v11002_v30 }
  0x7e   : > { %v14790_v25 = vld [vmem:[%s15947_s14 + $0x9cc] sm:$0xf0]  ;;  %v360_v26 = vld.sshfl [vmem:[#allocation1 + $0x30] sm:$0xff pattern:$0x73625140]  ;;  %v10858_v44 = vor.u32 %v14758_v20, %v10857_v19  ;;  %6731 = vmatpush.bf16.msra.mxu2 %v11130_v31 }
  0x7f   : > { %v358_v29 = vld.sshfl [vmem:[#allocation1 + $0x20] sm:$0xff pattern:$0x73625140]  ;;  %v361_v32 = vld.sshfl [vmem:[#allocation1 + $0x38] sm:$0xff pattern:$0x73625140]  ;;  %v16138_v39 = vpack.c.bf16 %v360_v26, %v360_v26  ;;  %v10986_v46 = vor.u32 %v14790_v25, %v10985_v24  ;;  %6744 = vmatpush.bf16.msra.mxu3 %v11258_v36 }
  0x80   : > { %v359_v35 = vld.sshfl [vmem:[#allocation1 + $0x28] sm:$0xff pattern:$0x73625140]  ;;  %v11113_v37 = vld [vmem:[%s15947_s14 + $0xac0] sm:$0xf]  ;;  %v16142_v42 = vpack.c.bf16 %v358_v29, %v358_v29  ;;  %v16144_v43 = vpack.c.bf16 %v361_v32, %v361_v32  ;;  %6706 = vmatpush.bf16.msra.mxu0 %v10858_v44  ;;  %v339_v17 = vld [vmem:[%s15962_s16 + $0x20] sm:$0xff] }
  0x81   : > { %v14822_v38 = vld [vmem:[%s15947_s14 + $0xacc] sm:$0xf0]  ;;  %363 = vst [vmem:[#allocation1 + $0x20] ss:$4 sm:$0xff] %v338_v21  ;;  %v11241_v40 = vld [vmem:[%s15947_s14 + $0xbc0] sm:$0xf]  ;;  %v16146_v45 = vpack.c.bf16 %v359_v35, %v359_v35  ;;  %6687 = vmatmul.bf16.vlgmr.msrb.gmra.mxu2 %v16138_v39  ;;  %6719 = vmatpush.bf16.msra.mxu1 %v10986_v46 }
  0x82   : > { %v14854_v41 = vld [vmem:[%s15947_s14 + $0xbcc] sm:$0xf0]  ;;  %v11114_v47 = vor.u32 %v14822_v38, %v11113_v37  ;;  %v10841_v48 = vld [vmem:[%s15947_s14 + $0x8a0] sm:$0xf]  ;;  %6661 = vmatmul.bf16.vlgmr.msrb.gmra.mxu0 %v16142_v42  ;;  %6700 = vmatmul.bf16.vlgmr.msrb.gmra.mxu3 %v16144_v43 }
  0x83   : > { %v14754_v49 = vld [vmem:[%s15947_s14 + $0x8ac] sm:$0xf0]  ;;  %v10969_v50 = vld [vmem:[%s15947_s14 + $0x9a0] sm:$0xf]  ;;  %v11242_v51 = vor.u32 %v14854_v41, %v11241_v40  ;;  %6674 = vmatmul.bf16.vlgmr.msrb.gmra.mxu1 %v16146_v45 }
  0x84   : > { %v14786_v52 = vld [vmem:[%s15947_s14 + $0x9ac] sm:$0xf0]  ;;  %v11097_v53 = vld [vmem:[%s15947_s14 + $0xaa0] sm:$0xf]  ;;  %v10842_v57 = vor.u32 %v14754_v49, %v10841_v48  ;;  %6732 = vmatpush.bf16.msra.mxu2 %v11114_v47 }
  0x85   : > { %v14818_v54 = vld [vmem:[%s15947_s14 + $0xaac] sm:$0xf0]  ;;  %v11225_v55 = vld [vmem:[%s15947_s14 + $0xba0] sm:$0xf]  ;;  %v10970_v58 = vor.u32 %v14786_v52, %v10969_v50  ;;  %6745 = vmatpush.bf16.msra.mxu3 %v11242_v51 }
  0x86   : > { %v14850_v56 = vld [vmem:[%s15947_s14 + $0xbac] sm:$0xf0]  ;;  %v11098_v59 = vor.u32 %v14818_v54, %v11097_v53  ;;  %v10825_v60 = vld [vmem:[%s15947_s14 + $0x880] sm:$0xf]  ;;  %6707 = vmatpush.bf16.msra.mxu0 %v10842_v57 }
  0x87   : > { %v14750_v61 = vld [vmem:[%s15947_s14 + $0x88c] sm:$0xf0]  ;;  %v10953_v62 = vld [vmem:[%s15947_s14 + $0x980] sm:$0xf]  ;;  %v11226_v63 = vor.u32 %v14850_v56, %v11225_v55  ;;  %6720 = vmatpush.bf16.msra.mxu1 %v10970_v58 }
  0x88   : > { %v14782_v0 = vld [vmem:[%s15947_s14 + $0x98c] sm:$0xf0]  ;;  %v11081_v1 = vld [vmem:[%s15947_s14 + $0xa80] sm:$0xf]  ;;  %v10826_v5 = vor.u32 %v14750_v61, %v10825_v60  ;;  %6733 = vmatpush.bf16.msra.mxu2 %v11098_v59 }
  0x89   : > { %v14814_v2 = vld [vmem:[%s15947_s14 + $0xa8c] sm:$0xf0]  ;;  %v11209_v3 = vld [vmem:[%s15947_s14 + $0xb80] sm:$0xf]  ;;  %v10954_v9 = vor.u32 %v14782_v0, %v10953_v62  ;;  %6746 = vmatpush.bf16.msra.mxu3 %v11226_v63 }
  0x8a   : > { %v14846_v4 = vld [vmem:[%s15947_s14 + $0xb8c] sm:$0xf0]  ;;  %v10809_v6 = vld [vmem:[%s15947_s14 + $0x860] sm:$0xf]  ;;  %v11082_v10 = vor.u32 %v14814_v2, %v11081_v1  ;;  %6708 = vmatpush.bf16.msra.mxu0 %v10826_v5 }
  0x8b   : > { %v14746_v7 = vld [vmem:[%s15947_s14 + $0x86c] sm:$0xf0]  ;;  %v10937_v8 = vld [vmem:[%s15947_s14 + $0x960] sm:$0xf]  ;;  %v11210_v14 = vor.u32 %v14846_v4, %v11209_v3  ;;  %6721 = vmatpush.bf16.msra.mxu1 %v10954_v9 }
  0x8c   : > { %v14778_v11 = vld [vmem:[%s15947_s14 + $0x96c] sm:$0xf0]  ;;  %v11065_v12 = vld [vmem:[%s15947_s14 + $0xa60] sm:$0xf]  ;;  %v10810_v21 = vor.u32 %v14746_v7, %v10809_v6  ;;  %6734 = vmatpush.bf16.msra.mxu2 %v11082_v10 }
  0x8d   : > { %v14810_v13 = vld [vmem:[%s15947_s14 + $0xa6c] sm:$0xf0]  ;;  %v11193_v15 = vld [vmem:[%s15947_s14 + $0xb60] sm:$0xf]  ;;  %v10938_v24 = vor.u32 %v14778_v11, %v10937_v8  ;;  %6747 = vmatpush.bf16.msra.mxu3 %v11210_v14 }
  0x8e   : > { %v14842_v16 = vld [vmem:[%s15947_s14 + $0xb6c] sm:$0xf0]  ;;  %v10793_v18 = vld [vmem:[%s15947_s14 + $0x840] sm:$0xf]  ;;  %v11066_v25 = vor.u32 %v14810_v13, %v11065_v12  ;;  %6709 = vmatpush.bf16.msra.mxu0 %v10810_v21 }
  0x8f   : > { %v16178_v19 = vld.sshfl [vmem:[#allocation1] sm:$0xff pattern:$0x73625140]  ;;  %v16180_v20 = vld.sshfl [vmem:[#allocation1 + $0x10] sm:$0xff pattern:$0x73625140]  ;;  %v11194_v30 = vor.u32 %v14842_v16, %v11193_v15  ;;  %6722 = vmatpush.bf16.msra.mxu1 %v10938_v24 }
  0x90   : > { %v16182_v22 = vld.sshfl [vmem:[#allocation1 + $0x8] sm:$0xff pattern:$0x73625140]  ;;  %v16184_v23 = vld.sshfl [vmem:[#allocation1 + $0x18] sm:$0xff pattern:$0x73625140]  ;;  %6735 = vmatpush.bf16.msra.mxu2 %v11066_v25  ;;  %v16222_v25 = vpack.c.bf16 %v16178_v19, %v16178_v19 }
  0x91   : > { %v14742_v26 = vld [vmem:[%s15947_s14 + $0x84c] sm:$0xf0]  ;;  %v10921_v29 = vld [vmem:[%s15947_s14 + $0x940] sm:$0xf]  ;;  %372 = vst [vmem:[#allocation1] ss:$4 sm:$0xff] %v339_v17  ;;  %6748 = vmatpush.bf16.msra.mxu3 %v11194_v30  ;;  %v16239_v19 = vpack.c.bf16 %v16184_v23, %v16184_v23 }
  0x92   : > { %v14774_v31 = vld [vmem:[%s15947_s14 + $0x94c] sm:$0xf0]  ;;  %v11049_v32 = vld [vmem:[%s15947_s14 + $0xa40] sm:$0xf]  ;;  %v10794_v38 = vor.u32 %v14742_v26, %v10793_v18 }
  0x93   : > { %v14806_v35 = vld [vmem:[%s15947_s14 + $0xa4c] sm:$0xf0]  ;;  %v11177_v36 = vld [vmem:[%s15947_s14 + $0xb40] sm:$0xf]  ;;  %v10922_v40 = vor.u32 %v14774_v31, %v10921_v29  ;;  %v16229_v31 = vpack.c.bf16 %v16180_v20, %v16180_v20 }
  0x94   : > { %v14838_v37 = vld [vmem:[%s15947_s14 + $0xb4c] sm:$0xf0]  ;;  %v11050_v41 = vor.u32 %v14806_v35, %v11049_v32  ;;  %v10777_v44 = vld [vmem:[%s15947_s14 + $0x820] sm:$0xf]  ;;  %6710 = vmatpush.bf16.msra.mxu0 %v10794_v38  ;;  %v16233_v32 = vpack.c.bf16 %v16182_v22, %v16182_v22 }
  0x95   : > { %v14738_v46 = vld [vmem:[%s15947_s14 + $0x82c] sm:$0xf0]  ;;  %v10905_v47 = vld [vmem:[%s15947_s14 + $0x920] sm:$0xf]  ;;  %v11178_v48 = vor.u32 %v14838_v37, %v11177_v36  ;;  %6723 = vmatpush.bf16.msra.mxu1 %v10922_v40 }
  0x96   : > { %v14770_v49 = vld [vmem:[%s15947_s14 + $0x92c] sm:$0xf0]  ;;  %v11033_v50 = vld [vmem:[%s15947_s14 + $0xa20] sm:$0xf]  ;;  %v10778_v54 = vor.u32 %v14738_v46, %v10777_v44  ;;  %6736 = vmatpush.bf16.msra.mxu2 %v11050_v41 }
  0x97   : > { %v14802_v51 = vld [vmem:[%s15947_s14 + $0xa2c] sm:$0xf0]  ;;  %v11161_v52 = vld [vmem:[%s15947_s14 + $0xb20] sm:$0xf]  ;;  %v10906_v57 = vor.u32 %v14770_v49, %v10905_v47  ;;  %6749 = vmatpush.bf16.msra.mxu3 %v11178_v48 }
  0x98   : > { %v14834_v53 = vld [vmem:[%s15947_s14 + $0xb2c] sm:$0xf0]  ;;  %v10761_v55 = vld [vmem:[%s15947_s14 + $0x800] sm:$0xf]  ;;  %v11034_v58 = vor.u32 %v14802_v51, %v11033_v50  ;;  %6711 = vmatpush.bf16.msra.mxu0 %v10778_v54 }
  0x99   : > { %v14734_v56 = vld [vmem:[%s15947_s14 + $0x80c] sm:$0xf0]  ;;  %v10889_v59 = vld [vmem:[%s15947_s14 + $0x900] sm:$0xf]  ;;  %v11162_v62 = vor.u32 %v14834_v53, %v11161_v52  ;;  %6724 = vmatpush.bf16.msra.mxu1 %v10906_v57  ;;  %v340_v57 = vld [vmem:[%s15962_s16 + $0x28] sm:$0xff] }
  0x9a   : > { %v14766_v60 = vld [vmem:[%s15947_s14 + $0x90c] sm:$0xf0]  ;;  %v11017_v61 = vld [vmem:[%s15947_s14 + $0xa00] sm:$0xf]  ;;  %v10762_v5 = vor.u32 %v14734_v56, %v10761_v55  ;;  %6737 = vmatpush.bf16.msra.mxu2 %v11034_v58 }
  0x9b   : > { %v14798_v63 = vld [vmem:[%s15947_s14 + $0xa0c] sm:$0xf0]  ;;  %v11145_v0 = vld [vmem:[%s15947_s14 + $0xb00] sm:$0xf]  ;;  %v10890_v9 = vor.u32 %v14766_v60, %v10889_v59  ;;  %6750 = vmatpush.bf16.msra.mxu3 %v11162_v62 }
  0x9c   : > { %v14830_v1 = vld [vmem:[%s15947_s14 + $0xb0c] sm:$0xf0]  ;;  %v11385_v2 = vld [vmem:[%s15947_s14 + $0xce0] sm:$0xf]  ;;  %v11018_v10 = vor.u32 %v14798_v63, %v11017_v61  ;;  %6712 = vmatpush.bf16.msra.mxu0 %v10762_v5 }
  0x9d   : > { %v14890_v3 = vld [vmem:[%s15947_s14 + $0xcec] sm:$0xf0]  ;;  %v11513_v4 = vld [vmem:[%s15947_s14 + $0xde0] sm:$0xf]  ;;  %v11146_v13 = vor.u32 %v14830_v1, %v11145_v0  ;;  %6725 = vmatpush.bf16.msra.mxu1 %v10890_v9 }
  0x9e   : > { %v14922_v6 = vld [vmem:[%s15947_s14 + $0xdec] sm:$0xf0]  ;;  %v11641_v7 = vld [vmem:[%s15947_s14 + $0xee0] sm:$0xf]  ;;  %v11386_v14 = vor.u32 %v14890_v3, %v11385_v2  ;;  %6738 = vmatpush.bf16.msra.mxu2 %v11018_v10 }
  0x9f   : > { %v14954_v8 = vld [vmem:[%s15947_s14 + $0xeec] sm:$0xf0]  ;;  %v11769_v11 = vld [vmem:[%s15947_s14 + $0xfe0] sm:$0xf]  ;;  %v11514_v15 = vor.u32 %v14922_v6, %v11513_v4  ;;  %6751 = vmatpush.bf16.msra.mxu3 %v11146_v13  ;;  %6713 = vmatmul.bf16.vlgmr.msra.gmra.mxu0 %v16222_v25 }
  0xa0   : > { %v14986_v12 = vld [vmem:[%s15947_s14 + $0xfec] sm:$0xf0]  ;;  %v11642_v16 = vor.u32 %v14954_v8, %v11641_v7  ;;  %v11369_v17 = vld [vmem:[%s15947_s14 + $0xcc0] sm:$0xf]  ;;  %6757 = vmatpush.bf16.msrb.mxu0 %v11386_v14  ;;  %6726 = vmatmul.bf16.vlgmr.msra.gmra.mxu1 %v16233_v32 }
  0xa1   : > { %v14886_v18 = vld [vmem:[%s15947_s14 + $0xccc] sm:$0xf0]  ;;  %v11497_v21 = vld [vmem:[%s15947_s14 + $0xdc0] sm:$0xf]  ;;  %v11770_v24 = vor.u32 %v14986_v12, %v11769_v11  ;;  %6770 = vmatpush.bf16.msrb.mxu1 %v11514_v15  ;;  %6739 = vmatmul.bf16.vlgmr.msra.gmra.mxu2 %v16229_v31 }
  0xa2   : > { %v14918_v26 = vld [vmem:[%s15947_s14 + $0xdcc] sm:$0xf0]  ;;  %v11625_v29 = vld [vmem:[%s15947_s14 + $0xec0] sm:$0xf]  ;;  %v11370_v37 = vor.u32 %v14886_v18, %v11369_v17  ;;  %6783 = vmatpush.bf16.msrb.mxu2 %v11642_v16  ;;  %6752 = vmatmul.bf16.vlgmr.msra.gmra.mxu3 %v16239_v19 }
  0xa3   : > { %v14950_v30 = vld [vmem:[%s15947_s14 + $0xecc] sm:$0xf0]  ;;  %v11753_v35 = vld [vmem:[%s15947_s14 + $0xfc0] sm:$0xf]  ;;  %v11498_v20 = vor.u32 %v14918_v26, %v11497_v21  ;;  %6796 = vmatpush.bf16.msrb.mxu3 %v11770_v24 }
  0xa4   : > { %v14982_v36 = vld [vmem:[%s15947_s14 + $0xfcc] sm:$0xf0]  ;;  %v11353_v38 = vld [vmem:[%s15947_s14 + $0xca0] sm:$0xf]  ;;  %v11626_v22 = vor.u32 %v14950_v30, %v11625_v29  ;;  %6758 = vmatpush.bf16.msrb.mxu0 %v11370_v37 }
  0xa5   : > { %v14882_v40 = vld [vmem:[%s15947_s14 + $0xcac] sm:$0xf0]  ;;  %v11481_v41 = vld [vmem:[%s15947_s14 + $0xda0] sm:$0xf]  ;;  %v11754_v23 = vor.u32 %v14982_v36, %v11753_v35  ;;  %6771 = vmatpush.bf16.msrb.mxu1 %v11498_v20 }
  0xa6   : > { %v14914_v44 = vld [vmem:[%s15947_s14 + $0xdac] sm:$0xf0]  ;;  %v11609_v46 = vld [vmem:[%s15947_s14 + $0xea0] sm:$0xf]  ;;  %v11354_v52 = vor.u32 %v14882_v40, %v11353_v38  ;;  %6784 = vmatpush.bf16.msrb.mxu2 %v11626_v22 }
  0xa7   : > { %v14946_v47 = vld [vmem:[%s15947_s14 + $0xeac] sm:$0xf0]  ;;  %v11737_v48 = vld [vmem:[%s15947_s14 + $0xfa0] sm:$0xf]  ;;  %v11482_v58 = vor.u32 %v14914_v44, %v11481_v41  ;;  %6797 = vmatpush.bf16.msrb.mxu3 %v11754_v23 }
  0xa8   : > { %v14978_v49 = vld [vmem:[%s15947_s14 + $0xfac] sm:$0xf0]  ;;  %v11337_v50 = vld [vmem:[%s15947_s14 + $0xc80] sm:$0xf]  ;;  %v11610_v59 = vor.u32 %v14946_v47, %v11609_v46  ;;  %6759 = vmatpush.bf16.msrb.mxu0 %v11354_v52 }
  0xa9   : > { %v14878_v51 = vld [vmem:[%s15947_s14 + $0xc8c] sm:$0xf0]  ;;  %v11465_v53 = vld [vmem:[%s15947_s14 + $0xd80] sm:$0xf]  ;;  %v11738_v62 = vor.u32 %v14978_v49, %v11737_v48  ;;  %6772 = vmatpush.bf16.msrb.mxu1 %v11482_v58 }
  0xaa   : > { %v14910_v54 = vld [vmem:[%s15947_s14 + $0xd8c] sm:$0xf0]  ;;  %v11593_v55 = vld [vmem:[%s15947_s14 + $0xe80] sm:$0xf]  ;;  %v11338_v3 = vor.u32 %v14878_v51, %v11337_v50  ;;  %6785 = vmatpush.bf16.msrb.mxu2 %v11610_v59 }
  0xab   : > { %v14942_v56 = vld [vmem:[%s15947_s14 + $0xe8c] sm:$0xf0]  ;;  %v16262_v61 = vld.sshfl [vmem:[#allocation1 + $0x30] sm:$0xff pattern:$0x73625140]  ;;  %v11466_v4 = vor.u32 %v14910_v54, %v11465_v53  ;;  %6798 = vmatpush.bf16.msrb.mxu3 %v11738_v62 }
  0xac   : > { %v16260_v60 = vld.sshfl [vmem:[#allocation1 + $0x20] sm:$0xff pattern:$0x73625140]  ;;  %v16264_v63 = vld.sshfl [vmem:[#allocation1 + $0x28] sm:$0xff pattern:$0x73625140]  ;;  %v11594_v5 = vor.u32 %v14942_v56, %v11593_v55  ;;  %6760 = vmatpush.bf16.msrb.mxu0 %v11338_v3 }
  0xad   : > { %v16266_v0 = vld.sshfl [vmem:[#allocation1 + $0x38] sm:$0xff pattern:$0x73625140]  ;;  %v11721_v1 = vld [vmem:[%s15947_s14 + $0xf80] sm:$0xf]  ;;  %6773 = vmatpush.bf16.msrb.mxu1 %v11466_v4 }
  0xae   : > { %v14974_v2 = vld [vmem:[%s15947_s14 + $0xf8c] sm:$0xf0]  ;;  %373 = vst [vmem:[#allocation1 + $0x20] ss:$4 sm:$0xff] %v340_v57  ;;  %v11321_v6 = vld [vmem:[%s15947_s14 + $0xc60] sm:$0xf]  ;;  %6786 = vmatpush.bf16.msrb.mxu2 %v11594_v5 }
  0xaf   : > { %v14874_v7 = vld [vmem:[%s15947_s14 + $0xc6c] sm:$0xf0]  ;;  %v11449_v8 = vld [vmem:[%s15947_s14 + $0xd60] sm:$0xf]  ;;  %v11722_v9 = vor.u32 %v14974_v2, %v11721_v1 }
  0xb0   : > { %v14906_v10 = vld [vmem:[%s15947_s14 + $0xd6c] sm:$0xf0]  ;;  %v11577_v11 = vld [vmem:[%s15947_s14 + $0xe60] sm:$0xf]  ;;  %v11322_v15 = vor.u32 %v14874_v7, %v11321_v6 }
  0xb1   : > { %v14938_v12 = vld [vmem:[%s15947_s14 + $0xe6c] sm:$0xf0]  ;;  %v11705_v13 = vld [vmem:[%s15947_s14 + $0xf60] sm:$0xf]  ;;  %v11450_v16 = vor.u32 %v14906_v10, %v11449_v8  ;;  %6799 = vmatpush.bf16.msrb.mxu3 %v11722_v9 }
  0xb2   : > { %v14970_v14 = vld [vmem:[%s15947_s14 + $0xf6c] sm:$0xf0]  ;;  %v11578_v17 = vor.u32 %v14938_v12, %v11577_v11  ;;  %v11305_v18 = vld [vmem:[%s15947_s14 + $0xc40] sm:$0xf]  ;;  %6761 = vmatpush.bf16.msrb.mxu0 %v11322_v15 }
  0xb3   : > { %v14870_v21 = vld [vmem:[%s15947_s14 + $0xc4c] sm:$0xf0]  ;;  %v11433_v24 = vld [vmem:[%s15947_s14 + $0xd40] sm:$0xf]  ;;  %v11706_v26 = vor.u32 %v14970_v14, %v11705_v13  ;;  %6774 = vmatpush.bf16.msrb.mxu1 %v11450_v16 }
  0xb4   : > { %v14902_v29 = vld [vmem:[%s15947_s14 + $0xd4c] sm:$0xf0]  ;;  %v11561_v30 = vld [vmem:[%s15947_s14 + $0xe40] sm:$0xf]  ;;  %v11306_v38 = vor.u32 %v14870_v21, %v11305_v18  ;;  %6787 = vmatpush.bf16.msrb.mxu2 %v11578_v17 }
  0xb5   : > { %v14934_v35 = vld [vmem:[%s15947_s14 + $0xe4c] sm:$0xf0]  ;;  %v11689_v36 = vld [vmem:[%s15947_s14 + $0xf40] sm:$0xf]  ;;  %v11434_v20 = vor.u32 %v14902_v29, %v11433_v24  ;;  %6800 = vmatpush.bf16.msrb.mxu3 %v11706_v26  ;;  %v16315_v29 = vpack.c.bf16 %v16260_v60, %v16260_v60 }
  0xb6   : > { %v14966_v37 = vld [vmem:[%s15947_s14 + $0xf4c] sm:$0xf0]  ;;  %v11562_v22 = vor.u32 %v14934_v35, %v11561_v30  ;;  %v11289_v40 = vld [vmem:[%s15947_s14 + $0xc20] sm:$0xf]  ;;  %6762 = vmatpush.bf16.msrb.mxu0 %v11306_v38  ;;  %v16326_v38 = vpack.c.bf16 %v16264_v63, %v16264_v63 }
  0xb7   : > { %v14866_v41 = vld [vmem:[%s15947_s14 + $0xc2c] sm:$0xf0]  ;;  %v11417_v44 = vld [vmem:[%s15947_s14 + $0xd20] sm:$0xf]  ;;  %v11690_v23 = vor.u32 %v14966_v37, %v11689_v36  ;;  %6775 = vmatpush.bf16.msrb.mxu1 %v11434_v20  ;;  %v16322_v37 = vpack.c.bf16 %v16262_v61, %v16262_v61 }
  0xb8   : > { %v14898_v46 = vld [vmem:[%s15947_s14 + $0xd2c] sm:$0xf0]  ;;  %v11545_v47 = vld [vmem:[%s15947_s14 + $0xe20] sm:$0xf]  ;;  %v11290_v51 = vor.u32 %v14866_v41, %v11289_v40  ;;  %6788 = vmatpush.bf16.msrb.mxu2 %v11562_v22  ;;  %v16332_v22 = vpack.c.bf16 %v16266_v0, %v16266_v0 }
  0xb9   : > { %v14930_v48 = vld [vmem:[%s15947_s14 + $0xe2c] sm:$0xf0]  ;;  %v11673_v49 = vld [vmem:[%s15947_s14 + $0xf20] sm:$0xf]  ;;  %v11418_v54 = vor.u32 %v14898_v46, %v11417_v44  ;;  %6801 = vmatpush.bf16.msrb.mxu3 %v11690_v23 }
  0xba   : > { %v14962_v50 = vld [vmem:[%s15947_s14 + $0xf2c] sm:$0xf0]  ;;  %v11273_v52 = vld [vmem:[%s15947_s14 + $0xc00] sm:$0xf]  ;;  %v11546_v55 = vor.u32 %v14930_v48, %v11545_v47  ;;  %6763 = vmatpush.bf16.msrb.mxu0 %v11290_v51 }
  0xbb   : > { %v14862_v53 = vld [vmem:[%s15947_s14 + $0xc0c] sm:$0xf0]  ;;  %v11401_v56 = vld [vmem:[%s15947_s14 + $0xd00] sm:$0xf]  ;;  %v11674_v59 = vor.u32 %v14962_v50, %v11673_v49  ;;  %6776 = vmatpush.bf16.msrb.mxu1 %v11418_v54 }
  0xbc   : > { %v14894_v57 = vld [vmem:[%s15947_s14 + $0xd0c] sm:$0xf0]  ;;  %v11529_v58 = vld [vmem:[%s15947_s14 + $0xe00] sm:$0xf]  ;;  %v11274_v6 = vor.u32 %v14862_v53, %v11273_v52  ;;  %6789 = vmatpush.bf16.msrb.mxu2 %v11546_v55 }
  0xbd   : > { %v14926_v62 = vld [vmem:[%s15947_s14 + $0xe0c] sm:$0xf0]  ;;  %v11657_v1 = vld [vmem:[%s15947_s14 + $0xf00] sm:$0xf]  ;;  %v11402_v10 = vor.u32 %v14894_v57, %v11401_v56  ;;  %6802 = vmatpush.bf16.msrb.mxu3 %v11674_v59 }
  0xbe   : > { %v14958_v2 = vld [vmem:[%s15947_s14 + $0xf0c] sm:$0xf0]  ;;  %v11897_v3 = vld [vmem:[%s15947_s14 + $0x10e0] sm:$0xf]  ;;  %v11530_v11 = vor.u32 %v14926_v62, %v11529_v58  ;;  %6764 = vmatpush.bf16.msrb.mxu0 %v11274_v6 }
  0xbf   : > { %v15018_v4 = vld [vmem:[%s15947_s14 + $0x10ec] sm:$0xf0]  ;;  %v12025_v5 = vld [vmem:[%s15947_s14 + $0x11e0] sm:$0xf]  ;;  %v11658_v14 = vor.u32 %v14958_v2, %v11657_v1  ;;  %6777 = vmatpush.bf16.msrb.mxu1 %v11402_v10 }
  0xc0   : > { %v15050_v7 = vld [vmem:[%s15947_s14 + $0x11ec] sm:$0xf0]  ;;  %v12153_v8 = vld [vmem:[%s15947_s14 + $0x12e0] sm:$0xf]  ;;  %v11898_v15 = vor.u32 %v15018_v4, %v11897_v3  ;;  %6790 = vmatpush.bf16.msrb.mxu2 %v11530_v11 }
  0xc1   : > { %v15082_v9 = vld [vmem:[%s15947_s14 + $0x12ec] sm:$0xf0]  ;;  %v12281_v12 = vld [vmem:[%s15947_s14 + $0x13e0] sm:$0xf]  ;;  %v12026_v16 = vor.u32 %v15050_v7, %v12025_v5  ;;  %6803 = vmatpush.bf16.msrb.mxu3 %v11658_v14  ;;  %6765 = vmatmul.bf16.vlgmr.msrb.gmra.mxu0 %v16315_v29 }
  0xc2   : > { %v15114_v13 = vld [vmem:[%s15947_s14 + $0x13ec] sm:$0xf0]  ;;  %v12154_v17 = vor.u32 %v15082_v9, %v12153_v8  ;;  %v11881_v18 = vld [vmem:[%s15947_s14 + $0x10c0] sm:$0xf]  ;;  %6809 = vmatpush.bf16.msra.mxu0 %v11898_v15  ;;  %6778 = vmatmul.bf16.vlgmr.msrb.gmra.mxu1 %v16326_v38 }
  0xc3   : > { %v15014_v21 = vld [vmem:[%s15947_s14 + $0x10cc] sm:$0xf0]  ;;  %v12009_v24 = vld [vmem:[%s15947_s14 + $0x11c0] sm:$0xf]  ;;  %v12282_v26 = vor.u32 %v15114_v13, %v12281_v12  ;;  %6822 = vmatpush.bf16.msra.mxu1 %v12026_v16  ;;  %6791 = vmatmul.bf16.vlgmr.msrb.gmra.mxu2 %v16322_v37 }
  0xc4   : > { %v15046_v30 = vld [vmem:[%s15947_s14 + $0x11cc] sm:$0xf0]  ;;  %v12137_v35 = vld [vmem:[%s15947_s14 + $0x12c0] sm:$0xf]  ;;  %v11882_v40 = vor.u32 %v15014_v21, %v11881_v18  ;;  %6835 = vmatpush.bf16.msra.mxu2 %v12154_v17  ;;  %6804 = vmatmul.bf16.vlgmr.msrb.gmra.mxu3 %v16332_v22 }
  0xc5   : > { %v15078_v36 = vld [vmem:[%s15947_s14 + $0x12cc] sm:$0xf0]  ;;  %v12265_v20 = vld [vmem:[%s15947_s14 + $0x13c0] sm:$0xf]  ;;  %v12010_v61 = vor.u32 %v15046_v30, %v12009_v24  ;;  %6848 = vmatpush.bf16.msra.mxu3 %v12282_v26 }
  0xc6   : > { %v15110_v60 = vld [vmem:[%s15947_s14 + $0x13cc] sm:$0xf0]  ;;  %v12138_v41 = vor.u32 %v15078_v36, %v12137_v35  ;;  %v11865_v63 = vld [vmem:[%s15947_s14 + $0x10a0] sm:$0xf]  ;;  %6810 = vmatpush.bf16.msra.mxu0 %v11882_v40 }
  0xc7   : > { %v15010_v44 = vld [vmem:[%s15947_s14 + $0x10ac] sm:$0xf0]  ;;  %v11993_v23 = vld [vmem:[%s15947_s14 + $0x11a0] sm:$0xf]  ;;  %v12266_v46 = vor.u32 %v15110_v60, %v12265_v20  ;;  %6823 = vmatpush.bf16.msra.mxu1 %v12010_v61 }
  0xc8   : > { %v15042_v47 = vld [vmem:[%s15947_s14 + $0x11ac] sm:$0xf0]  ;;  %v12121_v0 = vld [vmem:[%s15947_s14 + $0x12a0] sm:$0xf]  ;;  %v11866_v51 = vor.u32 %v15010_v44, %v11865_v63  ;;  %6836 = vmatpush.bf16.msra.mxu2 %v12138_v41 }
  0xc9   : > { %v15074_v48 = vld [vmem:[%s15947_s14 + $0x12ac] sm:$0xf0]  ;;  %v12249_v49 = vld [vmem:[%s15947_s14 + $0x13a0] sm:$0xf]  ;;  %v11994_v52 = vor.u32 %v15042_v47, %v11993_v23  ;;  %6849 = vmatpush.bf16.msra.mxu3 %v12266_v46 }
  0xca   : > { %v15106_v50 = vld [vmem:[%s15947_s14 + $0x13ac] sm:$0xf0]  ;;  %v12122_v53 = vor.u32 %v15074_v48, %v12121_v0  ;;  %v11849_v54 = vld [vmem:[%s15947_s14 + $0x1080] sm:$0xf]  ;;  %6811 = vmatpush.bf16.msra.mxu0 %v11866_v51 }
  0xcb   : > { %v15006_v55 = vld [vmem:[%s15947_s14 + $0x108c] sm:$0xf0]  ;;  %v11977_v56 = vld [vmem:[%s15947_s14 + $0x1180] sm:$0xf]  ;;  %v12250_v57 = vor.u32 %v15106_v50, %v12249_v49  ;;  %6824 = vmatpush.bf16.msra.mxu1 %v11994_v52 }
  0xcc   : > { %v15038_v58 = vld [vmem:[%s15947_s14 + $0x118c] sm:$0xf0]  ;;  %v12105_v59 = vld [vmem:[%s15947_s14 + $0x1280] sm:$0xf]  ;;  %v11850_v3 = vor.u32 %v15006_v55, %v11849_v54  ;;  %6837 = vmatpush.bf16.msra.mxu2 %v12122_v53 }
  0xcd   : > { %v15070_v62 = vld [vmem:[%s15947_s14 + $0x128c] sm:$0xf0]  ;;  %v12233_v1 = vld [vmem:[%s15947_s14 + $0x1380] sm:$0xf]  ;;  %v11978_v4 = vor.u32 %v15038_v58, %v11977_v56  ;;  %6850 = vmatpush.bf16.msra.mxu3 %v12250_v57 }
  0xce   : > { %v15102_v2 = vld [vmem:[%s15947_s14 + $0x138c] sm:$0xf0]  ;;  %v12106_v5 = vor.u32 %v15070_v62, %v12105_v59  ;;  %v11833_v6 = vld [vmem:[%s15947_s14 + $0x1060] sm:$0xf]  ;;  %6812 = vmatpush.bf16.msra.mxu0 %v11850_v3 }
  0xcf   : > { %v15002_v7 = vld [vmem:[%s15947_s14 + $0x106c] sm:$0xf0]  ;;  %v11961_v8 = vld [vmem:[%s15947_s14 + $0x1160] sm:$0xf]  ;;  %v12234_v9 = vor.u32 %v15102_v2, %v12233_v1  ;;  %6825 = vmatpush.bf16.msra.mxu1 %v11978_v4 }
  0xd0   : > { %v15034_v10 = vld [vmem:[%s15947_s14 + $0x116c] sm:$0xf0]  ;;  %v12089_v11 = vld [vmem:[%s15947_s14 + $0x1260] sm:$0xf]  ;;  %v11834_v15 = vor.u32 %v15002_v7, %v11833_v6  ;;  %6838 = vmatpush.bf16.msra.mxu2 %v12106_v5 }
  0xd1   : > { %v15066_v12 = vld [vmem:[%s15947_s14 + $0x126c] sm:$0xf0]  ;;  %v12217_v13 = vld [vmem:[%s15947_s14 + $0x1360] sm:$0xf]  ;;  %v11962_v16 = vor.u32 %v15034_v10, %v11961_v8  ;;  %6851 = vmatpush.bf16.msra.mxu3 %v12234_v9 }
  0xd2   : > { %v15098_v14 = vld [vmem:[%s15947_s14 + $0x136c] sm:$0xf0]  ;;  %v12090_v17 = vor.u32 %v15066_v12, %v12089_v11  ;;  %v11817_v18 = vld [vmem:[%s15947_s14 + $0x1040] sm:$0xf]  ;;  %6813 = vmatpush.bf16.msra.mxu0 %v11834_v15 }
  0xd3   : > { %v14998_v21 = vld [vmem:[%s15947_s14 + $0x104c] sm:$0xf0]  ;;  %v11945_v24 = vld [vmem:[%s15947_s14 + $0x1140] sm:$0xf]  ;;  %v12218_v26 = vor.u32 %v15098_v14, %v12217_v13  ;;  %6826 = vmatpush.bf16.msra.mxu1 %v11962_v16 }
  0xd4   : > { %v15030_v30 = vld [vmem:[%s15947_s14 + $0x114c] sm:$0xf0]  ;;  %v12073_v35 = vld [vmem:[%s15947_s14 + $0x1240] sm:$0xf]  ;;  %v11818_v40 = vor.u32 %v14998_v21, %v11817_v18  ;;  %6839 = vmatpush.bf16.msra.mxu2 %v12090_v17 }
  0xd5   : > { %v15062_v36 = vld [vmem:[%s15947_s14 + $0x124c] sm:$0xf0]  ;;  %v12201_v20 = vld [vmem:[%s15947_s14 + $0x1340] sm:$0xf]  ;;  %v11946_v61 = vor.u32 %v15030_v30, %v11945_v24  ;;  %6852 = vmatpush.bf16.msra.mxu3 %v12218_v26 }
  0xd6   : > { %v15094_v60 = vld [vmem:[%s15947_s14 + $0x134c] sm:$0xf0]  ;;  %v12074_v41 = vor.u32 %v15062_v36, %v12073_v35  ;;  %v11801_v63 = vld [vmem:[%s15947_s14 + $0x1020] sm:$0xf]  ;;  %6814 = vmatpush.bf16.msra.mxu0 %v11818_v40 }
  0xd7   : > { %v14994_v44 = vld [vmem:[%s15947_s14 + $0x102c] sm:$0xf0]  ;;  %v11929_v23 = vld [vmem:[%s15947_s14 + $0x1120] sm:$0xf]  ;;  %v12202_v46 = vor.u32 %v15094_v60, %v12201_v20  ;;  %6827 = vmatpush.bf16.msra.mxu1 %v11946_v61 }
  0xd8   : > { %v15026_v47 = vld [vmem:[%s15947_s14 + $0x112c] sm:$0xf0]  ;;  %v12057_v0 = vld [vmem:[%s15947_s14 + $0x1220] sm:$0xf]  ;;  %v11802_v52 = vor.u32 %v14994_v44, %v11801_v63  ;;  %6840 = vmatpush.bf16.msra.mxu2 %v12074_v41 }
  0xd9   : > { %v15058_v48 = vld [vmem:[%s15947_s14 + $0x122c] sm:$0xf0]  ;;  %v12185_v49 = vld [vmem:[%s15947_s14 + $0x1320] sm:$0xf]  ;;  %v11930_v56 = vor.u32 %v15026_v47, %v11929_v23  ;;  %6853 = vmatpush.bf16.msra.mxu3 %v12202_v46 }
  0xda   : > { %v15090_v50 = vld [vmem:[%s15947_s14 + $0x132c] sm:$0xf0]  ;;  %v11785_v51 = vld [vmem:[%s15947_s14 + $0x1000] sm:$0xf]  ;;  %v12058_v57 = vor.u32 %v15058_v48, %v12057_v0  ;;  %6815 = vmatpush.bf16.msra.mxu0 %v11802_v52 }
  0xdb   : > { %v14990_v53 = vld [vmem:[%s15947_s14 + $0x100c] sm:$0xf0]  ;;  %v11913_v54 = vld [vmem:[%s15947_s14 + $0x1100] sm:$0xf]  ;;  %v12186_v1 = vor.u32 %v15090_v50, %v12185_v49  ;;  %6828 = vmatpush.bf16.msra.mxu1 %v11930_v56 }
  0xdc   : > { %v15022_v55 = vld [vmem:[%s15947_s14 + $0x110c] sm:$0xf0]  ;;  %v12041_v58 = vld [vmem:[%s15947_s14 + $0x1200] sm:$0xf]  ;;  %v11786_v8 = vor.u32 %v14990_v53, %v11785_v51  ;;  %6841 = vmatpush.bf16.msra.mxu2 %v12058_v57 }
  0xdd   : > { %v15054_v59 = vld [vmem:[%s15947_s14 + $0x120c] sm:$0xf0]  ;;  %v12169_v62 = vld [vmem:[%s15947_s14 + $0x1300] sm:$0xf]  ;;  %v11914_v12 = vor.u32 %v15022_v55, %v11913_v54  ;;  %6854 = vmatpush.bf16.msra.mxu3 %v12186_v1 }
  0xde   : > { %v15086_v2 = vld [vmem:[%s15947_s14 + $0x130c] sm:$0xf0]  ;;  %v12409_v3 = vld [vmem:[%s15947_s14 + $0x14e0] sm:$0xf]  ;;  %v12042_v13 = vor.u32 %v15054_v59, %v12041_v58  ;;  %6816 = vmatpush.bf16.msra.mxu0 %v11786_v8 }
  0xdf   : > { %v15146_v4 = vld [vmem:[%s15947_s14 + $0x14ec] sm:$0xf0]  ;;  %v12537_v5 = vld [vmem:[%s15947_s14 + $0x15e0] sm:$0xf]  ;;  %v12170_v16 = vor.u32 %v15086_v2, %v12169_v62  ;;  %6829 = vmatpush.bf16.msra.mxu1 %v11914_v12 }
  0xe0   : > { %v15178_v6 = vld [vmem:[%s15947_s14 + $0x15ec] sm:$0xf0]  ;;  %v12665_v7 = vld [vmem:[%s15947_s14 + $0x16e0] sm:$0xf]  ;;  %v12410_v17 = vor.u32 %v15146_v4, %v12409_v3  ;;  %6842 = vmatpush.bf16.msra.mxu2 %v12042_v13 }
  0xe1   : > { %v15210_v9 = vld [vmem:[%s15947_s14 + $0x16ec] sm:$0xf0]  ;;  %v12793_v10 = vld [vmem:[%s15947_s14 + $0x17e0] sm:$0xf]  ;;  %v12538_v24 = vor.u32 %v15178_v6, %v12537_v5  ;;  %6855 = vmatpush.bf16.msra.mxu3 %v12170_v16 }
  0xe2   : > { %v15242_v11 = vld [vmem:[%s15947_s14 + $0x17ec] sm:$0xf0]  ;;  %v376_v15 = vld.sshfl [vmem:[#allocation1 + $0x10] sm:$0xff pattern:$0x73625140]  ;;  %v12666_v26 = vor.u32 %v15210_v9, %v12665_v7  ;;  %6861 = vmatpush.bf16.msrb.mxu0 %v12410_v17 }
  0xe3   : > { %v374_v14 = vld.sshfl [vmem:[#allocation1] sm:$0xff pattern:$0x73625140]  ;;  %v375_v18 = vld.sshfl [vmem:[#allocation1 + $0x8] sm:$0xff pattern:$0x73625140]  ;;  %v12794_v20 = vor.u32 %v15242_v11, %v12793_v10  ;;  %v16402_v63 = vpack.c.bf16 %v376_v15, %v376_v15  ;;  %6874 = vmatpush.bf16.msrb.mxu1 %v12538_v24 }
  0xe4   : > { %v377_v21 = vld.sshfl [vmem:[#allocation1 + $0x18] sm:$0xff pattern:$0x73625140]  ;;  %v12393_v30 = vld [vmem:[%s15947_s14 + $0x14c0] sm:$0xf]  ;;  %v16397_v60 = vpack.c.bf16 %v374_v14, %v374_v14  ;;  %v16404_v44 = vpack.c.bf16 %v375_v18, %v375_v18  ;;  %6887 = vmatpush.bf16.msrb.mxu2 %v12666_v26 }
  0xe5   : > { %v15142_v35 = vld [vmem:[%s15947_s14 + $0x14cc] sm:$0xf0]  ;;  %v12521_v36 = vld [vmem:[%s15947_s14 + $0x15c0] sm:$0xf]  ;;  %v16408_v47 = vpack.c.bf16 %v377_v21, %v377_v21  ;;  %6900 = vmatpush.bf16.msrb.mxu3 %v12794_v20  ;;  %6843 = vmatmul.bf16.vlgmr.msra.gmra.mxu2 %v16402_v63 }
  0xe6   : > { %v15174_v40 = vld [vmem:[%s15947_s14 + $0x15cc] sm:$0xf0]  ;;  %v12649_v61 = vld [vmem:[%s15947_s14 + $0x16c0] sm:$0xf]  ;;  %v12394_v0 = vor.u32 %v15142_v35, %v12393_v30  ;;  %6817 = vmatmul.bf16.vlgmr.msra.gmra.mxu0 %v16397_v60  ;;  %6830 = vmatmul.bf16.vlgmr.msra.gmra.mxu1 %v16404_v44 }
  0xe7   : > { %v15206_v41 = vld [vmem:[%s15947_s14 + $0x16cc] sm:$0xf0]  ;;  %v12777_v23 = vld [vmem:[%s15947_s14 + $0x17c0] sm:$0xf]  ;;  %v12522_v48 = vor.u32 %v15174_v40, %v12521_v36  ;;  %6856 = vmatmul.bf16.vlgmr.msra.gmra.mxu3 %v16408_v47 }
  0xe8   : > { %v15238_v46 = vld [vmem:[%s15947_s14 + $0x17cc] sm:$0xf0]  ;;  %v12650_v49 = vor.u32 %v15206_v41, %v12649_v61  ;;  %v12377_v50 = vld [vmem:[%s15947_s14 + $0x14a0] sm:$0xf]  ;;  %6862 = vmatpush.bf16.msrb.mxu0 %v12394_v0 }
  0xe9   : > { %v15138_v51 = vld [vmem:[%s15947_s14 + $0x14ac] sm:$0xf0]  ;;  %v12505_v52 = vld [vmem:[%s15947_s14 + $0x15a0] sm:$0xf]  ;;  %v12778_v53 = vor.u32 %v15238_v46, %v12777_v23  ;;  %6875 = vmatpush.bf16.msrb.mxu1 %v12522_v48 }
  0xea   : > { %v15170_v54 = vld [vmem:[%s15947_s14 + $0x15ac] sm:$0xf0]  ;;  %v12633_v55 = vld [vmem:[%s15947_s14 + $0x16a0] sm:$0xf]  ;;  %v12378_v59 = vor.u32 %v15138_v51, %v12377_v50  ;;  %6888 = vmatpush.bf16.msrb.mxu2 %v12650_v49 }
  0xeb   : > { %v15202_v56 = vld [vmem:[%s15947_s14 + $0x16ac] sm:$0xf0]  ;;  %v12761_v57 = vld [vmem:[%s15947_s14 + $0x17a0] sm:$0xf]  ;;  %v12506_v62 = vor.u32 %v15170_v54, %v12505_v52  ;;  %6901 = vmatpush.bf16.msrb.mxu3 %v12778_v53 }
  0xec   : > { %v15234_v58 = vld [vmem:[%s15947_s14 + $0x17ac] sm:$0xf0]  ;;  %v12634_v1 = vor.u32 %v15202_v56, %v12633_v55  ;;  %v12361_v2 = vld [vmem:[%s15947_s14 + $0x1480] sm:$0xf]  ;;  %6863 = vmatpush.bf16.msrb.mxu0 %v12378_v59 }
  0xed   : > { %v15134_v3 = vld [vmem:[%s15947_s14 + $0x148c] sm:$0xf0]  ;;  %v12489_v4 = vld [vmem:[%s15947_s14 + $0x1580] sm:$0xf]  ;;  %v12762_v5 = vor.u32 %v15234_v58, %v12761_v57  ;;  %6876 = vmatpush.bf16.msrb.mxu1 %v12506_v62 }
  0xee   : > { %v15166_v6 = vld [vmem:[%s15947_s14 + $0x158c] sm:$0xf0]  ;;  %v12617_v7 = vld [vmem:[%s15947_s14 + $0x1680] sm:$0xf]  ;;  %v12362_v11 = vor.u32 %v15134_v3, %v12361_v2  ;;  %6889 = vmatpush.bf16.msrb.mxu2 %v12634_v1 }
  0xef   : > { %v15198_v8 = vld [vmem:[%s15947_s14 + $0x168c] sm:$0xf0]  ;;  %v12745_v9 = vld [vmem:[%s15947_s14 + $0x1780] sm:$0xf]  ;;  %v12490_v12 = vor.u32 %v15166_v6, %v12489_v4  ;;  %6902 = vmatpush.bf16.msrb.mxu3 %v12762_v5  ;;  %v6610_v5 = vpop.f32.mrf.mxu0 }
  0xf0   : > { %v15230_v10 = vld [vmem:[%s15947_s14 + $0x178c] sm:$0xf0]  ;;  %v12618_v13 = vor.u32 %v15198_v8, %v12617_v7  ;;  %v12345_v14 = vld [vmem:[%s15947_s14 + $0x1460] sm:$0xf]  ;;  %6864 = vmatpush.bf16.msrb.mxu0 %v12362_v11  ;;  %v6623_v11 = vpop.f32.mrf.mxu1 }
  0xf1   : > { %v15130_v15 = vld [vmem:[%s15947_s14 + $0x146c] sm:$0xf0]  ;;  %v12473_v16 = vld [vmem:[%s15947_s14 + $0x1560] sm:$0xf]  ;;  %v12746_v17 = vor.u32 %v15230_v10, %v12745_v9  ;;  %6877 = vmatpush.bf16.msrb.mxu1 %v12490_v12 }
  0xf2   : > { %v15162_v18 = vld [vmem:[%s15947_s14 + $0x156c] sm:$0xf0]  ;;  %v12601_v21 = vld [vmem:[%s15947_s14 + $0x1660] sm:$0xf]  ;;  %v12346_v35 = vor.u32 %v15130_v15, %v12345_v14  ;;  %6890 = vmatpush.bf16.msrb.mxu2 %v12618_v13 }
  0xf3   : > { %v15194_v24 = vld [vmem:[%s15947_s14 + $0x166c] sm:$0xf0]  ;;  %v12729_v26 = vld [vmem:[%s15947_s14 + $0x1760] sm:$0xf]  ;;  %v12474_v36 = vor.u32 %v15162_v18, %v12473_v16  ;;  %6903 = vmatpush.bf16.msrb.mxu3 %v12746_v17  ;;  %v6624_v17 = vadd.f32 %v6623_v11, %v6610_v5 }
  0xf4   : > { %v15226_v30 = vld [vmem:[%s15947_s14 + $0x176c] sm:$0xf0]  ;;  %v12602_v20 = vor.u32 %v15194_v24, %v12601_v21  ;;  %v12329_v40 = vld [vmem:[%s15947_s14 + $0x1440] sm:$0xf]  ;;  %6865 = vmatpush.bf16.msrb.mxu0 %v12346_v35 }
  0xf5   : > { %v15126_v61 = vld [vmem:[%s15947_s14 + $0x144c] sm:$0xf0]  ;;  %v12457_v41 = vld [vmem:[%s15947_s14 + $0x1540] sm:$0xf]  ;;  %v12730_v23 = vor.u32 %v15226_v30, %v12729_v26  ;;  %6878 = vmatpush.bf16.msrb.mxu1 %v12474_v36  ;;  %v6636_v36 = vpop.f32.mrf.mxu2 }
  0xf6   : > { %v15158_v46 = vld [vmem:[%s15947_s14 + $0x154c] sm:$0xf0]  ;;  %v12585_v0 = vld [vmem:[%s15947_s14 + $0x1640] sm:$0xf]  ;;  %v12330_v51 = vor.u32 %v15126_v61, %v12329_v40  ;;  %6891 = vmatpush.bf16.msrb.mxu2 %v12602_v20 }
  0xf7   : > { %v15190_v48 = vld [vmem:[%s15947_s14 + $0x164c] sm:$0xf0]  ;;  %v12713_v49 = vld [vmem:[%s15947_s14 + $0x1740] sm:$0xf]  ;;  %v12458_v53 = vor.u32 %v15158_v46, %v12457_v41  ;;  %6904 = vmatpush.bf16.msrb.mxu3 %v12730_v23  ;;  %v6637_v23 = vadd.f32 %v6636_v36, %v6624_v17 }
  0xf8   : > { %v15222_v50 = vld [vmem:[%s15947_s14 + $0x174c] sm:$0xf0]  ;;  %v12313_v52 = vld [vmem:[%s15947_s14 + $0x1420] sm:$0xf]  ;;  %v12586_v54 = vor.u32 %v15190_v48, %v12585_v0  ;;  %6866 = vmatpush.bf16.msrb.mxu0 %v12330_v51 }
  0xf9   : > { %v15122_v55 = vld [vmem:[%s15947_s14 + $0x142c] sm:$0xf0]  ;;  %v12441_v56 = vld [vmem:[%s15947_s14 + $0x1520] sm:$0xf]  ;;  %v12714_v58 = vor.u32 %v15222_v50, %v12713_v49  ;;  %6879 = vmatpush.bf16.msrb.mxu1 %v12458_v53 }
  0xfa   : > { %v15154_v57 = vld [vmem:[%s15947_s14 + $0x152c] sm:$0xf0]  ;;  %v12569_v59 = vld [vmem:[%s15947_s14 + $0x1620] sm:$0xf]  ;;  %v12314_v6 = vor.u32 %v15122_v55, %v12313_v52  ;;  %6892 = vmatpush.bf16.msrb.mxu2 %v12586_v54  ;;  %v6649_v54 = vpop.f32.mrf.mxu3 }
  0xfb   : > { %v15186_v62 = vld [vmem:[%s15947_s14 + $0x162c] sm:$0xf0]  ;;  %v12697_v1 = vld [vmem:[%s15947_s14 + $0x1720] sm:$0xf]  ;;  %v12442_v12 = vor.u32 %v15154_v57, %v12441_v56  ;;  %6905 = vmatpush.bf16.msrb.mxu3 %v12714_v58 }
  0xfc   : > { %v15218_v2 = vld [vmem:[%s15947_s14 + $0x172c] sm:$0xf0]  ;;  %v12297_v3 = vld [vmem:[%s15947_s14 + $0x1400] sm:$0xf]  ;;  %v12570_v13 = vor.u32 %v15186_v62, %v12569_v59  ;;  %6867 = vmatpush.bf16.msrb.mxu0 %v12314_v6  ;;  %v16474_v62 = vadd.f32 %v6649_v54, %v6637_v23 }
  0xfd   : > { %v15118_v4 = vld [vmem:[%s15947_s14 + $0x140c] sm:$0xf0]  ;;  %v12425_v7 = vld [vmem:[%s15947_s14 + $0x1500] sm:$0xf]  ;;  %v12698_v18 = vor.u32 %v15218_v2, %v12697_v1  ;;  %6880 = vmatpush.bf16.msrb.mxu1 %v12442_v12  ;;  %v6612_v1 = vpop.f32.mrf.mxu0 }
  0xfe   : > { %v15150_v8 = vld [vmem:[%s15947_s14 + $0x150c] sm:$0xf0]  ;;  %v12553_v9 = vld [vmem:[%s15947_s14 + $0x1600] sm:$0xf]  ;;  %v12298_v40 = vor.u32 %v15118_v4, %v12297_v3  ;;  %6893 = vmatpush.bf16.msrb.mxu2 %v12570_v13 }
  0xff   : > { %v15182_v10 = vld [vmem:[%s15947_s14 + $0x160c] sm:$0xf0]  ;;  %v12681_v14 = vld [vmem:[%s15947_s14 + $0x1700] sm:$0xf]  ;;  %v12426_v46 = vor.u32 %v15150_v8, %v12425_v7  ;;  %6906 = vmatpush.bf16.msrb.mxu3 %v12698_v18  ;;  %v6625_v7 = vpop.f32.mrf.mxu1 }
 0x100   : > { %v15214_v15 = vld [vmem:[%s15947_s14 + $0x170c] sm:$0xf0]  ;;  %v12921_v16 = vld [vmem:[%s15947_s14 + $0x18e0] sm:$0xf]  ;;  %v12554_v0 = vor.u32 %v15182_v10, %v12553_v9  ;;  %6868 = vmatpush.bf16.msrb.mxu0 %v12298_v40 }
 0x101   : > { %v15274_v21 = vld [vmem:[%s15947_s14 + $0x18ec] sm:$0xf0]  ;;  %v13049_v24 = vld [vmem:[%s15947_s14 + $0x19e0] sm:$0xf]  ;;  %v12682_v50 = vor.u32 %v15214_v15, %v12681_v14  ;;  %6881 = vmatpush.bf16.msrb.mxu1 %v12426_v46 }
 0x102   : > { %v15306_v26 = vld [vmem:[%s15947_s14 + $0x19ec] sm:$0xf0]  ;;  %v13177_v30 = vld [vmem:[%s15947_s14 + $0x1ae0] sm:$0xf]  ;;  %v12922_v51 = vor.u32 %v15274_v21, %v12921_v16  ;;  %6894 = vmatpush.bf16.msrb.mxu2 %v12554_v0  ;;  %v6638_v21 = vpop.f32.mrf.mxu2 }
 0x103   : > { %v15338_v35 = vld [vmem:[%s15947_s14 + $0x1aec] sm:$0xf0]  ;;  %v341_v20 = vld [vmem:[%s15962_s16 + $0x30] sm:$0xff]  ;;  %v379_v52 = vld.sshfl [vmem:[#allocation1 + $0x28] sm:$0xff pattern:$0x73625140]  ;;  %v13050_v55 = vor.u32 %v15306_v26, %v13049_v24  ;;  %6907 = vmatpush.bf16.msrb.mxu3 %v12682_v50 }
 0x104   : > { %v13305_v61 = vld [vmem:[%s15947_s14 + $0x1be0] sm:$0xf]  ;;  %v15370_v41 = vld [vmem:[%s15947_s14 + $0x1bec] sm:$0xf0]  ;;  %382 = vst [vmem:[#allocation1] ss:$4 sm:$0xff] %v341_v20  ;;  %v13178_v56 = vor.u32 %v15338_v35, %v13177_v30  ;;  %v16483_v9 = vpack.c.bf16 %v379_v52, %v379_v52  ;;  %6913 = vmatpush.bf16.msra.mxu0 %v12922_v51 }
 0x105   : > { %v378_v48 = vld.sshfl [vmem:[#allocation1 + $0x20] sm:$0xff pattern:$0x73625140]  ;;  %v380_v49 = vld.sshfl [vmem:[#allocation1 + $0x30] sm:$0xff pattern:$0x73625140]  ;;  %v13306_v2 = vor.u32 %v15370_v41, %v13305_v61  ;;  %6926 = vmatpush.bf16.msra.mxu1 %v13050_v55  ;;  %v6651_v61 = vpop.f32.mrf.mxu3 }
 0x106   : > { %v381_v53 = vld.sshfl [vmem:[#allocation1 + $0x38] sm:$0xff pattern:$0x73625140]  ;;  %v12905_v57 = vld [vmem:[%s15947_s14 + $0x18c0] sm:$0xf]  ;;  %v16476_v3 = vpack.c.bf16 %v378_v48, %v378_v48  ;;  %v16481_v8 = vpack.c.bf16 %v380_v49, %v380_v49  ;;  %6939 = vmatpush.bf16.msra.mxu2 %v13178_v56  ;;  %6882 = vmatmul.bf16.vlgmr.msrb.gmra.mxu1 %v16483_v9  ;;  %v6662_v56 = vpop.f32.mrf.mxu0 }
 0x107   : > { %v15270_v58 = vld [vmem:[%s15947_s14 + $0x18cc] sm:$0xf0]  ;;  %v13033_v59 = vld [vmem:[%s15947_s14 + $0x19c0] sm:$0xf]  ;;  %v16487_v12 = vpack.c.bf16 %v381_v53, %v381_v53  ;;  %6952 = vmatpush.bf16.msra.mxu3 %v13306_v2 }
 0x108   : > { %v15302_v4 = vld [vmem:[%s15947_s14 + $0x19cc] sm:$0xf0]  ;;  %v13161_v5 = vld [vmem:[%s15947_s14 + $0x1ac0] sm:$0xf]  ;;  %v12906_v13 = vor.u32 %v15270_v58, %v12905_v57  ;;  %6869 = vmatmul.bf16.vlgmr.msrb.gmra.mxu0 %v16476_v3  ;;  %6895 = vmatmul.bf16.vlgmr.msrb.gmra.mxu2 %v16481_v8 }
 0x109   : > { %v15334_v6 = vld [vmem:[%s15947_s14 + $0x1acc] sm:$0xf0]  ;;  %v13289_v10 = vld [vmem:[%s15947_s14 + $0x1bc0] sm:$0xf]  ;;  %v13034_v14 = vor.u32 %v15302_v4, %v13033_v59  ;;  %6908 = vmatmul.bf16.vlgmr.msrb.gmra.mxu3 %v16487_v12  ;;  %v6663_v4 = vadd.f32 %v6662_v56, %v16474_v62 }
 0x10a   : > { %v15366_v11 = vld [vmem:[%s15947_s14 + $0x1bcc] sm:$0xf0]  ;;  %v13162_v15 = vor.u32 %v15334_v6, %v13161_v5  ;;  %v12889_v16 = vld [vmem:[%s15947_s14 + $0x18a0] sm:$0xf]  ;;  %6914 = vmatpush.bf16.msra.mxu0 %v12906_v13  ;;  %v6675_v5 = vpop.f32.mrf.mxu1 }
 0x10b   : > { %v15266_v17 = vld [vmem:[%s15947_s14 + $0x18ac] sm:$0xf0]  ;;  %v13017_v18 = vld [vmem:[%s15947_s14 + $0x19a0] sm:$0xf]  ;;  %v13290_v24 = vor.u32 %v15366_v11, %v13289_v10  ;;  %6927 = vmatpush.bf16.msra.mxu1 %v13034_v14 }
 0x10c   : > { %v15298_v26 = vld [vmem:[%s15947_s14 + $0x19ac] sm:$0xf0]  ;;  %v13145_v30 = vld [vmem:[%s15947_s14 + $0x1aa0] sm:$0xf]  ;;  %v12890_v40 = vor.u32 %v15266_v17, %v12889_v16  ;;  %6940 = vmatpush.bf16.msra.mxu2 %v13162_v15  ;;  %v6676_v15 = vadd.f32 %v6675_v5, %v6663_v4 }
 0x10d   : > { %v15330_v35 = vld [vmem:[%s15947_s14 + $0x1aac] sm:$0xf0]  ;;  %v13273_v36 = vld [vmem:[%s15947_s14 + $0x1ba0] sm:$0xf]  ;;  %v13018_v41 = vor.u32 %v15298_v26, %v13017_v18  ;;  %6953 = vmatpush.bf16.msra.mxu3 %v13290_v24  ;;  %v6688_v26 = vpop.f32.mrf.mxu2  ;;  %v6701_v61 = vpop.f32.mrf.mxu3 }
 0x10e   : > { %v15362_v20 = vld [vmem:[%s15947_s14 + $0x1bac] sm:$0xf0]  ;;  %v13146_v23 = vor.u32 %v15330_v35, %v13145_v30  ;;  %v12873_v46 = vld [vmem:[%s15947_s14 + $0x1880] sm:$0xf]  ;;  %6915 = vmatpush.bf16.msra.mxu0 %v12890_v40  ;;  %v6689_v40 = vadd.f32 %v6688_v26, %v6676_v15 }
 0x10f   : > { %v15262_v0 = vld [vmem:[%s15947_s14 + $0x188c] sm:$0xf0]  ;;  %v13001_v48 = vld [vmem:[%s15947_s14 + $0x1980] sm:$0xf]  ;;  %v13274_v49 = vor.u32 %v15362_v20, %v13273_v36  ;;  %6928 = vmatpush.bf16.msra.mxu1 %v13018_v41 }
 0x110   : > { %v15294_v50 = vld [vmem:[%s15947_s14 + $0x198c] sm:$0xf0]  ;;  %v13129_v51 = vld [vmem:[%s15947_s14 + $0x1a80] sm:$0xf]  ;;  %v12874_v55 = vor.u32 %v15262_v0, %v12873_v46  ;;  %6941 = vmatpush.bf16.msra.mxu2 %v13146_v23  ;;  %v16526_v0 = vadd.f32 %v6701_v61, %v6689_v40 }
 0x111   : > { %v15326_v52 = vld [vmem:[%s15947_s14 + $0x1a8c] sm:$0xf0]  ;;  %v13257_v53 = vld [vmem:[%s15947_s14 + $0x1b80] sm:$0xf]  ;;  %v13002_v57 = vor.u32 %v15294_v50, %v13001_v48  ;;  %6954 = vmatpush.bf16.msra.mxu3 %v13274_v49  ;;  %v6664_v49 = vpop.f32.mrf.mxu0 }
 0x112   : > { %v15358_v54 = vld [vmem:[%s15947_s14 + $0x1b8c] sm:$0xf0]  ;;  %v13130_v58 = vor.u32 %v15326_v52, %v13129_v51  ;;  %v12857_v59 = vld [vmem:[%s15947_s14 + $0x1860] sm:$0xf]  ;;  %6916 = vmatpush.bf16.msra.mxu0 %v12874_v55  ;;  %v6677_v55 = vpop.f32.mrf.mxu1 }
 0x113   : > { %v15258_v1 = vld [vmem:[%s15947_s14 + $0x186c] sm:$0xf0]  ;;  %v12985_v2 = vld [vmem:[%s15947_s14 + $0x1960] sm:$0xf]  ;;  %v13258_v6 = vor.u32 %v15358_v54, %v13257_v53  ;;  %6929 = vmatpush.bf16.msra.mxu1 %v13002_v57 }
 0x114   : > { %v15290_v7 = vld [vmem:[%s15947_s14 + $0x196c] sm:$0xf0]  ;;  %v13113_v10 = vld [vmem:[%s15947_s14 + $0x1a60] sm:$0xf]  ;;  %v12858_v16 = vor.u32 %v15258_v1, %v12857_v59  ;;  %6942 = vmatpush.bf16.msra.mxu2 %v13130_v58 }
 0x115   : > { %v15322_v11 = vld [vmem:[%s15947_s14 + $0x1a6c] sm:$0xf0]  ;;  %v13241_v13 = vld [vmem:[%s15947_s14 + $0x1b60] sm:$0xf]  ;;  %v12986_v62 = vor.u32 %v15290_v7, %v12985_v2  ;;  %6955 = vmatpush.bf16.msra.mxu3 %v13258_v6 }
 0x116   : > { %v15354_v14 = vld [vmem:[%s15947_s14 + $0x1b6c] sm:$0xf0]  ;;  %v13114_v17 = vor.u32 %v15322_v11, %v13113_v10  ;;  %v12841_v18 = vld [vmem:[%s15947_s14 + $0x1840] sm:$0xf]  ;;  %6917 = vmatpush.bf16.msra.mxu0 %v12858_v16 }
 0x117   : > { %v15254_v21 = vld [vmem:[%s15947_s14 + $0x184c] sm:$0xf0]  ;;  %v12969_v24 = vld [vmem:[%s15947_s14 + $0x1940] sm:$0xf]  ;;  %v13242_v30 = vor.u32 %v15354_v14, %v13241_v13  ;;  %6930 = vmatpush.bf16.msra.mxu1 %v12986_v62 }
 0x118   : > { %v15286_v35 = vld [vmem:[%s15947_s14 + $0x194c] sm:$0xf0]  ;;  %v13097_v36 = vld [vmem:[%s15947_s14 + $0x1a40] sm:$0xf]  ;;  %v12842_v46 = vor.u32 %v15254_v21, %v12841_v18  ;;  %6943 = vmatpush.bf16.msra.mxu2 %v13114_v17  ;;  %v6690_v17 = vpop.f32.mrf.mxu2 }
 0x119   : > { %v15318_v20 = vld [vmem:[%s15947_s14 + $0x1a4c] sm:$0xf0]  ;;  %v13225_v41 = vld [vmem:[%s15947_s14 + $0x1b40] sm:$0xf]  ;;  %v12970_v50 = vor.u32 %v15286_v35, %v12969_v24  ;;  %6956 = vmatpush.bf16.msra.mxu3 %v13242_v30  ;;  %v6703_v30 = vpop.f32.mrf.mxu3 }
 0x11a   : > { %v15350_v23 = vld [vmem:[%s15947_s14 + $0x1b4c] sm:$0xf0]  ;;  %v12825_v48 = vld [vmem:[%s15947_s14 + $0x1820] sm:$0xf]  ;;  %v13098_v51 = vor.u32 %v15318_v20, %v13097_v36  ;;  %6918 = vmatpush.bf16.msra.mxu0 %v12842_v46  ;;  %v342_v20 = vld [vmem:[%s15962_s16 + $0x38] sm:$0xff] }
 0x11b   : > { %v15250_v52 = vld [vmem:[%s15947_s14 + $0x182c] sm:$0xf0]  ;;  %v12953_v53 = vld [vmem:[%s15947_s14 + $0x1920] sm:$0xf]  ;;  %v13226_v56 = vor.u32 %v15350_v23, %v13225_v41  ;;  %6931 = vmatpush.bf16.msra.mxu1 %v12970_v50  ;;  %383 = vst [vmem:[#allocation1 + $0x20] ss:$4 sm:$0xff] %v342_v20 }
 0x11c   : > { %v15282_v54 = vld [vmem:[%s15947_s14 + $0x192c] sm:$0xf0]  ;;  %v13081_v57 = vld [vmem:[%s15947_s14 + $0x1a20] sm:$0xf]  ;;  %v12826_v5 = vor.u32 %v15250_v52, %v12825_v48  ;;  %6944 = vmatpush.bf16.msra.mxu2 %v13098_v51 }
 0x11d   : > { %v15314_v58 = vld [vmem:[%s15947_s14 + $0x1a2c] sm:$0xf0]  ;;  %v13209_v59 = vld [vmem:[%s15947_s14 + $0x1b20] sm:$0xf]  ;;  %v12954_v13 = vor.u32 %v15282_v54, %v12953_v53  ;;  %6957 = vmatpush.bf16.msra.mxu3 %v13226_v56 }
 0x11e   : > { %v15346_v1 = vld [vmem:[%s15947_s14 + $0x1b2c] sm:$0xf0]  ;;  %v12809_v2 = vld [vmem:[%s15947_s14 + $0x1800] sm:$0xf]  ;;  %v13082_v14 = vor.u32 %v15314_v58, %v13081_v57  ;;  %6919 = vmatpush.bf16.msra.mxu0 %v12826_v5 }
 0x11f   : > { %v15246_v4 = vld [vmem:[%s15947_s14 + $0x180c] sm:$0xf0]  ;;  %v12937_v6 = vld [vmem:[%s15947_s14 + $0x1900] sm:$0xf]  ;;  %v13210_v18 = vor.u32 %v15346_v1, %v13209_v59  ;;  %6932 = vmatpush.bf16.msra.mxu1 %v12954_v13 }
 0x120   : > { %v15278_v7 = vld [vmem:[%s15947_s14 + $0x190c] sm:$0xf0]  ;;  %v13065_v10 = vld [vmem:[%s15947_s14 + $0x1a00] sm:$0xf]  ;;  %v12810_v40 = vor.u32 %v15246_v4, %v12809_v2  ;;  %6945 = vmatpush.bf16.msra.mxu2 %v13082_v14 }
 0x121   : > { %v15310_v11 = vld [vmem:[%s15947_s14 + $0x1a0c] sm:$0xf0]  ;;  %v13193_v15 = vld [vmem:[%s15947_s14 + $0x1b00] sm:$0xf]  ;;  %v12938_v23 = vor.u32 %v15278_v7, %v12937_v6  ;;  %6958 = vmatpush.bf16.msra.mxu3 %v13210_v18 }
 0x122   : > { %v15342_v16 = vld [vmem:[%s15947_s14 + $0x1b0c] sm:$0xf0]  ;;  %v13433_v62 = vld [vmem:[%s15947_s14 + $0x1ce0] sm:$0xf]  ;;  %v13066_v46 = vor.u32 %v15310_v11, %v13065_v10  ;;  %6920 = vmatpush.bf16.msra.mxu0 %v12810_v40 }
 0x123   : > { %v15402_v21 = vld [vmem:[%s15947_s14 + $0x1cec] sm:$0xf0]  ;;  %v13561_v24 = vld [vmem:[%s15947_s14 + $0x1de0] sm:$0xf]  ;;  %v13194_v50 = vor.u32 %v15342_v16, %v13193_v15  ;;  %6933 = vmatpush.bf16.msra.mxu1 %v12938_v23 }
 0x124   : > { %v15434_v26 = vld [vmem:[%s15947_s14 + $0x1dec] sm:$0xf0]  ;;  %v13689_v35 = vld [vmem:[%s15947_s14 + $0x1ee0] sm:$0xf]  ;;  %v13434_v51 = vor.u32 %v15402_v21, %v13433_v62  ;;  %6946 = vmatpush.bf16.msra.mxu2 %v13066_v46 }
 0x125   : > { %v15466_v36 = vld [vmem:[%s15947_s14 + $0x1eec] sm:$0xf0]  ;;  %v13817_v61 = vld [vmem:[%s15947_s14 + $0x1fe0] sm:$0xf]  ;;  %v13562_v54 = vor.u32 %v15434_v26, %v13561_v24  ;;  %6959 = vmatpush.bf16.msra.mxu3 %v13194_v50 }
 0x126   : > { %v15498_v41 = vld [vmem:[%s15947_s14 + $0x1fec] sm:$0xf0]  ;;  %v386_v49 = vld.sshfl [vmem:[#allocation1 + $0x10] sm:$0xff pattern:$0x73625140]  ;;  %v13690_v55 = vor.u32 %v15466_v36, %v13689_v35  ;;  %6965 = vmatpush.bf16.msrb.mxu0 %v13434_v51 }
 0x127   : > { %v384_v48 = vld.sshfl [vmem:[#allocation1] sm:$0xff pattern:$0x73625140]  ;;  %v385_v52 = vld.sshfl [vmem:[#allocation1 + $0x8] sm:$0xff pattern:$0x73625140]  ;;  %v13818_v59 = vor.u32 %v15498_v41, %v13817_v61  ;;  %v16561_v6 = vpack.c.bf16 %v386_v49, %v386_v49  ;;  %6978 = vmatpush.bf16.msrb.mxu1 %v13562_v54 }
 0x128   : > { %v387_v53 = vld.sshfl [vmem:[#allocation1 + $0x18] sm:$0xff pattern:$0x73625140]  ;;  %v13417_v56 = vld [vmem:[%s15947_s14 + $0x1cc0] sm:$0xf]  ;;  %v16556_v1 = vpack.c.bf16 %v384_v48, %v384_v48  ;;  %v16563_v7 = vpack.c.bf16 %v385_v52, %v385_v52  ;;  %6991 = vmatpush.bf16.msrb.mxu2 %v13690_v55  ;;  %v6714_v52 = vpop.f32.mrf.mxu0 }
 0x129   : > { %v15398_v57 = vld [vmem:[%s15947_s14 + $0x1ccc] sm:$0xf0]  ;;  %v13545_v58 = vld [vmem:[%s15947_s14 + $0x1dc0] sm:$0xf]  ;;  %v16567_v13 = vpack.c.bf16 %v387_v53, %v387_v53  ;;  %7004 = vmatpush.bf16.msrb.mxu3 %v13818_v59  ;;  %6947 = vmatmul.bf16.vlgmr.msra.gmra.mxu2 %v16561_v6  ;;  %v6715_v55 = vadd.f32 %v6714_v52, %v16526_v0 }
 0x12a   : > { %v15430_v2 = vld [vmem:[%s15947_s14 + $0x1dcc] sm:$0xf0]  ;;  %v13673_v4 = vld [vmem:[%s15947_s14 + $0x1ec0] sm:$0xf]  ;;  %v13418_v14 = vor.u32 %v15398_v57, %v13417_v56  ;;  %6921 = vmatmul.bf16.vlgmr.msra.gmra.mxu0 %v16556_v1  ;;  %6934 = vmatmul.bf16.vlgmr.msra.gmra.mxu1 %v16563_v7  ;;  %v6727_v57 = vpop.f32.mrf.mxu1 }
 0x12b   : > { %v15462_v5 = vld [vmem:[%s15947_s14 + $0x1ecc] sm:$0xf0]  ;;  %v13801_v10 = vld [vmem:[%s15947_s14 + $0x1fc0] sm:$0xf]  ;;  %v13546_v15 = vor.u32 %v15430_v2, %v13545_v58  ;;  %6960 = vmatmul.bf16.vlgmr.msra.gmra.mxu3 %v16567_v13 }
 0x12c   : > { %v15494_v11 = vld [vmem:[%s15947_s14 + $0x1fcc] sm:$0xf0]  ;;  %v13674_v16 = vor.u32 %v15462_v5, %v13673_v4  ;;  %v13401_v62 = vld [vmem:[%s15947_s14 + $0x1ca0] sm:$0xf]  ;;  %6966 = vmatpush.bf16.msrb.mxu0 %v13418_v14 }
 0x12d   : > { %v15394_v17 = vld [vmem:[%s15947_s14 + $0x1cac] sm:$0xf0]  ;;  %v13529_v18 = vld [vmem:[%s15947_s14 + $0x1da0] sm:$0xf]  ;;  %v13802_v21 = vor.u32 %v15494_v11, %v13801_v10  ;;  %6979 = vmatpush.bf16.msrb.mxu1 %v13546_v15  ;;  %v6728_v11 = vadd.f32 %v6727_v57, %v6715_v55 }
 0x12e   : > { %v15426_v24 = vld [vmem:[%s15947_s14 + $0x1dac] sm:$0xf0]  ;;  %v13657_v26 = vld [vmem:[%s15947_s14 + $0x1ea0] sm:$0xf]  ;;  %v13402_v20 = vor.u32 %v15394_v17, %v13401_v62  ;;  %6992 = vmatpush.bf16.msrb.mxu2 %v13674_v16 }
 0x12f   : > { %v15458_v30 = vld [vmem:[%s15947_s14 + $0x1eac] sm:$0xf0]  ;;  %v13785_v35 = vld [vmem:[%s15947_s14 + $0x1fa0] sm:$0xf]  ;;  %v13530_v40 = vor.u32 %v15426_v24, %v13529_v18  ;;  %7005 = vmatpush.bf16.msrb.mxu3 %v13802_v21 }
 0x130   : > { %v15490_v36 = vld [vmem:[%s15947_s14 + $0x1fac] sm:$0xf0]  ;;  %v13658_v61 = vor.u32 %v15458_v30, %v13657_v26  ;;  %v13385_v41 = vld [vmem:[%s15947_s14 + $0x1c80] sm:$0xf]  ;;  %6967 = vmatpush.bf16.msrb.mxu0 %v13402_v20 }
 0x131   : > { %v15390_v23 = vld [vmem:[%s15947_s14 + $0x1c8c] sm:$0xf0]  ;;  %v13513_v46 = vld [vmem:[%s15947_s14 + $0x1d80] sm:$0xf]  ;;  %v13786_v48 = vor.u32 %v15490_v36, %v13785_v35  ;;  %6980 = vmatpush.bf16.msrb.mxu1 %v13530_v40  ;;  %v6740_v36 = vpop.f32.mrf.mxu2 }
 0x132   : > { %v15422_v49 = vld [vmem:[%s15947_s14 + $0x1d8c] sm:$0xf0]  ;;  %v13641_v50 = vld [vmem:[%s15947_s14 + $0x1e80] sm:$0xf]  ;;  %v13386_v56 = vor.u32 %v15390_v23, %v13385_v41  ;;  %6993 = vmatpush.bf16.msrb.mxu2 %v13658_v61  ;;  %v6741_v41 = vadd.f32 %v6740_v36, %v6728_v11  ;;  %v6753_v23 = vpop.f32.mrf.mxu3  ;;  %v9851_v36 = vld [vmem:[%s15947_s14 + $0xf0] sm:$0xf0] }
 0x133   : > { %v15454_v51 = vld [vmem:[%s15947_s14 + $0x1e8c] sm:$0xf0]  ;;  %v13769_v53 = vld [vmem:[%s15947_s14 + $0x1f80] sm:$0xf]  ;;  %v13514_v58 = vor.u32 %v15422_v49, %v13513_v46  ;;  %7006 = vmatpush.bf16.msrb.mxu3 %v13786_v48  ;;  %v6716_v49 = vpop.f32.mrf.mxu0 }
 0x134   : > { %v15486_v54 = vld [vmem:[%s15947_s14 + $0x1f8c] sm:$0xf0]  ;;  %v13642_v59 = vor.u32 %v15454_v51, %v13641_v50  ;;  %v13369_v2 = vld [vmem:[%s15947_s14 + $0x1c60] sm:$0xf]  ;;  %6968 = vmatpush.bf16.msrb.mxu0 %v13386_v56  ;;  %v6729_v51 = vpop.f32.mrf.mxu1  ;;  %v16606_v52 = vadd.f32 %v6753_v23, %v6741_v41  ;;  %v14568_v41 = vld [vmem:[%s15947_s14 + $0x2e4] sm:$0xf] }
 0x135   : > { %v15386_v4 = vld [vmem:[%s15947_s14 + $0x1c6c] sm:$0xf0]  ;;  %v13497_v5 = vld [vmem:[%s15947_s14 + $0x1d60] sm:$0xf]  ;;  %v13770_v10 = vor.u32 %v15486_v54, %v13769_v53  ;;  %6981 = vmatpush.bf16.msrb.mxu1 %v13514_v58  ;;  %v14600_v49 = vld [vmem:[%s15947_s14 + $0x3e4] sm:$0xf] }
 0x136   : > { %v15418_v14 = vld [vmem:[%s15947_s14 + $0x1d6c] sm:$0xf0]  ;;  %v13625_v15 = vld [vmem:[%s15947_s14 + $0x1e60] sm:$0xf]  ;;  %v13370_v17 = vor.u32 %v15386_v4, %v13369_v2  ;;  %6994 = vmatpush.bf16.msrb.mxu2 %v13642_v59 }
 0x137   : > { %v15450_v0 = vld [vmem:[%s15947_s14 + $0x1e6c] sm:$0xf0]  ;;  %v13753_v16 = vld [vmem:[%s15947_s14 + $0x1f60] sm:$0xf]  ;;  %v13498_v18 = vor.u32 %v15418_v14, %v13497_v5  ;;  %7007 = vmatpush.bf16.msrb.mxu3 %v13770_v10 }
 0x138   : > { %v15482_v62 = vld [vmem:[%s15947_s14 + $0x1f6c] sm:$0xf0]  ;;  %v13626_v21 = vor.u32 %v15450_v0, %v13625_v15  ;;  %v13353_v24 = vld [vmem:[%s15947_s14 + $0x1c40] sm:$0xf]  ;;  %6969 = vmatpush.bf16.msrb.mxu0 %v13370_v17 }
 0x139   : > { %v15382_v26 = vld [vmem:[%s15947_s14 + $0x1c4c] sm:$0xf0]  ;;  %v13481_v30 = vld [vmem:[%s15947_s14 + $0x1d40] sm:$0xf]  ;;  %v13754_v35 = vor.u32 %v15482_v62, %v13753_v16  ;;  %6982 = vmatpush.bf16.msrb.mxu1 %v13498_v18 }
 0x13a   : > { %v15414_v20 = vld [vmem:[%s15947_s14 + $0x1d4c] sm:$0xf0]  ;;  %v13609_v40 = vld [vmem:[%s15947_s14 + $0x1e40] sm:$0xf]  ;;  %v13354_v50 = vor.u32 %v15382_v26, %v13353_v24  ;;  %6995 = vmatpush.bf16.msrb.mxu2 %v13626_v21  ;;  %v6755_v23 = vpop.f32.mrf.mxu3 }
 0x13b   : > { %v15446_v61 = vld [vmem:[%s15947_s14 + $0x1e4c] sm:$0xf0]  ;;  %v13737_v46 = vld [vmem:[%s15947_s14 + $0x1f40] sm:$0xf]  ;;  %v13482_v53 = vor.u32 %v15414_v20, %v13481_v30  ;;  %7008 = vmatpush.bf16.msrb.mxu3 %v13754_v35  ;;  %v14504_v35 = vld [vmem:[%s15947_s14 + $0xe4] sm:$0xf]  ;;  %v6742_v20 = vpop.f32.mrf.mxu2 }
 0x13c   : > { %v15478_v48 = vld [vmem:[%s15947_s14 + $0x1f4c] sm:$0xf0]  ;;  %v13610_v54 = vor.u32 %v15446_v61, %v13609_v40  ;;  %v13337_v55 = vld [vmem:[%s15947_s14 + $0x1c20] sm:$0xf]  ;;  %6970 = vmatpush.bf16.msrb.mxu0 %v13354_v50  ;;  %v14536_v40 = vld [vmem:[%s15947_s14 + $0x1e4] sm:$0xf] }
 0x13d   : > { %v15378_v56 = vld [vmem:[%s15947_s14 + $0x1c2c] sm:$0xf0]  ;;  %v13465_v57 = vld [vmem:[%s15947_s14 + $0x1d20] sm:$0xf]  ;;  %v13738_v58 = vor.u32 %v15478_v48, %v13737_v46  ;;  %6983 = vmatpush.bf16.msrb.mxu1 %v13482_v53  ;;  %v9979_v61 = vld [vmem:[%s15947_s14 + $0x1f0] sm:$0xf0] }
 0x13e   : > { %v15410_v59 = vld [vmem:[%s15947_s14 + $0x1d2c] sm:$0xf0]  ;;  %v13593_v2 = vld [vmem:[%s15947_s14 + $0x1e20] sm:$0xf]  ;;  %v13338_v14 = vor.u32 %v15378_v56, %v13337_v55  ;;  %6996 = vmatpush.bf16.msrb.mxu2 %v13610_v54  ;;  %v10107_v48 = vld [vmem:[%s15947_s14 + $0x2f0] sm:$0xf0] }
 0x13f   : > { %v15442_v4 = vld [vmem:[%s15947_s14 + $0x1e2c] sm:$0xf0]  ;;  %v13721_v5 = vld [vmem:[%s15947_s14 + $0x1f20] sm:$0xf]  ;;  %v13466_v62 = vor.u32 %v15410_v59, %v13465_v57  ;;  %7009 = vmatpush.bf16.msrb.mxu3 %v13738_v58  ;;  %v10235_v50 = vld [vmem:[%s15947_s14 + $0x3f0] sm:$0xf0]  ;;  %v9854_v57 = vor.u32 %v14504_v35, %v9851_v36 }
 0x140   : > { %v15474_v10 = vld [vmem:[%s15947_s14 + $0x1f2c] sm:$0xf0]  ;;  %v13321_v11 = vld [vmem:[%s15947_s14 + $0x1c00] sm:$0xf]  ;;  %v13594_v17 = vor.u32 %v15442_v4, %v13593_v2  ;;  %6971 = vmatpush.bf16.msrb.mxu0 %v13338_v14  ;;  %v9982_v2 = vor.u32 %v14536_v40, %v9979_v61  ;;  %v10110_v4 = vor.u32 %v14568_v41, %v10107_v48  ;;  %v10238_v14 = vor.u32 %v14600_v49, %v10235_v50  ;;  %v14496_v20 = vld [vmem:[%s15947_s14 + $0xa4] sm:$0xf] }
 0x141   : > { %v15374_v15 = vld [vmem:[%s15947_s14 + $0x1c0c] sm:$0xf0]  ;;  %v13449_v0 = vld [vmem:[%s15947_s14 + $0x1d00] sm:$0xf]  ;;  %v13722_v26 = vor.u32 %v15474_v10, %v13721_v5  ;;  %6984 = vmatpush.bf16.msrb.mxu1 %v13466_v62  ;;  %v14500_v5 = vld [vmem:[%s15947_s14 + $0xc4] sm:$0xf] }
 0x142   : > { %v15406_v16 = vld [vmem:[%s15947_s14 + $0x1d0c] sm:$0xf0]  ;;  %v13577_v18 = vld [vmem:[%s15947_s14 + $0x1e00] sm:$0xf]  ;;  %v13322_v46 = vor.u32 %v15374_v15, %v13321_v11  ;;  %6997 = vmatpush.bf16.msrb.mxu2 %v13594_v17  ;;  %v9835_v10 = vld [vmem:[%s15947_s14 + $0xd0] sm:$0xf0] }
 0x143   : > { %v15438_v21 = vld [vmem:[%s15947_s14 + $0x1e0c] sm:$0xf0]  ;;  %v13705_v24 = vld [vmem:[%s15947_s14 + $0x1f00] sm:$0xf]  ;;  %v13450_v51 = vor.u32 %v15406_v16, %v13449_v0  ;;  %7010 = vmatpush.bf16.msrb.mxu3 %v13722_v26  ;;  %v14532_v11 = vld [vmem:[%s15947_s14 + $0x1c4] sm:$0xf] }
 0x144   : > { %v15470_v30 = vld [vmem:[%s15947_s14 + $0x1f0c] sm:$0xf0]  ;;  %v13578_v53 = vor.u32 %v15438_v21, %v13577_v18  ;;  %v390_v55 = vld.sshfl [vmem:[#allocation1 + $0x30] sm:$0xff pattern:$0x73625140]  ;;  %6972 = vmatpush.bf16.msrb.mxu0 %v13322_v46 }
 0x145   : > { %v388_v54 = vld.sshfl [vmem:[#allocation1 + $0x20] sm:$0xff pattern:$0x73625140]  ;;  %v13706_v56 = vor.u32 %v15470_v30, %v13705_v24  ;;  %v389_v58 = vld.sshfl [vmem:[#allocation1 + $0x28] sm:$0xff pattern:$0x73625140]  ;;  %6985 = vmatpush.bf16.msrb.mxu1 %v13450_v51  ;;  %v16640_v17 = vpack.c.bf16 %v390_v55, %v390_v55  ;;  %v9838_v30 = vor.u32 %v14500_v5, %v9835_v10  ;;  %v6766_v5 = vpop.f32.mrf.mxu0 }
 0x146   : > { %v391_v59 = vld.sshfl [vmem:[#allocation1 + $0x38] sm:$0xff pattern:$0x73625140]  ;;  %v16635_v15 = vpack.c.bf16 %v388_v54, %v388_v54  ;;  %v9963_v0 = vld [vmem:[%s15947_s14 + $0x1d0] sm:$0xf0]  ;;  %6998 = vmatpush.bf16.msrb.mxu2 %v13578_v53  ;;  %v16642_v18 = vpack.c.bf16 %v389_v58, %v389_v58 }
 0x147   : > { %v14564_v16 = vld [vmem:[%s15947_s14 + $0x2c4] sm:$0xf]  ;;  %v10091_v62 = vld [vmem:[%s15947_s14 + $0x2d0] sm:$0xf0]  ;;  %7011 = vmatpush.bf16.msrb.mxu3 %v13706_v56  ;;  %v16646_v26 = vpack.c.bf16 %v391_v59, %v391_v59  ;;  %v9966_v35 = vor.u32 %v14532_v11, %v9963_v0 }
 0x148   : > { %v14596_v21 = vld [vmem:[%s15947_s14 + $0x3c4] sm:$0xf]  ;;  %v10219_v24 = vld [vmem:[%s15947_s14 + $0x3d0] sm:$0xf0]  ;;  %7017 = vmatpush.bf16.msra.mxu0 %v9854_v57  ;;  %v10094_v36 = vor.u32 %v14564_v16, %v10091_v62  ;;  %6986 = vmatmul.bf16.vlgmr.msrb.gmra.mxu1 %v16642_v18  ;;  %v6779_v16 = vpop.f32.mrf.mxu1 }
 0x149   : > { %7030 = vmatpush.bf16.msra.mxu1 %v9982_v2  ;;  %v9819_v40 = vld [vmem:[%s15947_s14 + $0xb0] sm:$0xf0]  ;;  %v14528_v61 = vld [vmem:[%s15947_s14 + $0x1a4] sm:$0xf]  ;;  %6973 = vmatmul.bf16.vlgmr.msrb.gmra.mxu0 %v16635_v15  ;;  %v10222_v41 = vor.u32 %v14596_v21, %v10219_v24 }
 0x14a   : > { %7043 = vmatpush.bf16.msra.mxu2 %v10110_v4  ;;  %v9947_v23 = vld [vmem:[%s15947_s14 + $0x1b0] sm:$0xf0]  ;;  %v14560_v46 = vld [vmem:[%s15947_s14 + $0x2a4] sm:$0xf]  ;;  %7012 = vmatmul.bf16.vlgmr.msrb.gmra.mxu3 %v16646_v26  ;;  %v9822_v51 = vor.u32 %v14496_v20, %v9819_v40 }
 0x14b   : > { %7056 = vmatpush.bf16.msra.mxu3 %v10238_v14  ;;  %v10075_v48 = vld [vmem:[%s15947_s14 + $0x2b0] sm:$0xf0]  ;;  %6999 = vmatmul.bf16.vlgmr.msrb.gmra.mxu2 %v16640_v17  ;;  %v14592_v49 = vld [vmem:[%s15947_s14 + $0x3a4] sm:$0xf]  ;;  %v9950_v53 = vor.u32 %v14528_v61, %v9947_v23  ;;  %v6767_v14 = vadd.f32 %v6766_v5, %v16606_v52 }
 0x14c   : > { %v10203_v50 = vld [vmem:[%s15947_s14 + $0x3b0] sm:$0xf0]  ;;  %7018 = vmatpush.bf16.msra.mxu0 %v9838_v30  ;;  %v10078_v54 = vor.u32 %v14560_v46, %v10075_v48  ;;  %v14492_v55 = vld [vmem:[%s15947_s14 + $0x84] sm:$0xf] }
 0x14d   : > { %7031 = vmatpush.bf16.msra.mxu1 %v9966_v35  ;;  %v9803_v56 = vld [vmem:[%s15947_s14 + $0x90] sm:$0xf0]  ;;  %v14524_v57 = vld [vmem:[%s15947_s14 + $0x184] sm:$0xf]  ;;  %v10206_v58 = vor.u32 %v14592_v49, %v10203_v50  ;;  %v6780_v20 = vadd.f32 %v6779_v16, %v6767_v14 }
 0x14e   : > { %7044 = vmatpush.bf16.msra.mxu2 %v10094_v36  ;;  %v9931_v59 = vld [vmem:[%s15947_s14 + $0x190] sm:$0xf0]  ;;  %v14556_v2 = vld [vmem:[%s15947_s14 + $0x284] sm:$0xf]  ;;  %v9806_v0 = vor.u32 %v14492_v55, %v9803_v56  ;;  %v6792_v55 = vpop.f32.mrf.mxu2 }
 0x14f   : > { %7057 = vmatpush.bf16.msra.mxu3 %v10222_v41  ;;  %v10059_v4 = vld [vmem:[%s15947_s14 + $0x290] sm:$0xf0]  ;;  %v14588_v10 = vld [vmem:[%s15947_s14 + $0x384] sm:$0xf]  ;;  %v9934_v62 = vor.u32 %v14524_v57, %v9931_v59  ;;  %v6793_v59 = vadd.f32 %v6792_v55, %v6780_v20 }
 0x150   : > { %v10187_v11 = vld [vmem:[%s15947_s14 + $0x390] sm:$0xf0]  ;;  %7019 = vmatpush.bf16.msra.mxu0 %v9822_v51  ;;  %v10062_v21 = vor.u32 %v14556_v2, %v10059_v4  ;;  %v14488_v24 = vld [vmem:[%s15947_s14 + $0x64] sm:$0xf]  ;;  %v6805_v2 = vpop.f32.mrf.mxu3  ;;  %v6781_v14 = vpop.f32.mrf.mxu1 }
 0x151   : > { %7032 = vmatpush.bf16.msra.mxu1 %v9950_v53  ;;  %v9787_v30 = vld [vmem:[%s15947_s14 + $0x70] sm:$0xf0]  ;;  %v14520_v35 = vld [vmem:[%s15947_s14 + $0x164] sm:$0xf]  ;;  %v10190_v36 = vor.u32 %v14588_v10, %v10187_v11  ;;  %v6768_v10 = vpop.f32.mrf.mxu0 }
 0x152   : > { %7045 = vmatpush.bf16.msra.mxu2 %v10078_v54  ;;  %v9915_v40 = vld [vmem:[%s15947_s14 + $0x170] sm:$0xf0]  ;;  %v14552_v61 = vld [vmem:[%s15947_s14 + $0x264] sm:$0xf]  ;;  %v9790_v46 = vor.u32 %v14488_v24, %v9787_v30 }
 0x153   : > { %7058 = vmatpush.bf16.msra.mxu3 %v10206_v58  ;;  %v10043_v52 = vld [vmem:[%s15947_s14 + $0x270] sm:$0xf0]  ;;  %v14584_v41 = vld [vmem:[%s15947_s14 + $0x364] sm:$0xf]  ;;  %v9918_v48 = vor.u32 %v14520_v35, %v9915_v40 }
 0x154   : > { %v10171_v23 = vld [vmem:[%s15947_s14 + $0x370] sm:$0xf0]  ;;  %7020 = vmatpush.bf16.msra.mxu0 %v9806_v0  ;;  %v10046_v49 = vor.u32 %v14552_v61, %v10043_v52  ;;  %v14484_v50 = vld [vmem:[%s15947_s14 + $0x44] sm:$0xf]  ;;  %v16685_v0 = vadd.f32 %v6805_v2, %v6793_v59 }
 0x155   : > { %7033 = vmatpush.bf16.msra.mxu1 %v9934_v62  ;;  %v9771_v51 = vld [vmem:[%s15947_s14 + $0x50] sm:$0xf0]  ;;  %v14516_v53 = vld [vmem:[%s15947_s14 + $0x144] sm:$0xf]  ;;  %v10174_v54 = vor.u32 %v14584_v41, %v10171_v23 }
 0x156   : > { %7046 = vmatpush.bf16.msra.mxu2 %v10062_v21  ;;  %v9899_v56 = vld [vmem:[%s15947_s14 + $0x150] sm:$0xf0]  ;;  %v14548_v57 = vld [vmem:[%s15947_s14 + $0x244] sm:$0xf]  ;;  %v9774_v11 = vor.u32 %v14484_v50, %v9771_v51 }
 0x157   : > { %7059 = vmatpush.bf16.msra.mxu3 %v10190_v36  ;;  %v10027_v58 = vld [vmem:[%s15947_s14 + $0x250] sm:$0xf0]  ;;  %v14580_v4 = vld [vmem:[%s15947_s14 + $0x344] sm:$0xf]  ;;  %v9902_v16 = vor.u32 %v14516_v53, %v9899_v56 }
 0x158   : > { %v10155_v5 = vld [vmem:[%s15947_s14 + $0x350] sm:$0xf0]  ;;  %7021 = vmatpush.bf16.msra.mxu0 %v9790_v46  ;;  %v10030_v62 = vor.u32 %v14548_v57, %v10027_v58  ;;  %v14480_v21 = vld [vmem:[%s15947_s14 + $0x24] sm:$0xf]  ;;  %v6794_v58 = vpop.f32.mrf.mxu2 }
 0x159   : > { %7034 = vmatpush.bf16.msra.mxu1 %v9918_v48  ;;  %v9755_v24 = vld [vmem:[%s15947_s14 + $0x30] sm:$0xf0]  ;;  %v14512_v30 = vld [vmem:[%s15947_s14 + $0x124] sm:$0xf]  ;;  %v10158_v35 = vor.u32 %v14580_v4, %v10155_v5  ;;  %v6807_v5 = vpop.f32.mrf.mxu3 }
 0x15a   : > { %7047 = vmatpush.bf16.msra.mxu2 %v10046_v49  ;;  %v9883_v36 = vld [vmem:[%s15947_s14 + $0x130] sm:$0xf0]  ;;  %v14544_v20 = vld [vmem:[%s15947_s14 + $0x224] sm:$0xf]  ;;  %v9758_v41 = vor.u32 %v14480_v21, %v9755_v24 }
 0x15b   : > { %7060 = vmatpush.bf16.msra.mxu3 %v10174_v54  ;;  %v10011_v40 = vld [vmem:[%s15947_s14 + $0x230] sm:$0xf0]  ;;  %v14576_v61 = vld [vmem:[%s15947_s14 + $0x324] sm:$0xf]  ;;  %v9886_v48 = vor.u32 %v14512_v30, %v9883_v36 }
 0x15c   : > { %v10139_v52 = vld [vmem:[%s15947_s14 + $0x330] sm:$0xf0]  ;;  %7022 = vmatpush.bf16.msra.mxu0 %v9774_v11  ;;  %v14476_v23 = vld [vmem:[%s15947_s14 + $0x4] sm:$0xf]  ;;  %v10014_v49 = vor.u32 %v14544_v20, %v10011_v40 }
 0x15d   : > { %v9739_v46 = vld [vmem:[%s15947_s14 + $0x10] sm:$0xf0]  ;;  %7035 = vmatpush.bf16.msra.mxu1 %v9902_v16  ;;  %v14508_v50 = vld [vmem:[%s15947_s14 + $0x104] sm:$0xf]  ;;  %v10142_v54 = vor.u32 %v14576_v61, %v10139_v52 }
 0x15e   : > { %7048 = vmatpush.bf16.msra.mxu2 %v10030_v62  ;;  %v9867_v51 = vld [vmem:[%s15947_s14 + $0x110] sm:$0xf0]  ;;  %v14540_v53 = vld [vmem:[%s15947_s14 + $0x204] sm:$0xf]  ;;  %v9742_v10 = vor.u32 %v14476_v23, %v9739_v46 }
 0x15f   : > { %7061 = vmatpush.bf16.msra.mxu3 %v10158_v35  ;;  %v9995_v55 = vld [vmem:[%s15947_s14 + $0x210] sm:$0xf0]  ;;  %v14572_v56 = vld [vmem:[%s15947_s14 + $0x304] sm:$0xf]  ;;  %v9870_v62 = vor.u32 %v14508_v50, %v9867_v51 }
 0x160   : > { %v10123_v57 = vld [vmem:[%s15947_s14 + $0x310] sm:$0xf0]  ;;  %v14632_v59 = vld [vmem:[%s15947_s14 + $0x4e4] sm:$0xf]  ;;  %7023 = vmatpush.bf16.msra.mxu0 %v9758_v41  ;;  %v9998_v21 = vor.u32 %v14540_v53, %v9995_v55 }
 0x161   : > { %v10363_v2 = vld [vmem:[%s15947_s14 + $0x4f0] sm:$0xf0]  ;;  %v14664_v4 = vld [vmem:[%s15947_s14 + $0x5e4] sm:$0xf]  ;;  %7036 = vmatpush.bf16.msra.mxu1 %v9886_v48  ;;  %v10126_v35 = vor.u32 %v14572_v56, %v10123_v57 }
 0x162   : > { %v10491_v11 = vld [vmem:[%s15947_s14 + $0x5f0] sm:$0xf0]  ;;  %v14696_v14 = vld [vmem:[%s15947_s14 + $0x6e4] sm:$0xf]  ;;  %7049 = vmatpush.bf16.msra.mxu2 %v10014_v49  ;;  %v10366_v36 = vor.u32 %v14632_v59, %v10363_v2 }
 0x163   : > { %v10619_v16 = vld [vmem:[%s15947_s14 + $0x6f0] sm:$0xf0]  ;;  %v14728_v24 = vld [vmem:[%s15947_s14 + $0x7e4] sm:$0xf]  ;;  %7062 = vmatpush.bf16.msra.mxu3 %v10142_v54  ;;  %v10494_v20 = vor.u32 %v14664_v4, %v10491_v11 }
 0x164   : > { %v10747_v30 = vld [vmem:[%s15947_s14 + $0x7f0] sm:$0xf0]  ;;  %v10622_v40 = vor.u32 %v14696_v14, %v10619_v16  ;;  %v14628_v61 = vld [vmem:[%s15947_s14 + $0x4c4] sm:$0xf]  ;;  %7024 = vmatpush.bf16.msra.mxu0 %v9742_v10 }
 0x165   : > { %v10347_v52 = vld [vmem:[%s15947_s14 + $0x4d0] sm:$0xf0]  ;;  %v14660_v41 = vld [vmem:[%s15947_s14 + $0x5c4] sm:$0xf]  ;;  %v10750_v23 = vor.u32 %v14728_v24, %v10747_v30  ;;  %7037 = vmatpush.bf16.msra.mxu1 %v9870_v62 }
 0x166   : > { %v10475_v46 = vld [vmem:[%s15947_s14 + $0x5d0] sm:$0xf0]  ;;  %v14692_v48 = vld [vmem:[%s15947_s14 + $0x6c4] sm:$0xf]  ;;  %7050 = vmatpush.bf16.msra.mxu2 %v9998_v21  ;;  %v10350_v53 = vor.u32 %v14628_v61, %v10347_v52  ;;  %v6818_v61 = vpop.f32.mrf.mxu0 }
 0x167   : > { %v10603_v49 = vld [vmem:[%s15947_s14 + $0x6d0] sm:$0xf0]  ;;  %v14724_v50 = vld [vmem:[%s15947_s14 + $0x7c4] sm:$0xf]  ;;  %7063 = vmatpush.bf16.msra.mxu3 %v10126_v35  ;;  %v10478_v54 = vor.u32 %v14660_v41, %v10475_v46  ;;  %7025 = vmatmul.bf16.vlgmr.msra.gmra.mxu0 %v16086_v28 }
 0x168   : > { %v10731_v51 = vld [vmem:[%s15947_s14 + $0x7d0] sm:$0xf0]  ;;  %7069 = vmatpush.bf16.msrb.mxu0 %v10366_v36  ;;  %v10606_v55 = vor.u32 %v14692_v48, %v10603_v49  ;;  %v14624_v56 = vld [vmem:[%s15947_s14 + $0x4a4] sm:$0xf]  ;;  %7038 = vmatmul.bf16.vlgmr.msra.gmra.mxu1 %v16092_v34  ;;  %v6831_v48 = vpop.f32.mrf.mxu1 }
 0x169   : > { %7082 = vmatpush.bf16.msrb.mxu1 %v10494_v20  ;;  %v10331_v57 = vld [vmem:[%s15947_s14 + $0x4b0] sm:$0xf0]  ;;  %v14656_v58 = vld [vmem:[%s15947_s14 + $0x5a4] sm:$0xf]  ;;  %v10734_v59 = vor.u32 %v14724_v50, %v10731_v51  ;;  %7051 = vmatmul.bf16.vlgmr.msra.gmra.mxu2 %v16084_v27 }
 0x16a   : > { %7095 = vmatpush.bf16.msrb.mxu2 %v10622_v40  ;;  %v10459_v2 = vld [vmem:[%s15947_s14 + $0x5b0] sm:$0xf0]  ;;  %v14688_v4 = vld [vmem:[%s15947_s14 + $0x6a4] sm:$0xf]  ;;  %7064 = vmatmul.bf16.vlgmr.msra.gmra.mxu3 %v16090_v33  ;;  %v10334_v14 = vor.u32 %v14624_v56, %v10331_v57 }
 0x16b   : > { %7108 = vmatpush.bf16.msrb.mxu3 %v10750_v23  ;;  %v10587_v5 = vld [vmem:[%s15947_s14 + $0x6b0] sm:$0xf0]  ;;  %v14720_v10 = vld [vmem:[%s15947_s14 + $0x7a4] sm:$0xf]  ;;  %v10462_v16 = vor.u32 %v14656_v58, %v10459_v2  ;;  %v6819_v23 = vadd.f32 %v6818_v61, %v16685_v0 }
 0x16c   : > { %v10715_v11 = vld [vmem:[%s15947_s14 + $0x7b0] sm:$0xf0]  ;;  %7070 = vmatpush.bf16.msrb.mxu0 %v10350_v53  ;;  %v10590_v62 = vor.u32 %v14688_v4, %v10587_v5  ;;  %v14620_v21 = vld [vmem:[%s15947_s14 + $0x484] sm:$0xf] }
 0x16d   : > { %7083 = vmatpush.bf16.msrb.mxu1 %v10478_v54  ;;  %v10315_v24 = vld [vmem:[%s15947_s14 + $0x490] sm:$0xf0]  ;;  %v14652_v30 = vld [vmem:[%s15947_s14 + $0x584] sm:$0xf]  ;;  %v10718_v35 = vor.u32 %v14720_v10, %v10715_v11  ;;  %v6832_v56 = vadd.f32 %v6831_v48, %v6819_v23 }
 0x16e   : > { %7096 = vmatpush.bf16.msrb.mxu2 %v10606_v55  ;;  %v10443_v36 = vld [vmem:[%s15947_s14 + $0x590] sm:$0xf0]  ;;  %v14684_v20 = vld [vmem:[%s15947_s14 + $0x684] sm:$0xf]  ;;  %v10318_v46 = vor.u32 %v14620_v21, %v10315_v24  ;;  %v6844_v21 = vpop.f32.mrf.mxu2 }
 0x16f   : > { %7109 = vmatpush.bf16.msrb.mxu3 %v10734_v59  ;;  %v10571_v40 = vld [vmem:[%s15947_s14 + $0x690] sm:$0xf0]  ;;  %v14716_v52 = vld [vmem:[%s15947_s14 + $0x784] sm:$0xf]  ;;  %v10446_v49 = vor.u32 %v14652_v30, %v10443_v36  ;;  %v6845_v36 = vadd.f32 %v6844_v21, %v6832_v56 }
 0x170   : > { %v10699_v41 = vld [vmem:[%s15947_s14 + $0x790] sm:$0xf0]  ;;  %7071 = vmatpush.bf16.msrb.mxu0 %v10334_v14  ;;  %v10574_v50 = vor.u32 %v14684_v20, %v10571_v40  ;;  %v14616_v51 = vld [vmem:[%s15947_s14 + $0x464] sm:$0xf]  ;;  %v6857_v20 = vpop.f32.mrf.mxu3  ;;  %v6833_v23 = vpop.f32.mrf.mxu1 }
 0x171   : > { %7084 = vmatpush.bf16.msrb.mxu1 %v10462_v16  ;;  %v10299_v53 = vld [vmem:[%s15947_s14 + $0x470] sm:$0xf0]  ;;  %v14648_v54 = vld [vmem:[%s15947_s14 + $0x564] sm:$0xf]  ;;  %v10702_v55 = vor.u32 %v14716_v52, %v10699_v41  ;;  %v6820_v52 = vpop.f32.mrf.mxu0 }
 0x172   : > { %7097 = vmatpush.bf16.msrb.mxu2 %v10590_v62  ;;  %v10427_v57 = vld [vmem:[%s15947_s14 + $0x570] sm:$0xf0]  ;;  %v14680_v58 = vld [vmem:[%s15947_s14 + $0x664] sm:$0xf]  ;;  %v10302_v4 = vor.u32 %v14616_v51, %v10299_v53 }
 0x173   : > { %7110 = vmatpush.bf16.msrb.mxu3 %v10718_v35  ;;  %v10555_v0 = vld [vmem:[%s15947_s14 + $0x670] sm:$0xf0]  ;;  %v14712_v59 = vld [vmem:[%s15947_s14 + $0x764] sm:$0xf]  ;;  %v10430_v5 = vor.u32 %v14648_v54, %v10427_v57 }
 0x174   : > { %v10683_v2 = vld [vmem:[%s15947_s14 + $0x770] sm:$0xf0]  ;;  %7072 = vmatpush.bf16.msrb.mxu0 %v10318_v46  ;;  %v10558_v10 = vor.u32 %v14680_v58, %v10555_v0  ;;  %v14612_v11 = vld [vmem:[%s15947_s14 + $0x444] sm:$0xf]  ;;  %v16756_v46 = vadd.f32 %v6857_v20, %v6845_v36 }
 0x175   : > { %7085 = vmatpush.bf16.msrb.mxu1 %v10446_v49  ;;  %v10283_v14 = vld [vmem:[%s15947_s14 + $0x450] sm:$0xf0]  ;;  %v14644_v16 = vld [vmem:[%s15947_s14 + $0x544] sm:$0xf]  ;;  %v10686_v62 = vor.u32 %v14712_v59, %v10683_v2 }
 0x176   : > { %7098 = vmatpush.bf16.msrb.mxu2 %v10574_v50  ;;  %v10411_v24 = vld [vmem:[%s15947_s14 + $0x550] sm:$0xf0]  ;;  %v14676_v30 = vld [vmem:[%s15947_s14 + $0x644] sm:$0xf]  ;;  %v10286_v41 = vor.u32 %v14612_v11, %v10283_v14 }
 0x177   : > { %7111 = vmatpush.bf16.msrb.mxu3 %v10702_v55  ;;  %v10539_v35 = vld [vmem:[%s15947_s14 + $0x650] sm:$0xf0]  ;;  %v14708_v40 = vld [vmem:[%s15947_s14 + $0x744] sm:$0xf]  ;;  %v10414_v48 = vor.u32 %v14644_v16, %v10411_v24 }
 0x178   : > { %v10667_v61 = vld [vmem:[%s15947_s14 + $0x750] sm:$0xf0]  ;;  %7073 = vmatpush.bf16.msrb.mxu0 %v10302_v4  ;;  %v10542_v49 = vor.u32 %v14676_v30, %v10539_v35  ;;  %v14608_v50 = vld [vmem:[%s15947_s14 + $0x424] sm:$0xf]  ;;  %v6846_v35 = vpop.f32.mrf.mxu2 }
 0x179   : > { %7086 = vmatpush.bf16.msrb.mxu1 %v10430_v5  ;;  %v10267_v51 = vld [vmem:[%s15947_s14 + $0x430] sm:$0xf0]  ;;  %v14640_v53 = vld [vmem:[%s15947_s14 + $0x524] sm:$0xf]  ;;  %v10670_v54 = vor.u32 %v14708_v40, %v10667_v61  ;;  %v6859_v61 = vpop.f32.mrf.mxu3 }
 0x17a   : > { %7099 = vmatpush.bf16.msrb.mxu2 %v10558_v10  ;;  %v10395_v55 = vld [vmem:[%s15947_s14 + $0x530] sm:$0xf0]  ;;  %v14672_v56 = vld [vmem:[%s15947_s14 + $0x624] sm:$0xf]  ;;  %v10270_v59 = vor.u32 %v14608_v50, %v10267_v51 }
 0x17b   : > { %7112 = vmatpush.bf16.msrb.mxu3 %v10686_v62  ;;  %v10523_v57 = vld [vmem:[%s15947_s14 + $0x630] sm:$0xf0]  ;;  %v14704_v58 = vld [vmem:[%s15947_s14 + $0x724] sm:$0xf]  ;;  %v10398_v5 = vor.u32 %v14640_v53, %v10395_v55 }
 0x17c   : > { %v10651_v0 = vld [vmem:[%s15947_s14 + $0x730] sm:$0xf0]  ;;  %7074 = vmatpush.bf16.msrb.mxu0 %v10286_v41  ;;  %v14604_v2 = vld [vmem:[%s15947_s14 + $0x404] sm:$0xf]  ;;  %v10526_v10 = vor.u32 %v14672_v56, %v10523_v57 }
 0x17d   : > { %v10251_v4 = vld [vmem:[%s15947_s14 + $0x410] sm:$0xf0]  ;;  %7087 = vmatpush.bf16.msrb.mxu1 %v10414_v48  ;;  %v14636_v11 = vld [vmem:[%s15947_s14 + $0x504] sm:$0xf]  ;;  %v10654_v62 = vor.u32 %v14704_v58, %v10651_v0 }
 0x17e   : > { %7100 = vmatpush.bf16.msrb.mxu2 %v10542_v49  ;;  %v10379_v14 = vld [vmem:[%s15947_s14 + $0x510] sm:$0xf0]  ;;  %v14668_v16 = vld [vmem:[%s15947_s14 + $0x604] sm:$0xf]  ;;  %v10254_v52 = vor.u32 %v14604_v2, %v10251_v4 }
 0x17f   : > { %7113 = vmatpush.bf16.msrb.mxu3 %v10670_v54  ;;  %v10507_v21 = vld [vmem:[%s15947_s14 + $0x610] sm:$0xf0]  ;;  %v14700_v24 = vld [vmem:[%s15947_s14 + $0x704] sm:$0xf]  ;;  %v10382_v49 = vor.u32 %v14636_v11, %v10379_v14 }
 0x180   : > { %v10635_v30 = vld [vmem:[%s15947_s14 + $0x710] sm:$0xf0]  ;;  %v14760_v36 = vld [vmem:[%s15947_s14 + $0x8e4] sm:$0xf]  ;;  %7075 = vmatpush.bf16.msrb.mxu0 %v10270_v59  ;;  %v10510_v50 = vor.u32 %v14668_v16, %v10507_v21 }
 0x181   : > { %v10875_v20 = vld [vmem:[%s15947_s14 + $0x8f0] sm:$0xf0]  ;;  %v14792_v40 = vld [vmem:[%s15947_s14 + $0x9e4] sm:$0xf]  ;;  %7088 = vmatpush.bf16.msrb.mxu1 %v10398_v5  ;;  %v10638_v54 = vor.u32 %v14700_v24, %v10635_v30 }
 0x182   : > { %v11003_v41 = vld [vmem:[%s15947_s14 + $0x9f0] sm:$0xf0]  ;;  %v14824_v23 = vld [vmem:[%s15947_s14 + $0xae4] sm:$0xf]  ;;  %7101 = vmatpush.bf16.msrb.mxu2 %v10526_v10  ;;  %v10878_v55 = vor.u32 %v14760_v36, %v10875_v20 }
 0x183   : > { %v11131_v48 = vld [vmem:[%s15947_s14 + $0xaf0] sm:$0xf0]  ;;  %v14856_v51 = vld [vmem:[%s15947_s14 + $0xbe4] sm:$0xf]  ;;  %7114 = vmatpush.bf16.msrb.mxu3 %v10654_v62  ;;  %v11006_v56 = vor.u32 %v14792_v40, %v11003_v41 }
 0x184   : > { %v11259_v53 = vld [vmem:[%s15947_s14 + $0xbf0] sm:$0xf0]  ;;  %v11134_v57 = vor.u32 %v14824_v23, %v11131_v48  ;;  %v14756_v58 = vld [vmem:[%s15947_s14 + $0x8c4] sm:$0xf]  ;;  %7076 = vmatpush.bf16.msrb.mxu0 %v10254_v52 }
 0x185   : > { %v10859_v0 = vld [vmem:[%s15947_s14 + $0x8d0] sm:$0xf0]  ;;  %v14788_v59 = vld [vmem:[%s15947_s14 + $0x9c4] sm:$0xf]  ;;  %v11262_v2 = vor.u32 %v14856_v51, %v11259_v53  ;;  %7089 = vmatpush.bf16.msrb.mxu1 %v10382_v49 }
 0x186   : > { %v10987_v4 = vld [vmem:[%s15947_s14 + $0x9d0] sm:$0xf0]  ;;  %v14820_v5 = vld [vmem:[%s15947_s14 + $0xac4] sm:$0xf]  ;;  %7102 = vmatpush.bf16.msrb.mxu2 %v10510_v50  ;;  %v10862_v16 = vor.u32 %v14756_v58, %v10859_v0  ;;  %v6870_v58 = vpop.f32.mrf.mxu0 }
 0x187   : > { %v11115_v10 = vld [vmem:[%s15947_s14 + $0xad0] sm:$0xf0]  ;;  %v14852_v11 = vld [vmem:[%s15947_s14 + $0xbc4] sm:$0xf]  ;;  %7115 = vmatpush.bf16.msrb.mxu3 %v10638_v54  ;;  %v10990_v62 = vor.u32 %v14788_v59, %v10987_v4  ;;  %7077 = vmatmul.bf16.vlgmr.msrb.gmra.mxu0 %v16142_v42 }
 0x188   : > { %v11243_v14 = vld [vmem:[%s15947_s14 + $0xbd0] sm:$0xf0]  ;;  %7121 = vmatpush.bf16.msra.mxu0 %v10878_v55  ;;  %v11118_v21 = vor.u32 %v14820_v5, %v11115_v10  ;;  %v14752_v24 = vld [vmem:[%s15947_s14 + $0x8a4] sm:$0xf]  ;;  %7090 = vmatmul.bf16.vlgmr.msrb.gmra.mxu1 %v16146_v45  ;;  %v6883_v5 = vpop.f32.mrf.mxu1 }
 0x189   : > { %7134 = vmatpush.bf16.msra.mxu1 %v11006_v56  ;;  %v10843_v30 = vld [vmem:[%s15947_s14 + $0x8b0] sm:$0xf0]  ;;  %v14784_v35 = vld [vmem:[%s15947_s14 + $0x9a4] sm:$0xf]  ;;  %v11246_v36 = vor.u32 %v14852_v11, %v11243_v14  ;;  %7103 = vmatmul.bf16.vlgmr.msrb.gmra.mxu2 %v16138_v39 }
 0x18a   : > { %7147 = vmatpush.bf16.msra.mxu2 %v11134_v57  ;;  %v10971_v20 = vld [vmem:[%s15947_s14 + $0x9b0] sm:$0xf0]  ;;  %v14816_v40 = vld [vmem:[%s15947_s14 + $0xaa4] sm:$0xf]  ;;  %7116 = vmatmul.bf16.vlgmr.msrb.gmra.mxu3 %v16144_v43  ;;  %v10846_v23 = vor.u32 %v14752_v24, %v10843_v30 }
 0x18b   : > { %7160 = vmatpush.bf16.msra.mxu3 %v11262_v2  ;;  %v11099_v61 = vld [vmem:[%s15947_s14 + $0xab0] sm:$0xf0]  ;;  %v14848_v52 = vld [vmem:[%s15947_s14 + $0xba4] sm:$0xf]  ;;  %v10974_v48 = vor.u32 %v14784_v35, %v10971_v20  ;;  %v6871_v2 = vadd.f32 %v6870_v58, %v16756_v46 }
 0x18c   : > { %v11227_v41 = vld [vmem:[%s15947_s14 + $0xbb0] sm:$0xf0]  ;;  %7122 = vmatpush.bf16.msra.mxu0 %v10862_v16  ;;  %v11102_v49 = vor.u32 %v14816_v40, %v11099_v61  ;;  %v14748_v50 = vld [vmem:[%s15947_s14 + $0x884] sm:$0xf] }
 0x18d   : > { %7135 = vmatpush.bf16.msra.mxu1 %v10990_v62  ;;  %v10827_v51 = vld [vmem:[%s15947_s14 + $0x890] sm:$0xf0]  ;;  %v14780_v53 = vld [vmem:[%s15947_s14 + $0x984] sm:$0xf]  ;;  %v11230_v54 = vor.u32 %v14848_v52, %v11227_v41  ;;  %v6884_v24 = vadd.f32 %v6883_v5, %v6871_v2 }
 0x18e   : > { %7148 = vmatpush.bf16.msra.mxu2 %v11118_v21  ;;  %v10955_v55 = vld [vmem:[%s15947_s14 + $0x990] sm:$0xf0]  ;;  %v14812_v56 = vld [vmem:[%s15947_s14 + $0xa84] sm:$0xf]  ;;  %v10830_v4 = vor.u32 %v14748_v50, %v10827_v51  ;;  %v6896_v50 = vpop.f32.mrf.mxu2 }
 0x18f   : > { %7161 = vmatpush.bf16.msra.mxu3 %v11246_v36  ;;  %v11083_v57 = vld [vmem:[%s15947_s14 + $0xa90] sm:$0xf0]  ;;  %v14844_v0 = vld [vmem:[%s15947_s14 + $0xb84] sm:$0xf]  ;;  %v10958_v10 = vor.u32 %v14780_v53, %v10955_v55  ;;  %v6897_v55 = vadd.f32 %v6896_v50, %v6884_v24 }
 0x190   : > { %v11211_v59 = vld [vmem:[%s15947_s14 + $0xb90] sm:$0xf0]  ;;  %7123 = vmatpush.bf16.msra.mxu0 %v10846_v23  ;;  %v11086_v11 = vor.u32 %v14812_v56, %v11083_v57  ;;  %v14744_v14 = vld [vmem:[%s15947_s14 + $0x864] sm:$0xf]  ;;  %v6909_v56 = vpop.f32.mrf.mxu3  ;;  %v6885_v2 = vpop.f32.mrf.mxu1 }
 0x191   : > { %7136 = vmatpush.bf16.msra.mxu1 %v10974_v48  ;;  %v10811_v16 = vld [vmem:[%s15947_s14 + $0x870] sm:$0xf0]  ;;  %v14776_v62 = vld [vmem:[%s15947_s14 + $0x964] sm:$0xf]  ;;  %v11214_v21 = vor.u32 %v14844_v0, %v11211_v59  ;;  %v6872_v0 = vpop.f32.mrf.mxu0 }
 0x192   : > { %7149 = vmatpush.bf16.msra.mxu2 %v11102_v49  ;;  %v10939_v30 = vld [vmem:[%s15947_s14 + $0x970] sm:$0xf0]  ;;  %v14808_v35 = vld [vmem:[%s15947_s14 + $0xa64] sm:$0xf]  ;;  %v10814_v40 = vor.u32 %v14744_v14, %v10811_v16 }
 0x193   : > { %7162 = vmatpush.bf16.msra.mxu3 %v11230_v54  ;;  %v11067_v46 = vld [vmem:[%s15947_s14 + $0xa70] sm:$0xf0]  ;;  %v14840_v36 = vld [vmem:[%s15947_s14 + $0xb64] sm:$0xf]  ;;  %v10942_v61 = vor.u32 %v14776_v62, %v10939_v30 }
 0x194   : > { %v11195_v20 = vld [vmem:[%s15947_s14 + $0xb70] sm:$0xf0]  ;;  %7124 = vmatpush.bf16.msra.mxu0 %v10830_v4  ;;  %v11070_v52 = vor.u32 %v14808_v35, %v11067_v46  ;;  %v14740_v41 = vld [vmem:[%s15947_s14 + $0x844] sm:$0xf]  ;;  %v16827_v4 = vadd.f32 %v6909_v56, %v6897_v55 }
 0x195   : > { %7137 = vmatpush.bf16.msra.mxu1 %v10958_v10  ;;  %v10795_v23 = vld [vmem:[%s15947_s14 + $0x850] sm:$0xf0]  ;;  %v14772_v48 = vld [vmem:[%s15947_s14 + $0x944] sm:$0xf]  ;;  %v11198_v49 = vor.u32 %v14840_v36, %v11195_v20 }
 0x196   : > { %7150 = vmatpush.bf16.msra.mxu2 %v11086_v11  ;;  %v10923_v51 = vld [vmem:[%s15947_s14 + $0x950] sm:$0xf0]  ;;  %v14804_v53 = vld [vmem:[%s15947_s14 + $0xa44] sm:$0xf]  ;;  %v10798_v59 = vor.u32 %v14740_v41, %v10795_v23 }
 0x197   : > { %7163 = vmatpush.bf16.msra.mxu3 %v11214_v21  ;;  %v11051_v54 = vld [vmem:[%s15947_s14 + $0xa50] sm:$0xf0]  ;;  %v14836_v57 = vld [vmem:[%s15947_s14 + $0xb44] sm:$0xf]  ;;  %v10926_v5 = vor.u32 %v14772_v48, %v10923_v51 }
 0x198   : > { %v11179_v58 = vld [vmem:[%s15947_s14 + $0xb50] sm:$0xf0]  ;;  %7125 = vmatpush.bf16.msra.mxu0 %v10814_v40  ;;  %v11054_v10 = vor.u32 %v14804_v53, %v11051_v54  ;;  %v14736_v11 = vld [vmem:[%s15947_s14 + $0x824] sm:$0xf]  ;;  %v6898_v54 = vpop.f32.mrf.mxu2 }
 0x199   : > { %7138 = vmatpush.bf16.msra.mxu1 %v10942_v61  ;;  %v10779_v14 = vld [vmem:[%s15947_s14 + $0x830] sm:$0xf0]  ;;  %v14768_v16 = vld [vmem:[%s15947_s14 + $0x924] sm:$0xf]  ;;  %v11182_v62 = vor.u32 %v14836_v57, %v11179_v58  ;;  %v6911_v58 = vpop.f32.mrf.mxu3 }
 0x19a   : > { %7151 = vmatpush.bf16.msra.mxu2 %v11070_v52  ;;  %v10907_v21 = vld [vmem:[%s15947_s14 + $0x930] sm:$0xf0]  ;;  %v14800_v24 = vld [vmem:[%s15947_s14 + $0xa24] sm:$0xf]  ;;  %v10782_v36 = vor.u32 %v14736_v11, %v10779_v14 }
 0x19b   : > { %7164 = vmatpush.bf16.msra.mxu3 %v11198_v49  ;;  %v11035_v30 = vld [vmem:[%s15947_s14 + $0xa30] sm:$0xf0]  ;;  %v14832_v35 = vld [vmem:[%s15947_s14 + $0xb24] sm:$0xf]  ;;  %v10910_v61 = vor.u32 %v14768_v16, %v10907_v21 }
 0x19c   : > { %v11163_v46 = vld [vmem:[%s15947_s14 + $0xb30] sm:$0xf0]  ;;  %7126 = vmatpush.bf16.msra.mxu0 %v10798_v59  ;;  %v14732_v20 = vld [vmem:[%s15947_s14 + $0x804] sm:$0xf]  ;;  %v11038_v52 = vor.u32 %v14800_v24, %v11035_v30 }
 0x19d   : > { %v10763_v40 = vld [vmem:[%s15947_s14 + $0x810] sm:$0xf0]  ;;  %7139 = vmatpush.bf16.msra.mxu1 %v10926_v5  ;;  %v14764_v41 = vld [vmem:[%s15947_s14 + $0x904] sm:$0xf]  ;;  %v11166_v49 = vor.u32 %v14832_v35, %v11163_v46 }
 0x19e   : > { %7152 = vmatpush.bf16.msra.mxu2 %v11054_v10  ;;  %v10891_v23 = vld [vmem:[%s15947_s14 + $0x910] sm:$0xf0]  ;;  %v14796_v48 = vld [vmem:[%s15947_s14 + $0xa04] sm:$0xf]  ;;  %v10766_v0 = vor.u32 %v14732_v20, %v10763_v40 }
 0x19f   : > { %7165 = vmatpush.bf16.msra.mxu3 %v11182_v62  ;;  %v11019_v50 = vld [vmem:[%s15947_s14 + $0xa10] sm:$0xf0]  ;;  %v14828_v51 = vld [vmem:[%s15947_s14 + $0xb04] sm:$0xf]  ;;  %v10894_v10 = vor.u32 %v14764_v41, %v10891_v23 }
 0x1a0   : > { %v11147_v53 = vld [vmem:[%s15947_s14 + $0xb10] sm:$0xf0]  ;;  %v14888_v55 = vld [vmem:[%s15947_s14 + $0xce4] sm:$0xf]  ;;  %7127 = vmatpush.bf16.msra.mxu0 %v10782_v36  ;;  %v11022_v11 = vor.u32 %v14796_v48, %v11019_v50 }
 0x1a1   : > { %v11387_v56 = vld [vmem:[%s15947_s14 + $0xcf0] sm:$0xf0]  ;;  %v14920_v57 = vld [vmem:[%s15947_s14 + $0xde4] sm:$0xf]  ;;  %7140 = vmatpush.bf16.msra.mxu1 %v10910_v61  ;;  %v11150_v62 = vor.u32 %v14828_v51, %v11147_v53 }
 0x1a2   : > { %v11515_v59 = vld [vmem:[%s15947_s14 + $0xdf0] sm:$0xf0]  ;;  %v14952_v2 = vld [vmem:[%s15947_s14 + $0xee4] sm:$0xf]  ;;  %7153 = vmatpush.bf16.msra.mxu2 %v11038_v52  ;;  %v11390_v21 = vor.u32 %v14888_v55, %v11387_v56 }
 0x1a3   : > { %v11643_v5 = vld [vmem:[%s15947_s14 + $0xef0] sm:$0xf0]  ;;  %v14984_v14 = vld [vmem:[%s15947_s14 + $0xfe4] sm:$0xf]  ;;  %7166 = vmatpush.bf16.msra.mxu3 %v11166_v49  ;;  %v11518_v24 = vor.u32 %v14920_v57, %v11515_v59 }
 0x1a4   : > { %v11771_v16 = vld [vmem:[%s15947_s14 + $0xff0] sm:$0xf0]  ;;  %v11646_v30 = vor.u32 %v14952_v2, %v11643_v5  ;;  %v14884_v35 = vld [vmem:[%s15947_s14 + $0xcc4] sm:$0xf]  ;;  %7128 = vmatpush.bf16.msra.mxu0 %v10766_v0 }
 0x1a5   : > { %v11371_v46 = vld [vmem:[%s15947_s14 + $0xcd0] sm:$0xf0]  ;;  %v14916_v36 = vld [vmem:[%s15947_s14 + $0xdc4] sm:$0xf]  ;;  %v11774_v20 = vor.u32 %v14984_v14, %v11771_v16  ;;  %7141 = vmatpush.bf16.msra.mxu1 %v10894_v10 }
 0x1a6   : > { %v11499_v40 = vld [vmem:[%s15947_s14 + $0xdd0] sm:$0xf0]  ;;  %v14948_v61 = vld [vmem:[%s15947_s14 + $0xec4] sm:$0xf]  ;;  %7154 = vmatpush.bf16.msra.mxu2 %v11022_v11  ;;  %v11374_v48 = vor.u32 %v14884_v35, %v11371_v46 }
 0x1a7   : > { %v11627_v52 = vld [vmem:[%s15947_s14 + $0xed0] sm:$0xf0]  ;;  %v14980_v41 = vld [vmem:[%s15947_s14 + $0xfc4] sm:$0xf]  ;;  %7167 = vmatpush.bf16.msra.mxu3 %v11150_v62  ;;  %v11502_v49 = vor.u32 %v14916_v36, %v11499_v40  ;;  %7129 = vmatmul.bf16.vlgmr.msra.gmra.mxu0 %v16222_v25  ;;  %v6922_v35 = vpop.f32.mrf.mxu0 }
 0x1a8   : > { %v11755_v23 = vld [vmem:[%s15947_s14 + $0xfd0] sm:$0xf0]  ;;  %7173 = vmatpush.bf16.msrb.mxu0 %v11390_v21  ;;  %v11630_v50 = vor.u32 %v14948_v61, %v11627_v52  ;;  %v14880_v51 = vld [vmem:[%s15947_s14 + $0xca4] sm:$0xf]  ;;  %7142 = vmatmul.bf16.vlgmr.msra.gmra.mxu1 %v16233_v32  ;;  %v6935_v61 = vpop.f32.mrf.mxu1 }
 0x1a9   : > { %7186 = vmatpush.bf16.msrb.mxu1 %v11518_v24  ;;  %v11355_v53 = vld [vmem:[%s15947_s14 + $0xcb0] sm:$0xf0]  ;;  %v14912_v54 = vld [vmem:[%s15947_s14 + $0xda4] sm:$0xf]  ;;  %v11758_v55 = vor.u32 %v14980_v41, %v11755_v23  ;;  %7155 = vmatmul.bf16.vlgmr.msra.gmra.mxu2 %v16229_v31 }
 0x1aa   : > { %7199 = vmatpush.bf16.msrb.mxu2 %v11646_v30  ;;  %v11483_v56 = vld [vmem:[%s15947_s14 + $0xdb0] sm:$0xf0]  ;;  %v14944_v57 = vld [vmem:[%s15947_s14 + $0xea4] sm:$0xf]  ;;  %7168 = vmatmul.bf16.vlgmr.msra.gmra.mxu3 %v16239_v19  ;;  %v11358_v2 = vor.u32 %v14880_v51, %v11355_v53 }
 0x1ab   : > { %7212 = vmatpush.bf16.msrb.mxu3 %v11774_v20  ;;  %v11611_v58 = vld [vmem:[%s15947_s14 + $0xeb0] sm:$0xf0]  ;;  %v14976_v0 = vld [vmem:[%s15947_s14 + $0xfa4] sm:$0xf]  ;;  %v11486_v5 = vor.u32 %v14912_v54, %v11483_v56  ;;  %v6923_v20 = vadd.f32 %v6922_v35, %v16827_v4 }
 0x1ac   : > { %v11739_v59 = vld [vmem:[%s15947_s14 + $0xfb0] sm:$0xf0]  ;;  %7174 = vmatpush.bf16.msrb.mxu0 %v11374_v48  ;;  %v11614_v10 = vor.u32 %v14944_v57, %v11611_v58  ;;  %v14876_v11 = vld [vmem:[%s15947_s14 + $0xc84] sm:$0xf] }
 0x1ad   : > { %7187 = vmatpush.bf16.msrb.mxu1 %v11502_v49  ;;  %v11339_v14 = vld [vmem:[%s15947_s14 + $0xc90] sm:$0xf0]  ;;  %v14908_v16 = vld [vmem:[%s15947_s14 + $0xd84] sm:$0xf]  ;;  %v11742_v62 = vor.u32 %v14976_v0, %v11739_v59  ;;  %v6936_v51 = vadd.f32 %v6935_v61, %v6923_v20 }
 0x1ae   : > { %7200 = vmatpush.bf16.msrb.mxu2 %v11630_v50  ;;  %v11467_v21 = vld [vmem:[%s15947_s14 + $0xd90] sm:$0xf0]  ;;  %v14940_v24 = vld [vmem:[%s15947_s14 + $0xe84] sm:$0xf]  ;;  %v11342_v40 = vor.u32 %v14876_v11, %v11339_v14  ;;  %v6948_v11 = vpop.f32.mrf.mxu2 }
 0x1af   : > { %7213 = vmatpush.bf16.msrb.mxu3 %v11758_v55  ;;  %v11595_v30 = vld [vmem:[%s15947_s14 + $0xe90] sm:$0xf0]  ;;  %v14972_v46 = vld [vmem:[%s15947_s14 + $0xf84] sm:$0xf]  ;;  %v11470_v52 = vor.u32 %v14908_v16, %v11467_v21  ;;  %v6949_v21 = vadd.f32 %v6948_v11, %v6936_v51 }
 0x1b0   : > { %v11723_v36 = vld [vmem:[%s15947_s14 + $0xf90] sm:$0xf0]  ;;  %7175 = vmatpush.bf16.msrb.mxu0 %v11358_v2  ;;  %v11598_v41 = vor.u32 %v14940_v24, %v11595_v30  ;;  %v14872_v23 = vld [vmem:[%s15947_s14 + $0xc64] sm:$0xf]  ;;  %v6961_v24 = vpop.f32.mrf.mxu3  ;;  %v6937_v20 = vpop.f32.mrf.mxu1 }
 0x1b1   : > { %7188 = vmatpush.bf16.msrb.mxu1 %v11486_v5  ;;  %v11323_v48 = vld [vmem:[%s15947_s14 + $0xc70] sm:$0xf0]  ;;  %v14904_v49 = vld [vmem:[%s15947_s14 + $0xd64] sm:$0xf]  ;;  %v11726_v50 = vor.u32 %v14972_v46, %v11723_v36  ;;  %v6924_v46 = vpop.f32.mrf.mxu0 }
 0x1b2   : > { %7201 = vmatpush.bf16.msrb.mxu2 %v11614_v10  ;;  %v11451_v53 = vld [vmem:[%s15947_s14 + $0xd70] sm:$0xf0]  ;;  %v14936_v54 = vld [vmem:[%s15947_s14 + $0xe64] sm:$0xf]  ;;  %v11326_v57 = vor.u32 %v14872_v23, %v11323_v48 }
 0x1b3   : > { %7214 = vmatpush.bf16.msrb.mxu3 %v11742_v62  ;;  %v11579_v4 = vld [vmem:[%s15947_s14 + $0xe70] sm:$0xf0]  ;;  %v14968_v55 = vld [vmem:[%s15947_s14 + $0xf64] sm:$0xf]  ;;  %v11454_v58 = vor.u32 %v14904_v49, %v11451_v53 }
 0x1b4   : > { %v11707_v56 = vld [vmem:[%s15947_s14 + $0xf70] sm:$0xf0]  ;;  %7176 = vmatpush.bf16.msrb.mxu0 %v11342_v40  ;;  %v11582_v0 = vor.u32 %v14936_v54, %v11579_v4  ;;  %v14868_v59 = vld [vmem:[%s15947_s14 + $0xc44] sm:$0xf]  ;;  %v16898_v40 = vadd.f32 %v6961_v24, %v6949_v21 }
 0x1b5   : > { %7189 = vmatpush.bf16.msrb.mxu1 %v11470_v52  ;;  %v11307_v2 = vld [vmem:[%s15947_s14 + $0xc50] sm:$0xf0]  ;;  %v14900_v5 = vld [vmem:[%s15947_s14 + $0xd44] sm:$0xf]  ;;  %v11710_v10 = vor.u32 %v14968_v55, %v11707_v56 }
 0x1b6   : > { %7202 = vmatpush.bf16.msrb.mxu2 %v11598_v41  ;;  %v11435_v14 = vld [vmem:[%s15947_s14 + $0xd50] sm:$0xf0]  ;;  %v14932_v16 = vld [vmem:[%s15947_s14 + $0xe44] sm:$0xf]  ;;  %v11310_v36 = vor.u32 %v14868_v59, %v11307_v2 }
 0x1b7   : > { %7215 = vmatpush.bf16.msrb.mxu3 %v11726_v50  ;;  %v11563_v62 = vld [vmem:[%s15947_s14 + $0xe50] sm:$0xf0]  ;;  %v14964_v30 = vld [vmem:[%s15947_s14 + $0xf44] sm:$0xf]  ;;  %v11438_v61 = vor.u32 %v14900_v5, %v11435_v14 }
 0x1b8   : > { %v11691_v35 = vld [vmem:[%s15947_s14 + $0xf50] sm:$0xf0]  ;;  %7177 = vmatpush.bf16.msrb.mxu0 %v11326_v57  ;;  %v11566_v52 = vor.u32 %v14932_v16, %v11563_v62  ;;  %v14864_v41 = vld [vmem:[%s15947_s14 + $0xc24] sm:$0xf]  ;;  %v6950_v62 = vpop.f32.mrf.mxu2 }
 0x1b9   : > { %7190 = vmatpush.bf16.msrb.mxu1 %v11454_v58  ;;  %v11291_v23 = vld [vmem:[%s15947_s14 + $0xc30] sm:$0xf0]  ;;  %v14896_v48 = vld [vmem:[%s15947_s14 + $0xd24] sm:$0xf]  ;;  %v11694_v49 = vor.u32 %v14964_v30, %v11691_v35  ;;  %v6963_v35 = vpop.f32.mrf.mxu3 }
 0x1ba   : > { %7203 = vmatpush.bf16.msrb.mxu2 %v11582_v0  ;;  %v11419_v50 = vld [vmem:[%s15947_s14 + $0xd30] sm:$0xf0]  ;;  %v14928_v51 = vld [vmem:[%s15947_s14 + $0xe24] sm:$0xf]  ;;  %v11294_v55 = vor.u32 %v14864_v41, %v11291_v23 }
 0x1bb   : > { %7216 = vmatpush.bf16.msrb.mxu3 %v11710_v10  ;;  %v11547_v53 = vld [vmem:[%s15947_s14 + $0xe30] sm:$0xf0]  ;;  %v14960_v54 = vld [vmem:[%s15947_s14 + $0xf24] sm:$0xf]  ;;  %v11422_v58 = vor.u32 %v14896_v48, %v11419_v50 }
 0x1bc   : > { %v11675_v4 = vld [vmem:[%s15947_s14 + $0xf30] sm:$0xf0]  ;;  %7178 = vmatpush.bf16.msrb.mxu0 %v11310_v36  ;;  %v14860_v56 = vld [vmem:[%s15947_s14 + $0xc04] sm:$0xf]  ;;  %v11550_v0 = vor.u32 %v14928_v51, %v11547_v53 }
 0x1bd   : > { %v11275_v57 = vld [vmem:[%s15947_s14 + $0xc10] sm:$0xf0]  ;;  %7191 = vmatpush.bf16.msrb.mxu1 %v11438_v61  ;;  %v14892_v59 = vld [vmem:[%s15947_s14 + $0xd04] sm:$0xf]  ;;  %v11678_v10 = vor.u32 %v14960_v54, %v11675_v4 }
 0x1be   : > { %7204 = vmatpush.bf16.msrb.mxu2 %v11566_v52  ;;  %v11403_v2 = vld [vmem:[%s15947_s14 + $0xd10] sm:$0xf0]  ;;  %v14924_v5 = vld [vmem:[%s15947_s14 + $0xe04] sm:$0xf]  ;;  %v11278_v46 = vor.u32 %v14860_v56, %v11275_v57 }
 0x1bf   : > { %7217 = vmatpush.bf16.msrb.mxu3 %v11694_v49  ;;  %v11531_v11 = vld [vmem:[%s15947_s14 + $0xe10] sm:$0xf0]  ;;  %v14956_v14 = vld [vmem:[%s15947_s14 + $0xf04] sm:$0xf]  ;;  %v11406_v52 = vor.u32 %v14892_v59, %v11403_v2 }
 0x1c0   : > { %v11659_v16 = vld [vmem:[%s15947_s14 + $0xf10] sm:$0xf0]  ;;  %v15016_v21 = vld [vmem:[%s15947_s14 + $0x10e4] sm:$0xf]  ;;  %7179 = vmatpush.bf16.msrb.mxu0 %v11294_v55  ;;  %v11534_v41 = vor.u32 %v14924_v5, %v11531_v11 }
 0x1c1   : > { %v11899_v24 = vld [vmem:[%s15947_s14 + $0x10f0] sm:$0xf0]  ;;  %v15048_v30 = vld [vmem:[%s15947_s14 + $0x11e4] sm:$0xf]  ;;  %7192 = vmatpush.bf16.msrb.mxu1 %v11422_v58  ;;  %v11662_v49 = vor.u32 %v14956_v14, %v11659_v16 }
 0x1c2   : > { %v12027_v36 = vld [vmem:[%s15947_s14 + $0x11f0] sm:$0xf0]  ;;  %v15080_v20 = vld [vmem:[%s15947_s14 + $0x12e4] sm:$0xf]  ;;  %7205 = vmatpush.bf16.msrb.mxu2 %v11550_v0  ;;  %v11902_v50 = vor.u32 %v15016_v21, %v11899_v24 }
 0x1c3   : > { %v12155_v61 = vld [vmem:[%s15947_s14 + $0x12f0] sm:$0xf0]  ;;  %v15112_v23 = vld [vmem:[%s15947_s14 + $0x13e4] sm:$0xf]  ;;  %7218 = vmatpush.bf16.msrb.mxu3 %v11678_v10  ;;  %v12030_v51 = vor.u32 %v15048_v30, %v12027_v36 }
 0x1c4   : > { %v12283_v48 = vld [vmem:[%s15947_s14 + $0x13f0] sm:$0xf0]  ;;  %v12158_v53 = vor.u32 %v15080_v20, %v12155_v61  ;;  %v15012_v54 = vld [vmem:[%s15947_s14 + $0x10c4] sm:$0xf]  ;;  %7180 = vmatpush.bf16.msrb.mxu0 %v11278_v46 }
 0x1c5   : > { %v11883_v4 = vld [vmem:[%s15947_s14 + $0x10d0] sm:$0xf0]  ;;  %v15044_v55 = vld [vmem:[%s15947_s14 + $0x11c4] sm:$0xf]  ;;  %v12286_v56 = vor.u32 %v15112_v23, %v12283_v48  ;;  %7193 = vmatpush.bf16.msrb.mxu1 %v11406_v52 }
 0x1c6   : > { %v12011_v57 = vld [vmem:[%s15947_s14 + $0x11d0] sm:$0xf0]  ;;  %v15076_v58 = vld [vmem:[%s15947_s14 + $0x12c4] sm:$0xf]  ;;  %7206 = vmatpush.bf16.msrb.mxu2 %v11534_v41  ;;  %v11886_v5 = vor.u32 %v15012_v54, %v11883_v4  ;;  %v6974_v54 = vpop.f32.mrf.mxu0 }
 0x1c7   : > { %v12139_v0 = vld [vmem:[%s15947_s14 + $0x12d0] sm:$0xf0]  ;;  %v15108_v59 = vld [vmem:[%s15947_s14 + $0x13c4] sm:$0xf]  ;;  %7219 = vmatpush.bf16.msrb.mxu3 %v11662_v49  ;;  %v12014_v10 = vor.u32 %v15044_v55, %v12011_v57  ;;  %7181 = vmatmul.bf16.vlgmr.msrb.gmra.mxu0 %v16315_v29 }
 0x1c8   : > { %v12267_v2 = vld [vmem:[%s15947_s14 + $0x13d0] sm:$0xf0]  ;;  %7225 = vmatpush.bf16.msra.mxu0 %v11902_v50  ;;  %v12142_v11 = vor.u32 %v15076_v58, %v12139_v0  ;;  %v15008_v14 = vld [vmem:[%s15947_s14 + $0x10a4] sm:$0xf]  ;;  %7194 = vmatmul.bf16.vlgmr.msrb.gmra.mxu1 %v16326_v38  ;;  %v6987_v58 = vpop.f32.mrf.mxu1 }
 0x1c9   : > { %7238 = vmatpush.bf16.msra.mxu1 %v12030_v51  ;;  %v11867_v16 = vld [vmem:[%s15947_s14 + $0x10b0] sm:$0xf0]  ;;  %v15040_v62 = vld [vmem:[%s15947_s14 + $0x11a4] sm:$0xf]  ;;  %v12270_v21 = vor.u32 %v15108_v59, %v12267_v2  ;;  %7207 = vmatmul.bf16.vlgmr.msrb.gmra.mxu2 %v16322_v37 }
 0x1ca   : > { %7251 = vmatpush.bf16.msra.mxu2 %v12158_v53  ;;  %v11995_v24 = vld [vmem:[%s15947_s14 + $0x11b0] sm:$0xf0]  ;;  %v15072_v30 = vld [vmem:[%s15947_s14 + $0x12a4] sm:$0xf]  ;;  %7220 = vmatmul.bf16.vlgmr.msrb.gmra.mxu3 %v16332_v22  ;;  %v11870_v20 = vor.u32 %v15008_v14, %v11867_v16 }
 0x1cb   : > { %7264 = vmatpush.bf16.msra.mxu3 %v12286_v56  ;;  %v12123_v35 = vld [vmem:[%s15947_s14 + $0x12b0] sm:$0xf0]  ;;  %v15104_v46 = vld [vmem:[%s15947_s14 + $0x13a4] sm:$0xf]  ;;  %v11998_v61 = vor.u32 %v15040_v62, %v11995_v24  ;;  %v6975_v56 = vadd.f32 %v6974_v54, %v16898_v40 }
 0x1cc   : > { %v12251_v36 = vld [vmem:[%s15947_s14 + $0x13b0] sm:$0xf0]  ;;  %7226 = vmatpush.bf16.msra.mxu0 %v11886_v5  ;;  %v12126_v52 = vor.u32 %v15072_v30, %v12123_v35  ;;  %v15004_v41 = vld [vmem:[%s15947_s14 + $0x1084] sm:$0xf] }
 0x1cd   : > { %7239 = vmatpush.bf16.msra.mxu1 %v12014_v10  ;;  %v11851_v23 = vld [vmem:[%s15947_s14 + $0x1090] sm:$0xf0]  ;;  %v15036_v48 = vld [vmem:[%s15947_s14 + $0x1184] sm:$0xf]  ;;  %v12254_v49 = vor.u32 %v15104_v46, %v12251_v36  ;;  %v6988_v14 = vadd.f32 %v6987_v58, %v6975_v56 }
 0x1ce   : > { %7252 = vmatpush.bf16.msra.mxu2 %v12142_v11  ;;  %v11979_v50 = vld [vmem:[%s15947_s14 + $0x1190] sm:$0xf0]  ;;  %v15068_v51 = vld [vmem:[%s15947_s14 + $0x1284] sm:$0xf]  ;;  %v11854_v57 = vor.u32 %v15004_v41, %v11851_v23  ;;  %v7000_v41 = vpop.f32.mrf.mxu2 }
 0x1cf   : > { %7265 = vmatpush.bf16.msra.mxu3 %v12270_v21  ;;  %v12107_v53 = vld [vmem:[%s15947_s14 + $0x1290] sm:$0xf0]  ;;  %v15100_v4 = vld [vmem:[%s15947_s14 + $0x1384] sm:$0xf]  ;;  %v11982_v0 = vor.u32 %v15036_v48, %v11979_v50  ;;  %v7001_v50 = vadd.f32 %v7000_v41, %v6988_v14 }
 0x1d0   : > { %v12235_v55 = vld [vmem:[%s15947_s14 + $0x1390] sm:$0xf0]  ;;  %7227 = vmatpush.bf16.msra.mxu0 %v11870_v20  ;;  %v12110_v59 = vor.u32 %v15068_v51, %v12107_v53  ;;  %v15000_v2 = vld [vmem:[%s15947_s14 + $0x1064] sm:$0xf]  ;;  %v7013_v51 = vpop.f32.mrf.mxu3  ;;  %v6989_v56 = vpop.f32.mrf.mxu1 }
 0x1d1   : > { %7240 = vmatpush.bf16.msra.mxu1 %v11998_v61  ;;  %v11835_v5 = vld [vmem:[%s15947_s14 + $0x1070] sm:$0xf0]  ;;  %v15032_v10 = vld [vmem:[%s15947_s14 + $0x1164] sm:$0xf]  ;;  %v12238_v11 = vor.u32 %v15100_v4, %v12235_v55  ;;  %v6976_v4 = vpop.f32.mrf.mxu0 }
 0x1d2   : > { %7253 = vmatpush.bf16.msra.mxu2 %v12126_v52  ;;  %v11963_v16 = vld [vmem:[%s15947_s14 + $0x1170] sm:$0xf0]  ;;  %v15064_v62 = vld [vmem:[%s15947_s14 + $0x1264] sm:$0xf]  ;;  %v11838_v30 = vor.u32 %v15000_v2, %v11835_v5 }
 0x1d3   : > { %7266 = vmatpush.bf16.msra.mxu3 %v12254_v49  ;;  %v12091_v40 = vld [vmem:[%s15947_s14 + $0x1270] sm:$0xf0]  ;;  %v15096_v21 = vld [vmem:[%s15947_s14 + $0x1364] sm:$0xf]  ;;  %v11966_v35 = vor.u32 %v15032_v10, %v11963_v16 }
 0x1d4   : > { %v12219_v24 = vld [vmem:[%s15947_s14 + $0x1370] sm:$0xf0]  ;;  %7228 = vmatpush.bf16.msra.mxu0 %v11854_v57  ;;  %v12094_v46 = vor.u32 %v15064_v62, %v12091_v40  ;;  %v14996_v36 = vld [vmem:[%s15947_s14 + $0x1044] sm:$0xf]  ;;  %v16969_v57 = vadd.f32 %v7013_v51, %v7001_v50 }
 0x1d5   : > { %7241 = vmatpush.bf16.msra.mxu1 %v11982_v0  ;;  %v11819_v20 = vld [vmem:[%s15947_s14 + $0x1050] sm:$0xf0]  ;;  %v15028_v61 = vld [vmem:[%s15947_s14 + $0x1144] sm:$0xf]  ;;  %v12222_v52 = vor.u32 %v15096_v21, %v12219_v24 }
 0x1d6   : > { %7254 = vmatpush.bf16.msra.mxu2 %v12110_v59  ;;  %v11947_v23 = vld [vmem:[%s15947_s14 + $0x1150] sm:$0xf0]  ;;  %v15060_v48 = vld [vmem:[%s15947_s14 + $0x1244] sm:$0xf]  ;;  %v11822_v55 = vor.u32 %v14996_v36, %v11819_v20 }
 0x1d7   : > { %7267 = vmatpush.bf16.msra.mxu3 %v12238_v11  ;;  %v12075_v49 = vld [vmem:[%s15947_s14 + $0x1250] sm:$0xf0]  ;;  %v15092_v53 = vld [vmem:[%s15947_s14 + $0x1344] sm:$0xf]  ;;  %v11950_v58 = vor.u32 %v15028_v61, %v11947_v23 }
 0x1d8   : > { %v12203_v54 = vld [vmem:[%s15947_s14 + $0x1350] sm:$0xf0]  ;;  %7229 = vmatpush.bf16.msra.mxu0 %v11838_v30  ;;  %v12078_v0 = vor.u32 %v15060_v48, %v12075_v49  ;;  %v14992_v59 = vld [vmem:[%s15947_s14 + $0x1024] sm:$0xf]  ;;  %v7002_v49 = vpop.f32.mrf.mxu2 }
 0x1d9   : > { %7242 = vmatpush.bf16.msra.mxu1 %v11966_v35  ;;  %v11803_v2 = vld [vmem:[%s15947_s14 + $0x1030] sm:$0xf0]  ;;  %v15024_v5 = vld [vmem:[%s15947_s14 + $0x1124] sm:$0xf]  ;;  %v12206_v10 = vor.u32 %v15092_v53, %v12203_v54  ;;  %v7015_v54 = vpop.f32.mrf.mxu3 }
 0x1da   : > { %7255 = vmatpush.bf16.msra.mxu2 %v12094_v46  ;;  %v11931_v11 = vld [vmem:[%s15947_s14 + $0x1130] sm:$0xf0]  ;;  %v15056_v14 = vld [vmem:[%s15947_s14 + $0x1224] sm:$0xf]  ;;  %v11806_v21 = vor.u32 %v14992_v59, %v11803_v2 }
 0x1db   : > { %7268 = vmatpush.bf16.msra.mxu3 %v12222_v52  ;;  %v12059_v16 = vld [vmem:[%s15947_s14 + $0x1230] sm:$0xf0]  ;;  %v15088_v62 = vld [vmem:[%s15947_s14 + $0x1324] sm:$0xf]  ;;  %v11934_v35 = vor.u32 %v15024_v5, %v11931_v11 }
 0x1dc   : > { %v12187_v40 = vld [vmem:[%s15947_s14 + $0x1330] sm:$0xf0]  ;;  %7230 = vmatpush.bf16.msra.mxu0 %v11822_v55  ;;  %v14988_v24 = vld [vmem:[%s15947_s14 + $0x1004] sm:$0xf]  ;;  %v12062_v46 = vor.u32 %v15056_v14, %v12059_v16 }
 0x1dd   : > { %v11787_v30 = vld [vmem:[%s15947_s14 + $0x1010] sm:$0xf0]  ;;  %7243 = vmatpush.bf16.msra.mxu1 %v11950_v58  ;;  %v15020_v36 = vld [vmem:[%s15947_s14 + $0x1104] sm:$0xf]  ;;  %v12190_v52 = vor.u32 %v15088_v62, %v12187_v40 }
 0x1de   : > { %7256 = vmatpush.bf16.msra.mxu2 %v12078_v0  ;;  %v11915_v20 = vld [vmem:[%s15947_s14 + $0x1110] sm:$0xf0]  ;;  %v15052_v61 = vld [vmem:[%s15947_s14 + $0x1204] sm:$0xf]  ;;  %v11790_v4 = vor.u32 %v14988_v24, %v11787_v30 }
 0x1df   : > { %7269 = vmatpush.bf16.msra.mxu3 %v12206_v10  ;;  %v12043_v41 = vld [vmem:[%s15947_s14 + $0x1210] sm:$0xf0]  ;;  %v15084_v23 = vld [vmem:[%s15947_s14 + $0x1304] sm:$0xf]  ;;  %v11918_v0 = vor.u32 %v15020_v36, %v11915_v20 }
 0x1e0   : > { %v12171_v48 = vld [vmem:[%s15947_s14 + $0x1310] sm:$0xf0]  ;;  %v15144_v50 = vld [vmem:[%s15947_s14 + $0x14e4] sm:$0xf]  ;;  %7231 = vmatpush.bf16.msra.mxu0 %v11806_v21  ;;  %v12046_v59 = vor.u32 %v15052_v61, %v12043_v41 }
 0x1e1   : > { %v12411_v51 = vld [vmem:[%s15947_s14 + $0x14f0] sm:$0xf0]  ;;  %v15176_v53 = vld [vmem:[%s15947_s14 + $0x15e4] sm:$0xf]  ;;  %7244 = vmatpush.bf16.msra.mxu1 %v11934_v35  ;;  %v12174_v10 = vor.u32 %v15084_v23, %v12171_v48 }
 0x1e2   : > { %v12539_v55 = vld [vmem:[%s15947_s14 + $0x15f0] sm:$0xf0]  ;;  %v15208_v56 = vld [vmem:[%s15947_s14 + $0x16e4] sm:$0xf]  ;;  %7257 = vmatpush.bf16.msra.mxu2 %v12062_v46  ;;  %v12414_v11 = vor.u32 %v15144_v50, %v12411_v51 }
 0x1e3   : > { %v12667_v58 = vld [vmem:[%s15947_s14 + $0x16f0] sm:$0xf0]  ;;  %v15240_v2 = vld [vmem:[%s15947_s14 + $0x17e4] sm:$0xf]  ;;  %7270 = vmatpush.bf16.msra.mxu3 %v12190_v52  ;;  %v12542_v14 = vor.u32 %v15176_v53, %v12539_v55 }
 0x1e4   : > { %v12795_v5 = vld [vmem:[%s15947_s14 + $0x17f0] sm:$0xf0]  ;;  %v12670_v16 = vor.u32 %v15208_v56, %v12667_v58  ;;  %v15140_v62 = vld [vmem:[%s15947_s14 + $0x14c4] sm:$0xf]  ;;  %7232 = vmatpush.bf16.msra.mxu0 %v11790_v4 }
 0x1e5   : > { %v12395_v40 = vld [vmem:[%s15947_s14 + $0x14d0] sm:$0xf0]  ;;  %v15172_v21 = vld [vmem:[%s15947_s14 + $0x15c4] sm:$0xf]  ;;  %v12798_v24 = vor.u32 %v15240_v2, %v12795_v5  ;;  %7245 = vmatpush.bf16.msra.mxu1 %v11918_v0 }
 0x1e6   : > { %v12523_v30 = vld [vmem:[%s15947_s14 + $0x15d0] sm:$0xf0]  ;;  %v15204_v35 = vld [vmem:[%s15947_s14 + $0x16c4] sm:$0xf]  ;;  %7258 = vmatpush.bf16.msra.mxu2 %v12046_v59  ;;  %v12398_v61 = vor.u32 %v15140_v62, %v12395_v40 }
 0x1e7   : > { %v12651_v46 = vld [vmem:[%s15947_s14 + $0x16d0] sm:$0xf0]  ;;  %v15236_v36 = vld [vmem:[%s15947_s14 + $0x17c4] sm:$0xf]  ;;  %7271 = vmatpush.bf16.msra.mxu3 %v12174_v10  ;;  %v12526_v52 = vor.u32 %v15172_v21, %v12523_v30  ;;  %7233 = vmatmul.bf16.vlgmr.msra.gmra.mxu0 %v16397_v60 }
 0x1e8   : > { %v12779_v20 = vld [vmem:[%s15947_s14 + $0x17d0] sm:$0xf0]  ;;  %7277 = vmatpush.bf16.msrb.mxu0 %v12414_v11  ;;  %v12654_v41 = vor.u32 %v15204_v35, %v12651_v46  ;;  %v15136_v23 = vld [vmem:[%s15947_s14 + $0x14a4] sm:$0xf]  ;;  %7246 = vmatmul.bf16.vlgmr.msra.gmra.mxu1 %v16404_v44 }
 0x1e9   : > { %7290 = vmatpush.bf16.msrb.mxu1 %v12542_v14  ;;  %v12379_v48 = vld [vmem:[%s15947_s14 + $0x14b0] sm:$0xf0]  ;;  %v15168_v49 = vld [vmem:[%s15947_s14 + $0x15a4] sm:$0xf]  ;;  %v12782_v50 = vor.u32 %v15236_v36, %v12779_v20  ;;  %7259 = vmatmul.bf16.vlgmr.msra.gmra.mxu2 %v16402_v63 }
 0x1ea   : > { %7303 = vmatpush.bf16.msrb.mxu2 %v12670_v16  ;;  %v12507_v51 = vld [vmem:[%s15947_s14 + $0x15b0] sm:$0xf0]  ;;  %v15200_v53 = vld [vmem:[%s15947_s14 + $0x16a4] sm:$0xf]  ;;  %7272 = vmatmul.bf16.vlgmr.msra.gmra.mxu3 %v16408_v47  ;;  %v12382_v56 = vor.u32 %v15136_v23, %v12379_v48 }
 0x1eb   : > { %7316 = vmatpush.bf16.msrb.mxu3 %v12798_v24  ;;  %v12635_v54 = vld [vmem:[%s15947_s14 + $0x16b0] sm:$0xf0]  ;;  %v15232_v4 = vld [vmem:[%s15947_s14 + $0x17a4] sm:$0xf]  ;;  %v12510_v58 = vor.u32 %v15168_v49, %v12507_v51  ;;  %v7026_v24 = vpop.f32.mrf.mxu0 }
 0x1ec   : > { %v12763_v55 = vld [vmem:[%s15947_s14 + $0x17b0] sm:$0xf0]  ;;  %7278 = vmatpush.bf16.msrb.mxu0 %v12398_v61  ;;  %v12638_v0 = vor.u32 %v15200_v53, %v12635_v54  ;;  %v15132_v59 = vld [vmem:[%s15947_s14 + $0x1484] sm:$0xf]  ;;  %v7039_v61 = vpop.f32.mrf.mxu1 }
 0x1ed   : > { %7291 = vmatpush.bf16.msrb.mxu1 %v12526_v52  ;;  %v12363_v2 = vld [vmem:[%s15947_s14 + $0x1490] sm:$0xf0]  ;;  %v15164_v5 = vld [vmem:[%s15947_s14 + $0x1584] sm:$0xf]  ;;  %v12766_v10 = vor.u32 %v15232_v4, %v12763_v55  ;;  %v7040_v49 = vadd.f32 %v7039_v61, %v7026_v24 }
 0x1ee   : > { %7304 = vmatpush.bf16.msrb.mxu2 %v12654_v41  ;;  %v12491_v11 = vld [vmem:[%s15947_s14 + $0x1590] sm:$0xf0]  ;;  %v15196_v14 = vld [vmem:[%s15947_s14 + $0x1684] sm:$0xf]  ;;  %v12366_v21 = vor.u32 %v15132_v59, %v12363_v2 }
 0x1ef   : > { %7317 = vmatpush.bf16.msrb.mxu3 %v12782_v50  ;;  %v12619_v16 = vld [vmem:[%s15947_s14 + $0x1690] sm:$0xf0]  ;;  %v15228_v62 = vld [vmem:[%s15947_s14 + $0x1784] sm:$0xf]  ;;  %v12494_v30 = vor.u32 %v15164_v5, %v12491_v11 }
 0x1f0   : > { %v12747_v40 = vld [vmem:[%s15947_s14 + $0x1790] sm:$0xf0]  ;;  %7279 = vmatpush.bf16.msrb.mxu0 %v12382_v56  ;;  %v12622_v35 = vor.u32 %v15196_v14, %v12619_v16  ;;  %v15128_v46 = vld [vmem:[%s15947_s14 + $0x1464] sm:$0xf]  ;;  %v7065_v14 = vpop.f32.mrf.mxu3 }
 0x1f1   : > { %7292 = vmatpush.bf16.msrb.mxu1 %v12510_v58  ;;  %v12347_v36 = vld [vmem:[%s15947_s14 + $0x1470] sm:$0xf0]  ;;  %v15160_v20 = vld [vmem:[%s15947_s14 + $0x1564] sm:$0xf]  ;;  %v12750_v52 = vor.u32 %v15228_v62, %v12747_v40 }
 0x1f2   : > { %7305 = vmatpush.bf16.msrb.mxu2 %v12638_v0  ;;  %v12475_v41 = vld [vmem:[%s15947_s14 + $0x1570] sm:$0xf0]  ;;  %v15192_v23 = vld [vmem:[%s15947_s14 + $0x1664] sm:$0xf]  ;;  %v12350_v53 = vor.u32 %v15128_v46, %v12347_v36  ;;  %v7052_v0 = vpop.f32.mrf.mxu2 }
 0x1f3   : > { %7318 = vmatpush.bf16.msrb.mxu3 %v12766_v10  ;;  %v12603_v48 = vld [vmem:[%s15947_s14 + $0x1670] sm:$0xf0]  ;;  %v15224_v50 = vld [vmem:[%s15947_s14 + $0x1764] sm:$0xf]  ;;  %v12478_v54 = vor.u32 %v15160_v20, %v12475_v41  ;;  %v7053_v11 = vadd.f32 %v7052_v0, %v7040_v49  ;;  %v7028_v24 = vpop.f32.mrf.mxu0 }
 0x1f4   : > { %v12731_v51 = vld [vmem:[%s15947_s14 + $0x1770] sm:$0xf0]  ;;  %7280 = vmatpush.bf16.msrb.mxu0 %v12366_v21  ;;  %v12606_v4 = vor.u32 %v15192_v23, %v12603_v48  ;;  %v15124_v55 = vld [vmem:[%s15947_s14 + $0x1444] sm:$0xf]  ;;  %v7041_v61 = vpop.f32.mrf.mxu1 }
 0x1f5   : > { %7293 = vmatpush.bf16.msrb.mxu1 %v12494_v30  ;;  %v12331_v56 = vld [vmem:[%s15947_s14 + $0x1450] sm:$0xf0]  ;;  %v15156_v58 = vld [vmem:[%s15947_s14 + $0x1544] sm:$0xf]  ;;  %v12734_v59 = vor.u32 %v15224_v50, %v12731_v51  ;;  %v17039_v21 = vadd.f32 %v7065_v14, %v7053_v11 }
 0x1f6   : > { %7306 = vmatpush.bf16.msrb.mxu2 %v12622_v35  ;;  %v12459_v2 = vld [vmem:[%s15947_s14 + $0x1550] sm:$0xf0]  ;;  %v15188_v5 = vld [vmem:[%s15947_s14 + $0x1644] sm:$0xf]  ;;  %v12334_v40 = vor.u32 %v15124_v55, %v12331_v56 }
 0x1f7   : > { %7319 = vmatpush.bf16.msrb.mxu3 %v12750_v52  ;;  %v12587_v10 = vld [vmem:[%s15947_s14 + $0x1650] sm:$0xf0]  ;;  %v15220_v16 = vld [vmem:[%s15947_s14 + $0x1744] sm:$0xf]  ;;  %v12462_v30 = vor.u32 %v15156_v58, %v12459_v2 }
 0x1f8   : > { %v12715_v62 = vld [vmem:[%s15947_s14 + $0x1750] sm:$0xf0]  ;;  %7281 = vmatpush.bf16.msrb.mxu0 %v12350_v53  ;;  %v12590_v35 = vor.u32 %v15188_v5, %v12587_v10  ;;  %v15120_v46 = vld [vmem:[%s15947_s14 + $0x1424] sm:$0xf]  ;;  %v7067_v14 = vpop.f32.mrf.mxu3 }
 0x1f9   : > { %7294 = vmatpush.bf16.msrb.mxu1 %v12478_v54  ;;  %v12315_v36 = vld [vmem:[%s15947_s14 + $0x1430] sm:$0xf0]  ;;  %v15152_v20 = vld [vmem:[%s15947_s14 + $0x1524] sm:$0xf]  ;;  %v12718_v52 = vor.u32 %v15220_v16, %v12715_v62 }
 0x1fa   : > { %7307 = vmatpush.bf16.msrb.mxu2 %v12606_v4  ;;  %v12443_v41 = vld [vmem:[%s15947_s14 + $0x1530] sm:$0xf0]  ;;  %v15184_v23 = vld [vmem:[%s15947_s14 + $0x1624] sm:$0xf]  ;;  %v12318_v51 = vor.u32 %v15120_v46, %v12315_v36 }
 0x1fb   : > { %7320 = vmatpush.bf16.msrb.mxu3 %v12734_v59  ;;  %v12571_v48 = vld [vmem:[%s15947_s14 + $0x1630] sm:$0xf0]  ;;  %v15216_v49 = vld [vmem:[%s15947_s14 + $0x1724] sm:$0xf]  ;;  %v12446_v4 = vor.u32 %v15152_v20, %v12443_v41  ;;  %v7054_v59 = vpop.f32.mrf.mxu2 }
 0x1fc   : > { %v12699_v50 = vld [vmem:[%s15947_s14 + $0x1730] sm:$0xf0]  ;;  %7282 = vmatpush.bf16.msrb.mxu0 %v12334_v40  ;;  %v15116_v53 = vld [vmem:[%s15947_s14 + $0x1404] sm:$0xf]  ;;  %v12574_v55 = vor.u32 %v15184_v23, %v12571_v48 }
 0x1fd   : > { %v12299_v54 = vld [vmem:[%s15947_s14 + $0x1410] sm:$0xf0]  ;;  %7295 = vmatpush.bf16.msrb.mxu1 %v12462_v30  ;;  %v15148_v56 = vld [vmem:[%s15947_s14 + $0x1504] sm:$0xf]  ;;  %v12702_v2 = vor.u32 %v15216_v49, %v12699_v50 }
 0x1fe   : > { %7308 = vmatpush.bf16.msrb.mxu2 %v12590_v35  ;;  %v12427_v58 = vld [vmem:[%s15947_s14 + $0x1510] sm:$0xf0]  ;;  %v15180_v0 = vld [vmem:[%s15947_s14 + $0x1604] sm:$0xf]  ;;  %v12302_v24 = vor.u32 %v15116_v53, %v12299_v54 }
 0x1ff   : > { %7321 = vmatpush.bf16.msrb.mxu3 %v12718_v52  ;;  %v12555_v5 = vld [vmem:[%s15947_s14 + $0x1610] sm:$0xf0]  ;;  %v15212_v10 = vld [vmem:[%s15947_s14 + $0x1704] sm:$0xf]  ;;  %v12430_v36 = vor.u32 %v15148_v56, %v12427_v58 }
 0x200   : > { %v12683_v11 = vld [vmem:[%s15947_s14 + $0x1710] sm:$0xf0]  ;;  %v15272_v16 = vld [vmem:[%s15947_s14 + $0x18e4] sm:$0xf]  ;;  %7283 = vmatpush.bf16.msrb.mxu0 %v12318_v51  ;;  %v12558_v20 = vor.u32 %v15180_v0, %v12555_v5 }
 0x201   : > { %v12923_v62 = vld [vmem:[%s15947_s14 + $0x18f0] sm:$0xf0]  ;;  %v15304_v40 = vld [vmem:[%s15947_s14 + $0x19e4] sm:$0xf]  ;;  %7296 = vmatpush.bf16.msrb.mxu1 %v12446_v4  ;;  %v12686_v41 = vor.u32 %v15212_v10, %v12683_v11 }
 0x202   : > { %v13051_v30 = vld [vmem:[%s15947_s14 + $0x19f0] sm:$0xf0]  ;;  %v15336_v35 = vld [vmem:[%s15947_s14 + $0x1ae4] sm:$0xf]  ;;  %7309 = vmatpush.bf16.msrb.mxu2 %v12574_v55  ;;  %v12926_v23 = vor.u32 %v15272_v16, %v12923_v62 }
 0x203   : > { %v13179_v46 = vld [vmem:[%s15947_s14 + $0x1af0] sm:$0xf0]  ;;  %v15368_v61 = vld [vmem:[%s15947_s14 + $0x1be4] sm:$0xf]  ;;  %7322 = vmatpush.bf16.msrb.mxu3 %v12702_v2  ;;  %v13054_v48 = vor.u32 %v15304_v40, %v13051_v30 }
 0x204   : > { %v13307_v52 = vld [vmem:[%s15947_s14 + $0x1bf0] sm:$0xf0]  ;;  %v13182_v49 = vor.u32 %v15336_v35, %v13179_v46  ;;  %v15268_v50 = vld [vmem:[%s15947_s14 + $0x18c4] sm:$0xf]  ;;  %7284 = vmatpush.bf16.msrb.mxu0 %v12302_v24 }
 0x205   : > { %v12907_v51 = vld [vmem:[%s15947_s14 + $0x18d0] sm:$0xf0]  ;;  %v15300_v53 = vld [vmem:[%s15947_s14 + $0x19c4] sm:$0xf]  ;;  %v13310_v54 = vor.u32 %v15368_v61, %v13307_v52  ;;  %7297 = vmatpush.bf16.msrb.mxu1 %v12430_v36 }
 0x206   : > { %v13035_v4 = vld [vmem:[%s15947_s14 + $0x19d0] sm:$0xf0]  ;;  %v15332_v55 = vld [vmem:[%s15947_s14 + $0x1ac4] sm:$0xf]  ;;  %7310 = vmatpush.bf16.msrb.mxu2 %v12558_v20  ;;  %v12910_v59 = vor.u32 %v15268_v50, %v12907_v51 }
 0x207   : > { %v13163_v56 = vld [vmem:[%s15947_s14 + $0x1ad0] sm:$0xf0]  ;;  %v15364_v58 = vld [vmem:[%s15947_s14 + $0x1bc4] sm:$0xf]  ;;  %7323 = vmatpush.bf16.msrb.mxu3 %v12686_v41  ;;  %v13038_v2 = vor.u32 %v15300_v53, %v13035_v4  ;;  %7285 = vmatmul.bf16.vlgmr.msrb.gmra.mxu0 %v16476_v3  ;;  %v7078_v4 = vpop.f32.mrf.mxu0 }
 0x208   : > { %v13291_v0 = vld [vmem:[%s15947_s14 + $0x1bd0] sm:$0xf0]  ;;  %7329 = vmatpush.bf16.msra.mxu0 %v12926_v23  ;;  %v13166_v5 = vor.u32 %v15332_v55, %v13163_v56  ;;  %v15264_v10 = vld [vmem:[%s15947_s14 + $0x18a4] sm:$0xf]  ;;  %7298 = vmatmul.bf16.vlgmr.msrb.gmra.mxu1 %v16483_v9 }
 0x209   : > { %7342 = vmatpush.bf16.msra.mxu1 %v13054_v48  ;;  %v12891_v11 = vld [vmem:[%s15947_s14 + $0x18b0] sm:$0xf0]  ;;  %v15296_v14 = vld [vmem:[%s15947_s14 + $0x19a4] sm:$0xf]  ;;  %v13294_v16 = vor.u32 %v15364_v58, %v13291_v0  ;;  %7311 = vmatmul.bf16.vlgmr.msrb.gmra.mxu2 %v16481_v8 }
 0x20a   : > { %7355 = vmatpush.bf16.msra.mxu2 %v13182_v49  ;;  %v13019_v62 = vld [vmem:[%s15947_s14 + $0x19b0] sm:$0xf0]  ;;  %v15328_v40 = vld [vmem:[%s15947_s14 + $0x1aa4] sm:$0xf]  ;;  %7324 = vmatmul.bf16.vlgmr.msrb.gmra.mxu3 %v16487_v12  ;;  %v12894_v46 = vor.u32 %v15264_v10, %v12891_v11 }
 0x20b   : > { %7368 = vmatpush.bf16.msra.mxu3 %v13310_v54  ;;  %v13147_v24 = vld [vmem:[%s15947_s14 + $0x1ab0] sm:$0xf0]  ;;  %v15360_v30 = vld [vmem:[%s15947_s14 + $0x1ba4] sm:$0xf]  ;;  %v13022_v36 = vor.u32 %v15296_v14, %v13019_v62 }
 0x20c   : > { %v13275_v35 = vld [vmem:[%s15947_s14 + $0x1bb0] sm:$0xf0]  ;;  %7330 = vmatpush.bf16.msra.mxu0 %v12910_v59  ;;  %v13150_v20 = vor.u32 %v15328_v40, %v13147_v24  ;;  %v15260_v61 = vld [vmem:[%s15947_s14 + $0x1884] sm:$0xf] }
 0x20d   : > { %7343 = vmatpush.bf16.msra.mxu1 %v13038_v2  ;;  %v12875_v52 = vld [vmem:[%s15947_s14 + $0x1890] sm:$0xf0]  ;;  %v15292_v41 = vld [vmem:[%s15947_s14 + $0x1984] sm:$0xf]  ;;  %v13278_v23 = vor.u32 %v15360_v30, %v13275_v35  ;;  %v7079_v2 = vadd.f32 %v7078_v4, %v17039_v21 }
 0x20e   : > { %7356 = vmatpush.bf16.msra.mxu2 %v13166_v5  ;;  %v13003_v48 = vld [vmem:[%s15947_s14 + $0x1990] sm:$0xf0]  ;;  %v15324_v49 = vld [vmem:[%s15947_s14 + $0x1a84] sm:$0xf]  ;;  %v12878_v54 = vor.u32 %v15260_v61, %v12875_v52  ;;  %v7091_v5 = vpop.f32.mrf.mxu1  ;;  %v7104_v61 = vpop.f32.mrf.mxu2 }
 0x20f   : > { %7369 = vmatpush.bf16.msra.mxu3 %v13294_v16  ;;  %v13131_v50 = vld [vmem:[%s15947_s14 + $0x1a90] sm:$0xf0]  ;;  %v15356_v51 = vld [vmem:[%s15947_s14 + $0x1b84] sm:$0xf]  ;;  %v13006_v55 = vor.u32 %v15292_v41, %v13003_v48  ;;  %v7092_v24 = vadd.f32 %v7091_v5, %v7079_v2 }
 0x210   : > { %v13259_v53 = vld [vmem:[%s15947_s14 + $0x1b90] sm:$0xf0]  ;;  %7331 = vmatpush.bf16.msra.mxu0 %v12894_v46  ;;  %v13134_v56 = vor.u32 %v15324_v49, %v13131_v50  ;;  %v15256_v58 = vld [vmem:[%s15947_s14 + $0x1864] sm:$0xf]  ;;  %v7117_v50 = vpop.f32.mrf.mxu3 }
 0x211   : > { %7344 = vmatpush.bf16.msra.mxu1 %v13022_v36  ;;  %v12859_v0 = vld [vmem:[%s15947_s14 + $0x1870] sm:$0xf0]  ;;  %v15288_v59 = vld [vmem:[%s15947_s14 + $0x1964] sm:$0xf]  ;;  %v13262_v10 = vor.u32 %v15356_v51, %v13259_v53  ;;  %v7105_v49 = vadd.f32 %v7104_v61, %v7092_v24 }
 0x212   : > { %7357 = vmatpush.bf16.msra.mxu2 %v13150_v20  ;;  %v12987_v11 = vld [vmem:[%s15947_s14 + $0x1970] sm:$0xf0]  ;;  %v15320_v14 = vld [vmem:[%s15947_s14 + $0x1a64] sm:$0xf]  ;;  %v12862_v30 = vor.u32 %v15256_v58, %v12859_v0 }
 0x213   : > { %7370 = vmatpush.bf16.msra.mxu3 %v13278_v23  ;;  %v13115_v16 = vld [vmem:[%s15947_s14 + $0x1a70] sm:$0xf0]  ;;  %v15352_v62 = vld [vmem:[%s15947_s14 + $0x1b64] sm:$0xf]  ;;  %v12990_v21 = vor.u32 %v15288_v59, %v12987_v11  ;;  %v17110_v4 = vadd.f32 %v7117_v50, %v7105_v49 }
 0x214   : > { %v13243_v40 = vld [vmem:[%s15947_s14 + $0x1b70] sm:$0xf0]  ;;  %7332 = vmatpush.bf16.msra.mxu0 %v12878_v54  ;;  %v13118_v35 = vor.u32 %v15320_v14, %v13115_v16  ;;  %v15252_v46 = vld [vmem:[%s15947_s14 + $0x1844] sm:$0xf] }
 0x215   : > { %7345 = vmatpush.bf16.msra.mxu1 %v13006_v55  ;;  %v12843_v36 = vld [vmem:[%s15947_s14 + $0x1850] sm:$0xf0]  ;;  %v15284_v20 = vld [vmem:[%s15947_s14 + $0x1944] sm:$0xf]  ;;  %v13246_v52 = vor.u32 %v15352_v62, %v13243_v40  ;;  %v7080_v55 = vpop.f32.mrf.mxu0 }
 0x216   : > { %7358 = vmatpush.bf16.msra.mxu2 %v13134_v56  ;;  %v12971_v41 = vld [vmem:[%s15947_s14 + $0x1950] sm:$0xf0]  ;;  %v15316_v23 = vld [vmem:[%s15947_s14 + $0x1a44] sm:$0xf]  ;;  %v12846_v54 = vor.u32 %v15252_v46, %v12843_v36  ;;  %v7093_v5 = vpop.f32.mrf.mxu1 }
 0x217   : > { %7371 = vmatpush.bf16.msra.mxu3 %v13262_v10  ;;  %v13099_v48 = vld [vmem:[%s15947_s14 + $0x1a50] sm:$0xf0]  ;;  %v15348_v51 = vld [vmem:[%s15947_s14 + $0x1b44] sm:$0xf]  ;;  %v12974_v56 = vor.u32 %v15284_v20, %v12971_v41 }
 0x218   : > { %v13227_v53 = vld [vmem:[%s15947_s14 + $0x1b50] sm:$0xf0]  ;;  %7333 = vmatpush.bf16.msra.mxu0 %v12862_v30  ;;  %v13102_v58 = vor.u32 %v15316_v23, %v13099_v48  ;;  %v15248_v0 = vld [vmem:[%s15947_s14 + $0x1824] sm:$0xf]  ;;  %v7119_v50 = vpop.f32.mrf.mxu3 }
 0x219   : > { %7346 = vmatpush.bf16.msra.mxu1 %v12990_v21  ;;  %v12827_v59 = vld [vmem:[%s15947_s14 + $0x1830] sm:$0xf0]  ;;  %v15280_v2 = vld [vmem:[%s15947_s14 + $0x1924] sm:$0xf]  ;;  %v13230_v10 = vor.u32 %v15348_v51, %v13227_v53 }
 0x21a   : > { %7359 = vmatpush.bf16.msra.mxu2 %v13118_v35  ;;  %v12955_v11 = vld [vmem:[%s15947_s14 + $0x1930] sm:$0xf0]  ;;  %v15312_v14 = vld [vmem:[%s15947_s14 + $0x1a24] sm:$0xf]  ;;  %v12830_v24 = vor.u32 %v15248_v0, %v12827_v59 }
 0x21b   : > { %7372 = vmatpush.bf16.msra.mxu3 %v13246_v52  ;;  %v13083_v16 = vld [vmem:[%s15947_s14 + $0x1a30] sm:$0xf0]  ;;  %v15344_v62 = vld [vmem:[%s15947_s14 + $0x1b24] sm:$0xf]  ;;  %v12958_v35 = vor.u32 %v15280_v2, %v12955_v11  ;;  %v7106_v52 = vpop.f32.mrf.mxu2 }
 0x21c   : > { %v13211_v40 = vld [vmem:[%s15947_s14 + $0x1b30] sm:$0xf0]  ;;  %7334 = vmatpush.bf16.msra.mxu0 %v12846_v54  ;;  %v15244_v30 = vld [vmem:[%s15947_s14 + $0x1804] sm:$0xf]  ;;  %v13086_v46 = vor.u32 %v15312_v14, %v13083_v16 }
 0x21d   : > { %v12811_v21 = vld [vmem:[%s15947_s14 + $0x1810] sm:$0xf0]  ;;  %7347 = vmatpush.bf16.msra.mxu1 %v12974_v56  ;;  %v15276_v36 = vld [vmem:[%s15947_s14 + $0x1904] sm:$0xf]  ;;  %v13214_v41 = vor.u32 %v15344_v62, %v13211_v40 }
 0x21e   : > { %7360 = vmatpush.bf16.msra.mxu2 %v13102_v58  ;;  %v12939_v20 = vld [vmem:[%s15947_s14 + $0x1910] sm:$0xf0]  ;;  %v15308_v61 = vld [vmem:[%s15947_s14 + $0x1a04] sm:$0xf]  ;;  %v12814_v55 = vor.u32 %v15244_v30, %v12811_v21 }
 0x21f   : > { %7373 = vmatpush.bf16.msra.mxu3 %v13230_v10  ;;  %v13067_v23 = vld [vmem:[%s15947_s14 + $0x1a10] sm:$0xf0]  ;;  %v15340_v48 = vld [vmem:[%s15947_s14 + $0x1b04] sm:$0xf]  ;;  %v12942_v59 = vor.u32 %v15276_v36, %v12939_v20 }
 0x220   : > { %v13195_v49 = vld [vmem:[%s15947_s14 + $0x1b10] sm:$0xf0]  ;;  %v15400_v51 = vld [vmem:[%s15947_s14 + $0x1ce4] sm:$0xf]  ;;  %7335 = vmatpush.bf16.msra.mxu0 %v12830_v24  ;;  %v13070_v2 = vor.u32 %v15308_v61, %v13067_v23 }
 0x221   : > { %v13435_v53 = vld [vmem:[%s15947_s14 + $0x1cf0] sm:$0xf0]  ;;  %v15432_v54 = vld [vmem:[%s15947_s14 + $0x1de4] sm:$0xf]  ;;  %7348 = vmatpush.bf16.msra.mxu1 %v12958_v35  ;;  %v13198_v11 = vor.u32 %v15340_v48, %v13195_v49 }
 0x222   : > { %v13563_v56 = vld [vmem:[%s15947_s14 + $0x1df0] sm:$0xf0]  ;;  %v15464_v58 = vld [vmem:[%s15947_s14 + $0x1ee4] sm:$0xf]  ;;  %7361 = vmatpush.bf16.msra.mxu2 %v13086_v46  ;;  %v13438_v14 = vor.u32 %v15400_v51, %v13435_v53 }
 0x223   : > { %v13691_v0 = vld [vmem:[%s15947_s14 + $0x1ef0] sm:$0xf0]  ;;  %v15496_v5 = vld [vmem:[%s15947_s14 + $0x1fe4] sm:$0xf]  ;;  %7374 = vmatpush.bf16.msra.mxu3 %v13214_v41  ;;  %v13566_v16 = vor.u32 %v15432_v54, %v13563_v56 }
 0x224   : > { %v13819_v10 = vld [vmem:[%s15947_s14 + $0x1ff0] sm:$0xf0]  ;;  %v13694_v62 = vor.u32 %v15464_v58, %v13691_v0  ;;  %v15396_v40 = vld [vmem:[%s15947_s14 + $0x1cc4] sm:$0xf]  ;;  %7336 = vmatpush.bf16.msra.mxu0 %v12814_v55 }
 0x225   : > { %v13419_v24 = vld [vmem:[%s15947_s14 + $0x1cd0] sm:$0xf0]  ;;  %v15428_v30 = vld [vmem:[%s15947_s14 + $0x1dc4] sm:$0xf]  ;;  %v13822_v21 = vor.u32 %v15496_v5, %v13819_v10  ;;  %7349 = vmatpush.bf16.msra.mxu1 %v12942_v59 }
 0x226   : > { %v13547_v35 = vld [vmem:[%s15947_s14 + $0x1dd0] sm:$0xf0]  ;;  %v15460_v46 = vld [vmem:[%s15947_s14 + $0x1ec4] sm:$0xf]  ;;  %7362 = vmatpush.bf16.msra.mxu2 %v13070_v2  ;;  %v13422_v52 = vor.u32 %v15396_v40, %v13419_v24  ;;  %v7130_v24 = vpop.f32.mrf.mxu0 }
 0x227   : > { %v13675_v36 = vld [vmem:[%s15947_s14 + $0x1ed0] sm:$0xf0]  ;;  %v15492_v20 = vld [vmem:[%s15947_s14 + $0x1fc4] sm:$0xf]  ;;  %7375 = vmatpush.bf16.msra.mxu3 %v13198_v11  ;;  %v13550_v41 = vor.u32 %v15428_v30, %v13547_v35  ;;  %7337 = vmatmul.bf16.vlgmr.msra.gmra.mxu0 %v16556_v1  ;;  %v7131_v35 = vadd.f32 %v7130_v24, %v17110_v4 }
 0x228   : > { %v13803_v61 = vld [vmem:[%s15947_s14 + $0x1fd0] sm:$0xf0]  ;;  %7381 = vmatpush.bf16.msrb.mxu0 %v13438_v14  ;;  %v13678_v23 = vor.u32 %v15460_v46, %v13675_v36  ;;  %v15392_v48 = vld [vmem:[%s15947_s14 + $0x1ca4] sm:$0xf]  ;;  %7350 = vmatmul.bf16.vlgmr.msra.gmra.mxu1 %v16563_v7  ;;  %v7143_v36 = vpop.f32.mrf.mxu1 }
 0x229   : > { %7394 = vmatpush.bf16.msrb.mxu1 %v13566_v16  ;;  %v13403_v49 = vld [vmem:[%s15947_s14 + $0x1cb0] sm:$0xf0]  ;;  %v15424_v50 = vld [vmem:[%s15947_s14 + $0x1da4] sm:$0xf]  ;;  %v13806_v51 = vor.u32 %v15492_v20, %v13803_v61  ;;  %7363 = vmatmul.bf16.vlgmr.msra.gmra.mxu2 %v16561_v6 }
 0x22a   : > { %7407 = vmatpush.bf16.msrb.mxu2 %v13694_v62  ;;  %v13531_v53 = vld [vmem:[%s15947_s14 + $0x1db0] sm:$0xf0]  ;;  %v15456_v54 = vld [vmem:[%s15947_s14 + $0x1ea4] sm:$0xf]  ;;  %7376 = vmatmul.bf16.vlgmr.msra.gmra.mxu3 %v16567_v13  ;;  %v13406_v0 = vor.u32 %v15392_v48, %v13403_v49  ;;  %v7144_v49 = vadd.f32 %v7143_v36, %v7131_v35 }
 0x22b   : > { %7420 = vmatpush.bf16.msrb.mxu3 %v13822_v21  ;;  %v13659_v55 = vld [vmem:[%s15947_s14 + $0x1eb0] sm:$0xf0]  ;;  %v15488_v56 = vld [vmem:[%s15947_s14 + $0x1fa4] sm:$0xf]  ;;  %v13534_v59 = vor.u32 %v15424_v50, %v13531_v53 }
 0x22c   : > { %v13787_v58 = vld [vmem:[%s15947_s14 + $0x1fb0] sm:$0xf0]  ;;  %7382 = vmatpush.bf16.msrb.mxu0 %v13422_v52  ;;  %v13662_v2 = vor.u32 %v15456_v54, %v13659_v55  ;;  %v15388_v5 = vld [vmem:[%s15947_s14 + $0x1c84] sm:$0xf] }
 0x22d   : > { %7395 = vmatpush.bf16.msrb.mxu1 %v13550_v41  ;;  %v13387_v10 = vld [vmem:[%s15947_s14 + $0x1c90] sm:$0xf0]  ;;  %v15420_v11 = vld [vmem:[%s15947_s14 + $0x1d84] sm:$0xf]  ;;  %v13790_v14 = vor.u32 %v15488_v56, %v13787_v58 }
 0x22e   : > { %7408 = vmatpush.bf16.msrb.mxu2 %v13678_v23  ;;  %v13515_v16 = vld [vmem:[%s15947_s14 + $0x1d90] sm:$0xf0]  ;;  %v15452_v62 = vld [vmem:[%s15947_s14 + $0x1e84] sm:$0xf]  ;;  %v13390_v46 = vor.u32 %v15388_v5, %v13387_v10  ;;  %v7156_v10 = vpop.f32.mrf.mxu2 }
 0x22f   : > { %7421 = vmatpush.bf16.msrb.mxu3 %v13806_v51  ;;  %v13643_v40 = vld [vmem:[%s15947_s14 + $0x1e90] sm:$0xf0]  ;;  %v15484_v30 = vld [vmem:[%s15947_s14 + $0x1f84] sm:$0xf]  ;;  %v13518_v20 = vor.u32 %v15420_v11, %v13515_v16 }
 0x230   : > { %v13771_v21 = vld [vmem:[%s15947_s14 + $0x1f90] sm:$0xf0]  ;;  %7383 = vmatpush.bf16.msrb.mxu0 %v13406_v0  ;;  %v13646_v61 = vor.u32 %v15452_v62, %v13643_v40  ;;  %v15384_v52 = vld [vmem:[%s15947_s14 + $0x1c64] sm:$0xf]  ;;  %v7157_v62 = vadd.f32 %v7156_v10, %v7144_v49  ;;  %v7169_v40 = vpop.f32.mrf.mxu3 }
 0x231   : > { %7396 = vmatpush.bf16.msrb.mxu1 %v13534_v59  ;;  %v13371_v41 = vld [vmem:[%s15947_s14 + $0x1c70] sm:$0xf0]  ;;  %v15416_v23 = vld [vmem:[%s15947_s14 + $0x1d64] sm:$0xf]  ;;  %v13774_v48 = vor.u32 %v15484_v30, %v13771_v21  ;;  %v7132_v21 = vpop.f32.mrf.mxu0 }
 0x232   : > { %7409 = vmatpush.bf16.msrb.mxu2 %v13662_v2  ;;  %v13499_v50 = vld [vmem:[%s15947_s14 + $0x1d70] sm:$0xf0]  ;;  %v15448_v51 = vld [vmem:[%s15947_s14 + $0x1e64] sm:$0xf]  ;;  %v13374_v55 = vor.u32 %v15384_v52, %v13371_v41  ;;  %v17181_v36 = vadd.f32 %v7169_v40, %v7157_v62  ;;  %v9857_v40 = vld [vmem:[%s15947_s14 + $0xe8] sm:$0xf] }
 0x233   : > { %7422 = vmatpush.bf16.msrb.mxu3 %v13790_v14  ;;  %v13627_v4 = vld [vmem:[%s15947_s14 + $0x1e70] sm:$0xf0]  ;;  %v15480_v53 = vld [vmem:[%s15947_s14 + $0x1f64] sm:$0xf]  ;;  %v13502_v56 = vor.u32 %v15416_v23, %v13499_v50 }
 0x234   : > { %v13755_v54 = vld [vmem:[%s15947_s14 + $0x1f70] sm:$0xf0]  ;;  %7384 = vmatpush.bf16.msrb.mxu0 %v13390_v46  ;;  %v13630_v58 = vor.u32 %v15448_v51, %v13627_v4  ;;  %v15380_v0 = vld [vmem:[%s15947_s14 + $0x1c44] sm:$0xf]  ;;  %v7145_v46 = vpop.f32.mrf.mxu1 }
 0x235   : > { %7397 = vmatpush.bf16.msrb.mxu1 %v13518_v20  ;;  %v13355_v59 = vld [vmem:[%s15947_s14 + $0x1c50] sm:$0xf0]  ;;  %v15412_v2 = vld [vmem:[%s15947_s14 + $0x1d44] sm:$0xf]  ;;  %v13758_v5 = vor.u32 %v15480_v53, %v13755_v54  ;;  %v14539_v46 = vld [vmem:[%s15947_s14 + $0x1f4] sm:$0xf0] }
 0x236   : > { %7410 = vmatpush.bf16.msrb.mxu2 %v13646_v61  ;;  %v13483_v11 = vld [vmem:[%s15947_s14 + $0x1d50] sm:$0xf0]  ;;  %v15444_v14 = vld [vmem:[%s15947_s14 + $0x1e44] sm:$0xf]  ;;  %v13358_v35 = vor.u32 %v15380_v0, %v13355_v59  ;;  %v7158_v62 = vpop.f32.mrf.mxu2 }
 0x237   : > { %7423 = vmatpush.bf16.msrb.mxu3 %v13774_v48  ;;  %v13611_v16 = vld [vmem:[%s15947_s14 + $0x1e50] sm:$0xf0]  ;;  %v15476_v24 = vld [vmem:[%s15947_s14 + $0x1f44] sm:$0xf]  ;;  %v13486_v20 = vor.u32 %v15412_v2, %v13483_v11  ;;  %v14499_v62 = vld [vmem:[%s15947_s14 + $0xb4] sm:$0xf0] }
 0x238   : > { %v13739_v30 = vld [vmem:[%s15947_s14 + $0x1f50] sm:$0xf0]  ;;  %7385 = vmatpush.bf16.msrb.mxu0 %v13374_v55  ;;  %v13614_v61 = vor.u32 %v15444_v14, %v13611_v16  ;;  %v15376_v52 = vld [vmem:[%s15947_s14 + $0x1c24] sm:$0xf]  ;;  %v7171_v21 = vpop.f32.mrf.mxu3 }
 0x239   : > { %7398 = vmatpush.bf16.msrb.mxu1 %v13502_v56  ;;  %v13339_v41 = vld [vmem:[%s15947_s14 + $0x1c30] sm:$0xf0]  ;;  %v15408_v23 = vld [vmem:[%s15947_s14 + $0x1d24] sm:$0xf]  ;;  %v13742_v48 = vor.u32 %v15476_v24, %v13739_v30  ;;  %v14507_v24 = vld [vmem:[%s15947_s14 + $0xf4] sm:$0xf0] }
 0x23a   : > { %7411 = vmatpush.bf16.msrb.mxu2 %v13630_v58  ;;  %v13467_v49 = vld [vmem:[%s15947_s14 + $0x1d30] sm:$0xf0]  ;;  %v15440_v50 = vld [vmem:[%s15947_s14 + $0x1e24] sm:$0xf]  ;;  %v13342_v54 = vor.u32 %v15376_v52, %v13339_v41  ;;  %v9985_v30 = vld [vmem:[%s15947_s14 + $0x1e8] sm:$0xf] }
 0x23b   : > { %7424 = vmatpush.bf16.msrb.mxu3 %v13758_v5  ;;  %v13595_v51 = vld [vmem:[%s15947_s14 + $0x1e30] sm:$0xf0]  ;;  %v15472_v4 = vld [vmem:[%s15947_s14 + $0x1f24] sm:$0xf]  ;;  %v13470_v58 = vor.u32 %v15408_v23, %v13467_v49  ;;  %v10241_v23 = vld [vmem:[%s15947_s14 + $0x3e8] sm:$0xf] }
 0x23c   : > { %v13723_v53 = vld [vmem:[%s15947_s14 + $0x1f30] sm:$0xf0]  ;;  %7386 = vmatpush.bf16.msrb.mxu0 %v13358_v35  ;;  %v15372_v55 = vld [vmem:[%s15947_s14 + $0x1c04] sm:$0xf]  ;;  %v13598_v0 = vor.u32 %v15440_v50, %v13595_v51  ;;  %v9858_v50 = vor.u32 %v14507_v24, %v9857_v40  ;;  %v9986_v51 = vor.u32 %v14539_v46, %v9985_v30  ;;  %v9953_v40 = vld [vmem:[%s15947_s14 + $0x1a8] sm:$0xf] }
 0x23d   : > { %v13323_v56 = vld [vmem:[%s15947_s14 + $0x1c10] sm:$0xf0]  ;;  %7399 = vmatpush.bf16.msrb.mxu1 %v13486_v20  ;;  %v15404_v59 = vld [vmem:[%s15947_s14 + $0x1d04] sm:$0xf]  ;;  %v13726_v10 = vor.u32 %v15472_v4, %v13723_v53  ;;  %v10113_v20 = vld [vmem:[%s15947_s14 + $0x2e8] sm:$0xf] }
 0x23e   : > { %7412 = vmatpush.bf16.msrb.mxu2 %v13614_v61  ;;  %v13451_v2 = vld [vmem:[%s15947_s14 + $0x1d10] sm:$0xf0]  ;;  %v15436_v5 = vld [vmem:[%s15947_s14 + $0x1e04] sm:$0xf]  ;;  %v13326_v35 = vor.u32 %v15372_v55, %v13323_v56  ;;  %v14571_v61 = vld [vmem:[%s15947_s14 + $0x2f4] sm:$0xf0] }
 0x23f   : > { %7425 = vmatpush.bf16.msrb.mxu3 %v13742_v48  ;;  %v13579_v11 = vld [vmem:[%s15947_s14 + $0x1e10] sm:$0xf0]  ;;  %v15468_v14 = vld [vmem:[%s15947_s14 + $0x1f04] sm:$0xf]  ;;  %v13454_v52 = vor.u32 %v15404_v59, %v13451_v2  ;;  %v14603_v48 = vld [vmem:[%s15947_s14 + $0x3f4] sm:$0xf0]  ;;  %v10114_v4 = vor.u32 %v14571_v61, %v10113_v20 }
 0x240   : > { %v13707_v16 = vld [vmem:[%s15947_s14 + $0x1f10] sm:$0xf0]  ;;  %7387 = vmatpush.bf16.msrb.mxu0 %v13342_v54  ;;  %v13582_v41 = vor.u32 %v15436_v5, %v13579_v11  ;;  %v9841_v53 = vld [vmem:[%s15947_s14 + $0xc8] sm:$0xf]  ;;  %v14503_v54 = vld [vmem:[%s15947_s14 + $0xd4] sm:$0xf0]  ;;  %v10242_v56 = vor.u32 %v14603_v48, %v10241_v23 }
 0x241   : > { %7400 = vmatpush.bf16.msrb.mxu1 %v13470_v58  ;;  %v13710_v49 = vor.u32 %v15468_v14, %v13707_v16  ;;  %v9969_v55 = vld [vmem:[%s15947_s14 + $0x1c8] sm:$0xf]  ;;  %v14535_v58 = vld [vmem:[%s15947_s14 + $0x1d4] sm:$0xf0] }
 0x242   : > { %7413 = vmatpush.bf16.msrb.mxu2 %v13598_v0  ;;  %v10097_v0 = vld [vmem:[%s15947_s14 + $0x2c8] sm:$0xf]  ;;  %v14567_v59 = vld [vmem:[%s15947_s14 + $0x2d4] sm:$0xf0]  ;;  %v9970_v11 = vor.u32 %v14535_v58, %v9969_v55 }
 0x243   : > { %7426 = vmatpush.bf16.msrb.mxu3 %v13726_v10  ;;  %v10225_v2 = vld [vmem:[%s15947_s14 + $0x3c8] sm:$0xf]  ;;  %v14599_v5 = vld [vmem:[%s15947_s14 + $0x3d4] sm:$0xf0]  ;;  %v9842_v10 = vor.u32 %v14503_v54, %v9841_v53  ;;  %v10098_v14 = vor.u32 %v14567_v59, %v10097_v0 }
 0x244   : > { %7388 = vmatpush.bf16.msrb.mxu0 %v13326_v35  ;;  %v9825_v16 = vld [vmem:[%s15947_s14 + $0xa8] sm:$0xf]  ;;  %v10226_v24 = vor.u32 %v14599_v5, %v10225_v2  ;;  %v14531_v30 = vld [vmem:[%s15947_s14 + $0x1b4] sm:$0xf0]  ;;  %v7182_v54 = vpop.f32.mrf.mxu0 }
 0x245   : > { %7401 = vmatpush.bf16.msrb.mxu1 %v13454_v52  ;;  %v10081_v21 = vld [vmem:[%s15947_s14 + $0x2a8] sm:$0xf]  ;;  %v14563_v35 = vld [vmem:[%s15947_s14 + $0x2b4] sm:$0xf0]  ;;  %v9826_v61 = vor.u32 %v14499_v62, %v9825_v16  ;;  %v9954_v52 = vor.u32 %v14531_v30, %v9953_v40  ;;  %v7183_v58 = vadd.f32 %v7182_v54, %v17181_v36  ;;  %v7195_v59 = vpop.f32.mrf.mxu1 }
 0x246   : > { %7414 = vmatpush.bf16.msrb.mxu2 %v13582_v41  ;;  %v10209_v46 = vld [vmem:[%s15947_s14 + $0x3a8] sm:$0xf]  ;;  %v14595_v20 = vld [vmem:[%s15947_s14 + $0x3b4] sm:$0xf0]  ;;  %v10082_v41 = vor.u32 %v14563_v35, %v10081_v21 }
 0x247   : > { %7427 = vmatpush.bf16.msrb.mxu3 %v13710_v49  ;;  %7389 = vmatmul.bf16.vlgmr.msrb.gmra.mxu0 %v16635_v15  ;;  %v9809_v23 = vld [vmem:[%s15947_s14 + $0x88] sm:$0xf]  ;;  %v14495_v48 = vld [vmem:[%s15947_s14 + $0x94] sm:$0xf0]  ;;  %v7196_v62 = vadd.f32 %v7195_v59, %v7183_v58 }
 0x248   : > { %7433 = vmatpush.bf16.msra.mxu0 %v9858_v50  ;;  %7402 = vmatmul.bf16.vlgmr.msrb.gmra.mxu1 %v16642_v18  ;;  %v9937_v49 = vld [vmem:[%s15947_s14 + $0x188] sm:$0xf]  ;;  %v10210_v50 = vor.u32 %v14595_v20, %v10209_v46  ;;  %v14559_v53 = vld [vmem:[%s15947_s14 + $0x294] sm:$0xf0]  ;;  %v9810_v0 = vor.u32 %v14495_v48, %v9809_v23 }
 0x249   : > { %7446 = vmatpush.bf16.msra.mxu1 %v9986_v51  ;;  %7415 = vmatmul.bf16.vlgmr.msrb.gmra.mxu2 %v16640_v17  ;;  %v14527_v51 = vld [vmem:[%s15947_s14 + $0x194] sm:$0xf0]  ;;  %v10193_v55 = vld [vmem:[%s15947_s14 + $0x388] sm:$0xf] }
 0x24a   : > { %7459 = vmatpush.bf16.msra.mxu2 %v10114_v4  ;;  %7428 = vmatmul.bf16.vlgmr.msrb.gmra.mxu3 %v16646_v26  ;;  %v10065_v4 = vld [vmem:[%s15947_s14 + $0x288] sm:$0xf]  ;;  %v9938_v2 = vor.u32 %v14527_v51, %v9937_v49  ;;  %v14523_v40 = vld [vmem:[%s15947_s14 + $0x174] sm:$0xf0] }
 0x24b   : > { %7472 = vmatpush.bf16.msra.mxu3 %v10242_v56  ;;  %v14591_v56 = vld [vmem:[%s15947_s14 + $0x394] sm:$0xf0]  ;;  %v10066_v5 = vor.u32 %v14559_v53, %v10065_v4  ;;  %v10177_v30 = vld [vmem:[%s15947_s14 + $0x368] sm:$0xf] }
 0x24c   : > { %7434 = vmatpush.bf16.msra.mxu0 %v9842_v10  ;;  %v9793_v10 = vld [vmem:[%s15947_s14 + $0x68] sm:$0xf]  ;;  %v10194_v16 = vor.u32 %v14591_v56, %v10193_v55  ;;  %v14555_v36 = vld [vmem:[%s15947_s14 + $0x274] sm:$0xf0]  ;;  %v7208_v48 = vpop.f32.mrf.mxu2  ;;  %v7184_v56 = vpop.f32.mrf.mxu0 }
 0x24d   : > { %7447 = vmatpush.bf16.msra.mxu1 %v9970_v11  ;;  %v14491_v11 = vld [vmem:[%s15947_s14 + $0x74] sm:$0xf0]  ;;  %v7209_v4 = vadd.f32 %v7208_v48, %v7196_v62  ;;  %v7221_v53 = vpop.f32.mrf.mxu3  ;;  %v10161_v54 = vld [vmem:[%s15947_s14 + $0x348] sm:$0xf] }
 0x24e   : > { %7460 = vmatpush.bf16.msra.mxu2 %v10098_v14  ;;  %v9921_v14 = vld [vmem:[%s15947_s14 + $0x168] sm:$0xf]  ;;  %v14587_v21 = vld [vmem:[%s15947_s14 + $0x374] sm:$0xf0]  ;;  %v9794_v35 = vor.u32 %v14491_v11, %v9793_v10 }
 0x24f   : > { %7473 = vmatpush.bf16.msra.mxu3 %v10226_v24  ;;  %v10049_v24 = vld [vmem:[%s15947_s14 + $0x268] sm:$0xf]  ;;  %v9922_v46 = vor.u32 %v14523_v40, %v9921_v14  ;;  %v10178_v23 = vor.u32 %v14587_v21, %v10177_v30  ;;  %v14519_v49 = vld [vmem:[%s15947_s14 + $0x154] sm:$0xf0]  ;;  %v17252_v59 = vadd.f32 %v7221_v53, %v7209_v4 }
 0x250   : > { %7435 = vmatpush.bf16.msra.mxu0 %v9826_v61  ;;  %v10050_v20 = vor.u32 %v14555_v36, %v10049_v24  ;;  %v9777_v61 = vld [vmem:[%s15947_s14 + $0x48] sm:$0xf]  ;;  %v14551_v51 = vld [vmem:[%s15947_s14 + $0x254] sm:$0xf0] }
 0x251   : > { %7448 = vmatpush.bf16.msra.mxu1 %v9954_v52  ;;  %v14487_v52 = vld [vmem:[%s15947_s14 + $0x54] sm:$0xf0]  ;;  %v9761_v10 = vld [vmem:[%s15947_s14 + $0x28] sm:$0xf] }
 0x252   : > { %7461 = vmatpush.bf16.msra.mxu2 %v10082_v41  ;;  %v9905_v41 = vld [vmem:[%s15947_s14 + $0x148] sm:$0xf]  ;;  %v14583_v55 = vld [vmem:[%s15947_s14 + $0x354] sm:$0xf0]  ;;  %v9778_v58 = vor.u32 %v14487_v52, %v9777_v61 }
 0x253   : > { %7474 = vmatpush.bf16.msra.mxu3 %v10210_v50  ;;  %v10033_v50 = vld [vmem:[%s15947_s14 + $0x248] sm:$0xf]  ;;  %v14483_v11 = vld [vmem:[%s15947_s14 + $0x34] sm:$0xf0] }
 0x254   : > { %7436 = vmatpush.bf16.msra.mxu0 %v9810_v0  ;;  %v7197_v0 = vpop.f32.mrf.mxu1  ;;  %v9889_v14 = vld [vmem:[%s15947_s14 + $0x128] sm:$0xf]  ;;  %v14515_v62 = vld [vmem:[%s15947_s14 + $0x134] sm:$0xf0]  ;;  %v9762_v21 = vor.u32 %v14483_v11, %v9761_v10  ;;  %v7210_v4 = vpop.f32.mrf.mxu2 }
 0x255   : > { %7449 = vmatpush.bf16.msra.mxu1 %v9938_v2  ;;  %v9906_v2 = vor.u32 %v14519_v49, %v9905_v41  ;;  %v10017_v40 = vld [vmem:[%s15947_s14 + $0x228] sm:$0xf]  ;;  %v14547_v24 = vld [vmem:[%s15947_s14 + $0x234] sm:$0xf0]  ;;  %v7223_v56 = vpop.f32.mrf.mxu3 }
 0x256   : > { %7462 = vmatpush.bf16.msra.mxu2 %v10066_v5  ;;  %v10034_v5 = vor.u32 %v14551_v51, %v10033_v50  ;;  %v10145_v36 = vld [vmem:[%s15947_s14 + $0x328] sm:$0xf]  ;;  %v14579_v30 = vld [vmem:[%s15947_s14 + $0x334] sm:$0xf0]  ;;  %v10018_v61 = vor.u32 %v14547_v24, %v10017_v40 }
 0x257   : > { %7475 = vmatpush.bf16.msra.mxu3 %v10194_v16  ;;  %v10162_v16 = vor.u32 %v14583_v55, %v10161_v54  ;;  %v9873_v52 = vld [vmem:[%s15947_s14 + $0x108] sm:$0xf]  ;;  %v14511_v41 = vld [vmem:[%s15947_s14 + $0x114] sm:$0xf0]  ;;  %v10146_v48 = vor.u32 %v14579_v30, %v10145_v36 }
 0x258   : > { %7437 = vmatpush.bf16.msra.mxu0 %v9794_v35  ;;  %v9745_v35 = vld [vmem:[%s15947_s14 + $0x8] sm:$0xf]  ;;  %v14543_v49 = vld [vmem:[%s15947_s14 + $0x214] sm:$0xf0]  ;;  %v9874_v10 = vor.u32 %v14511_v41, %v9873_v52 }
 0x259   : > { %7450 = vmatpush.bf16.msra.mxu1 %v9922_v46  ;;  %v14479_v46 = vld [vmem:[%s15947_s14 + $0x14] sm:$0xf0]  ;;  %v10129_v50 = vld [vmem:[%s15947_s14 + $0x308] sm:$0xf] }
 0x25a   : > { %7463 = vmatpush.bf16.msra.mxu2 %v10050_v20  ;;  %v9890_v20 = vor.u32 %v14515_v62, %v9889_v14  ;;  %v14575_v51 = vld [vmem:[%s15947_s14 + $0x314] sm:$0xf0]  ;;  %v10369_v53 = vld [vmem:[%s15947_s14 + $0x4e8] sm:$0xf] }
 0x25b   : > { %7476 = vmatpush.bf16.msra.mxu3 %v10178_v23  ;;  %v10001_v23 = vld [vmem:[%s15947_s14 + $0x208] sm:$0xf]  ;;  %v14635_v54 = vld [vmem:[%s15947_s14 + $0x4f4] sm:$0xf0]  ;;  %v10130_v62 = vor.u32 %v14575_v51, %v10129_v50 }
 0x25c   : > { %7438 = vmatpush.bf16.msra.mxu0 %v9778_v58  ;;  %v10497_v55 = vld [vmem:[%s15947_s14 + $0x5e8] sm:$0xf]  ;;  %v9746_v58 = vor.u32 %v14479_v46, %v9745_v35  ;;  %v14667_v0 = vld [vmem:[%s15947_s14 + $0x5f4] sm:$0xf0]  ;;  %v10002_v11 = vor.u32 %v14543_v49, %v10001_v23  ;;  %v10370_v40 = vor.u32 %v14635_v54, %v10369_v53 }
 0x25d   : > { %7451 = vmatpush.bf16.msra.mxu1 %v9906_v2  ;;  %v10625_v2 = vld [vmem:[%s15947_s14 + $0x6e8] sm:$0xf]  ;;  %v10498_v24 = vor.u32 %v14667_v0, %v10497_v55  ;;  %v14695_v52 = vld [vmem:[%s15947_s14 + $0x6d4] sm:$0xf0] }
 0x25e   : > { %7464 = vmatpush.bf16.msra.mxu2 %v10034_v5  ;;  %v14699_v5 = vld [vmem:[%s15947_s14 + $0x6f4] sm:$0xf0]  ;;  %v10753_v14 = vld [vmem:[%s15947_s14 + $0x7e8] sm:$0xf] }
 0x25f   : > { %7477 = vmatpush.bf16.msra.mxu3 %v10162_v16  ;;  %v14731_v16 = vld [vmem:[%s15947_s14 + $0x7f4] sm:$0xf0]  ;;  %v10626_v36 = vor.u32 %v14699_v5, %v10625_v2  ;;  %v10353_v30 = vld [vmem:[%s15947_s14 + $0x4c8] sm:$0xf] }
 0x260   : > { %7439 = vmatpush.bf16.msra.mxu0 %v9762_v21  ;;  %v14631_v21 = vld [vmem:[%s15947_s14 + $0x4d4] sm:$0xf0]  ;;  %v10481_v35 = vld [vmem:[%s15947_s14 + $0x5c8] sm:$0xf]  ;;  %v10754_v46 = vor.u32 %v14731_v16, %v10753_v14 }
 0x261   : > { %7452 = vmatpush.bf16.msra.mxu1 %v9890_v20  ;;  %v14663_v20 = vld [vmem:[%s15947_s14 + $0x5d4] sm:$0xf0]  ;;  %v10737_v41 = vld [vmem:[%s15947_s14 + $0x7c8] sm:$0xf] }
 0x262   : > { %7465 = vmatpush.bf16.msra.mxu2 %v10018_v61  ;;  %v10609_v61 = vld [vmem:[%s15947_s14 + $0x6c8] sm:$0xf]  ;;  %v14727_v23 = vld [vmem:[%s15947_s14 + $0x7d4] sm:$0xf0]  ;;  %v10482_v49 = vor.u32 %v14663_v20, %v10481_v35 }
 0x263   : > { %7478 = vmatpush.bf16.msra.mxu3 %v10146_v48  ;;  %v10354_v48 = vor.u32 %v14631_v21, %v10353_v30  ;;  %v10610_v50 = vor.u32 %v14695_v52, %v10609_v61  ;;  %v10337_v51 = vld [vmem:[%s15947_s14 + $0x4a8] sm:$0xf]  ;;  %v14627_v4 = vld [vmem:[%s15947_s14 + $0x4b4] sm:$0xf0]  ;;  %v10738_v54 = vor.u32 %v14727_v23, %v10737_v41 }
 0x264   : > { %7440 = vmatpush.bf16.msra.mxu0 %v9746_v58  ;;  %v10465_v53 = vld [vmem:[%s15947_s14 + $0x5a8] sm:$0xf]  ;;  %v14659_v55 = vld [vmem:[%s15947_s14 + $0x5b4] sm:$0xf0]  ;;  %v10338_v5 = vor.u32 %v14627_v4, %v10337_v51  ;;  %v7234_v21 = vpop.f32.mrf.mxu0 }
 0x265   : > { %7453 = vmatpush.bf16.msra.mxu1 %v9874_v10  ;;  %v10593_v56 = vld [vmem:[%s15947_s14 + $0x6a8] sm:$0xf]  ;;  %v14691_v58 = vld [vmem:[%s15947_s14 + $0x6b4] sm:$0xf0]  ;;  %v10466_v10 = vor.u32 %v14659_v55, %v10465_v53  ;;  %v7235_v20 = vadd.f32 %v7234_v21, %v17252_v59  ;;  %v7247_v52 = vpop.f32.mrf.mxu1 }
 0x266   : > { %7466 = vmatpush.bf16.msra.mxu2 %v10002_v11  ;;  %v10721_v0 = vld [vmem:[%s15947_s14 + $0x7a8] sm:$0xf]  ;;  %v14723_v2 = vld [vmem:[%s15947_s14 + $0x7b4] sm:$0xf0]  ;;  %v10594_v11 = vor.u32 %v14691_v58, %v10593_v56 }
 0x267   : > { %7479 = vmatpush.bf16.msra.mxu3 %v10130_v62  ;;  %7441 = vmatmul.bf16.vlgmr.msra.gmra.mxu0 %v16086_v28  ;;  %v10321_v14 = vld [vmem:[%s15947_s14 + $0x488] sm:$0xf]  ;;  %v14623_v16 = vld [vmem:[%s15947_s14 + $0x494] sm:$0xf0]  ;;  %v7248_v4 = vadd.f32 %v7247_v52, %v7235_v20 }
 0x268   : > { %7485 = vmatpush.bf16.msrb.mxu0 %v10370_v40  ;;  %7454 = vmatmul.bf16.vlgmr.msra.gmra.mxu1 %v16092_v34  ;;  %v10449_v62 = vld [vmem:[%s15947_s14 + $0x588] sm:$0xf]  ;;  %v10722_v40 = vor.u32 %v14723_v2, %v10721_v0  ;;  %v14687_v30 = vld [vmem:[%s15947_s14 + $0x694] sm:$0xf0]  ;;  %v10322_v61 = vor.u32 %v14623_v16, %v10321_v14 }
 0x269   : > { %7498 = vmatpush.bf16.msrb.mxu1 %v10498_v24  ;;  %7467 = vmatmul.bf16.vlgmr.msra.gmra.mxu2 %v16084_v27  ;;  %v14655_v24 = vld [vmem:[%s15947_s14 + $0x594] sm:$0xf0]  ;;  %v10705_v35 = vld [vmem:[%s15947_s14 + $0x788] sm:$0xf] }
 0x26a   : > { %7511 = vmatpush.bf16.msrb.mxu2 %v10626_v36  ;;  %7480 = vmatmul.bf16.vlgmr.msra.gmra.mxu3 %v16090_v33  ;;  %v10577_v36 = vld [vmem:[%s15947_s14 + $0x688] sm:$0xf]  ;;  %v10450_v41 = vor.u32 %v14655_v24, %v10449_v62  ;;  %v14651_v53 = vld [vmem:[%s15947_s14 + $0x574] sm:$0xf0] }
 0x26b   : > { %7524 = vmatpush.bf16.msrb.mxu3 %v10754_v46  ;;  %v14719_v46 = vld [vmem:[%s15947_s14 + $0x794] sm:$0xf0]  ;;  %v10578_v23 = vor.u32 %v14687_v30, %v10577_v36  ;;  %v10689_v55 = vld [vmem:[%s15947_s14 + $0x768] sm:$0xf] }
 0x26c   : > { %7486 = vmatpush.bf16.msrb.mxu0 %v10354_v48  ;;  %v10305_v48 = vld [vmem:[%s15947_s14 + $0x468] sm:$0xf]  ;;  %v10706_v51 = vor.u32 %v14719_v46, %v10705_v35  ;;  %v14683_v59 = vld [vmem:[%s15947_s14 + $0x674] sm:$0xf0]  ;;  %v7260_v16 = vpop.f32.mrf.mxu2  ;;  %v7236_v46 = vpop.f32.mrf.mxu0 }
 0x26d   : > { %7499 = vmatpush.bf16.msrb.mxu1 %v10482_v49  ;;  %v14619_v49 = vld [vmem:[%s15947_s14 + $0x474] sm:$0xf0]  ;;  %v7261_v36 = vadd.f32 %v7260_v16, %v7248_v4  ;;  %v7273_v30 = vpop.f32.mrf.mxu3  ;;  %v10673_v21 = vld [vmem:[%s15947_s14 + $0x748] sm:$0xf] }
 0x26e   : > { %7512 = vmatpush.bf16.msrb.mxu2 %v10610_v50  ;;  %v10433_v50 = vld [vmem:[%s15947_s14 + $0x568] sm:$0xf]  ;;  %v14715_v56 = vld [vmem:[%s15947_s14 + $0x774] sm:$0xf0]  ;;  %v10306_v58 = vor.u32 %v14619_v49, %v10305_v48 }
 0x26f   : > { %7525 = vmatpush.bf16.msrb.mxu3 %v10738_v54  ;;  %v10561_v54 = vld [vmem:[%s15947_s14 + $0x668] sm:$0xf]  ;;  %v10434_v0 = vor.u32 %v14651_v53, %v10433_v50  ;;  %v10690_v14 = vor.u32 %v14715_v56, %v10689_v55  ;;  %v14647_v62 = vld [vmem:[%s15947_s14 + $0x554] sm:$0xf0]  ;;  %v17323_v52 = vadd.f32 %v7273_v30, %v7261_v36 }
 0x270   : > { %7487 = vmatpush.bf16.msrb.mxu0 %v10338_v5  ;;  %v10562_v2 = vor.u32 %v14683_v59, %v10561_v54  ;;  %v10289_v5 = vld [vmem:[%s15947_s14 + $0x448] sm:$0xf]  ;;  %v14679_v24 = vld [vmem:[%s15947_s14 + $0x654] sm:$0xf0] }
 0x271   : > { %7500 = vmatpush.bf16.msrb.mxu1 %v10466_v10  ;;  %v14615_v10 = vld [vmem:[%s15947_s14 + $0x454] sm:$0xf0]  ;;  %v10273_v48 = vld [vmem:[%s15947_s14 + $0x428] sm:$0xf] }
 0x272   : > { %7513 = vmatpush.bf16.msrb.mxu2 %v10594_v11  ;;  %v10417_v11 = vld [vmem:[%s15947_s14 + $0x548] sm:$0xf]  ;;  %v14711_v35 = vld [vmem:[%s15947_s14 + $0x754] sm:$0xf0]  ;;  %v10290_v20 = vor.u32 %v14615_v10, %v10289_v5 }
 0x273   : > { %7526 = vmatpush.bf16.msrb.mxu3 %v10722_v40  ;;  %v10545_v40 = vld [vmem:[%s15947_s14 + $0x648] sm:$0xf]  ;;  %v14611_v49 = vld [vmem:[%s15947_s14 + $0x434] sm:$0xf0] }
 0x274   : > { %7488 = vmatpush.bf16.msrb.mxu0 %v10322_v61  ;;  %v7249_v61 = vpop.f32.mrf.mxu1  ;;  %v10401_v50 = vld [vmem:[%s15947_s14 + $0x528] sm:$0xf]  ;;  %v14643_v4 = vld [vmem:[%s15947_s14 + $0x534] sm:$0xf0]  ;;  %v10274_v56 = vor.u32 %v14611_v49, %v10273_v48  ;;  %v7262_v36 = vpop.f32.mrf.mxu2 }
 0x275   : > { %7501 = vmatpush.bf16.msrb.mxu1 %v10450_v41  ;;  %v10418_v41 = vor.u32 %v14647_v62, %v10417_v11  ;;  %v10529_v53 = vld [vmem:[%s15947_s14 + $0x628] sm:$0xf]  ;;  %v14675_v54 = vld [vmem:[%s15947_s14 + $0x634] sm:$0xf0]  ;;  %v7275_v46 = vpop.f32.mrf.mxu3 }
 0x276   : > { %7514 = vmatpush.bf16.msrb.mxu2 %v10578_v23  ;;  %v10546_v23 = vor.u32 %v14679_v24, %v10545_v40  ;;  %v10657_v59 = vld [vmem:[%s15947_s14 + $0x728] sm:$0xf]  ;;  %v14707_v55 = vld [vmem:[%s15947_s14 + $0x734] sm:$0xf0]  ;;  %v10530_v5 = vor.u32 %v14675_v54, %v10529_v53 }
 0x277   : > { %7527 = vmatpush.bf16.msrb.mxu3 %v10706_v51  ;;  %v10674_v51 = vor.u32 %v14711_v35, %v10673_v21  ;;  %v10385_v10 = vld [vmem:[%s15947_s14 + $0x508] sm:$0xf]  ;;  %v14639_v11 = vld [vmem:[%s15947_s14 + $0x514] sm:$0xf0]  ;;  %v10658_v16 = vor.u32 %v14707_v55, %v10657_v59 }
 0x278   : > { %7489 = vmatpush.bf16.msrb.mxu0 %v10306_v58  ;;  %v10257_v58 = vld [vmem:[%s15947_s14 + $0x408] sm:$0xf]  ;;  %v14671_v62 = vld [vmem:[%s15947_s14 + $0x614] sm:$0xf0]  ;;  %v10386_v48 = vor.u32 %v14639_v11, %v10385_v10 }
 0x279   : > { %7502 = vmatpush.bf16.msrb.mxu1 %v10434_v0  ;;  %v14607_v0 = vld [vmem:[%s15947_s14 + $0x414] sm:$0xf0]  ;;  %v10641_v40 = vld [vmem:[%s15947_s14 + $0x708] sm:$0xf] }
 0x27a   : > { %7515 = vmatpush.bf16.msrb.mxu2 %v10562_v2  ;;  %v10402_v2 = vor.u32 %v14643_v4, %v10401_v50  ;;  %v14703_v24 = vld [vmem:[%s15947_s14 + $0x714] sm:$0xf0]  ;;  %v10881_v30 = vld [vmem:[%s15947_s14 + $0x8e8] sm:$0xf] }
 0x27b   : > { %7528 = vmatpush.bf16.msrb.mxu3 %v10690_v14  ;;  %v10513_v14 = vld [vmem:[%s15947_s14 + $0x608] sm:$0xf]  ;;  %v14763_v21 = vld [vmem:[%s15947_s14 + $0x8f4] sm:$0xf0]  ;;  %v10642_v4 = vor.u32 %v14703_v24, %v10641_v40 }
 0x27c   : > { %7490 = vmatpush.bf16.msrb.mxu0 %v10290_v20  ;;  %v11009_v35 = vld [vmem:[%s15947_s14 + $0x9e8] sm:$0xf]  ;;  %v10258_v20 = vor.u32 %v14607_v0, %v10257_v58  ;;  %v14795_v61 = vld [vmem:[%s15947_s14 + $0x9f4] sm:$0xf0]  ;;  %v10514_v49 = vor.u32 %v14671_v62, %v10513_v14  ;;  %v10882_v53 = vor.u32 %v14763_v21, %v10881_v30 }
 0x27d   : > { %7503 = vmatpush.bf16.msrb.mxu1 %v10418_v41  ;;  %v11137_v41 = vld [vmem:[%s15947_s14 + $0xae8] sm:$0xf]  ;;  %v11010_v54 = vor.u32 %v14795_v61, %v11009_v35  ;;  %v14823_v10 = vld [vmem:[%s15947_s14 + $0xad4] sm:$0xf0] }
 0x27e   : > { %7516 = vmatpush.bf16.msrb.mxu2 %v10546_v23  ;;  %v14827_v23 = vld [vmem:[%s15947_s14 + $0xaf4] sm:$0xf0]  ;;  %v11265_v50 = vld [vmem:[%s15947_s14 + $0xbe8] sm:$0xf] }
 0x27f   : > { %7529 = vmatpush.bf16.msrb.mxu3 %v10674_v51  ;;  %v14859_v51 = vld [vmem:[%s15947_s14 + $0xbf4] sm:$0xf0]  ;;  %v11138_v59 = vor.u32 %v14827_v23, %v11137_v41  ;;  %v10865_v55 = vld [vmem:[%s15947_s14 + $0x8c8] sm:$0xf] }
 0x280   : > { %7491 = vmatpush.bf16.msrb.mxu0 %v10274_v56  ;;  %v14759_v56 = vld [vmem:[%s15947_s14 + $0x8d4] sm:$0xf0]  ;;  %v10993_v58 = vld [vmem:[%s15947_s14 + $0x9c8] sm:$0xf]  ;;  %v11266_v0 = vor.u32 %v14859_v51, %v11265_v50 }
 0x281   : > { %7504 = vmatpush.bf16.msrb.mxu1 %v10402_v2  ;;  %v14791_v2 = vld [vmem:[%s15947_s14 + $0x9d4] sm:$0xf0]  ;;  %v11249_v11 = vld [vmem:[%s15947_s14 + $0xbc8] sm:$0xf] }
 0x282   : > { %7517 = vmatpush.bf16.msrb.mxu2 %v10530_v5  ;;  %v11121_v5 = vld [vmem:[%s15947_s14 + $0xac8] sm:$0xf]  ;;  %v14855_v14 = vld [vmem:[%s15947_s14 + $0xbd4] sm:$0xf0]  ;;  %v10994_v62 = vor.u32 %v14791_v2, %v10993_v58 }
 0x283   : > { %7530 = vmatpush.bf16.msrb.mxu3 %v10658_v16  ;;  %v10866_v16 = vor.u32 %v14759_v56, %v10865_v55  ;;  %v11122_v40 = vor.u32 %v14823_v10, %v11121_v5  ;;  %v10849_v24 = vld [vmem:[%s15947_s14 + $0x8a8] sm:$0xf]  ;;  %v14755_v36 = vld [vmem:[%s15947_s14 + $0x8b4] sm:$0xf0]  ;;  %v11250_v21 = vor.u32 %v14855_v14, %v11249_v11 }
 0x284   : > { %7492 = vmatpush.bf16.msrb.mxu0 %v10258_v20  ;;  %v10977_v30 = vld [vmem:[%s15947_s14 + $0x9a8] sm:$0xf]  ;;  %v14787_v35 = vld [vmem:[%s15947_s14 + $0x9b4] sm:$0xf0]  ;;  %v10850_v23 = vor.u32 %v14755_v36, %v10849_v24  ;;  %v7286_v56 = vpop.f32.mrf.mxu0 }
 0x285   : > { %7505 = vmatpush.bf16.msrb.mxu1 %v10386_v48  ;;  %v11105_v46 = vld [vmem:[%s15947_s14 + $0xaa8] sm:$0xf]  ;;  %v14819_v20 = vld [vmem:[%s15947_s14 + $0xab4] sm:$0xf0]  ;;  %v10978_v48 = vor.u32 %v14787_v35, %v10977_v30  ;;  %v7287_v2 = vadd.f32 %v7286_v56, %v17323_v52  ;;  %v7299_v10 = vpop.f32.mrf.mxu1 }
 0x286   : > { %7518 = vmatpush.bf16.msrb.mxu2 %v10514_v49  ;;  %v11233_v61 = vld [vmem:[%s15947_s14 + $0xba8] sm:$0xf]  ;;  %v14851_v41 = vld [vmem:[%s15947_s14 + $0xbb4] sm:$0xf0]  ;;  %v11106_v49 = vor.u32 %v14819_v20, %v11105_v46 }
 0x287   : > { %7531 = vmatpush.bf16.msrb.mxu3 %v10642_v4  ;;  %7493 = vmatmul.bf16.vlgmr.msrb.gmra.mxu0 %v16142_v42  ;;  %v10833_v50 = vld [vmem:[%s15947_s14 + $0x888] sm:$0xf]  ;;  %v14751_v51 = vld [vmem:[%s15947_s14 + $0x894] sm:$0xf0]  ;;  %v7300_v36 = vadd.f32 %v7299_v10, %v7287_v2 }
 0x288   : > { %7537 = vmatpush.bf16.msra.mxu0 %v10882_v53  ;;  %7506 = vmatmul.bf16.vlgmr.msrb.gmra.mxu1 %v16146_v45  ;;  %v10961_v4 = vld [vmem:[%s15947_s14 + $0x988] sm:$0xf]  ;;  %v11234_v53 = vor.u32 %v14851_v41, %v11233_v61  ;;  %v14815_v55 = vld [vmem:[%s15947_s14 + $0xa94] sm:$0xf0]  ;;  %v10834_v5 = vor.u32 %v14751_v51, %v10833_v50 }
 0x289   : > { %7550 = vmatpush.bf16.msra.mxu1 %v11010_v54  ;;  %7519 = vmatmul.bf16.vlgmr.msrb.gmra.mxu2 %v16138_v39  ;;  %v14783_v54 = vld [vmem:[%s15947_s14 + $0x994] sm:$0xf0]  ;;  %v11217_v58 = vld [vmem:[%s15947_s14 + $0xb88] sm:$0xf] }
 0x28a   : > { %7563 = vmatpush.bf16.msra.mxu2 %v11138_v59  ;;  %7532 = vmatmul.bf16.vlgmr.msrb.gmra.mxu3 %v16144_v43  ;;  %v11089_v59 = vld [vmem:[%s15947_s14 + $0xa88] sm:$0xf]  ;;  %v10962_v11 = vor.u32 %v14783_v54, %v10961_v4  ;;  %v14779_v30 = vld [vmem:[%s15947_s14 + $0x974] sm:$0xf0] }
 0x28b   : > { %7576 = vmatpush.bf16.msra.mxu3 %v11266_v0  ;;  %v14847_v0 = vld [vmem:[%s15947_s14 + $0xb94] sm:$0xf0]  ;;  %v11090_v14 = vor.u32 %v14815_v55, %v11089_v59  ;;  %v11201_v35 = vld [vmem:[%s15947_s14 + $0xb68] sm:$0xf] }
 0x28c   : > { %7538 = vmatpush.bf16.msra.mxu0 %v10866_v16  ;;  %v10817_v16 = vld [vmem:[%s15947_s14 + $0x868] sm:$0xf]  ;;  %v11218_v24 = vor.u32 %v14847_v0, %v11217_v58  ;;  %v14811_v52 = vld [vmem:[%s15947_s14 + $0xa74] sm:$0xf0]  ;;  %v7312_v51 = vpop.f32.mrf.mxu2  ;;  %v7288_v0 = vpop.f32.mrf.mxu0 }
 0x28d   : > { %7551 = vmatpush.bf16.msra.mxu1 %v10994_v62  ;;  %v14747_v62 = vld [vmem:[%s15947_s14 + $0x874] sm:$0xf0]  ;;  %v7313_v59 = vadd.f32 %v7312_v51, %v7300_v36  ;;  %v7325_v55 = vpop.f32.mrf.mxu3  ;;  %v11185_v56 = vld [vmem:[%s15947_s14 + $0xb48] sm:$0xf] }
 0x28e   : > { %7564 = vmatpush.bf16.msra.mxu2 %v11122_v40  ;;  %v10945_v40 = vld [vmem:[%s15947_s14 + $0x968] sm:$0xf]  ;;  %v14843_v46 = vld [vmem:[%s15947_s14 + $0xb74] sm:$0xf0]  ;;  %v10818_v20 = vor.u32 %v14747_v62, %v10817_v16 }
 0x28f   : > { %7577 = vmatpush.bf16.msra.mxu3 %v11250_v21  ;;  %v11073_v21 = vld [vmem:[%s15947_s14 + $0xa68] sm:$0xf]  ;;  %v10946_v61 = vor.u32 %v14779_v30, %v10945_v40  ;;  %v11202_v50 = vor.u32 %v14843_v46, %v11201_v35  ;;  %v14775_v4 = vld [vmem:[%s15947_s14 + $0x954] sm:$0xf0]  ;;  %v17394_v10 = vadd.f32 %v7325_v55, %v7313_v59 }
 0x290   : > { %7539 = vmatpush.bf16.msra.mxu0 %v10850_v23  ;;  %v11074_v41 = vor.u32 %v14811_v52, %v11073_v21  ;;  %v10801_v23 = vld [vmem:[%s15947_s14 + $0x848] sm:$0xf]  ;;  %v14807_v54 = vld [vmem:[%s15947_s14 + $0xa54] sm:$0xf0] }
 0x291   : > { %7552 = vmatpush.bf16.msra.mxu1 %v10978_v48  ;;  %v14743_v48 = vld [vmem:[%s15947_s14 + $0x854] sm:$0xf0]  ;;  %v10785_v16 = vld [vmem:[%s15947_s14 + $0x828] sm:$0xf] }
 0x292   : > { %7565 = vmatpush.bf16.msra.mxu2 %v11106_v49  ;;  %v10929_v49 = vld [vmem:[%s15947_s14 + $0x948] sm:$0xf]  ;;  %v14839_v58 = vld [vmem:[%s15947_s14 + $0xb54] sm:$0xf0]  ;;  %v10802_v2 = vor.u32 %v14743_v48, %v10801_v23 }
 0x293   : > { %7578 = vmatpush.bf16.msra.mxu3 %v11234_v53  ;;  %v11057_v53 = vld [vmem:[%s15947_s14 + $0xa48] sm:$0xf]  ;;  %v14739_v62 = vld [vmem:[%s15947_s14 + $0x834] sm:$0xf0] }
 0x294   : > { %7540 = vmatpush.bf16.msra.mxu0 %v10834_v5  ;;  %v7301_v5 = vpop.f32.mrf.mxu1  ;;  %v10913_v40 = vld [vmem:[%s15947_s14 + $0x928] sm:$0xf]  ;;  %v14771_v36 = vld [vmem:[%s15947_s14 + $0x934] sm:$0xf0]  ;;  %v10786_v46 = vor.u32 %v14739_v62, %v10785_v16  ;;  %v7314_v59 = vpop.f32.mrf.mxu2 }
 0x295   : > { %7553 = vmatpush.bf16.msra.mxu1 %v10962_v11  ;;  %v10930_v11 = vor.u32 %v14775_v4, %v10929_v49  ;;  %v11041_v30 = vld [vmem:[%s15947_s14 + $0xa28] sm:$0xf]  ;;  %v14803_v21 = vld [vmem:[%s15947_s14 + $0xa34] sm:$0xf0]  ;;  %v7327_v0 = vpop.f32.mrf.mxu3 }
 0x296   : > { %7566 = vmatpush.bf16.msra.mxu2 %v11090_v14  ;;  %v11058_v14 = vor.u32 %v14807_v54, %v11057_v53  ;;  %v11169_v52 = vld [vmem:[%s15947_s14 + $0xb28] sm:$0xf]  ;;  %v14835_v35 = vld [vmem:[%s15947_s14 + $0xb34] sm:$0xf0]  ;;  %v11042_v23 = vor.u32 %v14803_v21, %v11041_v30 }
 0x297   : > { %7579 = vmatpush.bf16.msra.mxu3 %v11218_v24  ;;  %v11186_v24 = vor.u32 %v14839_v58, %v11185_v56  ;;  %v10897_v48 = vld [vmem:[%s15947_s14 + $0x908] sm:$0xf]  ;;  %v14767_v49 = vld [vmem:[%s15947_s14 + $0x914] sm:$0xf0]  ;;  %v11170_v51 = vor.u32 %v14835_v35, %v11169_v52 }
 0x298   : > { %7541 = vmatpush.bf16.msra.mxu0 %v10818_v20  ;;  %v10769_v20 = vld [vmem:[%s15947_s14 + $0x808] sm:$0xf]  ;;  %v14799_v4 = vld [vmem:[%s15947_s14 + $0xa14] sm:$0xf0]  ;;  %v10898_v16 = vor.u32 %v14767_v49, %v10897_v48 }
 0x299   : > { %7554 = vmatpush.bf16.msra.mxu1 %v10946_v61  ;;  %v14735_v61 = vld [vmem:[%s15947_s14 + $0x814] sm:$0xf0]  ;;  %v11153_v53 = vld [vmem:[%s15947_s14 + $0xb08] sm:$0xf] }
 0x29a   : > { %7567 = vmatpush.bf16.msra.mxu2 %v11074_v41  ;;  %v10914_v41 = vor.u32 %v14771_v36, %v10913_v40  ;;  %v14831_v54 = vld [vmem:[%s15947_s14 + $0xb14] sm:$0xf0]  ;;  %v11393_v55 = vld [vmem:[%s15947_s14 + $0xce8] sm:$0xf] }
 0x29b   : > { %7580 = vmatpush.bf16.msra.mxu3 %v11202_v50  ;;  %v11025_v50 = vld [vmem:[%s15947_s14 + $0xa08] sm:$0xf]  ;;  %v14891_v56 = vld [vmem:[%s15947_s14 + $0xcf4] sm:$0xf0]  ;;  %v11154_v36 = vor.u32 %v14831_v54, %v11153_v53 }
 0x29c   : > { %7542 = vmatpush.bf16.msra.mxu0 %v10802_v2  ;;  %v11521_v58 = vld [vmem:[%s15947_s14 + $0xde8] sm:$0xf]  ;;  %v10770_v2 = vor.u32 %v14735_v61, %v10769_v20  ;;  %v14923_v5 = vld [vmem:[%s15947_s14 + $0xdf4] sm:$0xf0]  ;;  %v11026_v62 = vor.u32 %v14799_v4, %v11025_v50  ;;  %v11394_v30 = vor.u32 %v14891_v56, %v11393_v55 }
 0x29d   : > { %7555 = vmatpush.bf16.msra.mxu1 %v10930_v11  ;;  %v11649_v11 = vld [vmem:[%s15947_s14 + $0xee8] sm:$0xf]  ;;  %v11522_v21 = vor.u32 %v14923_v5, %v11521_v58  ;;  %v14951_v48 = vld [vmem:[%s15947_s14 + $0xed4] sm:$0xf0] }
 0x29e   : > { %7568 = vmatpush.bf16.msra.mxu2 %v11058_v14  ;;  %v14955_v14 = vld [vmem:[%s15947_s14 + $0xef4] sm:$0xf0]  ;;  %v11777_v40 = vld [vmem:[%s15947_s14 + $0xfe8] sm:$0xf] }
 0x29f   : > { %7581 = vmatpush.bf16.msra.mxu3 %v11186_v24  ;;  %v14987_v24 = vld [vmem:[%s15947_s14 + $0xff4] sm:$0xf0]  ;;  %v11650_v52 = vor.u32 %v14955_v14, %v11649_v11  ;;  %v11377_v35 = vld [vmem:[%s15947_s14 + $0xcc8] sm:$0xf] }
 0x2a0   : > { %7543 = vmatpush.bf16.msra.mxu0 %v10786_v46  ;;  %v14887_v46 = vld [vmem:[%s15947_s14 + $0xcd4] sm:$0xf0]  ;;  %v11505_v20 = vld [vmem:[%s15947_s14 + $0xdc8] sm:$0xf]  ;;  %v11778_v61 = vor.u32 %v14987_v24, %v11777_v40 }
 0x2a1   : > { %7556 = vmatpush.bf16.msra.mxu1 %v10914_v41  ;;  %v14919_v41 = vld [vmem:[%s15947_s14 + $0xdd4] sm:$0xf0]  ;;  %v11761_v49 = vld [vmem:[%s15947_s14 + $0xfc8] sm:$0xf] }
 0x2a2   : > { %7569 = vmatpush.bf16.msra.mxu2 %v11042_v23  ;;  %v11633_v23 = vld [vmem:[%s15947_s14 + $0xec8] sm:$0xf]  ;;  %v14983_v50 = vld [vmem:[%s15947_s14 + $0xfd4] sm:$0xf0]  ;;  %v11506_v4 = vor.u32 %v14919_v41, %v11505_v20 }
 0x2a3   : > { %7582 = vmatpush.bf16.msra.mxu3 %v11170_v51  ;;  %v11378_v51 = vor.u32 %v14887_v46, %v11377_v35  ;;  %v11634_v53 = vor.u32 %v14951_v48, %v11633_v23  ;;  %v11361_v54 = vld [vmem:[%s15947_s14 + $0xca8] sm:$0xf]  ;;  %v14883_v59 = vld [vmem:[%s15947_s14 + $0xcb4] sm:$0xf0]  ;;  %v11762_v56 = vor.u32 %v14983_v50, %v11761_v49 }
 0x2a4   : > { %7544 = vmatpush.bf16.msra.mxu0 %v10770_v2  ;;  %v11489_v55 = vld [vmem:[%s15947_s14 + $0xda8] sm:$0xf]  ;;  %v14915_v58 = vld [vmem:[%s15947_s14 + $0xdb4] sm:$0xf0]  ;;  %v11362_v14 = vor.u32 %v14883_v59, %v11361_v54  ;;  %v7338_v46 = vpop.f32.mrf.mxu0 }
 0x2a5   : > { %7557 = vmatpush.bf16.msra.mxu1 %v10898_v16  ;;  %v11617_v0 = vld [vmem:[%s15947_s14 + $0xea8] sm:$0xf]  ;;  %v14947_v2 = vld [vmem:[%s15947_s14 + $0xeb4] sm:$0xf0]  ;;  %v11490_v16 = vor.u32 %v14915_v58, %v11489_v55  ;;  %v7339_v41 = vadd.f32 %v7338_v46, %v17394_v10  ;;  %v7351_v48 = vpop.f32.mrf.mxu1 }
 0x2a6   : > { %7570 = vmatpush.bf16.msra.mxu2 %v11026_v62  ;;  %v11745_v5 = vld [vmem:[%s15947_s14 + $0xfa8] sm:$0xf]  ;;  %v14979_v11 = vld [vmem:[%s15947_s14 + $0xfb4] sm:$0xf0]  ;;  %v11618_v62 = vor.u32 %v14947_v2, %v11617_v0 }
 0x2a7   : > { %7583 = vmatpush.bf16.msra.mxu3 %v11154_v36  ;;  %7545 = vmatmul.bf16.vlgmr.msra.gmra.mxu0 %v16222_v25  ;;  %v11345_v40 = vld [vmem:[%s15947_s14 + $0xc88] sm:$0xf]  ;;  %v14879_v24 = vld [vmem:[%s15947_s14 + $0xc94] sm:$0xf0]  ;;  %v7352_v59 = vadd.f32 %v7351_v48, %v7339_v41 }
 0x2a8   : > { %7589 = vmatpush.bf16.msrb.mxu0 %v11394_v30  ;;  %7558 = vmatmul.bf16.vlgmr.msra.gmra.mxu1 %v16233_v32  ;;  %v11473_v36 = vld [vmem:[%s15947_s14 + $0xd88] sm:$0xf]  ;;  %v11746_v30 = vor.u32 %v14979_v11, %v11745_v5  ;;  %v14943_v35 = vld [vmem:[%s15947_s14 + $0xe94] sm:$0xf0]  ;;  %v11346_v23 = vor.u32 %v14879_v24, %v11345_v40 }
 0x2a9   : > { %7602 = vmatpush.bf16.msrb.mxu1 %v11522_v21  ;;  %7571 = vmatmul.bf16.vlgmr.msra.gmra.mxu2 %v16229_v31  ;;  %v14911_v21 = vld [vmem:[%s15947_s14 + $0xd94] sm:$0xf0]  ;;  %v11729_v20 = vld [vmem:[%s15947_s14 + $0xf88] sm:$0xf] }
 0x2aa   : > { %7615 = vmatpush.bf16.msrb.mxu2 %v11650_v52  ;;  %7584 = vmatmul.bf16.vlgmr.msra.gmra.mxu3 %v16239_v19  ;;  %v11601_v52 = vld [vmem:[%s15947_s14 + $0xe88] sm:$0xf]  ;;  %v11474_v49 = vor.u32 %v14911_v21, %v11473_v36  ;;  %v14907_v55 = vld [vmem:[%s15947_s14 + $0xd74] sm:$0xf0] }
 0x2ab   : > { %7628 = vmatpush.bf16.msrb.mxu3 %v11778_v61  ;;  %v14975_v61 = vld [vmem:[%s15947_s14 + $0xf94] sm:$0xf0]  ;;  %v11602_v50 = vor.u32 %v14943_v35, %v11601_v52  ;;  %v11713_v58 = vld [vmem:[%s15947_s14 + $0xf68] sm:$0xf] }
 0x2ac   : > { %7590 = vmatpush.bf16.msrb.mxu0 %v11378_v51  ;;  %v11329_v51 = vld [vmem:[%s15947_s14 + $0xc68] sm:$0xf]  ;;  %v11730_v54 = vor.u32 %v14975_v61, %v11729_v20  ;;  %v14939_v10 = vld [vmem:[%s15947_s14 + $0xe74] sm:$0xf0]  ;;  %v7364_v24 = vpop.f32.mrf.mxu2  ;;  %v7340_v61 = vpop.f32.mrf.mxu0 }
 0x2ad   : > { %7603 = vmatpush.bf16.msrb.mxu1 %v11506_v4  ;;  %v14875_v4 = vld [vmem:[%s15947_s14 + $0xc74] sm:$0xf0]  ;;  %v7365_v52 = vadd.f32 %v7364_v24, %v7352_v59  ;;  %v7377_v35 = vpop.f32.mrf.mxu3  ;;  %v11697_v46 = vld [vmem:[%s15947_s14 + $0xf48] sm:$0xf] }
 0x2ae   : > { %7616 = vmatpush.bf16.msrb.mxu2 %v11634_v53  ;;  %v11457_v53 = vld [vmem:[%s15947_s14 + $0xd68] sm:$0xf]  ;;  %v14971_v0 = vld [vmem:[%s15947_s14 + $0xf74] sm:$0xf0]  ;;  %v11330_v2 = vor.u32 %v14875_v4, %v11329_v51 }
 0x2af   : > { %7629 = vmatpush.bf16.msrb.mxu3 %v11762_v56  ;;  %v11585_v56 = vld [vmem:[%s15947_s14 + $0xe68] sm:$0xf]  ;;  %v11458_v5 = vor.u32 %v14907_v55, %v11457_v53  ;;  %v11714_v40 = vor.u32 %v14971_v0, %v11713_v58  ;;  %v14903_v36 = vld [vmem:[%s15947_s14 + $0xd54] sm:$0xf0]  ;;  %v17465_v48 = vadd.f32 %v7377_v35, %v7365_v52 }
 0x2b0   : > { %7591 = vmatpush.bf16.msrb.mxu0 %v11362_v14  ;;  %v11586_v11 = vor.u32 %v14939_v10, %v11585_v56  ;;  %v11313_v14 = vld [vmem:[%s15947_s14 + $0xc48] sm:$0xf]  ;;  %v14935_v21 = vld [vmem:[%s15947_s14 + $0xe54] sm:$0xf0] }
 0x2b1   : > { %7604 = vmatpush.bf16.msrb.mxu1 %v11490_v16  ;;  %v14871_v16 = vld [vmem:[%s15947_s14 + $0xc54] sm:$0xf0]  ;;  %v11297_v51 = vld [vmem:[%s15947_s14 + $0xc28] sm:$0xf] }
 0x2b2   : > { %7617 = vmatpush.bf16.msrb.mxu2 %v11618_v62  ;;  %v11441_v62 = vld [vmem:[%s15947_s14 + $0xd48] sm:$0xf]  ;;  %v14967_v20 = vld [vmem:[%s15947_s14 + $0xf54] sm:$0xf0]  ;;  %v11314_v41 = vor.u32 %v14871_v16, %v11313_v14 }
 0x2b3   : > { %7630 = vmatpush.bf16.msrb.mxu3 %v11746_v30  ;;  %v11569_v30 = vld [vmem:[%s15947_s14 + $0xe48] sm:$0xf]  ;;  %v14867_v4 = vld [vmem:[%s15947_s14 + $0xc34] sm:$0xf0] }
 0x2b4   : > { %7592 = vmatpush.bf16.msrb.mxu0 %v11346_v23  ;;  %v7353_v23 = vpop.f32.mrf.mxu1  ;;  %v11425_v53 = vld [vmem:[%s15947_s14 + $0xd28] sm:$0xf]  ;;  %v14899_v59 = vld [vmem:[%s15947_s14 + $0xd34] sm:$0xf0]  ;;  %v11298_v0 = vor.u32 %v14867_v4, %v11297_v51  ;;  %v7366_v52 = vpop.f32.mrf.mxu2 }
 0x2b5   : > { %7605 = vmatpush.bf16.msrb.mxu1 %v11474_v49  ;;  %v11442_v49 = vor.u32 %v14903_v36, %v11441_v62  ;;  %v11553_v55 = vld [vmem:[%s15947_s14 + $0xe28] sm:$0xf]  ;;  %v14931_v56 = vld [vmem:[%s15947_s14 + $0xe34] sm:$0xf0]  ;;  %v7379_v61 = vpop.f32.mrf.mxu3 }
 0x2b6   : > { %7618 = vmatpush.bf16.msrb.mxu2 %v11602_v50  ;;  %v11570_v50 = vor.u32 %v14935_v21, %v11569_v30  ;;  %v11681_v10 = vld [vmem:[%s15947_s14 + $0xf28] sm:$0xf]  ;;  %v14963_v58 = vld [vmem:[%s15947_s14 + $0xf34] sm:$0xf0]  ;;  %v11554_v14 = vor.u32 %v14931_v56, %v11553_v55 }
 0x2b7   : > { %7631 = vmatpush.bf16.msrb.mxu3 %v11730_v54  ;;  %v11698_v54 = vor.u32 %v14967_v20, %v11697_v46  ;;  %v11409_v16 = vld [vmem:[%s15947_s14 + $0xd08] sm:$0xf]  ;;  %v14895_v62 = vld [vmem:[%s15947_s14 + $0xd14] sm:$0xf0]  ;;  %v11682_v24 = vor.u32 %v14963_v58, %v11681_v10 }
 0x2b8   : > { %7593 = vmatpush.bf16.msrb.mxu0 %v11330_v2  ;;  %v11281_v2 = vld [vmem:[%s15947_s14 + $0xc08] sm:$0xf]  ;;  %v14927_v36 = vld [vmem:[%s15947_s14 + $0xe14] sm:$0xf0]  ;;  %v11410_v51 = vor.u32 %v14895_v62, %v11409_v16 }
 0x2b9   : > { %7606 = vmatpush.bf16.msrb.mxu1 %v11458_v5  ;;  %v14863_v5 = vld [vmem:[%s15947_s14 + $0xc14] sm:$0xf0]  ;;  %v11665_v30 = vld [vmem:[%s15947_s14 + $0xf08] sm:$0xf] }
 0x2ba   : > { %7619 = vmatpush.bf16.msrb.mxu2 %v11586_v11  ;;  %v11426_v11 = vor.u32 %v14899_v59, %v11425_v53  ;;  %v14959_v21 = vld [vmem:[%s15947_s14 + $0xf14] sm:$0xf0]  ;;  %v11905_v35 = vld [vmem:[%s15947_s14 + $0x10e8] sm:$0xf] }
 0x2bb   : > { %7632 = vmatpush.bf16.msrb.mxu3 %v11714_v40  ;;  %v11537_v40 = vld [vmem:[%s15947_s14 + $0xe08] sm:$0xf]  ;;  %v15019_v46 = vld [vmem:[%s15947_s14 + $0x10f4] sm:$0xf0]  ;;  %v11666_v59 = vor.u32 %v14959_v21, %v11665_v30 }
 0x2bc   : > { %7594 = vmatpush.bf16.msrb.mxu0 %v11314_v41  ;;  %v12033_v20 = vld [vmem:[%s15947_s14 + $0x11e8] sm:$0xf]  ;;  %v11282_v41 = vor.u32 %v14863_v5, %v11281_v2  ;;  %v15051_v23 = vld [vmem:[%s15947_s14 + $0x11f4] sm:$0xf0]  ;;  %v11538_v4 = vor.u32 %v14927_v36, %v11537_v40  ;;  %v11906_v55 = vor.u32 %v15019_v46, %v11905_v35 }
 0x2bd   : > { %7607 = vmatpush.bf16.msrb.mxu1 %v11442_v49  ;;  %v12161_v49 = vld [vmem:[%s15947_s14 + $0x12e8] sm:$0xf]  ;;  %v12034_v56 = vor.u32 %v15051_v23, %v12033_v20  ;;  %v15079_v16 = vld [vmem:[%s15947_s14 + $0x12d4] sm:$0xf0] }
 0x2be   : > { %7620 = vmatpush.bf16.msrb.mxu2 %v11570_v50  ;;  %v15083_v50 = vld [vmem:[%s15947_s14 + $0x12f4] sm:$0xf0]  ;;  %v12289_v53 = vld [vmem:[%s15947_s14 + $0x13e8] sm:$0xf] }
 0x2bf   : > { %7633 = vmatpush.bf16.msrb.mxu3 %v11698_v54  ;;  %v15115_v54 = vld [vmem:[%s15947_s14 + $0x13f4] sm:$0xf0]  ;;  %v12162_v10 = vor.u32 %v15083_v50, %v12161_v49  ;;  %v11889_v58 = vld [vmem:[%s15947_s14 + $0x10c8] sm:$0xf] }
 0x2c0   : > { %7595 = vmatpush.bf16.msrb.mxu0 %v11298_v0  ;;  %v15015_v0 = vld [vmem:[%s15947_s14 + $0x10d4] sm:$0xf0]  ;;  %v12017_v2 = vld [vmem:[%s15947_s14 + $0x11c8] sm:$0xf]  ;;  %v12290_v5 = vor.u32 %v15115_v54, %v12289_v53 }
 0x2c1   : > { %7608 = vmatpush.bf16.msrb.mxu1 %v11426_v11  ;;  %v15047_v11 = vld [vmem:[%s15947_s14 + $0x11d4] sm:$0xf0]  ;;  %v12273_v62 = vld [vmem:[%s15947_s14 + $0x13c8] sm:$0xf] }
 0x2c2   : > { %7621 = vmatpush.bf16.msrb.mxu2 %v11554_v14  ;;  %v12145_v14 = vld [vmem:[%s15947_s14 + $0x12c8] sm:$0xf]  ;;  %v15111_v40 = vld [vmem:[%s15947_s14 + $0x13d4] sm:$0xf0]  ;;  %v12018_v36 = vor.u32 %v15047_v11, %v12017_v2 }
 0x2c3   : > { %7634 = vmatpush.bf16.msrb.mxu3 %v11682_v24  ;;  %v11890_v24 = vor.u32 %v15015_v0, %v11889_v58  ;;  %v12146_v30 = vor.u32 %v15079_v16, %v12145_v14  ;;  %v11873_v21 = vld [vmem:[%s15947_s14 + $0x10a8] sm:$0xf]  ;;  %v15011_v52 = vld [vmem:[%s15947_s14 + $0x10b4] sm:$0xf0]  ;;  %v12274_v46 = vor.u32 %v15111_v40, %v12273_v62 }
 0x2c4   : > { %7596 = vmatpush.bf16.msrb.mxu0 %v11282_v41  ;;  %v12001_v35 = vld [vmem:[%s15947_s14 + $0x11a8] sm:$0xf]  ;;  %v15043_v20 = vld [vmem:[%s15947_s14 + $0x11b4] sm:$0xf0]  ;;  %v11874_v50 = vor.u32 %v15011_v52, %v11873_v21  ;;  %v7390_v0 = vpop.f32.mrf.mxu0 }
 0x2c5   : > { %7609 = vmatpush.bf16.msrb.mxu1 %v11410_v51  ;;  %v12129_v61 = vld [vmem:[%s15947_s14 + $0x12a8] sm:$0xf]  ;;  %v15075_v41 = vld [vmem:[%s15947_s14 + $0x12b4] sm:$0xf0]  ;;  %v12002_v51 = vor.u32 %v15043_v20, %v12001_v35  ;;  %v7391_v11 = vadd.f32 %v7390_v0, %v17465_v48  ;;  %v7403_v16 = vpop.f32.mrf.mxu1 }
 0x2c6   : > { %7622 = vmatpush.bf16.msrb.mxu2 %v11538_v4  ;;  %v12257_v23 = vld [vmem:[%s15947_s14 + $0x13a8] sm:$0xf]  ;;  %v15107_v49 = vld [vmem:[%s15947_s14 + $0x13b4] sm:$0xf0]  ;;  %v12130_v4 = vor.u32 %v15075_v41, %v12129_v61 }
 0x2c7   : > { %7635 = vmatpush.bf16.msrb.mxu3 %v11666_v59  ;;  %7597 = vmatmul.bf16.vlgmr.msrb.gmra.mxu0 %v16315_v29  ;;  %v11857_v53 = vld [vmem:[%s15947_s14 + $0x1088] sm:$0xf]  ;;  %v15007_v54 = vld [vmem:[%s15947_s14 + $0x1094] sm:$0xf0]  ;;  %v7404_v52 = vadd.f32 %v7403_v16, %v7391_v11 }
 0x2c8   : > { %7641 = vmatpush.bf16.msra.mxu0 %v11906_v55  ;;  %7610 = vmatmul.bf16.vlgmr.msrb.gmra.mxu1 %v16326_v38  ;;  %v11985_v59 = vld [vmem:[%s15947_s14 + $0x1188] sm:$0xf]  ;;  %v12258_v55 = vor.u32 %v15107_v49, %v12257_v23  ;;  %v15071_v58 = vld [vmem:[%s15947_s14 + $0x1294] sm:$0xf0]  ;;  %v11858_v14 = vor.u32 %v15007_v54, %v11857_v53 }
 0x2c9   : > { %7654 = vmatpush.bf16.msra.mxu1 %v12034_v56  ;;  %7623 = vmatmul.bf16.vlgmr.msrb.gmra.mxu2 %v16322_v37  ;;  %v15039_v56 = vld [vmem:[%s15947_s14 + $0x1194] sm:$0xf0]  ;;  %v12241_v2 = vld [vmem:[%s15947_s14 + $0x1388] sm:$0xf] }
 0x2ca   : > { %7667 = vmatpush.bf16.msra.mxu2 %v12162_v10  ;;  %7636 = vmatmul.bf16.vlgmr.msrb.gmra.mxu3 %v16332_v22  ;;  %v12113_v10 = vld [vmem:[%s15947_s14 + $0x1288] sm:$0xf]  ;;  %v11986_v62 = vor.u32 %v15039_v56, %v11985_v59  ;;  %v15035_v35 = vld [vmem:[%s15947_s14 + $0x1174] sm:$0xf0] }
 0x2cb   : > { %7680 = vmatpush.bf16.msra.mxu3 %v12290_v5  ;;  %v15103_v5 = vld [vmem:[%s15947_s14 + $0x1394] sm:$0xf0]  ;;  %v12114_v40 = vor.u32 %v15071_v58, %v12113_v10  ;;  %v12225_v20 = vld [vmem:[%s15947_s14 + $0x1368] sm:$0xf] }
 0x2cc   : > { %7642 = vmatpush.bf16.msra.mxu0 %v11890_v24  ;;  %v11841_v24 = vld [vmem:[%s15947_s14 + $0x1068] sm:$0xf]  ;;  %v12242_v21 = vor.u32 %v15103_v5, %v12241_v2  ;;  %v15067_v48 = vld [vmem:[%s15947_s14 + $0x1274] sm:$0xf0]  ;;  %v7416_v54 = vpop.f32.mrf.mxu2  ;;  %v7392_v5 = vpop.f32.mrf.mxu0 }
 0x2cd   : > { %7655 = vmatpush.bf16.msra.mxu1 %v12018_v36  ;;  %v15003_v36 = vld [vmem:[%s15947_s14 + $0x1074] sm:$0xf0]  ;;  %v7417_v10 = vadd.f32 %v7416_v54, %v7404_v52  ;;  %v7429_v58 = vpop.f32.mrf.mxu3  ;;  %v12209_v0 = vld [vmem:[%s15947_s14 + $0x1348] sm:$0xf] }
 0x2ce   : > { %7668 = vmatpush.bf16.msra.mxu2 %v12146_v30  ;;  %v11969_v30 = vld [vmem:[%s15947_s14 + $0x1168] sm:$0xf]  ;;  %v15099_v61 = vld [vmem:[%s15947_s14 + $0x1374] sm:$0xf0]  ;;  %v11842_v41 = vor.u32 %v15003_v36, %v11841_v24 }
 0x2cf   : > { %7681 = vmatpush.bf16.msra.mxu3 %v12274_v46  ;;  %v12097_v46 = vld [vmem:[%s15947_s14 + $0x1268] sm:$0xf]  ;;  %v11970_v23 = vor.u32 %v15035_v35, %v11969_v30  ;;  %v12226_v53 = vor.u32 %v15099_v61, %v12225_v20  ;;  %v15031_v59 = vld [vmem:[%s15947_s14 + $0x1154] sm:$0xf0]  ;;  %v7430_v16 = vadd.f32 %v7429_v58, %v7417_v10 }
 0x2d0   : > { %7643 = vmatpush.bf16.msra.mxu0 %v11874_v50  ;;  %v12098_v49 = vor.u32 %v15067_v48, %v12097_v46  ;;  %v11825_v50 = vld [vmem:[%s15947_s14 + $0x1048] sm:$0xf]  ;;  %v15063_v56 = vld [vmem:[%s15947_s14 + $0x1254] sm:$0xf0] }
 0x2d1   : > { %7656 = vmatpush.bf16.msra.mxu1 %v12002_v51  ;;  %v14999_v51 = vld [vmem:[%s15947_s14 + $0x1054] sm:$0xf0]  ;;  %v11809_v24 = vld [vmem:[%s15947_s14 + $0x1028] sm:$0xf]  ;;  %v8269_v48 = vrot.slane %v7430_v16, 6 }
 0x2d2   : > { %7669 = vmatpush.bf16.msra.mxu2 %v12130_v4  ;;  %v11953_v4 = vld [vmem:[%s15947_s14 + $0x1148] sm:$0xf]  ;;  %v15095_v2 = vld [vmem:[%s15947_s14 + $0x1354] sm:$0xf0]  ;;  %v11826_v11 = vor.u32 %v14999_v51, %v11825_v50 }
 0x2d3   : > { %7682 = vmatpush.bf16.msra.mxu3 %v12258_v55  ;;  %v12081_v55 = vld [vmem:[%s15947_s14 + $0x1248] sm:$0xf]  ;;  %v14995_v36 = vld [vmem:[%s15947_s14 + $0x1034] sm:$0xf0]  ;;  %v17548_v50 = vsel %vm8272_vm0, %v16969_v57, %v8269_v48 }
 0x2d4   : > { %7644 = vmatpush.bf16.msra.mxu0 %v11858_v14  ;;  %v7405_v14 = vpop.f32.mrf.mxu1  ;;  %v11937_v30 = vld [vmem:[%s15947_s14 + $0x1128] sm:$0xf]  ;;  %v15027_v52 = vld [vmem:[%s15947_s14 + $0x1134] sm:$0xf0]  ;;  %v7418_v57 = vpop.f32.mrf.mxu2 }
 0x2d5   : > { %7657 = vmatpush.bf16.msra.mxu1 %v11986_v62  ;;  %v11954_v62 = vor.u32 %v15031_v59, %v11953_v4  ;;  %v12065_v35 = vld [vmem:[%s15947_s14 + $0x1228] sm:$0xf]  ;;  %v15059_v46 = vld [vmem:[%s15947_s14 + $0x1234] sm:$0xf0]  ;;  %v11938_v51 = vor.u32 %v15027_v52, %v11937_v30 }
 0x2d6   : > { %7670 = vmatpush.bf16.msra.mxu2 %v12114_v40  ;;  %v12082_v40 = vor.u32 %v15063_v56, %v12081_v55  ;;  %v12193_v20 = vld [vmem:[%s15947_s14 + $0x1328] sm:$0xf]  ;;  %v15091_v61 = vld [vmem:[%s15947_s14 + $0x1334] sm:$0xf0]  ;;  %v12066_v4 = vor.u32 %v15059_v46, %v12065_v35 }
 0x2d7   : > { %7683 = vmatpush.bf16.msra.mxu3 %v12242_v21  ;;  %v12210_v21 = vor.u32 %v15095_v2, %v12209_v0  ;;  %v15023_v54 = vld [vmem:[%s15947_s14 + $0x1114] sm:$0xf0]  ;;  %v12049_v59 = vld [vmem:[%s15947_s14 + $0x1208] sm:$0xf]  ;;  %v12194_v55 = vor.u32 %v15091_v61, %v12193_v20 }
 0x2d8   : > { %7645 = vmatpush.bf16.msra.mxu0 %v11842_v41  ;;  %v11810_v41 = vor.u32 %v14995_v36, %v11809_v24  ;;  %v15055_v56 = vld [vmem:[%s15947_s14 + $0x1214] sm:$0xf0]  ;;  %v12177_v10 = vld [vmem:[%s15947_s14 + $0x1308] sm:$0xf] }
 0x2d9   : > { %7658 = vmatpush.bf16.msra.mxu1 %v11970_v23  ;;  %v11793_v23 = vld [vmem:[%s15947_s14 + $0x1008] sm:$0xf]  ;;  %v15087_v58 = vld [vmem:[%s15947_s14 + $0x1314] sm:$0xf0]  ;;  %v12050_v36 = vor.u32 %v15055_v56, %v12049_v59 }
 0x2da   : > { %7671 = vmatpush.bf16.msra.mxu2 %v12098_v49  ;;  %v14991_v49 = vld [vmem:[%s15947_s14 + $0x1014] sm:$0xf0]  ;;  %v12417_v0 = vld [vmem:[%s15947_s14 + $0x14e8] sm:$0xf]  ;;  %v12178_v52 = vor.u32 %v15087_v58, %v12177_v10 }
 0x2db   : > { %7684 = vmatpush.bf16.msra.mxu3 %v12226_v53  ;;  %v11921_v53 = vld [vmem:[%s15947_s14 + $0x1108] sm:$0xf]  ;;  %v15147_v2 = vld [vmem:[%s15947_s14 + $0x14f4] sm:$0xf0]  ;;  %v11794_v14 = vor.u32 %v14991_v49, %v11793_v23 }
 0x2dc   : > { %7646 = vmatpush.bf16.msra.mxu0 %v11826_v11  ;;  %v12545_v5 = vld [vmem:[%s15947_s14 + $0x15e8] sm:$0xf]  ;;  %v7431_v11 = vpop.f32.mrf.mxu3  ;;  %v15179_v16 = vld [vmem:[%s15947_s14 + $0x15f4] sm:$0xf0]  ;;  %v11922_v24 = vor.u32 %v15023_v54, %v11921_v53  ;;  %v12418_v35 = vor.u32 %v15147_v2, %v12417_v0 }
 0x2dd   : > { %7659 = vmatpush.bf16.msra.mxu1 %v11954_v62  ;;  %v12673_v62 = vld [vmem:[%s15947_s14 + $0x16e8] sm:$0xf]  ;;  %v12546_v46 = vor.u32 %v15179_v16, %v12545_v5  ;;  %v15143_v61 = vld [vmem:[%s15947_s14 + $0x14d4] sm:$0xf0] }
 0x2de   : > { %7672 = vmatpush.bf16.msra.mxu2 %v12082_v40  ;;  %v15211_v40 = vld [vmem:[%s15947_s14 + $0x16f4] sm:$0xf0]  ;;  %v12801_v30 = vld [vmem:[%s15947_s14 + $0x17e8] sm:$0xf] }
 0x2df   : > { %7685 = vmatpush.bf16.msra.mxu3 %v12210_v21  ;;  %v15243_v21 = vld [vmem:[%s15947_s14 + $0x17f4] sm:$0xf0]  ;;  %v12674_v48 = vor.u32 %v15211_v40, %v12673_v62  ;;  %v12401_v20 = vld [vmem:[%s15947_s14 + $0x14c8] sm:$0xf] }
 0x2e0   : > { %7647 = vmatpush.bf16.msra.mxu0 %v11810_v41  ;;  %v12529_v41 = vld [vmem:[%s15947_s14 + $0x15c8] sm:$0xf]  ;;  %v12802_v23 = vor.u32 %v15243_v21, %v12801_v30  ;;  %v15175_v49 = vld [vmem:[%s15947_s14 + $0x15d4] sm:$0xf0]  ;;  %v12402_v59 = vor.u32 %v15143_v61, %v12401_v20 }
 0x2e1   : > { %7660 = vmatpush.bf16.msra.mxu1 %v11938_v51  ;;  %v12657_v51 = vld [vmem:[%s15947_s14 + $0x16c8] sm:$0xf]  ;;  %v15239_v54 = vld [vmem:[%s15947_s14 + $0x17d4] sm:$0xf0] }
 0x2e2   : > { %7673 = vmatpush.bf16.msra.mxu2 %v12066_v4  ;;  %v15207_v4 = vld [vmem:[%s15947_s14 + $0x16d4] sm:$0xf0]  ;;  %v12785_v53 = vld [vmem:[%s15947_s14 + $0x17c8] sm:$0xf] }
 0x2e3   : > { %7686 = vmatpush.bf16.msra.mxu3 %v12194_v55  ;;  %v12530_v55 = vor.u32 %v15175_v49, %v12529_v41  ;;  %v12658_v56 = vor.u32 %v15207_v4, %v12657_v51  ;;  %v12385_v10 = vld [vmem:[%s15947_s14 + $0x14a8] sm:$0xf]  ;;  %v15139_v58 = vld [vmem:[%s15947_s14 + $0x14b4] sm:$0xf0]  ;;  %v12786_v0 = vor.u32 %v15239_v54, %v12785_v53 }
 0x2e4   : > { %7648 = vmatpush.bf16.msra.mxu0 %v11794_v14  ;;  %v12513_v57 = vld [vmem:[%s15947_s14 + $0x15a8] sm:$0xf]  ;;  %v15171_v2 = vld [vmem:[%s15947_s14 + $0x15b4] sm:$0xf0]  ;;  %v12386_v62 = vor.u32 %v15139_v58, %v12385_v10 }
 0x2e5   : > { %7661 = vmatpush.bf16.msra.mxu1 %v11922_v24  ;;  %v12641_v5 = vld [vmem:[%s15947_s14 + $0x16a8] sm:$0xf]  ;;  %v15203_v11 = vld [vmem:[%s15947_s14 + $0x16b4] sm:$0xf0]  ;;  %v12514_v40 = vor.u32 %v15171_v2, %v12513_v57 }
 0x2e6   : > { %7674 = vmatpush.bf16.msra.mxu2 %v12050_v36  ;;  %v12769_v14 = vld [vmem:[%s15947_s14 + $0x17a8] sm:$0xf]  ;;  %v15235_v16 = vld [vmem:[%s15947_s14 + $0x17b4] sm:$0xf0]  ;;  %v12642_v24 = vor.u32 %v15203_v11, %v12641_v5 }
 0x2e7   : > { %7687 = vmatpush.bf16.msra.mxu3 %v12178_v52  ;;  %7649 = vmatmul.bf16.vlgmr.msra.gmra.mxu0 %v16397_v60  ;;  %v12369_v36 = vld [vmem:[%s15947_s14 + $0x1488] sm:$0xf]  ;;  %v15135_v30 = vld [vmem:[%s15947_s14 + $0x1494] sm:$0xf0]  ;;  %v12770_v52 = vor.u32 %v15235_v16, %v12769_v14 }
 0x2e8   : > { %7693 = vmatpush.bf16.msrb.mxu0 %v12418_v35  ;;  %7662 = vmatmul.bf16.vlgmr.msra.gmra.mxu1 %v16404_v44  ;;  %v12497_v21 = vld [vmem:[%s15947_s14 + $0x1588] sm:$0xf]  ;;  %v15167_v35 = vld [vmem:[%s15947_s14 + $0x1594] sm:$0xf0]  ;;  %v12370_v41 = vor.u32 %v15135_v30, %v12369_v36 }
 0x2e9   : > { %7706 = vmatpush.bf16.msrb.mxu1 %v12546_v46  ;;  %7675 = vmatmul.bf16.vlgmr.msra.gmra.mxu2 %v16402_v63  ;;  %v12625_v46 = vld [vmem:[%s15947_s14 + $0x1688] sm:$0xf]  ;;  %v15231_v61 = vld [vmem:[%s15947_s14 + $0x1794] sm:$0xf0]  ;;  %v12498_v49 = vor.u32 %v15167_v35, %v12497_v21 }
 0x2ea   : > { %7719 = vmatpush.bf16.msrb.mxu2 %v12674_v48  ;;  %7688 = vmatmul.bf16.vlgmr.msra.gmra.mxu3 %v16408_v47  ;;  %v15199_v48 = vld [vmem:[%s15947_s14 + $0x1694] sm:$0xf0]  ;;  %v12753_v20 = vld [vmem:[%s15947_s14 + $0x1788] sm:$0xf] }
 0x2eb   : > { %7732 = vmatpush.bf16.msrb.mxu3 %v12802_v23  ;;  %v7442_v23 = vpop.f32.mrf.mxu0  ;;  %v12626_v51 = vor.u32 %v15199_v48, %v12625_v46  ;;  %v12353_v4 = vld [vmem:[%s15947_s14 + $0x1468] sm:$0xf]  ;;  %v15131_v53 = vld [vmem:[%s15947_s14 + $0x1474] sm:$0xf0] }
 0x2ec   : > { %7694 = vmatpush.bf16.msrb.mxu0 %v12402_v59  ;;  %v12481_v54 = vld [vmem:[%s15947_s14 + $0x1568] sm:$0xf]  ;;  %v7455_v59 = vpop.f32.mrf.mxu1  ;;  %v15195_v58 = vld [vmem:[%s15947_s14 + $0x1674] sm:$0xf0]  ;;  %v12354_v5 = vor.u32 %v15131_v53, %v12353_v4 }
 0x2ed   : > { %7707 = vmatpush.bf16.msrb.mxu1 %v12530_v55  ;;  %v12754_v55 = vor.u32 %v15231_v61, %v12753_v20  ;;  %v12609_v10 = vld [vmem:[%s15947_s14 + $0x1668] sm:$0xf]  ;;  %v7456_v57 = vadd.f32 %v7455_v59, %v7442_v23  ;;  %v15227_v2 = vld [vmem:[%s15947_s14 + $0x1774] sm:$0xf0]  ;;  %v7481_v46 = vpop.f32.mrf.mxu3 }
 0x2ee   : > { %7720 = vmatpush.bf16.msrb.mxu2 %v12658_v56  ;;  %v15163_v56 = vld [vmem:[%s15947_s14 + $0x1574] sm:$0xf0]  ;;  %v12610_v14 = vor.u32 %v15195_v58, %v12609_v10  ;;  %v12337_v16 = vld [vmem:[%s15947_s14 + $0x1448] sm:$0xf] }
 0x2ef   : > { %7733 = vmatpush.bf16.msrb.mxu3 %v12786_v0  ;;  %v12737_v0 = vld [vmem:[%s15947_s14 + $0x1768] sm:$0xf]  ;;  %v12482_v11 = vor.u32 %v15163_v56, %v12481_v54  ;;  %v15159_v30 = vld [vmem:[%s15947_s14 + $0x1554] sm:$0xf0] }
 0x2f0   : > { %7695 = vmatpush.bf16.msrb.mxu0 %v12386_v62  ;;  %v15127_v62 = vld [vmem:[%s15947_s14 + $0x1454] sm:$0xf0]  ;;  %v12738_v36 = vor.u32 %v15227_v2, %v12737_v0  ;;  %v12593_v21 = vld [vmem:[%s15947_s14 + $0x1648] sm:$0xf] }
 0x2f1   : > { %7708 = vmatpush.bf16.msrb.mxu1 %v12514_v40  ;;  %v12465_v40 = vld [vmem:[%s15947_s14 + $0x1548] sm:$0xf]  ;;  %v15223_v20 = vld [vmem:[%s15947_s14 + $0x1754] sm:$0xf0]  ;;  %v12338_v61 = vor.u32 %v15127_v62, %v12337_v16 }
 0x2f2   : > { %7721 = vmatpush.bf16.msrb.mxu2 %v12642_v24  ;;  %v7468_v24 = vpop.f32.mrf.mxu2  ;;  %v12721_v48 = vld [vmem:[%s15947_s14 + $0x1748] sm:$0xf]  ;;  %v15123_v53 = vld [vmem:[%s15947_s14 + $0x1434] sm:$0xf0] }
 0x2f3   : > { %7734 = vmatpush.bf16.msrb.mxu3 %v12770_v52  ;;  %v15191_v52 = vld [vmem:[%s15947_s14 + $0x1654] sm:$0xf0]  ;;  %v7469_v35 = vadd.f32 %v7468_v24, %v7456_v57  ;;  %v7444_v23 = vpop.f32.mrf.mxu0  ;;  %v12321_v4 = vld [vmem:[%s15947_s14 + $0x1428] sm:$0xf] }
 0x2f4   : > { %7696 = vmatpush.bf16.msrb.mxu0 %v12370_v41  ;;  %v12449_v54 = vld [vmem:[%s15947_s14 + $0x1528] sm:$0xf]  ;;  %v7457_v59 = vpop.f32.mrf.mxu1  ;;  %v15155_v56 = vld [vmem:[%s15947_s14 + $0x1534] sm:$0xf0]  ;;  %v12322_v2 = vor.u32 %v15123_v53, %v12321_v4 }
 0x2f5   : > { %7709 = vmatpush.bf16.msrb.mxu1 %v12498_v49  ;;  %v17608_v41 = vadd.f32 %v7481_v46, %v7469_v35  ;;  %v12466_v49 = vor.u32 %v15159_v30, %v12465_v40  ;;  %v12577_v10 = vld [vmem:[%s15947_s14 + $0x1628] sm:$0xf]  ;;  %v15187_v58 = vld [vmem:[%s15947_s14 + $0x1634] sm:$0xf0]  ;;  %v7483_v46 = vpop.f32.mrf.mxu3 }
 0x2f6   : > { %7722 = vmatpush.bf16.msrb.mxu2 %v12626_v51  ;;  %v12594_v51 = vor.u32 %v15191_v52, %v12593_v21  ;;  %v12705_v57 = vld [vmem:[%s15947_s14 + $0x1728] sm:$0xf]  ;;  %v15219_v0 = vld [vmem:[%s15947_s14 + $0x1734] sm:$0xf0]  ;;  %v12578_v16 = vor.u32 %v15187_v58, %v12577_v10 }
 0x2f7   : > { %7735 = vmatpush.bf16.msrb.mxu3 %v12754_v55  ;;  %v12722_v55 = vor.u32 %v15223_v20, %v12721_v48  ;;  %v12433_v62 = vld [vmem:[%s15947_s14 + $0x1508] sm:$0xf]  ;;  %v15151_v40 = vld [vmem:[%s15947_s14 + $0x1514] sm:$0xf0]  ;;  %v12706_v30 = vor.u32 %v15219_v0, %v12705_v57 }
 0x2f8   : > { %7697 = vmatpush.bf16.msrb.mxu0 %v12354_v5  ;;  %v12305_v5 = vld [vmem:[%s15947_s14 + $0x1408] sm:$0xf]  ;;  %v15183_v21 = vld [vmem:[%s15947_s14 + $0x1614] sm:$0xf0]  ;;  %v12434_v53 = vor.u32 %v15151_v40, %v12433_v62 }
 0x2f9   : > { %7710 = vmatpush.bf16.msrb.mxu1 %v12482_v11  ;;  %v15119_v11 = vld [vmem:[%s15947_s14 + $0x1414] sm:$0xf0]  ;;  %v12561_v24 = vld [vmem:[%s15947_s14 + $0x1608] sm:$0xf] }
 0x2fa   : > { %7723 = vmatpush.bf16.msrb.mxu2 %v12610_v14  ;;  %v12450_v14 = vor.u32 %v15155_v56, %v12449_v54  ;;  %v12689_v52 = vld [vmem:[%s15947_s14 + $0x1708] sm:$0xf]  ;;  %v15215_v35 = vld [vmem:[%s15947_s14 + $0x1714] sm:$0xf0]  ;;  %v12306_v23 = vor.u32 %v15119_v11, %v12305_v5  ;;  %v12562_v54 = vor.u32 %v15183_v21, %v12561_v24 }
 0x2fb   : > { %7736 = vmatpush.bf16.msrb.mxu3 %v12738_v36  ;;  %v7470_v36 = vpop.f32.mrf.mxu2  ;;  %v12929_v48 = vld [vmem:[%s15947_s14 + $0x18e8] sm:$0xf]  ;;  %v15275_v20 = vld [vmem:[%s15947_s14 + $0x18f4] sm:$0xf0]  ;;  %v12690_v56 = vor.u32 %v15215_v35, %v12689_v52 }
 0x2fc   : > { %7698 = vmatpush.bf16.msrb.mxu0 %v12338_v61  ;;  %v13057_v61 = vld [vmem:[%s15947_s14 + $0x19e8] sm:$0xf]  ;;  %v15339_v4 = vld [vmem:[%s15947_s14 + $0x1af4] sm:$0xf0]  ;;  %v12930_v10 = vor.u32 %v15275_v20, %v12929_v48 }
 0x2fd   : > { %7711 = vmatpush.bf16.msrb.mxu1 %v12466_v49  ;;  %v15307_v49 = vld [vmem:[%s15947_s14 + $0x19f4] sm:$0xf0]  ;;  %v13313_v59 = vld [vmem:[%s15947_s14 + $0x1be8] sm:$0xf] }
 0x2fe   : > { %7724 = vmatpush.bf16.msrb.mxu2 %v12594_v51  ;;  %v13185_v51 = vld [vmem:[%s15947_s14 + $0x1ae8] sm:$0xf]  ;;  %v13058_v58 = vor.u32 %v15307_v49, %v13057_v61  ;;  %v15335_v62 = vld [vmem:[%s15947_s14 + $0x1ad4] sm:$0xf0] }
 0x2ff   : > { %7737 = vmatpush.bf16.msrb.mxu3 %v12722_v55  ;;  %v15371_v55 = vld [vmem:[%s15947_s14 + $0x1bf4] sm:$0xf0]  ;;  %v13186_v57 = vor.u32 %v15339_v4, %v13185_v51  ;;  %v12913_v0 = vld [vmem:[%s15947_s14 + $0x18c8] sm:$0xf] }
 0x300   : > { %7699 = vmatpush.bf16.msrb.mxu0 %v12322_v2  ;;  %v15271_v2 = vld [vmem:[%s15947_s14 + $0x18d4] sm:$0xf0]  ;;  %v13041_v5 = vld [vmem:[%s15947_s14 + $0x19c8] sm:$0xf]  ;;  %v13314_v11 = vor.u32 %v15371_v55, %v13313_v59 }
 0x301   : > { %7712 = vmatpush.bf16.msrb.mxu1 %v12450_v14  ;;  %v15303_v14 = vld [vmem:[%s15947_s14 + $0x19d4] sm:$0xf0]  ;;  %v13297_v40 = vld [vmem:[%s15947_s14 + $0x1bc8] sm:$0xf]  ;;  %v12914_v36 = vor.u32 %v15271_v2, %v12913_v0 }
 0x302   : > { %7725 = vmatpush.bf16.msrb.mxu2 %v12578_v16  ;;  %v13169_v16 = vld [vmem:[%s15947_s14 + $0x1ac8] sm:$0xf]  ;;  %v15367_v24 = vld [vmem:[%s15947_s14 + $0x1bd4] sm:$0xf0] }
 0x303   : > { %7738 = vmatpush.bf16.msrb.mxu3 %v12706_v30  ;;  %v13042_v30 = vor.u32 %v15303_v14, %v13041_v5  ;;  %v13170_v21 = vor.u32 %v15335_v62, %v13169_v16  ;;  %v12897_v52 = vld [vmem:[%s15947_s14 + $0x18a8] sm:$0xf]  ;;  %v15267_v35 = vld [vmem:[%s15947_s14 + $0x18b4] sm:$0xf0]  ;;  %v13298_v48 = vor.u32 %v15367_v24, %v13297_v40 }
 0x304   : > { %7700 = vmatpush.bf16.msrb.mxu0 %v12306_v23  ;;  %v13025_v46 = vld [vmem:[%s15947_s14 + $0x19a8] sm:$0xf]  ;;  %v15299_v20 = vld [vmem:[%s15947_s14 + $0x19b4] sm:$0xf0]  ;;  %v12898_v4 = vor.u32 %v15267_v35, %v12897_v52  ;;  %v7494_v14 = vpop.f32.mrf.mxu0 }
 0x305   : > { %7713 = vmatpush.bf16.msrb.mxu1 %v12434_v53  ;;  %v13153_v61 = vld [vmem:[%s15947_s14 + $0x1aa8] sm:$0xf]  ;;  %v15331_v23 = vld [vmem:[%s15947_s14 + $0x1ab4] sm:$0xf0]  ;;  %v13026_v53 = vor.u32 %v15299_v20, %v13025_v46 }
 0x306   : > { %7726 = vmatpush.bf16.msrb.mxu2 %v12562_v54  ;;  %v13281_v49 = vld [vmem:[%s15947_s14 + $0x1ba8] sm:$0xf]  ;;  %v15363_v51 = vld [vmem:[%s15947_s14 + $0x1bb4] sm:$0xf0]  ;;  %v13154_v54 = vor.u32 %v15331_v23, %v13153_v61 }
 0x307   : > { %7739 = vmatpush.bf16.msrb.mxu3 %v12690_v56  ;;  %7701 = vmatmul.bf16.vlgmr.msrb.gmra.mxu0 %v16476_v3  ;;  %v12881_v59 = vld [vmem:[%s15947_s14 + $0x1888] sm:$0xf]  ;;  %v15263_v55 = vld [vmem:[%s15947_s14 + $0x1894] sm:$0xf0] }
 0x308   : > { %7745 = vmatpush.bf16.msra.mxu0 %v12930_v10  ;;  %7714 = vmatmul.bf16.vlgmr.msrb.gmra.mxu1 %v16483_v9  ;;  %v13009_v56 = vld [vmem:[%s15947_s14 + $0x1988] sm:$0xf]  ;;  %v13282_v10 = vor.u32 %v15363_v51, %v13281_v49  ;;  %v15327_v0 = vld [vmem:[%s15947_s14 + $0x1a94] sm:$0xf0] }
 0x309   : > { %7758 = vmatpush.bf16.msra.mxu1 %v13058_v58  ;;  %7727 = vmatmul.bf16.vlgmr.msrb.gmra.mxu2 %v16481_v8  ;;  %v15295_v58 = vld [vmem:[%s15947_s14 + $0x1994] sm:$0xf0]  ;;  %v13265_v2 = vld [vmem:[%s15947_s14 + $0x1b88] sm:$0xf] }
 0x30a   : > { %7771 = vmatpush.bf16.msra.mxu2 %v13186_v57  ;;  %7740 = vmatmul.bf16.vlgmr.msrb.gmra.mxu3 %v16487_v12  ;;  %v13137_v57 = vld [vmem:[%s15947_s14 + $0x1a88] sm:$0xf]  ;;  %v15359_v5 = vld [vmem:[%s15947_s14 + $0x1b94] sm:$0xf0]  ;;  %v13010_v16 = vor.u32 %v15295_v58, %v13009_v56 }
 0x30b   : > { %7784 = vmatpush.bf16.msra.mxu3 %v13314_v11  ;;  %v12882_v11 = vor.u32 %v15263_v55, %v12881_v59  ;;  %v13138_v62 = vor.u32 %v15327_v0, %v13137_v57  ;;  %v12865_v40 = vld [vmem:[%s15947_s14 + $0x1868] sm:$0xf]  ;;  %v15259_v24 = vld [vmem:[%s15947_s14 + $0x1874] sm:$0xf0]  ;;  %v13266_v52 = vor.u32 %v15359_v5, %v13265_v2 }
 0x30c   : > { %7746 = vmatpush.bf16.msra.mxu0 %v12914_v36  ;;  %v12993_v36 = vld [vmem:[%s15947_s14 + $0x1968] sm:$0xf]  ;;  %v15291_v35 = vld [vmem:[%s15947_s14 + $0x1974] sm:$0xf0]  ;;  %v12866_v49 = vor.u32 %v15259_v24, %v12865_v40  ;;  %v7520_v59 = vpop.f32.mrf.mxu2 }
 0x30d   : > { %7759 = vmatpush.bf16.msra.mxu1 %v13042_v30  ;;  %v7495_v30 = vadd.f32 %v7494_v14, %v17608_v41  ;;  %v13121_v46 = vld [vmem:[%s15947_s14 + $0x1a68] sm:$0xf]  ;;  %v15355_v61 = vld [vmem:[%s15947_s14 + $0x1b74] sm:$0xf0]  ;;  %v12994_v41 = vor.u32 %v15291_v35, %v12993_v36  ;;  %v7533_v0 = vpop.f32.mrf.mxu3 }
 0x30e   : > { %7772 = vmatpush.bf16.msra.mxu2 %v13170_v21  ;;  %v7507_v21 = vpop.f32.mrf.mxu1  ;;  %v13249_v20 = vld [vmem:[%s15947_s14 + $0x1b68] sm:$0xf]  ;;  %v15287_v56 = vld [vmem:[%s15947_s14 + $0x1954] sm:$0xf0] }
 0x30f   : > { %7785 = vmatpush.bf16.msra.mxu3 %v13298_v48  ;;  %v15323_v48 = vld [vmem:[%s15947_s14 + $0x1a74] sm:$0xf0]  ;;  %v7508_v23 = vadd.f32 %v7507_v21, %v7495_v30  ;;  %v13250_v55 = vor.u32 %v15355_v61, %v13249_v20  ;;  %v13233_v2 = vld [vmem:[%s15947_s14 + $0x1b48] sm:$0xf] }
 0x310   : > { %7747 = vmatpush.bf16.msra.mxu0 %v12898_v4  ;;  %v13122_v51 = vor.u32 %v15323_v48, %v13121_v46  ;;  %v12849_v4 = vld [vmem:[%s15947_s14 + $0x1848] sm:$0xf]  ;;  %v15319_v58 = vld [vmem:[%s15947_s14 + $0x1a54] sm:$0xf0] }
 0x311   : > { %7760 = vmatpush.bf16.msra.mxu1 %v13026_v53  ;;  %v15255_v53 = vld [vmem:[%s15947_s14 + $0x1854] sm:$0xf0]  ;;  %v7521_v57 = vadd.f32 %v7520_v59, %v7508_v23  ;;  %v12833_v24 = vld [vmem:[%s15947_s14 + $0x1828] sm:$0xf] }
 0x312   : > { %7773 = vmatpush.bf16.msra.mxu2 %v13154_v54  ;;  %v12977_v54 = vld [vmem:[%s15947_s14 + $0x1948] sm:$0xf]  ;;  %v15351_v5 = vld [vmem:[%s15947_s14 + $0x1b54] sm:$0xf0] }
 0x313   : > { %7786 = vmatpush.bf16.msra.mxu3 %v13282_v10  ;;  %v13105_v10 = vld [vmem:[%s15947_s14 + $0x1a48] sm:$0xf]  ;;  %v17679_v14 = vadd.f32 %v7533_v0, %v7521_v57  ;;  %v15251_v36 = vld [vmem:[%s15947_s14 + $0x1834] sm:$0xf0] }
 0x314   : > { %7748 = vmatpush.bf16.msra.mxu0 %v12882_v11  ;;  %v12850_v11 = vor.u32 %v15255_v53, %v12849_v4  ;;  %v13106_v40 = vor.u32 %v15319_v58, %v13105_v10  ;;  %v12961_v30 = vld [vmem:[%s15947_s14 + $0x1928] sm:$0xf]  ;;  %v15283_v35 = vld [vmem:[%s15947_s14 + $0x1934] sm:$0xf0]  ;;  %v12834_v23 = vor.u32 %v15251_v36, %v12833_v24 }
 0x315   : > { %7761 = vmatpush.bf16.msra.mxu1 %v13010_v16  ;;  %v7496_v16 = vpop.f32.mrf.mxu0  ;;  %v13089_v46 = vld [vmem:[%s15947_s14 + $0x1a28] sm:$0xf]  ;;  %v15315_v48 = vld [vmem:[%s15947_s14 + $0x1a34] sm:$0xf0]  ;;  %v7535_v0 = vpop.f32.mrf.mxu3 }
 0x316   : > { %7774 = vmatpush.bf16.msra.mxu2 %v13138_v62  ;;  %v12978_v62 = vor.u32 %v15287_v56, %v12977_v54  ;;  %v7509_v21 = vpop.f32.mrf.mxu1  ;;  %v13217_v20 = vld [vmem:[%s15947_s14 + $0x1b28] sm:$0xf]  ;;  %v15347_v61 = vld [vmem:[%s15947_s14 + $0x1b34] sm:$0xf0]  ;;  %v13090_v4 = vor.u32 %v15315_v48, %v13089_v46 }
 0x317   : > { %7787 = vmatpush.bf16.msra.mxu3 %v13266_v52  ;;  %v13234_v52 = vor.u32 %v15351_v5, %v13233_v2  ;;  %v12945_v53 = vld [vmem:[%s15947_s14 + $0x1908] sm:$0xf]  ;;  %v15279_v54 = vld [vmem:[%s15947_s14 + $0x1914] sm:$0xf0]  ;;  %v13218_v56 = vor.u32 %v15347_v61, %v13217_v20 }
 0x318   : > { %7749 = vmatpush.bf16.msra.mxu0 %v12866_v49  ;;  %v12817_v49 = vld [vmem:[%s15947_s14 + $0x1808] sm:$0xf]  ;;  %v15311_v10 = vld [vmem:[%s15947_s14 + $0x1a14] sm:$0xf0]  ;;  %v12946_v36 = vor.u32 %v15279_v54, %v12945_v53 }
 0x319   : > { %7762 = vmatpush.bf16.msra.mxu1 %v12994_v41  ;;  %v15247_v41 = vld [vmem:[%s15947_s14 + $0x1814] sm:$0xf0]  ;;  %v13073_v59 = vld [vmem:[%s15947_s14 + $0x1a08] sm:$0xf] }
 0x31a   : > { %7775 = vmatpush.bf16.msra.mxu2 %v13122_v51  ;;  %v12962_v51 = vor.u32 %v15283_v35, %v12961_v30  ;;  %v13201_v58 = vld [vmem:[%s15947_s14 + $0x1b08] sm:$0xf]  ;;  %v15343_v57 = vld [vmem:[%s15947_s14 + $0x1b14] sm:$0xf0]  ;;  %v12818_v16 = vor.u32 %v15247_v41, %v12817_v49  ;;  %v13074_v30 = vor.u32 %v15311_v10, %v13073_v59 }
 0x31b   : > { %7788 = vmatpush.bf16.msra.mxu3 %v13250_v55  ;;  %v7522_v55 = vpop.f32.mrf.mxu2  ;;  %v13441_v2 = vld [vmem:[%s15947_s14 + $0x1ce8] sm:$0xf]  ;;  %v15403_v5 = vld [vmem:[%s15947_s14 + $0x1cf4] sm:$0xf0]  ;;  %v13202_v35 = vor.u32 %v15343_v57, %v13201_v58 }
 0x31c   : > { %7750 = vmatpush.bf16.msra.mxu0 %v12850_v11  ;;  %v13569_v11 = vld [vmem:[%s15947_s14 + $0x1de8] sm:$0xf]  ;;  %v15467_v24 = vld [vmem:[%s15947_s14 + $0x1ef4] sm:$0xf0]  ;;  %v13442_v46 = vor.u32 %v15403_v5, %v13441_v2 }
 0x31d   : > { %7763 = vmatpush.bf16.msra.mxu1 %v12978_v62  ;;  %v15435_v62 = vld [vmem:[%s15947_s14 + $0x1df4] sm:$0xf0]  ;;  %v13825_v21 = vld [vmem:[%s15947_s14 + $0x1fe8] sm:$0xf] }
 0x31e   : > { %7776 = vmatpush.bf16.msra.mxu2 %v13106_v40  ;;  %v13697_v40 = vld [vmem:[%s15947_s14 + $0x1ee8] sm:$0xf]  ;;  %v13570_v48 = vor.u32 %v15435_v62, %v13569_v11  ;;  %v15463_v53 = vld [vmem:[%s15947_s14 + $0x1ed4] sm:$0xf0] }
 0x31f   : > { %7789 = vmatpush.bf16.msra.mxu3 %v13234_v52  ;;  %v15499_v52 = vld [vmem:[%s15947_s14 + $0x1ff4] sm:$0xf0]  ;;  %v13698_v20 = vor.u32 %v15467_v24, %v13697_v40  ;;  %v13425_v61 = vld [vmem:[%s15947_s14 + $0x1cc8] sm:$0xf] }
 0x320   : > { %7751 = vmatpush.bf16.msra.mxu0 %v12834_v23  ;;  %v15399_v23 = vld [vmem:[%s15947_s14 + $0x1cd4] sm:$0xf0]  ;;  %v13553_v49 = vld [vmem:[%s15947_s14 + $0x1dc8] sm:$0xf]  ;;  %v13826_v41 = vor.u32 %v15499_v52, %v13825_v21 }
 0x321   : > { %7764 = vmatpush.bf16.msra.mxu1 %v12962_v51  ;;  %v15431_v51 = vld [vmem:[%s15947_s14 + $0x1dd4] sm:$0xf0]  ;;  %v13809_v54 = vld [vmem:[%s15947_s14 + $0x1fc8] sm:$0xf]  ;;  %v13426_v55 = vor.u32 %v15399_v23, %v13425_v61 }
 0x322   : > { %7777 = vmatpush.bf16.msra.mxu2 %v13090_v4  ;;  %v13681_v4 = vld [vmem:[%s15947_s14 + $0x1ec8] sm:$0xf]  ;;  %v15495_v59 = vld [vmem:[%s15947_s14 + $0x1fd4] sm:$0xf0] }
 0x323   : > { %7790 = vmatpush.bf16.msra.mxu3 %v13218_v56  ;;  %v13554_v56 = vor.u32 %v15431_v51, %v13553_v49  ;;  %v13682_v10 = vor.u32 %v15463_v53, %v13681_v4  ;;  %v13409_v58 = vld [vmem:[%s15947_s14 + $0x1ca8] sm:$0xf]  ;;  %v15395_v57 = vld [vmem:[%s15947_s14 + $0x1cb4] sm:$0xf0]  ;;  %v13810_v2 = vor.u32 %v15495_v59, %v13809_v54 }
 0x324   : > { %7752 = vmatpush.bf16.msra.mxu0 %v12818_v16  ;;  %v13537_v0 = vld [vmem:[%s15947_s14 + $0x1da8] sm:$0xf]  ;;  %v15427_v5 = vld [vmem:[%s15947_s14 + $0x1db4] sm:$0xf0]  ;;  %v13410_v24 = vor.u32 %v15395_v57, %v13409_v58  ;;  %v7546_v23 = vpop.f32.mrf.mxu0 }
 0x325   : > { %7765 = vmatpush.bf16.msra.mxu1 %v12946_v36  ;;  %v13665_v11 = vld [vmem:[%s15947_s14 + $0x1ea8] sm:$0xf]  ;;  %v15459_v16 = vld [vmem:[%s15947_s14 + $0x1eb4] sm:$0xf0]  ;;  %v13538_v36 = vor.u32 %v15427_v5, %v13537_v0  ;;  %v7547_v51 = vadd.f32 %v7546_v23, %v17679_v14  ;;  %v7559_v53 = vpop.f32.mrf.mxu1 }
 0x326   : > { %7778 = vmatpush.bf16.msra.mxu2 %v13074_v30  ;;  %v13793_v62 = vld [vmem:[%s15947_s14 + $0x1fa8] sm:$0xf]  ;;  %v15491_v40 = vld [vmem:[%s15947_s14 + $0x1fb4] sm:$0xf0]  ;;  %v13666_v30 = vor.u32 %v15459_v16, %v13665_v11 }
 0x327   : > { %7791 = vmatpush.bf16.msra.mxu3 %v13202_v35  ;;  %7753 = vmatmul.bf16.vlgmr.msra.gmra.mxu0 %v16556_v1  ;;  %v13393_v21 = vld [vmem:[%s15947_s14 + $0x1c88] sm:$0xf]  ;;  %v15391_v52 = vld [vmem:[%s15947_s14 + $0x1c94] sm:$0xf0]  ;;  %v7560_v57 = vadd.f32 %v7559_v53, %v7547_v51 }
 0x328   : > { %7797 = vmatpush.bf16.msrb.mxu0 %v13442_v46  ;;  %7766 = vmatmul.bf16.vlgmr.msra.gmra.mxu1 %v16563_v7  ;;  %v13521_v35 = vld [vmem:[%s15947_s14 + $0x1d88] sm:$0xf]  ;;  %v13794_v46 = vor.u32 %v15491_v40, %v13793_v62  ;;  %v15455_v61 = vld [vmem:[%s15947_s14 + $0x1e94] sm:$0xf0]  ;;  %v13394_v4 = vor.u32 %v15391_v52, %v13393_v21 }
 0x329   : > { %7810 = vmatpush.bf16.msrb.mxu1 %v13570_v48  ;;  %7779 = vmatmul.bf16.vlgmr.msra.gmra.mxu2 %v16561_v6  ;;  %v15423_v48 = vld [vmem:[%s15947_s14 + $0x1d94] sm:$0xf0]  ;;  %v13777_v49 = vld [vmem:[%s15947_s14 + $0x1f88] sm:$0xf] }
 0x32a   : > { %7823 = vmatpush.bf16.msrb.mxu2 %v13698_v20  ;;  %7792 = vmatmul.bf16.vlgmr.msra.gmra.mxu3 %v16567_v13  ;;  %v13649_v20 = vld [vmem:[%s15947_s14 + $0x1e88] sm:$0xf]  ;;  %v13522_v54 = vor.u32 %v15423_v48, %v13521_v35  ;;  %v15419_v0 = vld [vmem:[%s15947_s14 + $0x1d74] sm:$0xf0] }
 0x32b   : > { %7836 = vmatpush.bf16.msrb.mxu3 %v13826_v41  ;;  %v15487_v41 = vld [vmem:[%s15947_s14 + $0x1f94] sm:$0xf0]  ;;  %v13650_v59 = vor.u32 %v15455_v61, %v13649_v20  ;;  %v13761_v5 = vld [vmem:[%s15947_s14 + $0x1f68] sm:$0xf] }
 0x32c   : > { %7798 = vmatpush.bf16.msrb.mxu0 %v13426_v55  ;;  %v13377_v55 = vld [vmem:[%s15947_s14 + $0x1c68] sm:$0xf]  ;;  %v13778_v58 = vor.u32 %v15487_v41, %v13777_v49  ;;  %v15451_v14 = vld [vmem:[%s15947_s14 + $0x1e74] sm:$0xf0]  ;;  %v7572_v52 = vpop.f32.mrf.mxu2  ;;  %v7548_v41 = vpop.f32.mrf.mxu0 }
 0x32d   : > { %7811 = vmatpush.bf16.msrb.mxu1 %v13554_v56  ;;  %v15387_v56 = vld [vmem:[%s15947_s14 + $0x1c74] sm:$0xf0]  ;;  %v7573_v20 = vadd.f32 %v7572_v52, %v7560_v57  ;;  %v7585_v61 = vpop.f32.mrf.mxu3  ;;  %v13745_v23 = vld [vmem:[%s15947_s14 + $0x1f48] sm:$0xf] }
 0x32e   : > { %7824 = vmatpush.bf16.msrb.mxu2 %v13682_v10  ;;  %v13505_v10 = vld [vmem:[%s15947_s14 + $0x1d68] sm:$0xf]  ;;  %v15483_v11 = vld [vmem:[%s15947_s14 + $0x1f74] sm:$0xf0]  ;;  %v13378_v16 = vor.u32 %v15387_v56, %v13377_v55 }
 0x32f   : > { %7837 = vmatpush.bf16.msrb.mxu3 %v13810_v2  ;;  %v13633_v2 = vld [vmem:[%s15947_s14 + $0x1e68] sm:$0xf]  ;;  %v13506_v62 = vor.u32 %v15419_v0, %v13505_v10  ;;  %v13762_v21 = vor.u32 %v15483_v11, %v13761_v5  ;;  %v15415_v35 = vld [vmem:[%s15947_s14 + $0x1d54] sm:$0xf0]  ;;  %v17750_v53 = vadd.f32 %v7585_v61, %v7573_v20  ;;  %v14505_v61 = vld [vmem:[%s15947_s14 + $0xec] sm:$0xf] }
 0x330   : > { %7799 = vmatpush.bf16.msrb.mxu0 %v13410_v24  ;;  %v13634_v40 = vor.u32 %v15451_v14, %v13633_v2  ;;  %v13361_v24 = vld [vmem:[%s15947_s14 + $0x1c48] sm:$0xf]  ;;  %v15447_v48 = vld [vmem:[%s15947_s14 + $0x1e54] sm:$0xf0] }
 0x331   : > { %7812 = vmatpush.bf16.msrb.mxu1 %v13538_v36  ;;  %v15383_v36 = vld [vmem:[%s15947_s14 + $0x1c54] sm:$0xf0]  ;;  %v13345_v55 = vld [vmem:[%s15947_s14 + $0x1c28] sm:$0xf] }
 0x332   : > { %7825 = vmatpush.bf16.msrb.mxu2 %v13666_v30  ;;  %v13489_v30 = vld [vmem:[%s15947_s14 + $0x1d48] sm:$0xf]  ;;  %v15479_v49 = vld [vmem:[%s15947_s14 + $0x1f54] sm:$0xf0]  ;;  %v13362_v51 = vor.u32 %v15383_v36, %v13361_v24 }
 0x333   : > { %7838 = vmatpush.bf16.msrb.mxu3 %v13794_v46  ;;  %v13617_v46 = vld [vmem:[%s15947_s14 + $0x1e48] sm:$0xf]  ;;  %v15379_v56 = vld [vmem:[%s15947_s14 + $0x1c34] sm:$0xf0] }
 0x334   : > { %7800 = vmatpush.bf16.msrb.mxu0 %v13394_v4  ;;  %v7561_v4 = vpop.f32.mrf.mxu1  ;;  %v13473_v10 = vld [vmem:[%s15947_s14 + $0x1d28] sm:$0xf]  ;;  %v15411_v57 = vld [vmem:[%s15947_s14 + $0x1d34] sm:$0xf0]  ;;  %v13346_v11 = vor.u32 %v15379_v56, %v13345_v55  ;;  %v7574_v20 = vpop.f32.mrf.mxu2 }
 0x335   : > { %7813 = vmatpush.bf16.msrb.mxu1 %v13522_v54  ;;  %v13490_v54 = vor.u32 %v15415_v35, %v13489_v30  ;;  %v13601_v0 = vld [vmem:[%s15947_s14 + $0x1e28] sm:$0xf]  ;;  %v15443_v2 = vld [vmem:[%s15947_s14 + $0x1e34] sm:$0xf0]  ;;  %v7587_v41 = vpop.f32.mrf.mxu3  ;;  %v9987_v4 = vld [vmem:[%s15947_s14 + $0x1f8] sm:$0xf0] }
 0x336   : > { %7826 = vmatpush.bf16.msrb.mxu2 %v13650_v59  ;;  %v13618_v59 = vor.u32 %v15447_v48, %v13617_v46  ;;  %v13729_v14 = vld [vmem:[%s15947_s14 + $0x1f28] sm:$0xf]  ;;  %v15475_v5 = vld [vmem:[%s15947_s14 + $0x1f34] sm:$0xf0]  ;;  %v13602_v24 = vor.u32 %v15443_v2, %v13601_v0  ;;  %v9827_v20 = vld [vmem:[%s15947_s14 + $0xb8] sm:$0xf0] }
 0x337   : > { %7839 = vmatpush.bf16.msrb.mxu3 %v13778_v58  ;;  %v13746_v58 = vor.u32 %v15479_v49, %v13745_v23  ;;  %v13457_v36 = vld [vmem:[%s15947_s14 + $0x1d08] sm:$0xf]  ;;  %v15407_v30 = vld [vmem:[%s15947_s14 + $0x1d14] sm:$0xf0]  ;;  %v13730_v52 = vor.u32 %v15475_v5, %v13729_v14  ;;  %v9859_v23 = vld [vmem:[%s15947_s14 + $0xf8] sm:$0xf0] }
 0x338   : > { %7801 = vmatpush.bf16.msrb.mxu0 %v13378_v16  ;;  %v13329_v16 = vld [vmem:[%s15947_s14 + $0x1c08] sm:$0xf]  ;;  %v15439_v35 = vld [vmem:[%s15947_s14 + $0x1e14] sm:$0xf0]  ;;  %v14537_v49 = vld [vmem:[%s15947_s14 + $0x1ec] sm:$0xf]  ;;  %v13458_v55 = vor.u32 %v15407_v30, %v13457_v36  ;;  %v9862_v0 = vor.u32 %v14505_v61, %v9859_v23 }
 0x339   : > { %7814 = vmatpush.bf16.msrb.mxu1 %v13506_v62  ;;  %v15375_v62 = vld [vmem:[%s15947_s14 + $0x1c14] sm:$0xf0]  ;;  %v13713_v46 = vld [vmem:[%s15947_s14 + $0x1f08] sm:$0xf]  ;;  %v9990_v2 = vor.u32 %v14537_v49, %v9987_v4  ;;  %v14501_v5 = vld [vmem:[%s15947_s14 + $0xcc] sm:$0xf] }
 0x33a   : > { %7827 = vmatpush.bf16.msrb.mxu2 %v13634_v40  ;;  %v13474_v40 = vor.u32 %v15411_v57, %v13473_v10  ;;  %v15471_v48 = vld [vmem:[%s15947_s14 + $0x1f14] sm:$0xf0]  ;;  %v14601_v10 = vld [vmem:[%s15947_s14 + $0x3ec] sm:$0xf]  ;;  %v10099_v36 = vld [vmem:[%s15947_s14 + $0x2d8] sm:$0xf0] }
 0x33b   : > { %7840 = vmatpush.bf16.msrb.mxu3 %v13762_v21  ;;  %v13585_v21 = vld [vmem:[%s15947_s14 + $0x1e08] sm:$0xf]  ;;  %v13714_v57 = vor.u32 %v15471_v48, %v13713_v46  ;;  %v14597_v30 = vld [vmem:[%s15947_s14 + $0x3cc] sm:$0xf]  ;;  %v9955_v49 = vld [vmem:[%s15947_s14 + $0x1b8] sm:$0xf0] }
 0x33c   : > { %7802 = vmatpush.bf16.msrb.mxu0 %v13362_v51  ;;  %v13330_v51 = vor.u32 %v15375_v62, %v13329_v16  ;;  %v13586_v56 = vor.u32 %v15439_v35, %v13585_v21  ;;  %v14533_v16 = vld [vmem:[%s15947_s14 + $0x1cc] sm:$0xf]  ;;  %v10227_v21 = vld [vmem:[%s15947_s14 + $0x3d8] sm:$0xf0] }
 0x33d   : > { %7815 = vmatpush.bf16.msrb.mxu1 %v13490_v54  ;;  %v14569_v54 = vld [vmem:[%s15947_s14 + $0x2ec] sm:$0xf]  ;;  %v10230_v23 = vor.u32 %v14597_v30, %v10227_v21 }
 0x33e   : > { %7828 = vmatpush.bf16.msrb.mxu2 %v13618_v59  ;;  %v10115_v59 = vld [vmem:[%s15947_s14 + $0x2f8] sm:$0xf0]  ;;  %v14497_v48 = vld [vmem:[%s15947_s14 + $0xac] sm:$0xf] }
 0x33f   : > { %7841 = vmatpush.bf16.msrb.mxu3 %v13746_v58  ;;  %v10243_v58 = vld [vmem:[%s15947_s14 + $0x3f8] sm:$0xf0]  ;;  %v10118_v14 = vor.u32 %v14569_v54, %v10115_v59  ;;  %v14529_v61 = vld [vmem:[%s15947_s14 + $0x1ac] sm:$0xf]  ;;  %v9830_v59 = vor.u32 %v14497_v48, %v9827_v20 }
 0x340   : > { %7803 = vmatpush.bf16.msrb.mxu0 %v13346_v11  ;;  %v9843_v11 = vld [vmem:[%s15947_s14 + $0xd8] sm:$0xf0]  ;;  %v10246_v62 = vor.u32 %v14601_v10, %v10243_v58  ;;  %v14561_v41 = vld [vmem:[%s15947_s14 + $0x2ac] sm:$0xf] }
 0x341   : > { %7816 = vmatpush.bf16.msrb.mxu1 %v13474_v40  ;;  %v9971_v40 = vld [vmem:[%s15947_s14 + $0x1d8] sm:$0xf0]  ;;  %v14593_v4 = vld [vmem:[%s15947_s14 + $0x3ac] sm:$0xf] }
 0x342   : > { %7829 = vmatpush.bf16.msrb.mxu2 %v13602_v24  ;;  %v14565_v24 = vld [vmem:[%s15947_s14 + $0x2cc] sm:$0xf]  ;;  %v9974_v35 = vor.u32 %v14533_v16, %v9971_v40  ;;  %v10211_v54 = vld [vmem:[%s15947_s14 + $0x3b8] sm:$0xf0] }
 0x343   : > { %7842 = vmatpush.bf16.msrb.mxu3 %v13730_v52  ;;  %v9846_v52 = vor.u32 %v14501_v5, %v9843_v11  ;;  %v10102_v46 = vor.u32 %v14565_v24, %v10099_v36  ;;  %v14493_v10 = vld [vmem:[%s15947_s14 + $0x8c] sm:$0xf]  ;;  %v9811_v58 = vld [vmem:[%s15947_s14 + $0x98] sm:$0xf0] }
 0x344   : > { %7804 = vmatpush.bf16.msrb.mxu0 %v13330_v51  ;;  %v10083_v51 = vld [vmem:[%s15947_s14 + $0x2b8] sm:$0xf0]  ;;  %v7598_v11 = vpop.f32.mrf.mxu0  ;;  %v14589_v16 = vld [vmem:[%s15947_s14 + $0x38c] sm:$0xf]  ;;  %v9814_v24 = vor.u32 %v14493_v10, %v9811_v58 }
 0x345   : > { %7817 = vmatpush.bf16.msrb.mxu1 %v13458_v55  ;;  %v9958_v55 = vor.u32 %v14529_v61, %v9955_v49  ;;  %v10067_v5 = vld [vmem:[%s15947_s14 + $0x298] sm:$0xf0]  ;;  %v7599_v40 = vadd.f32 %v7598_v11, %v17750_v53  ;;  %v7611_v36 = vpop.f32.mrf.mxu1  ;;  %v14585_v49 = vld [vmem:[%s15947_s14 + $0x36c] sm:$0xf] }
 0x346   : > { %7830 = vmatpush.bf16.msrb.mxu2 %v13586_v56  ;;  %v10086_v56 = vor.u32 %v14561_v41, %v10083_v51  ;;  %v9923_v61 = vld [vmem:[%s15947_s14 + $0x178] sm:$0xf0]  ;;  %v14581_v11 = vld [vmem:[%s15947_s14 + $0x34c] sm:$0xf] }
 0x347   : > { %7843 = vmatpush.bf16.msrb.mxu3 %v13714_v57  ;;  %7805 = vmatmul.bf16.vlgmr.msrb.gmra.mxu0 %v16635_v15  ;;  %v14525_v57 = vld [vmem:[%s15947_s14 + $0x18c] sm:$0xf]  ;;  %v7612_v20 = vadd.f32 %v7611_v36, %v7599_v40  ;;  %v10051_v53 = vld [vmem:[%s15947_s14 + $0x278] sm:$0xf0] }
 0x348   : > { %7849 = vmatpush.bf16.msra.mxu0 %v9862_v0  ;;  %7818 = vmatmul.bf16.vlgmr.msrb.gmra.mxu1 %v16642_v18  ;;  %v10214_v0 = vor.u32 %v14593_v4, %v10211_v54  ;;  %v10179_v41 = vld [vmem:[%s15947_s14 + $0x378] sm:$0xf0] }
 0x349   : > { %7862 = vmatpush.bf16.msra.mxu1 %v9990_v2  ;;  %7831 = vmatmul.bf16.vlgmr.msrb.gmra.mxu2 %v16640_v17  ;;  %v9939_v2 = vld [vmem:[%s15947_s14 + $0x198] sm:$0xf0]  ;;  %v10182_v10 = vor.u32 %v14585_v49, %v10179_v41 }
 0x34a   : > { %7875 = vmatpush.bf16.msra.mxu2 %v10118_v14  ;;  %7844 = vmatmul.bf16.vlgmr.msrb.gmra.mxu3 %v16646_v26  ;;  %v14557_v14 = vld [vmem:[%s15947_s14 + $0x28c] sm:$0xf]  ;;  %v9942_v30 = vor.u32 %v14525_v57, %v9939_v2  ;;  %v9907_v57 = vld [vmem:[%s15947_s14 + $0x158] sm:$0xf0] }
 0x34b   : > { %7888 = vmatpush.bf16.msra.mxu3 %v10246_v62  ;;  %v10195_v62 = vld [vmem:[%s15947_s14 + $0x398] sm:$0xf0]  ;;  %v10070_v21 = vor.u32 %v14557_v14, %v10067_v5 }
 0x34c   : > { %7850 = vmatpush.bf16.msra.mxu0 %v9846_v52  ;;  %v14489_v52 = vld [vmem:[%s15947_s14 + $0x6c] sm:$0xf]  ;;  %v10198_v48 = vor.u32 %v14589_v16, %v10195_v62  ;;  %v7624_v58 = vpop.f32.mrf.mxu2  ;;  %v10035_v2 = vld [vmem:[%s15947_s14 + $0x258] sm:$0xf0]  ;;  %v7600_v62 = vpop.f32.mrf.mxu0 }
 0x34d   : > { %7863 = vmatpush.bf16.msra.mxu1 %v9974_v35  ;;  %v9795_v35 = vld [vmem:[%s15947_s14 + $0x78] sm:$0xf0]  ;;  %v7625_v14 = vadd.f32 %v7624_v58, %v7612_v20  ;;  %v7637_v5 = vpop.f32.mrf.mxu3 }
 0x34e   : > { %7876 = vmatpush.bf16.msra.mxu2 %v10102_v46  ;;  %v14521_v46 = vld [vmem:[%s15947_s14 + $0x16c] sm:$0xf]  ;;  %v9798_v51 = vor.u32 %v14489_v52, %v9795_v35  ;;  %v10163_v16 = vld [vmem:[%s15947_s14 + $0x358] sm:$0xf0] }
 0x34f   : > { %7889 = vmatpush.bf16.msra.mxu3 %v10230_v23  ;;  %v14553_v23 = vld [vmem:[%s15947_s14 + $0x26c] sm:$0xf]  ;;  %v9926_v4 = vor.u32 %v14521_v46, %v9923_v61  ;;  %v17821_v36 = vadd.f32 %v7637_v5, %v7625_v14  ;;  %v9763_v35 = vld [vmem:[%s15947_s14 + $0x38] sm:$0xf0] }
 0x350   : > { %7851 = vmatpush.bf16.msra.mxu0 %v9830_v59  ;;  %v10054_v54 = vor.u32 %v14553_v23, %v10051_v53  ;;  %v14485_v59 = vld [vmem:[%s15947_s14 + $0x4c] sm:$0xf]  ;;  %v9891_v20 = vld [vmem:[%s15947_s14 + $0x138] sm:$0xf0] }
 0x351   : > { %7864 = vmatpush.bf16.msra.mxu1 %v9958_v55  ;;  %v9779_v55 = vld [vmem:[%s15947_s14 + $0x58] sm:$0xf0]  ;;  %v14481_v52 = vld [vmem:[%s15947_s14 + $0x2c] sm:$0xf] }
 0x352   : > { %7877 = vmatpush.bf16.msra.mxu2 %v10086_v56  ;;  %v14517_v56 = vld [vmem:[%s15947_s14 + $0x14c] sm:$0xf]  ;;  %v9782_v40 = vor.u32 %v14485_v59, %v9779_v55  ;;  %v10019_v23 = vld [vmem:[%s15947_s14 + $0x238] sm:$0xf0]  ;;  %v9766_v41 = vor.u32 %v14481_v52, %v9763_v35 }
 0x353   : > { %7890 = vmatpush.bf16.msra.mxu3 %v10214_v0  ;;  %v14549_v0 = vld [vmem:[%s15947_s14 + $0x24c] sm:$0xf]  ;;  %v10147_v49 = vld [vmem:[%s15947_s14 + $0x338] sm:$0xf0] }
 0x354   : > { %7852 = vmatpush.bf16.msra.mxu0 %v9814_v24  ;;  %v7613_v24 = vpop.f32.mrf.mxu1  ;;  %v14513_v46 = vld [vmem:[%s15947_s14 + $0x12c] sm:$0xf]  ;;  %v7626_v14 = vpop.f32.mrf.mxu2 }
 0x355   : > { %7865 = vmatpush.bf16.msra.mxu1 %v9942_v30  ;;  %v9910_v30 = vor.u32 %v14517_v56, %v9907_v57  ;;  %v14545_v61 = vld [vmem:[%s15947_s14 + $0x22c] sm:$0xf]  ;;  %v9875_v56 = vld [vmem:[%s15947_s14 + $0x118] sm:$0xf0]  ;;  %v7639_v62 = vpop.f32.mrf.mxu3 }
 0x356   : > { %7878 = vmatpush.bf16.msra.mxu2 %v10070_v21  ;;  %v10038_v21 = vor.u32 %v14549_v0, %v10035_v2  ;;  %v14577_v53 = vld [vmem:[%s15947_s14 + $0x32c] sm:$0xf]  ;;  %v10022_v59 = vor.u32 %v14545_v61, %v10019_v23  ;;  %v10003_v57 = vld [vmem:[%s15947_s14 + $0x218] sm:$0xf0] }
 0x357   : > { %7891 = vmatpush.bf16.msra.mxu3 %v10198_v48  ;;  %v10166_v48 = vor.u32 %v14581_v11, %v10163_v16  ;;  %v14509_v55 = vld [vmem:[%s15947_s14 + $0x10c] sm:$0xf]  ;;  %v10150_v58 = vor.u32 %v14577_v53, %v10147_v49  ;;  %v10131_v2 = vld [vmem:[%s15947_s14 + $0x318] sm:$0xf0] }
 0x358   : > { %7853 = vmatpush.bf16.msra.mxu0 %v9798_v51  ;;  %v14477_v51 = vld [vmem:[%s15947_s14 + $0xc] sm:$0xf]  ;;  %v10371_v11 = vld [vmem:[%s15947_s14 + $0x4f8] sm:$0xf0]  ;;  %v9878_v52 = vor.u32 %v14509_v55, %v9875_v56 }
 0x359   : > { %7866 = vmatpush.bf16.msra.mxu1 %v9926_v4  ;;  %v9747_v4 = vld [vmem:[%s15947_s14 + $0x18] sm:$0xf0]  ;;  %v14573_v0 = vld [vmem:[%s15947_s14 + $0x30c] sm:$0xf] }
 0x35a   : > { %7879 = vmatpush.bf16.msra.mxu2 %v10054_v54  ;;  %v9894_v54 = vor.u32 %v14513_v46, %v9891_v20  ;;  %v14633_v5 = vld [vmem:[%s15947_s14 + $0x4ec] sm:$0xf]  ;;  %v10499_v24 = vld [vmem:[%s15947_s14 + $0x5f8] sm:$0xf0]  ;;  %v10134_v20 = vor.u32 %v14573_v0, %v10131_v2 }
 0x35b   : > { %7892 = vmatpush.bf16.msra.mxu3 %v10182_v10  ;;  %v14541_v10 = vld [vmem:[%s15947_s14 + $0x20c] sm:$0xf]  ;;  %v10374_v61 = vor.u32 %v14633_v5, %v10371_v11  ;;  %v10611_v55 = vld [vmem:[%s15947_s14 + $0x6d8] sm:$0xf0] }
 0x35c   : > { %7854 = vmatpush.bf16.msra.mxu0 %v9782_v40  ;;  %v14665_v16 = vld [vmem:[%s15947_s14 + $0x5ec] sm:$0xf]  ;;  %v9750_v40 = vor.u32 %v14477_v51, %v9747_v4  ;;  %v10006_v35 = vor.u32 %v14541_v10, %v10003_v57  ;;  %v10739_v10 = vld [vmem:[%s15947_s14 + $0x7d8] sm:$0xf0] }
 0x35d   : > { %7867 = vmatpush.bf16.msra.mxu1 %v9910_v30  ;;  %v14697_v30 = vld [vmem:[%s15947_s14 + $0x6ec] sm:$0xf]  ;;  %v10502_v23 = vor.u32 %v14665_v16, %v10499_v24  ;;  %v10339_v14 = vld [vmem:[%s15947_s14 + $0x4b8] sm:$0xf0] }
 0x35e   : > { %7880 = vmatpush.bf16.msra.mxu2 %v10038_v21  ;;  %v10627_v21 = vld [vmem:[%s15947_s14 + $0x6f8] sm:$0xf0]  ;;  %v14729_v46 = vld [vmem:[%s15947_s14 + $0x7ec] sm:$0xf] }
 0x35f   : > { %7893 = vmatpush.bf16.msra.mxu3 %v10166_v48  ;;  %v10755_v48 = vld [vmem:[%s15947_s14 + $0x7f8] sm:$0xf0]  ;;  %v10630_v53 = vor.u32 %v14697_v30, %v10627_v21  ;;  %v14629_v49 = vld [vmem:[%s15947_s14 + $0x4cc] sm:$0xf] }
 0x360   : > { %7855 = vmatpush.bf16.msra.mxu0 %v9766_v41  ;;  %v10355_v41 = vld [vmem:[%s15947_s14 + $0x4d8] sm:$0xf0]  ;;  %v14661_v51 = vld [vmem:[%s15947_s14 + $0x5cc] sm:$0xf]  ;;  %v10758_v4 = vor.u32 %v14729_v46, %v10755_v48 }
 0x361   : > { %7868 = vmatpush.bf16.msra.mxu1 %v9894_v54  ;;  %v10483_v54 = vld [vmem:[%s15947_s14 + $0x5d8] sm:$0xf0]  ;;  %v14725_v56 = vld [vmem:[%s15947_s14 + $0x7cc] sm:$0xf] }
 0x362   : > { %7881 = vmatpush.bf16.msra.mxu2 %v10022_v59  ;;  %v14693_v59 = vld [vmem:[%s15947_s14 + $0x6cc] sm:$0xf]  ;;  %v10486_v57 = vor.u32 %v14661_v51, %v10483_v54  ;;  %v10742_v11 = vor.u32 %v14725_v56, %v10739_v10  ;;  %v10467_v16 = vld [vmem:[%s15947_s14 + $0x5b8] sm:$0xf0] }
 0x363   : > { %7894 = vmatpush.bf16.msra.mxu3 %v10150_v58  ;;  %v10358_v58 = vor.u32 %v14629_v49, %v10355_v41  ;;  %v10614_v0 = vor.u32 %v14693_v59, %v10611_v55  ;;  %v14625_v2 = vld [vmem:[%s15947_s14 + $0x4ac] sm:$0xf]  ;;  %v10723_v30 = vld [vmem:[%s15947_s14 + $0x7b8] sm:$0xf0] }
 0x364   : > { %7856 = vmatpush.bf16.msra.mxu0 %v9750_v40  ;;  %v14657_v5 = vld [vmem:[%s15947_s14 + $0x5ac] sm:$0xf]  ;;  %v10595_v40 = vld [vmem:[%s15947_s14 + $0x6b8] sm:$0xf0]  ;;  %v10342_v21 = vor.u32 %v14625_v2, %v10339_v14 }
 0x365   : > { %7869 = vmatpush.bf16.msra.mxu1 %v9878_v52  ;;  %v14689_v62 = vld [vmem:[%s15947_s14 + $0x6ac] sm:$0xf]  ;;  %v10470_v52 = vor.u32 %v14657_v5, %v10467_v16  ;;  %v10323_v46 = vld [vmem:[%s15947_s14 + $0x498] sm:$0xf0]  ;;  %v7663_v51 = vpop.f32.mrf.mxu1 }
 0x366   : > { %7882 = vmatpush.bf16.msra.mxu2 %v10006_v35  ;;  %v14721_v24 = vld [vmem:[%s15947_s14 + $0x7ac] sm:$0xf]  ;;  %v10598_v35 = vor.u32 %v14689_v62, %v10595_v40  ;;  %v10707_v49 = vld [vmem:[%s15947_s14 + $0x798] sm:$0xf0] }
 0x367   : > { %7895 = vmatpush.bf16.msra.mxu3 %v10134_v20  ;;  %7857 = vmatmul.bf16.vlgmr.msra.gmra.mxu0 %v16086_v28  ;;  %v14653_v48 = vld [vmem:[%s15947_s14 + $0x58c] sm:$0xf]  ;;  %v10726_v20 = vor.u32 %v14721_v24, %v10723_v30  ;;  %v10451_v28 = vld [vmem:[%s15947_s14 + $0x598] sm:$0xf0] }
 0x368   : > { %7901 = vmatpush.bf16.msrb.mxu0 %v10374_v61  ;;  %7870 = vmatmul.bf16.vlgmr.msra.gmra.mxu1 %v16092_v34  ;;  %v10579_v61 = vld [vmem:[%s15947_s14 + $0x698] sm:$0xf0]  ;;  %v14617_v59 = vld [vmem:[%s15947_s14 + $0x46c] sm:$0xf] }
 0x369   : > { %7914 = vmatpush.bf16.msrb.mxu1 %v10502_v23  ;;  %7883 = vmatmul.bf16.vlgmr.msra.gmra.mxu2 %v16084_v27  ;;  %v14621_v27 = vld [vmem:[%s15947_s14 + $0x48c] sm:$0xf]  ;;  %v7650_v23 = vpop.f32.mrf.mxu0  ;;  %v10307_v55 = vld [vmem:[%s15947_s14 + $0x478] sm:$0xf0] }
 0x36a   : > { %7927 = vmatpush.bf16.msrb.mxu2 %v10630_v53  ;;  %7896 = vmatmul.bf16.vlgmr.msra.gmra.mxu3 %v16090_v33  ;;  %v14685_v33 = vld [vmem:[%s15947_s14 + $0x68c] sm:$0xf]  ;;  %v7651_v34 = vadd.f32 %v7650_v23, %v17821_v36  ;;  %v10326_v41 = vor.u32 %v14621_v27, %v10323_v46  ;;  %v10563_v36 = vld [vmem:[%s15947_s14 + $0x678] sm:$0xf0]  ;;  %v10310_v5 = vor.u32 %v14617_v59, %v10307_v55 }
 0x36b   : > { %7940 = vmatpush.bf16.msrb.mxu3 %v10758_v4  ;;  %v14717_v53 = vld [vmem:[%s15947_s14 + $0x78c] sm:$0xf]  ;;  %v10454_v4 = vor.u32 %v14653_v48, %v10451_v28  ;;  %v10582_v54 = vor.u32 %v14685_v33, %v10579_v61  ;;  %v10691_v14 = vld [vmem:[%s15947_s14 + $0x778] sm:$0xf0] }
 0x36c   : > { %7902 = vmatpush.bf16.msrb.mxu0 %v10358_v58  ;;  %v14649_v56 = vld [vmem:[%s15947_s14 + $0x56c] sm:$0xf]  ;;  %v10710_v10 = vor.u32 %v14717_v53, %v10707_v49  ;;  %v7664_v58 = vadd.f32 %v7663_v51, %v7651_v34  ;;  %v10291_v40 = vld [vmem:[%s15947_s14 + $0x458] sm:$0xf0] }
 0x36d   : > { %7915 = vmatpush.bf16.msrb.mxu1 %v10486_v57  ;;  %v10435_v57 = vld [vmem:[%s15947_s14 + $0x578] sm:$0xf0]  ;;  %v14713_v2 = vld [vmem:[%s15947_s14 + $0x76c] sm:$0xf]  ;;  %v7689_v48 = vpop.f32.mrf.mxu3  ;;  %v7665_v23 = vpop.f32.mrf.mxu1 }
 0x36e   : > { %7928 = vmatpush.bf16.msrb.mxu2 %v10614_v0  ;;  %v14681_v0 = vld [vmem:[%s15947_s14 + $0x66c] sm:$0xf]  ;;  %v10694_v30 = vor.u32 %v14713_v2, %v10691_v14  ;;  %v10547_v27 = vld [vmem:[%s15947_s14 + $0x658] sm:$0xf0] }
 0x36f   : > { %7941 = vmatpush.bf16.msrb.mxu3 %v10742_v11  ;;  %v10438_v11 = vor.u32 %v14649_v56, %v10435_v57  ;;  %v10566_v16 = vor.u32 %v14681_v0, %v10563_v36  ;;  %v14613_v62 = vld [vmem:[%s15947_s14 + $0x44c] sm:$0xf]  ;;  %v10675_v28 = vld [vmem:[%s15947_s14 + $0x758] sm:$0xf0] }
 0x370   : > { %7903 = vmatpush.bf16.msrb.mxu0 %v10342_v21  ;;  %v14645_v24 = vld [vmem:[%s15947_s14 + $0x54c] sm:$0xf]  ;;  %v7676_v21 = vpop.f32.mrf.mxu2  ;;  %v10294_v61 = vor.u32 %v14613_v62, %v10291_v40  ;;  %v10275_v51 = vld [vmem:[%s15947_s14 + $0x438] sm:$0xf0] }
 0x371   : > { %7916 = vmatpush.bf16.msrb.mxu1 %v10470_v52  ;;  %v10419_v52 = vld [vmem:[%s15947_s14 + $0x558] sm:$0xf0]  ;;  %v7677_v46 = vadd.f32 %v7676_v21, %v7664_v58  ;;  %v7652_v33 = vpop.f32.mrf.mxu0  ;;  %v14673_v55 = vld [vmem:[%s15947_s14 + $0x62c] sm:$0xf] }
 0x372   : > { %7929 = vmatpush.bf16.msrb.mxu2 %v10598_v35  ;;  %v14677_v35 = vld [vmem:[%s15947_s14 + $0x64c] sm:$0xf]  ;;  %v10422_v49 = vor.u32 %v14645_v24, %v10419_v52  ;;  %v10403_v59 = vld [vmem:[%s15947_s14 + $0x538] sm:$0xf0] }
 0x373   : > { %7942 = vmatpush.bf16.msrb.mxu3 %v10726_v20  ;;  %v14709_v20 = vld [vmem:[%s15947_s14 + $0x74c] sm:$0xf]  ;;  %v17892_v53 = vadd.f32 %v7689_v48, %v7677_v46  ;;  %v10550_v34 = vor.u32 %v14677_v35, %v10547_v27  ;;  %v10531_v56 = vld [vmem:[%s15947_s14 + $0x638] sm:$0xf0] }
 0x374   : > { %7904 = vmatpush.bf16.msrb.mxu0 %v10326_v41  ;;  %v14609_v41 = vld [vmem:[%s15947_s14 + $0x42c] sm:$0xf]  ;;  %v10659_v58 = vld [vmem:[%s15947_s14 + $0x738] sm:$0xf0]  ;;  %v10534_v14 = vor.u32 %v14673_v55, %v10531_v56 }
 0x375   : > { %7917 = vmatpush.bf16.msrb.mxu1 %v10454_v4  ;;  %v14641_v4 = vld [vmem:[%s15947_s14 + $0x52c] sm:$0xf]  ;;  %v10278_v57 = vor.u32 %v14609_v41, %v10275_v51  ;;  %v10259_v36 = vld [vmem:[%s15947_s14 + $0x418] sm:$0xf0]  ;;  %v7691_v46 = vpop.f32.mrf.mxu3 }
 0x376   : > { %7930 = vmatpush.bf16.msrb.mxu2 %v10582_v54  ;;  %v10678_v54 = vor.u32 %v14709_v20, %v10675_v28  ;;  %v14605_v0 = vld [vmem:[%s15947_s14 + $0x40c] sm:$0xf]  ;;  %v10406_v2 = vor.u32 %v14641_v4, %v10403_v59  ;;  %v10515_v40 = vld [vmem:[%s15947_s14 + $0x618] sm:$0xf0] }
 0x377   : > { %7943 = vmatpush.bf16.msrb.mxu3 %v10710_v10  ;;  %v14705_v10 = vld [vmem:[%s15947_s14 + $0x72c] sm:$0xf]  ;;  %v10883_v35 = vld [vmem:[%s15947_s14 + $0x8f8] sm:$0xf0]  ;;  %v10262_v48 = vor.u32 %v14605_v0, %v10259_v36 }
 0x378   : > { %7905 = vmatpush.bf16.msrb.mxu0 %v10310_v5  ;;  %v14637_v5 = vld [vmem:[%s15947_s14 + $0x50c] sm:$0xf]  ;;  %v10662_v62 = vor.u32 %v14705_v10, %v10659_v58  ;;  %v7678_v21 = vpop.f32.mrf.mxu2  ;;  %v11011_v20 = vld [vmem:[%s15947_s14 + $0x9f8] sm:$0xf0] }
 0x379   : > { %7918 = vmatpush.bf16.msrb.mxu1 %v10438_v11  ;;  %v10387_v11 = vld [vmem:[%s15947_s14 + $0x518] sm:$0xf0]  ;;  %v14701_v24 = vld [vmem:[%s15947_s14 + $0x70c] sm:$0xf] }
 0x37a   : > { %7931 = vmatpush.bf16.msrb.mxu2 %v10566_v16  ;;  %v14669_v16 = vld [vmem:[%s15947_s14 + $0x60c] sm:$0xf]  ;;  %v11139_v33 = vld [vmem:[%s15947_s14 + $0xaf8] sm:$0xf0] }
 0x37b   : > { %7944 = vmatpush.bf16.msrb.mxu3 %v10694_v30  ;;  %v10643_v30 = vld [vmem:[%s15947_s14 + $0x718] sm:$0xf0]  ;;  %v14761_v52 = vld [vmem:[%s15947_s14 + $0x8ec] sm:$0xf]  ;;  %v10518_v23 = vor.u32 %v14669_v16, %v10515_v40 }
 0x37c   : > { %7906 = vmatpush.bf16.msrb.mxu0 %v10294_v61  ;;  %v14793_v27 = vld [vmem:[%s15947_s14 + $0x9ec] sm:$0xf]  ;;  %v10390_v61 = vor.u32 %v14637_v5, %v10387_v11  ;;  %v10646_v41 = vor.u32 %v14701_v24, %v10643_v30  ;;  %v10886_v51 = vor.u32 %v14761_v52, %v10883_v35  ;;  %v10867_v55 = vld [vmem:[%s15947_s14 + $0x8d8] sm:$0xf0] }
 0x37d   : > { %7919 = vmatpush.bf16.msrb.mxu1 %v10422_v49  ;;  %v14825_v28 = vld [vmem:[%s15947_s14 + $0xaec] sm:$0xf]  ;;  %v11014_v4 = vor.u32 %v14793_v27, %v11011_v20  ;;  %v10995_v58 = vld [vmem:[%s15947_s14 + $0x9d8] sm:$0xf0] }
 0x37e   : > { %7932 = vmatpush.bf16.msrb.mxu2 %v10550_v34  ;;  %v14857_v49 = vld [vmem:[%s15947_s14 + $0xbec] sm:$0xf]  ;;  %v11267_v34 = vld [vmem:[%s15947_s14 + $0xbf8] sm:$0xf0] }
 0x37f   : > { %7945 = vmatpush.bf16.msrb.mxu3 %v10678_v54  ;;  %v11142_v54 = vor.u32 %v14825_v28, %v11139_v33  ;;  %v14757_v59 = vld [vmem:[%s15947_s14 + $0x8cc] sm:$0xf]  ;;  %v11270_v10 = vor.u32 %v14857_v49, %v11267_v34  ;;  %v11123_v0 = vld [vmem:[%s15947_s14 + $0xad8] sm:$0xf0] }
 0x380   : > { %7907 = vmatpush.bf16.msrb.mxu0 %v10278_v57  ;;  %v14789_v56 = vld [vmem:[%s15947_s14 + $0x9cc] sm:$0xf]  ;;  %v10979_v30 = vld [vmem:[%s15947_s14 + $0x9b8] sm:$0xf0] }
 0x381   : > { %7920 = vmatpush.bf16.msrb.mxu1 %v10406_v2  ;;  %v14821_v57 = vld [vmem:[%s15947_s14 + $0xacc] sm:$0xf]  ;;  %v11251_v2 = vld [vmem:[%s15947_s14 + $0xbd8] sm:$0xf0]  ;;  %v10998_v5 = vor.u32 %v14789_v56, %v10995_v58 }
 0x382   : > { %7933 = vmatpush.bf16.msrb.mxu2 %v10534_v14  ;;  %v14853_v36 = vld [vmem:[%s15947_s14 + $0xbcc] sm:$0xf]  ;;  %v10870_v14 = vor.u32 %v14757_v59, %v10867_v55  ;;  %v11126_v11 = vor.u32 %v14821_v57, %v11123_v0  ;;  %v11107_v52 = vld [vmem:[%s15947_s14 + $0xab8] sm:$0xf0] }
 0x383   : > { %7946 = vmatpush.bf16.msrb.mxu3 %v10662_v62  ;;  %v14753_v16 = vld [vmem:[%s15947_s14 + $0x8ac] sm:$0xf]  ;;  %v10851_v62 = vld [vmem:[%s15947_s14 + $0x8b8] sm:$0xf0]  ;;  %v11254_v24 = vor.u32 %v14853_v36, %v11251_v2 }
 0x384   : > { %7908 = vmatpush.bf16.msrb.mxu0 %v10262_v48  ;;  %v14785_v40 = vld [vmem:[%s15947_s14 + $0x9ac] sm:$0xf]  ;;  %v11235_v27 = vld [vmem:[%s15947_s14 + $0xbb8] sm:$0xf0]  ;;  %v10854_v46 = vor.u32 %v14753_v16, %v10851_v62  ;;  %v7702_v49 = vpop.f32.mrf.mxu0 }
 0x385   : > { %7921 = vmatpush.bf16.msrb.mxu1 %v10390_v61  ;;  %v14817_v21 = vld [vmem:[%s15947_s14 + $0xaac] sm:$0xf]  ;;  %v10835_v28 = vld [vmem:[%s15947_s14 + $0x898] sm:$0xf0] }
 0x386   : > { %7934 = vmatpush.bf16.msrb.mxu2 %v10518_v23  ;;  %v14849_v35 = vld [vmem:[%s15947_s14 + $0xbac] sm:$0xf]  ;;  %v11110_v48 = vor.u32 %v14817_v21, %v11107_v52  ;;  %v10963_v33 = vld [vmem:[%s15947_s14 + $0x998] sm:$0xf0] }
 0x387   : > { %7947 = vmatpush.bf16.msrb.mxu3 %v10646_v41  ;;  %7909 = vmatmul.bf16.vlgmr.msrb.gmra.mxu0 %v16142_v42  ;;  %v14749_v20 = vld [vmem:[%s15947_s14 + $0x88c] sm:$0xf]  ;;  %v11091_v23 = vld [vmem:[%s15947_s14 + $0xa98] sm:$0xf0] }
 0x388   : > { %7953 = vmatpush.bf16.msra.mxu0 %v10886_v51  ;;  %7922 = vmatmul.bf16.vlgmr.msrb.gmra.mxu1 %v16146_v45  ;;  %v14781_v42 = vld [vmem:[%s15947_s14 + $0x98c] sm:$0xf]  ;;  %v11219_v41 = vld [vmem:[%s15947_s14 + $0xb98] sm:$0xf0]  ;;  %v7703_v45 = vadd.f32 %v7702_v49, %v17892_v53  ;;  %v10838_v51 = vor.u32 %v14749_v20, %v10835_v28 }
 0x389   : > { %7966 = vmatpush.bf16.msra.mxu1 %v11014_v4  ;;  %7935 = vmatmul.bf16.vlgmr.msrb.gmra.mxu2 %v16138_v39  ;;  %v10982_v39 = vor.u32 %v14785_v40, %v10979_v30  ;;  %v14813_v61 = vld [vmem:[%s15947_s14 + $0xa8c] sm:$0xf]  ;;  %v7715_v4 = vpop.f32.mrf.mxu1  ;;  %v10819_v56 = vld [vmem:[%s15947_s14 + $0x878] sm:$0xf0] }
 0x38a   : > { %7979 = vmatpush.bf16.msra.mxu2 %v11142_v54  ;;  %7948 = vmatmul.bf16.vlgmr.msrb.gmra.mxu3 %v16144_v43  ;;  %v11238_v43 = vor.u32 %v14849_v35, %v11235_v27  ;;  %v14845_v34 = vld [vmem:[%s15947_s14 + $0xb8c] sm:$0xf]  ;;  %v10966_v54 = vor.u32 %v14781_v42, %v10963_v33  ;;  %v11094_v59 = vor.u32 %v14813_v61, %v11091_v23  ;;  %v10947_v0 = vld [vmem:[%s15947_s14 + $0x978] sm:$0xf0] }
 0x38b   : > { %7992 = vmatpush.bf16.msra.mxu3 %v11270_v10  ;;  %v14745_v55 = vld [vmem:[%s15947_s14 + $0x86c] sm:$0xf]  ;;  %v11222_v58 = vor.u32 %v14845_v34, %v11219_v41  ;;  %v7716_v57 = vadd.f32 %v7715_v4, %v7703_v45  ;;  %v11075_v53 = vld [vmem:[%s15947_s14 + $0xa78] sm:$0xf0] }
 0x38c   : > { %7954 = vmatpush.bf16.msra.mxu0 %v10870_v14  ;;  %v14777_v10 = vld [vmem:[%s15947_s14 + $0x96c] sm:$0xf]  ;;  %v11203_v14 = vld [vmem:[%s15947_s14 + $0xb78] sm:$0xf0]  ;;  %v7728_v21 = vpop.f32.mrf.mxu2  ;;  %v7704_v28 = vpop.f32.mrf.mxu0 }
 0x38d   : > { %7967 = vmatpush.bf16.msra.mxu1 %v10998_v5  ;;  %v14809_v36 = vld [vmem:[%s15947_s14 + $0xa6c] sm:$0xf]  ;;  %v10822_v5 = vor.u32 %v14745_v55, %v10819_v56  ;;  %v10803_v40 = vld [vmem:[%s15947_s14 + $0x858] sm:$0xf0] }
 0x38e   : > { %7980 = vmatpush.bf16.msra.mxu2 %v11126_v11  ;;  %v14841_v2 = vld [vmem:[%s15947_s14 + $0xb6c] sm:$0xf]  ;;  %v10950_v11 = vor.u32 %v14777_v10, %v10947_v0  ;;  %v11078_v16 = vor.u32 %v14809_v36, %v11075_v53  ;;  %v10931_v52 = vld [vmem:[%s15947_s14 + $0x958] sm:$0xf0] }
 0x38f   : > { %7993 = vmatpush.bf16.msra.mxu3 %v11254_v24  ;;  %v14741_v62 = vld [vmem:[%s15947_s14 + $0x84c] sm:$0xf]  ;;  %v11206_v30 = vor.u32 %v14841_v2, %v11203_v14  ;;  %v11059_v27 = vld [vmem:[%s15947_s14 + $0xa58] sm:$0xf0] }
 0x390   : > { %7955 = vmatpush.bf16.msra.mxu0 %v10854_v46  ;;  %v14773_v24 = vld [vmem:[%s15947_s14 + $0x94c] sm:$0xf]  ;;  %v7729_v46 = vadd.f32 %v7728_v21, %v7716_v57  ;;  %v11187_v20 = vld [vmem:[%s15947_s14 + $0xb58] sm:$0xf0]  ;;  %v10806_v42 = vor.u32 %v14741_v62, %v10803_v40 }
 0x391   : > { %7968 = vmatpush.bf16.msra.mxu1 %v10982_v39  ;;  %v14805_v35 = vld [vmem:[%s15947_s14 + $0xa4c] sm:$0xf]  ;;  %v7741_v39 = vpop.f32.mrf.mxu3  ;;  %v10934_v61 = vor.u32 %v14773_v24, %v10931_v52  ;;  %v10787_v34 = vld [vmem:[%s15947_s14 + $0x838] sm:$0xf0] }
 0x392   : > { %7981 = vmatpush.bf16.msra.mxu2 %v11110_v48  ;;  %v14837_v48 = vld [vmem:[%s15947_s14 + $0xb4c] sm:$0xf]  ;;  %v17963_v33 = vadd.f32 %v7741_v39, %v7729_v46  ;;  %v11062_v23 = vor.u32 %v14805_v35, %v11059_v27  ;;  %v11171_v55 = vld [vmem:[%s15947_s14 + $0xb38] sm:$0xf0] }
 0x393   : > { %7994 = vmatpush.bf16.msra.mxu3 %v11238_v43  ;;  %v7717_v43 = vpop.f32.mrf.mxu1  ;;  %v14737_v49 = vld [vmem:[%s15947_s14 + $0x82c] sm:$0xf]  ;;  %v11190_v45 = vor.u32 %v14837_v48, %v11187_v20  ;;  %v10899_v53 = vld [vmem:[%s15947_s14 + $0x918] sm:$0xf0] }
 0x394   : > { %7956 = vmatpush.bf16.msra.mxu0 %v10838_v51  ;;  %v14769_v41 = vld [vmem:[%s15947_s14 + $0x92c] sm:$0xf]  ;;  %v10915_v51 = vld [vmem:[%s15947_s14 + $0x938] sm:$0xf0]  ;;  %v10790_v56 = vor.u32 %v14737_v49, %v10787_v34  ;;  %v7730_v62 = vpop.f32.mrf.mxu2 }
 0x395   : > { %7969 = vmatpush.bf16.msra.mxu1 %v10966_v54  ;;  %v14801_v4 = vld [vmem:[%s15947_s14 + $0xa2c] sm:$0xf]  ;;  %v11043_v54 = vld [vmem:[%s15947_s14 + $0xa38] sm:$0xf0]  ;;  %v10918_v57 = vor.u32 %v14769_v41, %v10915_v51 }
 0x396   : > { %7982 = vmatpush.bf16.msra.mxu2 %v11094_v59  ;;  %v14833_v59 = vld [vmem:[%s15947_s14 + $0xb2c] sm:$0xf]  ;;  %v11046_v0 = vor.u32 %v14801_v4, %v11043_v54  ;;  %v11395_v24 = vld [vmem:[%s15947_s14 + $0xcf8] sm:$0xf0] }
 0x397   : > { %7995 = vmatpush.bf16.msra.mxu3 %v11222_v58  ;;  %v14733_v10 = vld [vmem:[%s15947_s14 + $0x80c] sm:$0xf]  ;;  %v10771_v58 = vld [vmem:[%s15947_s14 + $0x818] sm:$0xf0]  ;;  %v11174_v14 = vor.u32 %v14833_v59, %v11171_v55 }
 0x398   : > { %7957 = vmatpush.bf16.msra.mxu0 %v10822_v5  ;;  %v14765_v36 = vld [vmem:[%s15947_s14 + $0x90c] sm:$0xf]  ;;  %v11027_v5 = vld [vmem:[%s15947_s14 + $0xa18] sm:$0xf0]  ;;  %v10774_v52 = vor.u32 %v14733_v10, %v10771_v58 }
 0x399   : > { %7970 = vmatpush.bf16.msra.mxu1 %v10950_v11  ;;  %v14797_v2 = vld [vmem:[%s15947_s14 + $0xa0c] sm:$0xf]  ;;  %v7743_v21 = vpop.f32.mrf.mxu3  ;;  %v11523_v35 = vld [vmem:[%s15947_s14 + $0xdf8] sm:$0xf0]  ;;  %v10902_v39 = vor.u32 %v14765_v36, %v10899_v53 }
 0x39a   : > { %7983 = vmatpush.bf16.msra.mxu2 %v11078_v16  ;;  %v14829_v11 = vld [vmem:[%s15947_s14 + $0xb0c] sm:$0xf]  ;;  %v11155_v16 = vld [vmem:[%s15947_s14 + $0xb18] sm:$0xf0]  ;;  %v11030_v48 = vor.u32 %v14797_v2, %v11027_v5 }
 0x39b   : > { %7996 = vmatpush.bf16.msra.mxu3 %v11206_v30  ;;  %v14889_v40 = vld [vmem:[%s15947_s14 + $0xcec] sm:$0xf]  ;;  %v11651_v46 = vld [vmem:[%s15947_s14 + $0xef8] sm:$0xf0] }
 0x39c   : > { %7958 = vmatpush.bf16.msra.mxu0 %v10806_v42  ;;  %v14921_v30 = vld [vmem:[%s15947_s14 + $0xdec] sm:$0xf]  ;;  %v11779_v28 = vld [vmem:[%s15947_s14 + $0xff8] sm:$0xf0]  ;;  %v11158_v42 = vor.u32 %v14829_v11, %v11155_v16  ;;  %v11398_v43 = vor.u32 %v14889_v40, %v11395_v24 }
 0x39d   : > { %7971 = vmatpush.bf16.msra.mxu1 %v10934_v61  ;;  %v14953_v27 = vld [vmem:[%s15947_s14 + $0xeec] sm:$0xf]  ;;  %v11526_v61 = vor.u32 %v14921_v30, %v11523_v35  ;;  %v11379_v34 = vld [vmem:[%s15947_s14 + $0xcd8] sm:$0xf0] }
 0x39e   : > { %7984 = vmatpush.bf16.msra.mxu2 %v11062_v23  ;;  %v14985_v20 = vld [vmem:[%s15947_s14 + $0xfec] sm:$0xf]  ;;  %v11654_v23 = vor.u32 %v14953_v27, %v11651_v46  ;;  %v11507_v51 = vld [vmem:[%s15947_s14 + $0xdd8] sm:$0xf0] }
 0x39f   : > { %7997 = vmatpush.bf16.msra.mxu3 %v11190_v45  ;;  %v14885_v49 = vld [vmem:[%s15947_s14 + $0xccc] sm:$0xf]  ;;  %v11782_v45 = vor.u32 %v14985_v20, %v11779_v28  ;;  %v11635_v54 = vld [vmem:[%s15947_s14 + $0xed8] sm:$0xf0] }
 0x3a0   : > { %7959 = vmatpush.bf16.msra.mxu0 %v10790_v56  ;;  %v14917_v41 = vld [vmem:[%s15947_s14 + $0xdcc] sm:$0xf]  ;;  %v11763_v55 = vld [vmem:[%s15947_s14 + $0xfd8] sm:$0xf0]  ;;  %v11382_v56 = vor.u32 %v14885_v49, %v11379_v34 }
 0x3a1   : > { %7972 = vmatpush.bf16.msra.mxu1 %v10918_v57  ;;  %v14949_v4 = vld [vmem:[%s15947_s14 + $0xecc] sm:$0xf]  ;;  %v11510_v10 = vor.u32 %v14917_v41, %v11507_v51  ;;  %v11491_v2 = vld [vmem:[%s15947_s14 + $0xdb8] sm:$0xf0] }
 0x3a2   : > { %7985 = vmatpush.bf16.msra.mxu2 %v11046_v0  ;;  %v14981_v59 = vld [vmem:[%s15947_s14 + $0xfcc] sm:$0xf]  ;;  %v11638_v58 = vor.u32 %v14949_v4, %v11635_v54  ;;  %v11363_v0 = vld [vmem:[%s15947_s14 + $0xcb8] sm:$0xf0] }
 0x3a3   : > { %7998 = vmatpush.bf16.msra.mxu3 %v11174_v14  ;;  %v14881_v57 = vld [vmem:[%s15947_s14 + $0xcac] sm:$0xf]  ;;  %v11766_v53 = vor.u32 %v14981_v59, %v11763_v55  ;;  %v11619_v5 = vld [vmem:[%s15947_s14 + $0xeb8] sm:$0xf0] }
 0x3a4   : > { %7960 = vmatpush.bf16.msra.mxu0 %v10774_v52  ;;  %v14913_v36 = vld [vmem:[%s15947_s14 + $0xdac] sm:$0xf]  ;;  %v11747_v16 = vld [vmem:[%s15947_s14 + $0xfb8] sm:$0xf0] }
 0x3a5   : > { %7973 = vmatpush.bf16.msra.mxu1 %v10902_v39  ;;  %v14945_v14 = vld [vmem:[%s15947_s14 + $0xeac] sm:$0xf]  ;;  %v11494_v62 = vor.u32 %v14913_v36, %v11491_v2  ;;  %v11347_v30 = vld [vmem:[%s15947_s14 + $0xc98] sm:$0xf0]  ;;  %v7767_v20 = vpop.f32.mrf.mxu1 }
 0x3a6   : > { %7986 = vmatpush.bf16.msra.mxu2 %v11030_v48  ;;  %v14977_v11 = vld [vmem:[%s15947_s14 + $0xfac] sm:$0xf]  ;;  %v11622_v40 = vor.u32 %v14945_v14, %v11619_v5  ;;  %v11475_v21 = vld [vmem:[%s15947_s14 + $0xd98] sm:$0xf0] }
 0x3a7   : > { %7999 = vmatpush.bf16.msra.mxu3 %v11158_v42  ;;  %7961 = vmatmul.bf16.vlgmr.msra.gmra.mxu0 %v16222_v25  ;;  %v11366_v25 = vor.u32 %v14881_v57, %v11363_v0  ;;  %v14877_v24 = vld [vmem:[%s15947_s14 + $0xc8c] sm:$0xf]  ;;  %v11603_v35 = vld [vmem:[%s15947_s14 + $0xe98] sm:$0xf0] }
 0x3a8   : > { %8005 = vmatpush.bf16.msrb.mxu0 %v11398_v43  ;;  %7974 = vmatmul.bf16.vlgmr.msra.gmra.mxu1 %v16233_v32  ;;  %v11750_v32 = vor.u32 %v14977_v11, %v11747_v16  ;;  %v14941_v52 = vld [vmem:[%s15947_s14 + $0xe8c] sm:$0xf]  ;;  %v11731_v46 = vld [vmem:[%s15947_s14 + $0xf98] sm:$0xf0]  ;;  %v11350_v48 = vor.u32 %v14877_v24, %v11347_v30 }
 0x3a9   : > { %8018 = vmatpush.bf16.msrb.mxu1 %v11526_v61  ;;  %7987 = vmatmul.bf16.vlgmr.msra.gmra.mxu2 %v16229_v31  ;;  %v14909_v31 = vld [vmem:[%s15947_s14 + $0xd8c] sm:$0xf]  ;;  %v11606_v42 = vor.u32 %v14941_v52, %v11603_v35  ;;  %v11331_v61 = vld [vmem:[%s15947_s14 + $0xc78] sm:$0xf0] }
 0x3aa   : > { %8031 = vmatpush.bf16.msrb.mxu2 %v11654_v23  ;;  %8000 = vmatmul.bf16.vlgmr.msra.gmra.mxu3 %v16239_v19  ;;  %v7754_v19 = vpop.f32.mrf.mxu0  ;;  %v14973_v27 = vld [vmem:[%s15947_s14 + $0xf8c] sm:$0xf]  ;;  %v11478_v28 = vor.u32 %v14909_v31, %v11475_v21  ;;  %v11459_v41 = vld [vmem:[%s15947_s14 + $0xd78] sm:$0xf0] }
 0x3ab   : > { %8044 = vmatpush.bf16.msrb.mxu3 %v11782_v45  ;;  %v7755_v39 = vadd.f32 %v7754_v19, %v17963_v33  ;;  %v14873_v43 = vld [vmem:[%s15947_s14 + $0xc6c] sm:$0xf]  ;;  %v11734_v49 = vor.u32 %v14973_v27, %v11731_v46  ;;  %v11587_v33 = vld [vmem:[%s15947_s14 + $0xe78] sm:$0xf0] }
 0x3ac   : > { %8006 = vmatpush.bf16.msrb.mxu0 %v11382_v56  ;;  %v14905_v23 = vld [vmem:[%s15947_s14 + $0xd6c] sm:$0xf]  ;;  %v11715_v4 = vld [vmem:[%s15947_s14 + $0xf78] sm:$0xf0]  ;;  %v11334_v54 = vor.u32 %v14873_v43, %v11331_v61  ;;  %v7780_v0 = vpop.f32.mrf.mxu2 }
 0x3ad   : > { %8019 = vmatpush.bf16.msrb.mxu1 %v11510_v10  ;;  %v7768_v34 = vadd.f32 %v7767_v20, %v7755_v39  ;;  %v14937_v45 = vld [vmem:[%s15947_s14 + $0xe6c] sm:$0xf]  ;;  %v11462_v59 = vor.u32 %v14905_v23, %v11459_v41  ;;  %v11315_v10 = vld [vmem:[%s15947_s14 + $0xc58] sm:$0xf0]  ;;  %v7793_v5 = vpop.f32.mrf.mxu3 }
 0x3ae   : > { %8032 = vmatpush.bf16.msrb.mxu2 %v11638_v58  ;;  %v14969_v51 = vld [vmem:[%s15947_s14 + $0xf6c] sm:$0xf]  ;;  %v11590_v55 = vor.u32 %v14937_v45, %v11587_v33  ;;  %v11443_v36 = vld [vmem:[%s15947_s14 + $0xd58] sm:$0xf0] }
 0x3af   : > { %8045 = vmatpush.bf16.msrb.mxu3 %v11766_v53  ;;  %v14869_v56 = vld [vmem:[%s15947_s14 + $0xc4c] sm:$0xf]  ;;  %v11718_v57 = vor.u32 %v14969_v51, %v11715_v4  ;;  %v11571_v2 = vld [vmem:[%s15947_s14 + $0xe58] sm:$0xf0]  ;;  %v7781_v14 = vadd.f32 %v7780_v0, %v7768_v34 }
 0x3b0   : > { %8007 = vmatpush.bf16.msrb.mxu0 %v11366_v25  ;;  %v14901_v58 = vld [vmem:[%s15947_s14 + $0xd4c] sm:$0xf]  ;;  %v11699_v16 = vld [vmem:[%s15947_s14 + $0xf58] sm:$0xf0] }
 0x3b1   : > { %8020 = vmatpush.bf16.msrb.mxu1 %v11494_v62  ;;  %v14933_v53 = vld [vmem:[%s15947_s14 + $0xe4c] sm:$0xf]  ;;  %v11318_v62 = vor.u32 %v14869_v56, %v11315_v10  ;;  %v18034_v24 = vadd.f32 %v7793_v5, %v7781_v14  ;;  %v11446_v30 = vor.u32 %v14901_v58, %v11443_v36  ;;  %v11299_v21 = vld [vmem:[%s15947_s14 + $0xc38] sm:$0xf0] }
 0x3b2   : > { %8033 = vmatpush.bf16.msrb.mxu2 %v11622_v40  ;;  %v14965_v11 = vld [vmem:[%s15947_s14 + $0xf4c] sm:$0xf]  ;;  %v7756_v25 = vpop.f32.mrf.mxu0  ;;  %v7769_v40 = vpop.f32.mrf.mxu1  ;;  %v11574_v31 = vor.u32 %v14933_v53, %v11571_v2  ;;  %v11427_v19 = vld [vmem:[%s15947_s14 + $0xd38] sm:$0xf0] }
 0x3b3   : > { %8046 = vmatpush.bf16.msrb.mxu3 %v11750_v32  ;;  %v14865_v32 = vld [vmem:[%s15947_s14 + $0xc2c] sm:$0xf]  ;;  %v11702_v35 = vor.u32 %v14965_v11, %v11699_v16  ;;  %v11555_v46 = vld [vmem:[%s15947_s14 + $0xe38] sm:$0xf0] }
 0x3b4   : > { %8008 = vmatpush.bf16.msrb.mxu0 %v11350_v48  ;;  %v14897_v52 = vld [vmem:[%s15947_s14 + $0xd2c] sm:$0xf]  ;;  %v11683_v48 = vld [vmem:[%s15947_s14 + $0xf38] sm:$0xf0]  ;;  %v11302_v20 = vor.u32 %v14865_v32, %v11299_v21  ;;  %v7782_v4 = vpop.f32.mrf.mxu2 }
 0x3b5   : > { %8021 = vmatpush.bf16.msrb.mxu1 %v11478_v28  ;;  %v14929_v27 = vld [vmem:[%s15947_s14 + $0xe2c] sm:$0xf]  ;;  %v11430_v43 = vor.u32 %v14897_v52, %v11427_v19  ;;  %v11539_v45 = vld [vmem:[%s15947_s14 + $0xe18] sm:$0xf0]  ;;  %v7795_v56 = vpop.f32.mrf.mxu3 }
 0x3b6   : > { %8034 = vmatpush.bf16.msrb.mxu2 %v11606_v42  ;;  %v14961_v39 = vld [vmem:[%s15947_s14 + $0xf2c] sm:$0xf]  ;;  %v11283_v42 = vld [vmem:[%s15947_s14 + $0xc18] sm:$0xf0]  ;;  %v11558_v61 = vor.u32 %v14929_v27, %v11555_v46 }
 0x3b7   : > { %8047 = vmatpush.bf16.msrb.mxu3 %v11734_v49  ;;  %v14861_v28 = vld [vmem:[%s15947_s14 + $0xc0c] sm:$0xf]  ;;  %v11411_v49 = vld [vmem:[%s15947_s14 + $0xd18] sm:$0xf0]  ;;  %v11686_v41 = vor.u32 %v14961_v39, %v11683_v48 }
 0x3b8   : > { %8009 = vmatpush.bf16.msrb.mxu0 %v11334_v54  ;;  %v14893_v23 = vld [vmem:[%s15947_s14 + $0xd0c] sm:$0xf]  ;;  %v11667_v51 = vld [vmem:[%s15947_s14 + $0xf18] sm:$0xf0]  ;;  %v11286_v10 = vor.u32 %v14861_v28, %v11283_v42 }
 0x3b9   : > { %8022 = vmatpush.bf16.msrb.mxu1 %v11462_v59  ;;  %v14925_v34 = vld [vmem:[%s15947_s14 + $0xe0c] sm:$0xf]  ;;  %v11907_v59 = vld [vmem:[%s15947_s14 + $0x10f8] sm:$0xf0]  ;;  %v11414_v36 = vor.u32 %v14893_v23, %v11411_v49 }
 0x3ba   : > { %8035 = vmatpush.bf16.msrb.mxu2 %v11590_v55  ;;  %v14957_v33 = vld [vmem:[%s15947_s14 + $0xf0c] sm:$0xf]  ;;  %v12035_v58 = vld [vmem:[%s15947_s14 + $0x11f8] sm:$0xf0]  ;;  %v11542_v53 = vor.u32 %v14925_v34, %v11539_v45 }
 0x3bb   : > { %8048 = vmatpush.bf16.msrb.mxu3 %v11718_v57  ;;  %v15017_v54 = vld [vmem:[%s15947_s14 + $0x10ec] sm:$0xf]  ;;  %v12163_v0 = vld [vmem:[%s15947_s14 + $0x12f8] sm:$0xf0]  ;;  %v11670_v5 = vor.u32 %v14957_v33, %v11667_v51 }
 0x3bc   : > { %8010 = vmatpush.bf16.msrb.mxu0 %v11318_v62  ;;  %v15049_v55 = vld [vmem:[%s15947_s14 + $0x11ec] sm:$0xf]  ;;  %v12291_v14 = vld [vmem:[%s15947_s14 + $0x13f8] sm:$0xf0]  ;;  %v11910_v11 = vor.u32 %v15017_v54, %v11907_v59 }
 0x3bd   : > { %8023 = vmatpush.bf16.msrb.mxu1 %v11446_v30  ;;  %v15081_v57 = vld [vmem:[%s15947_s14 + $0x12ec] sm:$0xf]  ;;  %v12038_v16 = vor.u32 %v15049_v55, %v12035_v58  ;;  %v11891_v40 = vld [vmem:[%s15947_s14 + $0x10d8] sm:$0xf0] }
 0x3be   : > { %8036 = vmatpush.bf16.msrb.mxu2 %v11574_v31  ;;  %v15113_v2 = vld [vmem:[%s15947_s14 + $0x13ec] sm:$0xf]  ;;  %v12166_v25 = vor.u32 %v15081_v57, %v12163_v0  ;;  %v12019_v32 = vld [vmem:[%s15947_s14 + $0x11d8] sm:$0xf0] }
 0x3bf   : > { %8049 = vmatpush.bf16.msrb.mxu3 %v11702_v35  ;;  %v15013_v62 = vld [vmem:[%s15947_s14 + $0x10cc] sm:$0xf]  ;;  %v12294_v31 = vor.u32 %v15113_v2, %v12291_v14  ;;  %v12147_v52 = vld [vmem:[%s15947_s14 + $0x12d8] sm:$0xf0] }
 0x3c0   : > { %8011 = vmatpush.bf16.msrb.mxu0 %v11302_v20  ;;  %v15045_v30 = vld [vmem:[%s15947_s14 + $0x11cc] sm:$0xf]  ;;  %v12275_v19 = vld [vmem:[%s15947_s14 + $0x13d8] sm:$0xf0]  ;;  %v11894_v27 = vor.u32 %v15013_v62, %v11891_v40 }
 0x3c1   : > { %8024 = vmatpush.bf16.msrb.mxu1 %v11430_v43  ;;  %v15077_v21 = vld [vmem:[%s15947_s14 + $0x12cc] sm:$0xf]  ;;  %v12022_v46 = vor.u32 %v15045_v30, %v12019_v32  ;;  %v11875_v20 = vld [vmem:[%s15947_s14 + $0x10b8] sm:$0xf0] }
 0x3c2   : > { %8037 = vmatpush.bf16.msrb.mxu2 %v11558_v61  ;;  %v15109_v35 = vld [vmem:[%s15947_s14 + $0x13cc] sm:$0xf]  ;;  %v12150_v39 = vor.u32 %v15077_v21, %v12147_v52  ;;  %v12003_v43 = vld [vmem:[%s15947_s14 + $0x11b8] sm:$0xf0] }
 0x3c3   : > { %8050 = vmatpush.bf16.msrb.mxu3 %v11686_v41  ;;  %v15009_v48 = vld [vmem:[%s15947_s14 + $0x10ac] sm:$0xf]  ;;  %v12278_v42 = vor.u32 %v15109_v35, %v12275_v19  ;;  %v12131_v23 = vld [vmem:[%s15947_s14 + $0x12b8] sm:$0xf0] }
 0x3c4   : > { %8012 = vmatpush.bf16.msrb.mxu0 %v11286_v10  ;;  %v15041_v28 = vld [vmem:[%s15947_s14 + $0x11ac] sm:$0xf]  ;;  %v12259_v34 = vld [vmem:[%s15947_s14 + $0x13b8] sm:$0xf0] }
 0x3c5   : > { %8025 = vmatpush.bf16.msrb.mxu1 %v11414_v36  ;;  %v15073_v61 = vld [vmem:[%s15947_s14 + $0x12ac] sm:$0xf]  ;;  %v12006_v41 = vor.u32 %v15041_v28, %v12003_v43  ;;  %v11859_v51 = vld [vmem:[%s15947_s14 + $0x1098] sm:$0xf0]  ;;  %v7819_v57 = vpop.f32.mrf.mxu1 }
 0x3c6   : > { %8038 = vmatpush.bf16.msrb.mxu2 %v11542_v53  ;;  %v15105_v49 = vld [vmem:[%s15947_s14 + $0x13ac] sm:$0xf]  ;;  %v12134_v45 = vor.u32 %v15073_v61, %v12131_v23  ;;  %v11987_v4 = vld [vmem:[%s15947_s14 + $0x1198] sm:$0xf0] }
 0x3c7   : > { %8051 = vmatpush.bf16.msrb.mxu3 %v11670_v5  ;;  %8013 = vmatmul.bf16.vlgmr.msrb.gmra.mxu0 %v16315_v29  ;;  %v11878_v29 = vor.u32 %v15009_v48, %v11875_v20  ;;  %v15005_v33 = vld [vmem:[%s15947_s14 + $0x108c] sm:$0xf]  ;;  %v12115_v59 = vld [vmem:[%s15947_s14 + $0x1298] sm:$0xf0] }
 0x3c8   : > { %8057 = vmatpush.bf16.msra.mxu0 %v11910_v11  ;;  %8026 = vmatmul.bf16.vlgmr.msrb.gmra.mxu1 %v16326_v38  ;;  %v12262_v38 = vor.u32 %v15105_v49, %v12259_v34  ;;  %v15069_v54 = vld [vmem:[%s15947_s14 + $0x128c] sm:$0xf]  ;;  %v12243_v56 = vld [vmem:[%s15947_s14 + $0x1398] sm:$0xf0]  ;;  %v11862_v58 = vor.u32 %v15005_v33, %v11859_v51 }
 0x3c9   : > { %8070 = vmatpush.bf16.msra.mxu1 %v12038_v16  ;;  %8039 = vmatmul.bf16.vlgmr.msrb.gmra.mxu2 %v16322_v37  ;;  %v15037_v37 = vld [vmem:[%s15947_s14 + $0x118c] sm:$0xf]  ;;  %v12118_v36 = vor.u32 %v15069_v54, %v12115_v59  ;;  %v11843_v2 = vld [vmem:[%s15947_s14 + $0x1078] sm:$0xf0] }
 0x3ca   : > { %8083 = vmatpush.bf16.msra.mxu2 %v12166_v25  ;;  %8052 = vmatmul.bf16.vlgmr.msrb.gmra.mxu3 %v16332_v22  ;;  %v7806_v22 = vpop.f32.mrf.mxu0  ;;  %v15101_v55 = vld [vmem:[%s15947_s14 + $0x138c] sm:$0xf]  ;;  %v11990_v0 = vor.u32 %v15037_v37, %v11987_v4  ;;  %v11971_v16 = vld [vmem:[%s15947_s14 + $0x1178] sm:$0xf0] }
 0x3cb   : > { %8096 = vmatpush.bf16.msra.mxu3 %v12294_v31  ;;  %v7807_v10 = vadd.f32 %v7806_v22, %v18034_v24  ;;  %v15001_v53 = vld [vmem:[%s15947_s14 + $0x106c] sm:$0xf]  ;;  %v12246_v5 = vor.u32 %v15101_v55, %v12243_v56  ;;  %v12099_v24 = vld [vmem:[%s15947_s14 + $0x1278] sm:$0xf0] }
 0x3cc   : > { %8058 = vmatpush.bf16.msra.mxu0 %v11894_v27  ;;  %v15033_v14 = vld [vmem:[%s15947_s14 + $0x116c] sm:$0xf]  ;;  %v12227_v40 = vld [vmem:[%s15947_s14 + $0x1378] sm:$0xf0]  ;;  %v11846_v30 = vor.u32 %v15001_v53, %v11843_v2  ;;  %v7832_v27 = vpop.f32.mrf.mxu2 }
 0x3cd   : > { %8071 = vmatpush.bf16.msra.mxu1 %v12022_v46  ;;  %v7820_v11 = vadd.f32 %v7819_v57, %v7807_v10  ;;  %v15065_v25 = vld [vmem:[%s15947_s14 + $0x126c] sm:$0xf]  ;;  %v11974_v31 = vor.u32 %v15033_v14, %v11971_v16  ;;  %v11827_v52 = vld [vmem:[%s15947_s14 + $0x1058] sm:$0xf0]  ;;  %v7845_v28 = vpop.f32.mrf.mxu3  ;;  %v7821_v49 = vpop.f32.mrf.mxu1 }
 0x3ce   : > { %8084 = vmatpush.bf16.msra.mxu2 %v12150_v39  ;;  %v15097_v62 = vld [vmem:[%s15947_s14 + $0x136c] sm:$0xf]  ;;  %v12102_v32 = vor.u32 %v15065_v25, %v12099_v24  ;;  %v11955_v46 = vld [vmem:[%s15947_s14 + $0x1158] sm:$0xf0] }
 0x3cf   : > { %8097 = vmatpush.bf16.msra.mxu3 %v12278_v42  ;;  %v14997_v21 = vld [vmem:[%s15947_s14 + $0x104c] sm:$0xf]  ;;  %v12230_v19 = vor.u32 %v15097_v62, %v12227_v40  ;;  %v12083_v48 = vld [vmem:[%s15947_s14 + $0x1258] sm:$0xf0]  ;;  %v7833_v20 = vadd.f32 %v7832_v27, %v7820_v11 }
 0x3d0   : > { %8059 = vmatpush.bf16.msra.mxu0 %v11878_v29  ;;  %v15029_v35 = vld [vmem:[%s15947_s14 + $0x114c] sm:$0xf]  ;;  %v12211_v43 = vld [vmem:[%s15947_s14 + $0x1358] sm:$0xf0]  ;;  %v11830_v23 = vor.u32 %v14997_v21, %v11827_v52 }
 0x3d1   : > { %8072 = vmatpush.bf16.msra.mxu1 %v12006_v41  ;;  %v15061_v39 = vld [vmem:[%s15947_s14 + $0x124c] sm:$0xf]  ;;  %v18105_v34 = vadd.f32 %v7845_v28, %v7833_v20  ;;  %v11958_v29 = vor.u32 %v15029_v35, %v11955_v46  ;;  %v11811_v33 = vld [vmem:[%s15947_s14 + $0x1038] sm:$0xf0] }
 0x3d2   : > { %8085 = vmatpush.bf16.msra.mxu2 %v12134_v45  ;;  %v15093_v42 = vld [vmem:[%s15947_s14 + $0x134c] sm:$0xf]  ;;  %v7808_v61 = vpop.f32.mrf.mxu0  ;;  %v12086_v41 = vor.u32 %v15061_v39, %v12083_v48  ;;  %v12067_v54 = vld [vmem:[%s15947_s14 + $0x1238] sm:$0xf0] }
 0x3d3   : > { %8098 = vmatpush.bf16.msra.mxu3 %v12262_v38  ;;  %v14993_v45 = vld [vmem:[%s15947_s14 + $0x102c] sm:$0xf]  ;;  %v12214_v37 = vor.u32 %v15093_v42, %v12211_v43  ;;  %v11939_v38 = vld [vmem:[%s15947_s14 + $0x1138] sm:$0xf0] }
 0x3d4   : > { %8060 = vmatpush.bf16.msra.mxu0 %v11862_v58  ;;  %v15025_v51 = vld [vmem:[%s15947_s14 + $0x112c] sm:$0xf]  ;;  %v12195_v22 = vld [vmem:[%s15947_s14 + $0x1338] sm:$0xf0]  ;;  %v11814_v55 = vor.u32 %v14993_v45, %v11811_v33  ;;  %v7834_v16 = vpop.f32.mrf.mxu2 }
 0x3d5   : > { %8073 = vmatpush.bf16.msra.mxu1 %v11990_v0  ;;  %v15057_v4 = vld [vmem:[%s15947_s14 + $0x122c] sm:$0xf]  ;;  %v11795_v10 = vld [vmem:[%s15947_s14 + $0x1018] sm:$0xf0]  ;;  %v11942_v58 = vor.u32 %v15025_v51, %v11939_v38  ;;  %v7847_v40 = vpop.f32.mrf.mxu3 }
 0x3d6   : > { %8086 = vmatpush.bf16.msra.mxu2 %v12118_v36  ;;  %v15089_v59 = vld [vmem:[%s15947_s14 + $0x132c] sm:$0xf]  ;;  %v12070_v57 = vor.u32 %v15057_v4, %v12067_v54  ;;  %v11923_v36 = vld [vmem:[%s15947_s14 + $0x1118] sm:$0xf0] }
 0x3d7   : > { %8099 = vmatpush.bf16.msra.mxu3 %v12246_v5  ;;  %v14989_v56 = vld [vmem:[%s15947_s14 + $0x100c] sm:$0xf]  ;;  %v12198_v2 = vor.u32 %v15089_v59, %v12195_v22  ;;  %v12051_v14 = vld [vmem:[%s15947_s14 + $0x1218] sm:$0xf0] }
 0x3d8   : > { %8061 = vmatpush.bf16.msra.mxu0 %v11846_v30  ;;  %v15021_v0 = vld [vmem:[%s15947_s14 + $0x110c] sm:$0xf]  ;;  %v12179_v11 = vld [vmem:[%s15947_s14 + $0x1318] sm:$0xf0]  ;;  %v11798_v30 = vor.u32 %v14989_v56, %v11795_v10 }
 0x3d9   : > { %8074 = vmatpush.bf16.msra.mxu1 %v11974_v31  ;;  %v15053_v53 = vld [vmem:[%s15947_s14 + $0x120c] sm:$0xf]  ;;  %v12419_v24 = vld [vmem:[%s15947_s14 + $0x14f8] sm:$0xf0]  ;;  %v11926_v52 = vor.u32 %v15021_v0, %v11923_v36 }
 0x3da   : > { %8087 = vmatpush.bf16.msra.mxu2 %v12102_v32  ;;  %v15085_v5 = vld [vmem:[%s15947_s14 + $0x130c] sm:$0xf]  ;;  %v12547_v31 = vld [vmem:[%s15947_s14 + $0x15f8] sm:$0xf0]  ;;  %v12054_v35 = vor.u32 %v15053_v53, %v12051_v14 }
 0x3db   : > { %8100 = vmatpush.bf16.msra.mxu3 %v12230_v19  ;;  %v15145_v25 = vld [vmem:[%s15947_s14 + $0x14ec] sm:$0xf]  ;;  %v12675_v21 = vld [vmem:[%s15947_s14 + $0x16f8] sm:$0xf0]  ;;  %v12182_v46 = vor.u32 %v15085_v5, %v12179_v11 }
 0x3dc   : > { %8062 = vmatpush.bf16.msra.mxu0 %v11830_v23  ;;  %v15177_v62 = vld [vmem:[%s15947_s14 + $0x15ec] sm:$0xf]  ;;  %v12803_v27 = vld [vmem:[%s15947_s14 + $0x17f8] sm:$0xf0]  ;;  %v12422_v39 = vor.u32 %v15145_v25, %v12419_v24 }
 0x3dd   : > { %8075 = vmatpush.bf16.msra.mxu1 %v11958_v29  ;;  %v15209_v32 = vld [vmem:[%s15947_s14 + $0x16ec] sm:$0xf]  ;;  %v12550_v48 = vor.u32 %v15177_v62, %v12547_v31  ;;  %v12403_v42 = vld [vmem:[%s15947_s14 + $0x14d8] sm:$0xf0] }
 0x3de   : > { %8088 = vmatpush.bf16.msra.mxu2 %v12086_v41  ;;  %v15241_v19 = vld [vmem:[%s15947_s14 + $0x17ec] sm:$0xf]  ;;  %v12678_v20 = vor.u32 %v15209_v32, %v12675_v21  ;;  %v12531_v23 = vld [vmem:[%s15947_s14 + $0x15d8] sm:$0xf0] }
 0x3df   : > { %8101 = vmatpush.bf16.msra.mxu3 %v12214_v37  ;;  %v15141_v28 = vld [vmem:[%s15947_s14 + $0x14cc] sm:$0xf]  ;;  %v12806_v61 = vor.u32 %v15241_v19, %v12803_v27  ;;  %v12659_v29 = vld [vmem:[%s15947_s14 + $0x16d8] sm:$0xf0] }
 0x3e0   : > { %8063 = vmatpush.bf16.msra.mxu0 %v11814_v55  ;;  %v15173_v43 = vld [vmem:[%s15947_s14 + $0x15cc] sm:$0xf]  ;;  %v12787_v45 = vld [vmem:[%s15947_s14 + $0x17d8] sm:$0xf0]  ;;  %v12406_v33 = vor.u32 %v15141_v28, %v12403_v42 }
 0x3e1   : > { %8076 = vmatpush.bf16.msra.mxu1 %v11942_v58  ;;  %v15205_v49 = vld [vmem:[%s15947_s14 + $0x16cc] sm:$0xf]  ;;  %v12534_v51 = vor.u32 %v15173_v43, %v12531_v23  ;;  %v12387_v4 = vld [vmem:[%s15947_s14 + $0x14b8] sm:$0xf0] }
 0x3e2   : > { %8089 = vmatpush.bf16.msra.mxu2 %v12070_v57  ;;  %v15237_v41 = vld [vmem:[%s15947_s14 + $0x17cc] sm:$0xf]  ;;  %v12662_v37 = vor.u32 %v15205_v49, %v12659_v29  ;;  %v12515_v22 = vld [vmem:[%s15947_s14 + $0x15b8] sm:$0xf0] }
 0x3e3   : > { %8102 = vmatpush.bf16.msra.mxu3 %v12198_v2  ;;  %v15137_v38 = vld [vmem:[%s15947_s14 + $0x14ac] sm:$0xf]  ;;  %v12790_v59 = vor.u32 %v15237_v41, %v12787_v45  ;;  %v12643_v56 = vld [vmem:[%s15947_s14 + $0x16b8] sm:$0xf0] }
 0x3e4   : > { %8064 = vmatpush.bf16.msra.mxu0 %v11798_v30  ;;  %v15169_v54 = vld [vmem:[%s15947_s14 + $0x15ac] sm:$0xf]  ;;  %v12771_v58 = vld [vmem:[%s15947_s14 + $0x17b8] sm:$0xf0]  ;;  %v7858_v25 = vpop.f32.mrf.mxu0 }
 0x3e5   : > { %8077 = vmatpush.bf16.msra.mxu1 %v11926_v52  ;;  %v15201_v55 = vld [vmem:[%s15947_s14 + $0x16ac] sm:$0xf]  ;;  %v12518_v57 = vor.u32 %v15169_v54, %v12515_v22  ;;  %v12371_v53 = vld [vmem:[%s15947_s14 + $0x1498] sm:$0xf0]  ;;  %v7871_v32 = vpop.f32.mrf.mxu1 }
 0x3e6   : > { %8090 = vmatpush.bf16.msra.mxu2 %v12054_v35  ;;  %v15233_v10 = vld [vmem:[%s15947_s14 + $0x17ac] sm:$0xf]  ;;  %v12646_v0 = vor.u32 %v15201_v55, %v12643_v56  ;;  %v12499_v2 = vld [vmem:[%s15947_s14 + $0x1598] sm:$0xf0]  ;;  %v7872_v27 = vadd.f32 %v7871_v32, %v7858_v25 }
 0x3e7   : > { %8103 = vmatpush.bf16.msra.mxu3 %v12182_v46  ;;  %8065 = vmatmul.bf16.vlgmr.msra.gmra.mxu0 %v16397_v60  ;;  %v12390_v60 = vor.u32 %v15137_v38, %v12387_v4  ;;  %v15133_v36 = vld [vmem:[%s15947_s14 + $0x148c] sm:$0xf]  ;;  %v12627_v5 = vld [vmem:[%s15947_s14 + $0x1698] sm:$0xf0] }
 0x3e8   : > { %8109 = vmatpush.bf16.msrb.mxu0 %v12422_v39  ;;  %8078 = vmatmul.bf16.vlgmr.msra.gmra.mxu1 %v16404_v44  ;;  %v12774_v44 = vor.u32 %v15233_v10, %v12771_v58  ;;  %v15197_v14 = vld [vmem:[%s15947_s14 + $0x168c] sm:$0xf]  ;;  %v12755_v11 = vld [vmem:[%s15947_s14 + $0x1798] sm:$0xf0]  ;;  %v12374_v16 = vor.u32 %v15133_v36, %v12371_v53 }
 0x3e9   : > { %8122 = vmatpush.bf16.msrb.mxu1 %v12550_v48  ;;  %8091 = vmatmul.bf16.vlgmr.msra.gmra.mxu2 %v16402_v63  ;;  %v15165_v63 = vld [vmem:[%s15947_s14 + $0x158c] sm:$0xf]  ;;  %v12630_v62 = vor.u32 %v15197_v14, %v12627_v5  ;;  %v12355_v30 = vld [vmem:[%s15947_s14 + $0x1478] sm:$0xf0] }
 0x3ea   : > { %8135 = vmatpush.bf16.msrb.mxu2 %v12678_v20  ;;  %8104 = vmatmul.bf16.vlgmr.msra.gmra.mxu3 %v16408_v47  ;;  %v15229_v47 = vld [vmem:[%s15947_s14 + $0x178c] sm:$0xf]  ;;  %v12502_v24 = vor.u32 %v15165_v63, %v12499_v2  ;;  %v12483_v52 = vld [vmem:[%s15947_s14 + $0x1578] sm:$0xf0] }
 0x3eb   : > { %8148 = vmatpush.bf16.msrb.mxu3 %v12806_v61  ;;  %v15129_v40 = vld [vmem:[%s15947_s14 + $0x146c] sm:$0xf]  ;;  %v12758_v21 = vor.u32 %v15229_v47, %v12755_v11  ;;  %v12611_v19 = vld [vmem:[%s15947_s14 + $0x1678] sm:$0xf0] }
 0x3ec   : > { %8110 = vmatpush.bf16.msrb.mxu0 %v12406_v33  ;;  %v15161_v31 = vld [vmem:[%s15947_s14 + $0x156c] sm:$0xf]  ;;  %v12739_v39 = vld [vmem:[%s15947_s14 + $0x1778] sm:$0xf0]  ;;  %v12358_v48 = vor.u32 %v15129_v40, %v12355_v30  ;;  %v7884_v23 = vpop.f32.mrf.mxu2 }
 0x3ed   : > { %8123 = vmatpush.bf16.msrb.mxu1 %v12534_v51  ;;  %v15193_v35 = vld [vmem:[%s15947_s14 + $0x166c] sm:$0xf]  ;;  %v12486_v20 = vor.u32 %v15161_v31, %v12483_v52  ;;  %v12339_v43 = vld [vmem:[%s15947_s14 + $0x1458] sm:$0xf0]  ;;  %v7885_v33 = vadd.f32 %v7884_v23, %v7872_v27  ;;  %v7897_v51 = vpop.f32.mrf.mxu3 }
 0x3ee   : > { %8136 = vmatpush.bf16.msrb.mxu2 %v12662_v37  ;;  %v15225_v46 = vld [vmem:[%s15947_s14 + $0x176c] sm:$0xf]  ;;  %v12614_v28 = vor.u32 %v15193_v35, %v12611_v19  ;;  %v12467_v29 = vld [vmem:[%s15947_s14 + $0x1558] sm:$0xf0] }
 0x3ef   : > { %8149 = vmatpush.bf16.msrb.mxu3 %v12790_v59  ;;  %v15125_v42 = vld [vmem:[%s15947_s14 + $0x144c] sm:$0xf]  ;;  %v12742_v49 = vor.u32 %v15225_v46, %v12739_v39  ;;  %v12595_v45 = vld [vmem:[%s15947_s14 + $0x1658] sm:$0xf0]  ;;  %v18175_v54 = vadd.f32 %v7897_v51, %v7885_v33  ;;  %v7860_v59 = vpop.f32.mrf.mxu0 }
 0x3f0   : > { %8111 = vmatpush.bf16.msrb.mxu0 %v12390_v60  ;;  %v15157_v61 = vld [vmem:[%s15947_s14 + $0x154c] sm:$0xf]  ;;  %v12723_v38 = vld [vmem:[%s15947_s14 + $0x1758] sm:$0xf0]  ;;  %v12342_v4 = vor.u32 %v15125_v42, %v12339_v43  ;;  %v7873_v60 = vpop.f32.mrf.mxu1 }
 0x3f1   : > { %8124 = vmatpush.bf16.msrb.mxu1 %v12518_v57  ;;  %v15189_v41 = vld [vmem:[%s15947_s14 + $0x164c] sm:$0xf]  ;;  %v12470_v22 = vor.u32 %v15157_v61, %v12467_v29  ;;  %v12323_v10 = vld [vmem:[%s15947_s14 + $0x1438] sm:$0xf0] }
 0x3f2   : > { %8137 = vmatpush.bf16.msrb.mxu2 %v12646_v0  ;;  %v15221_v37 = vld [vmem:[%s15947_s14 + $0x174c] sm:$0xf]  ;;  %v12598_v55 = vor.u32 %v15189_v41, %v12595_v45  ;;  %v12451_v0 = vld [vmem:[%s15947_s14 + $0x1538] sm:$0xf0] }
 0x3f3   : > { %8150 = vmatpush.bf16.msrb.mxu3 %v12774_v44  ;;  %v15121_v56 = vld [vmem:[%s15947_s14 + $0x142c] sm:$0xf]  ;;  %v12726_v57 = vor.u32 %v15221_v37, %v12723_v38  ;;  %v12579_v53 = vld [vmem:[%s15947_s14 + $0x1638] sm:$0xf0] }
 0x3f4   : > { %8112 = vmatpush.bf16.msrb.mxu0 %v12374_v16  ;;  %v15153_v58 = vld [vmem:[%s15947_s14 + $0x152c] sm:$0xf]  ;;  %v12707_v44 = vld [vmem:[%s15947_s14 + $0x1738] sm:$0xf0]  ;;  %v12326_v2 = vor.u32 %v15121_v56, %v12323_v10 }
 0x3f5   : > { %8125 = vmatpush.bf16.msrb.mxu1 %v12502_v24  ;;  %v15185_v36 = vld [vmem:[%s15947_s14 + $0x162c] sm:$0xf]  ;;  %v12307_v5 = vld [vmem:[%s15947_s14 + $0x1418] sm:$0xf0]  ;;  %v12454_v47 = vor.u32 %v15153_v58, %v12451_v0 }
 0x3f6   : > { %8138 = vmatpush.bf16.msrb.mxu2 %v12630_v62  ;;  %v15217_v63 = vld [vmem:[%s15947_s14 + $0x172c] sm:$0xf]  ;;  %v12582_v11 = vor.u32 %v15185_v36, %v12579_v53  ;;  %v12435_v25 = vld [vmem:[%s15947_s14 + $0x1518] sm:$0xf0]  ;;  %v7886_v62 = vpop.f32.mrf.mxu2 }
 0x3f7   : > { %8151 = vmatpush.bf16.msrb.mxu3 %v12758_v21  ;;  %v15117_v14 = vld [vmem:[%s15947_s14 + $0x140c] sm:$0xf]  ;;  %v12710_v40 = vor.u32 %v15217_v63, %v12707_v44  ;;  %v12563_v30 = vld [vmem:[%s15947_s14 + $0x1618] sm:$0xf0]  ;;  %v7899_v21 = vpop.f32.mrf.mxu3 }
 0x3f8   : > { %8113 = vmatpush.bf16.msrb.mxu0 %v12358_v48  ;;  %v15149_v16 = vld [vmem:[%s15947_s14 + $0x150c] sm:$0xf]  ;;  %v12691_v32 = vld [vmem:[%s15947_s14 + $0x1718] sm:$0xf0]  ;;  %v12310_v27 = vor.u32 %v15117_v14, %v12307_v5 }
 0x3f9   : > { %8126 = vmatpush.bf16.msrb.mxu1 %v12486_v20  ;;  %v15181_v24 = vld [vmem:[%s15947_s14 + $0x160c] sm:$0xf]  ;;  %v12931_v35 = vld [vmem:[%s15947_s14 + $0x18f8] sm:$0xf0]  ;;  %v12438_v20 = vor.u32 %v15149_v16, %v12435_v25 }
 0x3fa   : > { %8139 = vmatpush.bf16.msrb.mxu2 %v12614_v28  ;;  %v15213_v31 = vld [vmem:[%s15947_s14 + $0x170c] sm:$0xf]  ;;  %v13059_v46 = vld [vmem:[%s15947_s14 + $0x19f8] sm:$0xf0]  ;;  %v12566_v28 = vor.u32 %v15181_v24, %v12563_v30 }
 0x3fb   : > { %8152 = vmatpush.bf16.msrb.mxu3 %v12742_v49  ;;  %v15273_v52 = vld [vmem:[%s15947_s14 + $0x18ec] sm:$0xf]  ;;  %v13187_v48 = vld [vmem:[%s15947_s14 + $0x1af8] sm:$0xf0]  ;;  %v12694_v61 = vor.u32 %v15213_v31, %v12691_v32 }
 0x3fc   : > { %8114 = vmatpush.bf16.msrb.mxu0 %v12342_v4  ;;  %v15305_v19 = vld [vmem:[%s15947_s14 + $0x19ec] sm:$0xf]  ;;  %v13315_v43 = vld [vmem:[%s15947_s14 + $0x1bf8] sm:$0xf0]  ;;  %v12934_v23 = vor.u32 %v15273_v52, %v12931_v35 }
 0x3fd   : > { %8127 = vmatpush.bf16.msrb.mxu1 %v12470_v22  ;;  %v15337_v39 = vld [vmem:[%s15947_s14 + $0x1aec] sm:$0xf]  ;;  %v13062_v49 = vor.u32 %v15305_v19, %v13059_v46  ;;  %v12915_v45 = vld [vmem:[%s15947_s14 + $0x18d8] sm:$0xf0] }
 0x3fe   : > { %8140 = vmatpush.bf16.msrb.mxu2 %v12598_v55  ;;  %v15369_v42 = vld [vmem:[%s15947_s14 + $0x1bec] sm:$0xf]  ;;  %v13190_v29 = vor.u32 %v15337_v39, %v13187_v48  ;;  %v13043_v37 = vld [vmem:[%s15947_s14 + $0x19d8] sm:$0xf0] }
 0x3ff   : > { %8153 = vmatpush.bf16.msrb.mxu3 %v12726_v57  ;;  %v15269_v41 = vld [vmem:[%s15947_s14 + $0x18cc] sm:$0xf]  ;;  %v13318_v51 = vor.u32 %v15369_v42, %v13315_v43  ;;  %v13171_v4 = vld [vmem:[%s15947_s14 + $0x1ad8] sm:$0xf0] }
 0x400   : > { %8115 = vmatpush.bf16.msrb.mxu0 %v12326_v2  ;;  %v15301_v33 = vld [vmem:[%s15947_s14 + $0x19cc] sm:$0xf]  ;;  %v13299_v22 = vld [vmem:[%s15947_s14 + $0x1bd8] sm:$0xf0]  ;;  %v12918_v55 = vor.u32 %v15269_v41, %v12915_v45 }
 0x401   : > { %8128 = vmatpush.bf16.msrb.mxu1 %v12454_v47  ;;  %v15333_v38 = vld [vmem:[%s15947_s14 + $0x1acc] sm:$0xf]  ;;  %v13046_v56 = vor.u32 %v15301_v33, %v13043_v37  ;;  %v12899_v60 = vld [vmem:[%s15947_s14 + $0x18b8] sm:$0xf0] }
 0x402   : > { %8141 = vmatpush.bf16.msrb.mxu2 %v12582_v11  ;;  %v15365_v59 = vld [vmem:[%s15947_s14 + $0x1bcc] sm:$0xf]  ;;  %v13174_v10 = vor.u32 %v15333_v38, %v13171_v4  ;;  %v13027_v36 = vld [vmem:[%s15947_s14 + $0x19b8] sm:$0xf0] }
 0x403   : > { %8154 = vmatpush.bf16.msrb.mxu3 %v12710_v40  ;;  %v15265_v58 = vld [vmem:[%s15947_s14 + $0x18ac] sm:$0xf]  ;;  %v13302_v0 = vor.u32 %v15365_v59, %v13299_v22  ;;  %v13155_v63 = vld [vmem:[%s15947_s14 + $0x1ab8] sm:$0xf0] }
 0x404   : > { %8116 = vmatpush.bf16.msrb.mxu0 %v12310_v27  ;;  %v15297_v57 = vld [vmem:[%s15947_s14 + $0x19ac] sm:$0xf]  ;;  %v13283_v2 = vld [vmem:[%s15947_s14 + $0x1bb8] sm:$0xf0]  ;;  %v7910_v30 = vpop.f32.mrf.mxu0 }
 0x405   : > { %8129 = vmatpush.bf16.msrb.mxu1 %v12438_v20  ;;  %v15329_v53 = vld [vmem:[%s15947_s14 + $0x1aac] sm:$0xf]  ;;  %v13030_v14 = vor.u32 %v15297_v57, %v13027_v36  ;;  %v12883_v11 = vld [vmem:[%s15947_s14 + $0x1898] sm:$0xf0]  ;;  %v7911_v19 = vadd.f32 %v7910_v30, %v18175_v54  ;;  %v7923_v27 = vpop.f32.mrf.mxu1 }
 0x406   : > { %8142 = vmatpush.bf16.msrb.mxu2 %v12566_v28  ;;  %v15361_v44 = vld [vmem:[%s15947_s14 + $0x1bac] sm:$0xf]  ;;  %v13158_v5 = vor.u32 %v15329_v53, %v13155_v63  ;;  %v13011_v16 = vld [vmem:[%s15947_s14 + $0x1998] sm:$0xf0] }
 0x407   : > { %8155 = vmatpush.bf16.msrb.mxu3 %v12694_v61  ;;  %8117 = vmatmul.bf16.vlgmr.msrb.gmra.mxu0 %v16476_v3  ;;  %v12902_v3 = vor.u32 %v15265_v58, %v12899_v60  ;;  %v15261_v47 = vld [vmem:[%s15947_s14 + $0x188c] sm:$0xf]  ;;  %v13139_v24 = vld [vmem:[%s15947_s14 + $0x1a98] sm:$0xf0]  ;;  %v7924_v43 = vadd.f32 %v7923_v27, %v7911_v19 }
 0x408   : > { %8161 = vmatpush.bf16.msra.mxu0 %v12934_v23  ;;  %8130 = vmatmul.bf16.vlgmr.msrb.gmra.mxu1 %v16483_v9  ;;  %v13286_v9 = vor.u32 %v15361_v44, %v13283_v2  ;;  %v15325_v25 = vld [vmem:[%s15947_s14 + $0x1a8c] sm:$0xf]  ;;  %v12886_v40 = vor.u32 %v15261_v47, %v12883_v11  ;;  %v12867_v52 = vld [vmem:[%s15947_s14 + $0x1878] sm:$0xf0] }
 0x409   : > { %8174 = vmatpush.bf16.msra.mxu1 %v13062_v49  ;;  %8143 = vmatmul.bf16.vlgmr.msrb.gmra.mxu2 %v16481_v8  ;;  %v15293_v8 = vld [vmem:[%s15947_s14 + $0x198c] sm:$0xf]  ;;  %v13142_v32 = vor.u32 %v15325_v25, %v13139_v24  ;;  %v12995_v39 = vld [vmem:[%s15947_s14 + $0x1978] sm:$0xf0] }
 0x40a   : > { %8187 = vmatpush.bf16.msra.mxu2 %v13190_v29  ;;  %8156 = vmatmul.bf16.vlgmr.msrb.gmra.mxu3 %v16487_v12  ;;  %v15357_v62 = vld [vmem:[%s15947_s14 + $0x1b8c] sm:$0xf]  ;;  %v13267_v12 = vld [vmem:[%s15947_s14 + $0x1b98] sm:$0xf0]  ;;  %v13014_v31 = vor.u32 %v15293_v8, %v13011_v16 }
 0x40b   : > { %8200 = vmatpush.bf16.msra.mxu3 %v13318_v51  ;;  %v15257_v21 = vld [vmem:[%s15947_s14 + $0x186c] sm:$0xf]  ;;  %v13270_v46 = vor.u32 %v15357_v62, %v13267_v12  ;;  %v13123_v20 = vld [vmem:[%s15947_s14 + $0x1a78] sm:$0xf0] }
 0x40c   : > { %8162 = vmatpush.bf16.msra.mxu0 %v12918_v55  ;;  %v15289_v35 = vld [vmem:[%s15947_s14 + $0x196c] sm:$0xf]  ;;  %v13251_v42 = vld [vmem:[%s15947_s14 + $0x1b78] sm:$0xf0]  ;;  %v12870_v61 = vor.u32 %v15257_v21, %v12867_v52  ;;  %v7936_v45 = vpop.f32.mrf.mxu2  ;;  %v7912_v58 = vpop.f32.mrf.mxu0 }
 0x40d   : > { %8175 = vmatpush.bf16.msra.mxu1 %v13046_v56  ;;  %v15321_v48 = vld [vmem:[%s15947_s14 + $0x1a6c] sm:$0xf]  ;;  %v12998_v54 = vor.u32 %v15289_v35, %v12995_v39  ;;  %v12851_v29 = vld [vmem:[%s15947_s14 + $0x1858] sm:$0xf0]  ;;  %v7937_v4 = vadd.f32 %v7936_v45, %v7924_v43  ;;  %v7949_v59 = vpop.f32.mrf.mxu3  ;;  %v7925_v63 = vpop.f32.mrf.mxu1 }
 0x40e   : > { %8188 = vmatpush.bf16.msra.mxu2 %v13174_v10  ;;  %v15353_v28 = vld [vmem:[%s15947_s14 + $0x1b6c] sm:$0xf]  ;;  %v13126_v23 = vor.u32 %v15321_v48, %v13123_v20  ;;  %v12979_v51 = vld [vmem:[%s15947_s14 + $0x1958] sm:$0xf0] }
 0x40f   : > { %8201 = vmatpush.bf16.msra.mxu3 %v13302_v0  ;;  %v15253_v49 = vld [vmem:[%s15947_s14 + $0x184c] sm:$0xf]  ;;  %v13254_v33 = vor.u32 %v15353_v28, %v13251_v42  ;;  %v13107_v38 = vld [vmem:[%s15947_s14 + $0x1a58] sm:$0xf0]  ;;  %v18246_v10 = vadd.f32 %v7949_v59, %v7937_v4 }
 0x410   : > { %8163 = vmatpush.bf16.msra.mxu0 %v12902_v3  ;;  %v15285_v41 = vld [vmem:[%s15947_s14 + $0x194c] sm:$0xf]  ;;  %v13235_v55 = vld [vmem:[%s15947_s14 + $0x1b58] sm:$0xf0]  ;;  %v12854_v56 = vor.u32 %v15253_v49, %v12851_v29 }
 0x411   : > { %8176 = vmatpush.bf16.msra.mxu1 %v13030_v14  ;;  %v15317_v37 = vld [vmem:[%s15947_s14 + $0x1a4c] sm:$0xf]  ;;  %v12982_v60 = vor.u32 %v15285_v41, %v12979_v51  ;;  %v12835_v36 = vld [vmem:[%s15947_s14 + $0x1838] sm:$0xf0] }
 0x412   : > { %8189 = vmatpush.bf16.msra.mxu2 %v13158_v5  ;;  %v15349_v22 = vld [vmem:[%s15947_s14 + $0x1b4c] sm:$0xf]  ;;  %v13110_v57 = vor.u32 %v15317_v37, %v13107_v38  ;;  %v12963_v2 = vld [vmem:[%s15947_s14 + $0x1938] sm:$0xf0] }
 0x413   : > { %8202 = vmatpush.bf16.msra.mxu3 %v13286_v9  ;;  %v15249_v0 = vld [vmem:[%s15947_s14 + $0x182c] sm:$0xf]  ;;  %v13238_v44 = vor.u32 %v15349_v22, %v13235_v55  ;;  %v13091_v14 = vld [vmem:[%s15947_s14 + $0x1a38] sm:$0xf0] }
 0x414   : > { %8164 = vmatpush.bf16.msra.mxu0 %v12886_v40  ;;  %v15281_v53 = vld [vmem:[%s15947_s14 + $0x192c] sm:$0xf]  ;;  %v13219_v47 = vld [vmem:[%s15947_s14 + $0x1b38] sm:$0xf0]  ;;  %v12838_v11 = vor.u32 %v15249_v0, %v12835_v36  ;;  %v7938_v40 = vpop.f32.mrf.mxu2 }
 0x415   : > { %8177 = vmatpush.bf16.msra.mxu1 %v13014_v31  ;;  %v15313_v3 = vld [vmem:[%s15947_s14 + $0x1a2c] sm:$0xf]  ;;  %v12819_v9 = vld [vmem:[%s15947_s14 + $0x1818] sm:$0xf0]  ;;  %v12966_v16 = vor.u32 %v15281_v53, %v12963_v2  ;;  %v7951_v52 = vpop.f32.mrf.mxu3 }
 0x416   : > { %8190 = vmatpush.bf16.msra.mxu2 %v13142_v32  ;;  %v15345_v5 = vld [vmem:[%s15947_s14 + $0x1b2c] sm:$0xf]  ;;  %v13094_v25 = vor.u32 %v15313_v3, %v13091_v14  ;;  %v12947_v62 = vld [vmem:[%s15947_s14 + $0x1918] sm:$0xf0] }
 0x417   : > { %8203 = vmatpush.bf16.msra.mxu3 %v13270_v46  ;;  %v15245_v8 = vld [vmem:[%s15947_s14 + $0x180c] sm:$0xf]  ;;  %v13222_v30 = vor.u32 %v15345_v5, %v13219_v47  ;;  %v13075_v31 = vld [vmem:[%s15947_s14 + $0x1a18] sm:$0xf0] }
 0x418   : > { %8165 = vmatpush.bf16.msra.mxu0 %v12870_v61  ;;  %v15277_v24 = vld [vmem:[%s15947_s14 + $0x190c] sm:$0xf]  ;;  %v13203_v21 = vld [vmem:[%s15947_s14 + $0x1b18] sm:$0xf0]  ;;  %v12822_v46 = vor.u32 %v15245_v8, %v12819_v9 }
 0x419   : > { %8178 = vmatpush.bf16.msra.mxu1 %v12998_v54  ;;  %v15309_v12 = vld [vmem:[%s15947_s14 + $0x1a0c] sm:$0xf]  ;;  %v13443_v19 = vld [vmem:[%s15947_s14 + $0x1cf8] sm:$0xf0]  ;;  %v12950_v28 = vor.u32 %v15277_v24, %v12947_v62 }
 0x41a   : > { %8191 = vmatpush.bf16.msra.mxu2 %v13126_v23  ;;  %v15341_v32 = vld [vmem:[%s15947_s14 + $0x1b0c] sm:$0xf]  ;;  %v13571_v39 = vld [vmem:[%s15947_s14 + $0x1df8] sm:$0xf0]  ;;  %v13078_v42 = vor.u32 %v15309_v12, %v13075_v31 }
 0x41b   : > { %8204 = vmatpush.bf16.msra.mxu3 %v13254_v33  ;;  %v15401_v35 = vld [vmem:[%s15947_s14 + $0x1cec] sm:$0xf]  ;;  %v13699_v20 = vld [vmem:[%s15947_s14 + $0x1ef8] sm:$0xf0]  ;;  %v13206_v54 = vor.u32 %v15341_v32, %v13203_v21 }
 0x41c   : > { %8166 = vmatpush.bf16.msra.mxu0 %v12854_v56  ;;  %v15433_v27 = vld [vmem:[%s15947_s14 + $0x1dec] sm:$0xf]  ;;  %v13827_v61 = vld [vmem:[%s15947_s14 + $0x1ff8] sm:$0xf0]  ;;  %v13446_v23 = vor.u32 %v15401_v35, %v13443_v19 }
 0x41d   : > { %8179 = vmatpush.bf16.msra.mxu1 %v12982_v60  ;;  %v15465_v48 = vld [vmem:[%s15947_s14 + $0x1eec] sm:$0xf]  ;;  %v13574_v49 = vor.u32 %v15433_v27, %v13571_v39  ;;  %v13427_v45 = vld [vmem:[%s15947_s14 + $0x1cd8] sm:$0xf0] }
 0x41e   : > { %8192 = vmatpush.bf16.msra.mxu2 %v13110_v57  ;;  %v15497_v43 = vld [vmem:[%s15947_s14 + $0x1fec] sm:$0xf]  ;;  %v13702_v29 = vor.u32 %v15465_v48, %v13699_v20  ;;  %v13555_v37 = vld [vmem:[%s15947_s14 + $0x1dd8] sm:$0xf0] }
 0x41f   : > { %8205 = vmatpush.bf16.msra.mxu3 %v13238_v44  ;;  %v15397_v41 = vld [vmem:[%s15947_s14 + $0x1ccc] sm:$0xf]  ;;  %v13830_v51 = vor.u32 %v15497_v43, %v13827_v61  ;;  %v13683_v4 = vld [vmem:[%s15947_s14 + $0x1ed8] sm:$0xf0] }
 0x420   : > { %8167 = vmatpush.bf16.msra.mxu0 %v12838_v11  ;;  %v15429_v33 = vld [vmem:[%s15947_s14 + $0x1dcc] sm:$0xf]  ;;  %v13811_v22 = vld [vmem:[%s15947_s14 + $0x1fd8] sm:$0xf0]  ;;  %v13430_v55 = vor.u32 %v15397_v41, %v13427_v45 }
 0x421   : > { %8180 = vmatpush.bf16.msra.mxu1 %v12966_v16  ;;  %v15461_v38 = vld [vmem:[%s15947_s14 + $0x1ecc] sm:$0xf]  ;;  %v13558_v56 = vor.u32 %v15429_v33, %v13555_v37  ;;  %v13411_v57 = vld [vmem:[%s15947_s14 + $0x1cb8] sm:$0xf0] }
 0x422   : > { %8193 = vmatpush.bf16.msra.mxu2 %v13094_v25  ;;  %v15493_v59 = vld [vmem:[%s15947_s14 + $0x1fcc] sm:$0xf]  ;;  %v13686_v58 = vor.u32 %v15461_v38, %v13683_v4  ;;  %v13539_v53 = vld [vmem:[%s15947_s14 + $0x1db8] sm:$0xf0] }
 0x423   : > { %8206 = vmatpush.bf16.msra.mxu3 %v13222_v30  ;;  %v15393_v60 = vld [vmem:[%s15947_s14 + $0x1cac] sm:$0xf]  ;;  %v13814_v36 = vor.u32 %v15493_v59, %v13811_v22  ;;  %v13667_v44 = vld [vmem:[%s15947_s14 + $0x1eb8] sm:$0xf0] }
 0x424   : > { %8168 = vmatpush.bf16.msra.mxu0 %v12822_v46  ;;  %v15425_v0 = vld [vmem:[%s15947_s14 + $0x1dac] sm:$0xf]  ;;  %v13795_v3 = vld [vmem:[%s15947_s14 + $0x1fb8] sm:$0xf0] }
 0x425   : > { %8181 = vmatpush.bf16.msra.mxu1 %v12950_v28  ;;  %v15457_v63 = vld [vmem:[%s15947_s14 + $0x1eac] sm:$0xf]  ;;  %v13542_v14 = vor.u32 %v15425_v0, %v13539_v53  ;;  %v13395_v11 = vld [vmem:[%s15947_s14 + $0x1c98] sm:$0xf0]  ;;  %v7975_v40 = vpop.f32.mrf.mxu1 }
 0x426   : > { %8194 = vmatpush.bf16.msra.mxu2 %v13078_v42  ;;  %v15489_v2 = vld [vmem:[%s15947_s14 + $0x1fac] sm:$0xf]  ;;  %v13670_v5 = vor.u32 %v15457_v63, %v13667_v44  ;;  %v13523_v8 = vld [vmem:[%s15947_s14 + $0x1d98] sm:$0xf0] }
 0x427   : > { %8207 = vmatpush.bf16.msra.mxu3 %v13206_v54  ;;  %8169 = vmatmul.bf16.vlgmr.msra.gmra.mxu0 %v16556_v1  ;;  %v13414_v1 = vor.u32 %v15393_v60, %v13411_v57  ;;  %v15389_v47 = vld [vmem:[%s15947_s14 + $0x1c8c] sm:$0xf]  ;;  %v13651_v16 = vld [vmem:[%s15947_s14 + $0x1e98] sm:$0xf0] }
 0x428   : > { %8213 = vmatpush.bf16.msrb.mxu0 %v13446_v23  ;;  %8182 = vmatmul.bf16.vlgmr.msra.gmra.mxu1 %v16563_v7  ;;  %v13798_v7 = vor.u32 %v15489_v2, %v13795_v3  ;;  %v15453_v9 = vld [vmem:[%s15947_s14 + $0x1e8c] sm:$0xf]  ;;  %v13779_v24 = vld [vmem:[%s15947_s14 + $0x1f98] sm:$0xf0]  ;;  %v13398_v12 = vor.u32 %v15389_v47, %v13395_v11 }
 0x429   : > { %8226 = vmatpush.bf16.msrb.mxu1 %v13574_v49  ;;  %8195 = vmatmul.bf16.vlgmr.msra.gmra.mxu2 %v16561_v6  ;;  %v15421_v6 = vld [vmem:[%s15947_s14 + $0x1d8c] sm:$0xf]  ;;  %v13654_v31 = vor.u32 %v15453_v9, %v13651_v16  ;;  %v13379_v21 = vld [vmem:[%s15947_s14 + $0x1c78] sm:$0xf0] }
 0x42a   : > { %8239 = vmatpush.bf16.msrb.mxu2 %v13702_v29  ;;  %8208 = vmatmul.bf16.vlgmr.msra.gmra.mxu3 %v16567_v13  ;;  %v7962_v13 = vpop.f32.mrf.mxu0  ;;  %v15485_v25 = vld [vmem:[%s15947_s14 + $0x1f8c] sm:$0xf]  ;;  %v13526_v30 = vor.u32 %v15421_v6, %v13523_v8  ;;  %v13507_v27 = vld [vmem:[%s15947_s14 + $0x1d78] sm:$0xf0] }
 0x42b   : > { %8252 = vmatpush.bf16.msrb.mxu3 %v13830_v51  ;;  %v7963_v62 = vadd.f32 %v7962_v13, %v18246_v10  ;;  %v15385_v32 = vld [vmem:[%s15947_s14 + $0x1c6c] sm:$0xf]  ;;  %v13782_v35 = vor.u32 %v15485_v25, %v13779_v24  ;;  %v13635_v10 = vld [vmem:[%s15947_s14 + $0x1e78] sm:$0xf0] }
 0x42c   : > { %8214 = vmatpush.bf16.msrb.mxu0 %v13430_v55  ;;  %v15417_v52 = vld [vmem:[%s15947_s14 + $0x1d6c] sm:$0xf]  ;;  %v13763_v48 = vld [vmem:[%s15947_s14 + $0x1f78] sm:$0xf0]  ;;  %v13382_v20 = vor.u32 %v15385_v32, %v13379_v21  ;;  %v7988_v49 = vpop.f32.mrf.mxu2 }
 0x42d   : > { %8227 = vmatpush.bf16.msrb.mxu1 %v13558_v56  ;;  %v7976_v19 = vadd.f32 %v7975_v40, %v7963_v62  ;;  %v15449_v46 = vld [vmem:[%s15947_s14 + $0x1e6c] sm:$0xf]  ;;  %v13510_v28 = vor.u32 %v15417_v52, %v13507_v27  ;;  %v13363_v61 = vld [vmem:[%s15947_s14 + $0x1c58] sm:$0xf0]  ;;  %v8001_v51 = vpop.f32.mrf.mxu3  ;;  %v7977_v22 = vpop.f32.mrf.mxu1 }
 0x42e   : > { %8240 = vmatpush.bf16.msrb.mxu2 %v13686_v58  ;;  %v15481_v39 = vld [vmem:[%s15947_s14 + $0x1f6c] sm:$0xf]  ;;  %v13638_v42 = vor.u32 %v15449_v46, %v13635_v10  ;;  %v13491_v29 = vld [vmem:[%s15947_s14 + $0x1d58] sm:$0xf0] }
 0x42f   : > { %8253 = vmatpush.bf16.msrb.mxu3 %v13814_v36  ;;  %v15381_v43 = vld [vmem:[%s15947_s14 + $0x1c4c] sm:$0xf]  ;;  %v13766_v23 = vor.u32 %v15481_v39, %v13763_v48  ;;  %v13619_v45 = vld [vmem:[%s15947_s14 + $0x1e58] sm:$0xf0]  ;;  %v7989_v33 = vadd.f32 %v7988_v49, %v7976_v19 }
 0x430   : > { %8215 = vmatpush.bf16.msrb.mxu0 %v13414_v1  ;;  %v15413_v54 = vld [vmem:[%s15947_s14 + $0x1d4c] sm:$0xf]  ;;  %v13747_v38 = vld [vmem:[%s15947_s14 + $0x1f58] sm:$0xf0]  ;;  %v13366_v59 = vor.u32 %v15381_v43, %v13363_v61 }
 0x431   : > { %8228 = vmatpush.bf16.msrb.mxu1 %v13542_v14  ;;  %v15445_v41 = vld [vmem:[%s15947_s14 + $0x1e4c] sm:$0xf]  ;;  %v8002_v55 = vadd.f32 %v8001_v51, %v7989_v33  ;;  %v13494_v56 = vor.u32 %v15413_v54, %v13491_v29  ;;  %v13347_v57 = vld [vmem:[%s15947_s14 + $0x1c38] sm:$0xf0] }
 0x432   : > { %8241 = vmatpush.bf16.msrb.mxu2 %v13670_v5  ;;  %v15477_v37 = vld [vmem:[%s15947_s14 + $0x1f4c] sm:$0xf]  ;;  %v7964_v4 = vpop.f32.mrf.mxu0  ;;  %v13622_v58 = vor.u32 %v15445_v41, %v13619_v45  ;;  %v13475_v53 = vld [vmem:[%s15947_s14 + $0x1d38] sm:$0xf0] }
 0x433   : > { %8254 = vmatpush.bf16.msrb.mxu3 %v13798_v7  ;;  %v15377_v60 = vld [vmem:[%s15947_s14 + $0x1c2c] sm:$0xf]  ;;  %v13750_v36 = vor.u32 %v15477_v37, %v13747_v38  ;;  %v13603_v44 = vld [vmem:[%s15947_s14 + $0x1e38] sm:$0xf0] }
 0x434   : > { %8216 = vmatpush.bf16.msrb.mxu0 %v13398_v12  ;;  %v15409_v0 = vld [vmem:[%s15947_s14 + $0x1d2c] sm:$0xf]  ;;  %v13731_v3 = vld [vmem:[%s15947_s14 + $0x1f38] sm:$0xf0]  ;;  %v13350_v1 = vor.u32 %v15377_v60, %v13347_v57  ;;  %v7990_v13 = vpop.f32.mrf.mxu2 }
 0x435   : > { %8229 = vmatpush.bf16.msrb.mxu1 %v13526_v30  ;;  %v15441_v63 = vld [vmem:[%s15947_s14 + $0x1e2c] sm:$0xf]  ;;  %v13478_v14 = vor.u32 %v15409_v0, %v13475_v53  ;;  %v13331_v11 = vld [vmem:[%s15947_s14 + $0x1c18] sm:$0xf0]  ;;  %v8003_v62 = vpop.f32.mrf.mxu3 }
 0x436   : > { %8242 = vmatpush.bf16.msrb.mxu2 %v13654_v31  ;;  %v15473_v2 = vld [vmem:[%s15947_s14 + $0x1f2c] sm:$0xf]  ;;  %v13606_v5 = vor.u32 %v15441_v63, %v13603_v44  ;;  %v13459_v8 = vld [vmem:[%s15947_s14 + $0x1d18] sm:$0xf0] }
 0x437   : > { %8255 = vmatpush.bf16.msrb.mxu3 %v13782_v35  ;;  %v15373_v47 = vld [vmem:[%s15947_s14 + $0x1c0c] sm:$0xf]  ;;  %v13734_v7 = vor.u32 %v15473_v2, %v13731_v3  ;;  %v13587_v16 = vld [vmem:[%s15947_s14 + $0x1e18] sm:$0xf0] }
 0x438   : > { %8217 = vmatpush.bf16.msrb.mxu0 %v13382_v20  ;;  %v15405_v6 = vld [vmem:[%s15947_s14 + $0x1d0c] sm:$0xf]  ;;  %v13715_v24 = vld [vmem:[%s15947_s14 + $0x1f18] sm:$0xf0]  ;;  %v13334_v12 = vor.u32 %v15373_v47, %v13331_v11 }
 0x439   : > { %8230 = vmatpush.bf16.msrb.mxu1 %v13510_v28  ;;  %v15437_v9 = vld [vmem:[%s15947_s14 + $0x1e0c] sm:$0xf]  ;;  %v13462_v40 = vor.u32 %v15405_v6, %v13459_v8 }
 0x43a   : > { %8243 = vmatpush.bf16.msrb.mxu2 %v13638_v42  ;;  %v15469_v25 = vld [vmem:[%s15947_s14 + $0x1f0c] sm:$0xf]  ;;  %v13590_v30 = vor.u32 %v15437_v9, %v13587_v16 }
 0x43b   : > { %8256 = vmatpush.bf16.msrb.mxu3 %v13766_v23  ;;  %v13718_v31 = vor.u32 %v15469_v25, %v13715_v24 }
 0x43c   : > { %8218 = vmatpush.bf16.msrb.mxu0 %v13366_v59 }
 0x43d   : > { %8231 = vmatpush.bf16.msrb.mxu1 %v13494_v56 }
 0x43e   : > { %8244 = vmatpush.bf16.msrb.mxu2 %v13622_v58 }
 0x43f   : > { %8257 = vmatpush.bf16.msrb.mxu3 %v13750_v36 }
 0x440   : > { %8219 = vmatpush.bf16.msrb.mxu0 %v13350_v1 }
 0x441   : > { %8232 = vmatpush.bf16.msrb.mxu1 %v13478_v14 }
 0x442   : > { %8245 = vmatpush.bf16.msrb.mxu2 %v13606_v5 }
 0x443   : > { %8258 = vmatpush.bf16.msrb.mxu3 %v13734_v7 }
 0x444   : > { %8220 = vmatpush.bf16.msrb.mxu0 %v13334_v12  ;;  %v8014_v32 = vpop.f32.mrf.mxu0  ;;  %v8270_v12 = vrot.slane %v18105_v34, 4 }
 0x445   : > { %8233 = vmatpush.bf16.msrb.mxu1 %v13462_v40  ;;  %v8015_v21 = vadd.f32 %v8014_v32, %v8002_v55  ;;  %v8027_v52 = vpop.f32.mrf.mxu1 }
 0x446   : > { %8246 = vmatpush.bf16.msrb.mxu2 %v13590_v30  ;;  %v456_v30 = vld [vmem:[#allocation2] sm:$0xff] }
 0x447   : > { %8259 = vmatpush.bf16.msrb.mxu3 %v13718_v31  ;;  %8221 = vmatmul.bf16.vlgmr.msrb.gmra.mxu0 %v16635_v15  ;;  %v8028_v35 = vadd.f32 %v8027_v52, %v8015_v21 }
 0x448   : > { %8234 = vmatmul.bf16.vlgmr.msrb.gmra.mxu1 %v16642_v18 }
 0x449   : > { %8247 = vmatmul.bf16.vlgmr.msrb.gmra.mxu2 %v16640_v17 }
 0x44a   : > { %8260 = vmatmul.bf16.vlgmr.msrb.gmra.mxu3 %v16646_v26 }
 0x44c   : > { %v8040_v19 = vpop.f32.mrf.mxu2  ;;  %v8016_v10 = vpop.f32.mrf.mxu0 }
 0x44d   : > { %v8041_v27 = vadd.f32 %v8040_v19, %v8028_v35  ;;  %v8053_v46 = vpop.f32.mrf.mxu3  ;;  %v8029_v39 = vpop.f32.mrf.mxu1 }
 0x44f   : > { %v8054_v48 = vadd.f32 %v8053_v46, %v8041_v27 }
 0x454   : > { %v8042_v20 = vpop.f32.mrf.mxu2 }
 0x455   : > { %v8055_v28 = vpop.f32.mrf.mxu3 }
 0x464   : > { %v8066_v42 = vpop.f32.mrf.mxu0 }
 0x465   : > { %v8067_v15 = vadd.f32 %v8066_v42, %v8054_v48  ;;  %v8079_v43 = vpop.f32.mrf.mxu1 }
 0x467   : > { %v8080_v18 = vadd.f32 %v8079_v43, %v8067_v15 }
 0x46c   : > { %v8092_v61 = vpop.f32.mrf.mxu2  ;;  %v8068_v26 = vpop.f32.mrf.mxu0 }
 0x46d   : > { %v8093_v17 = vadd.f32 %v8092_v61, %v8080_v18  ;;  %v8105_v54 = vpop.f32.mrf.mxu3  ;;  %v8081_v23 = vpop.f32.mrf.mxu1 }
 0x46f   : > { %v8106_v49 = vadd.f32 %v8105_v54, %v8093_v17 }
 0x474   : > { %v8094_v29 = vpop.f32.mrf.mxu2 }
 0x475   : > { %v8107_v41 = vpop.f32.mrf.mxu3 }
 0x484   : > { %v8118_v45 = vpop.f32.mrf.mxu0 }
 0x485   : > { %v8131_v33 = vpop.f32.mrf.mxu1  ;;  %v8119_v58 = vadd.f32 %v8118_v45, %v8106_v49 }
 0x487   : > { %v8132_v53 = vadd.f32 %v8131_v33, %v8119_v58 }
 0x48c   : > { %v8144_v51 = vpop.f32.mrf.mxu2  ;;  %v8120_v38 = vpop.f32.mrf.mxu0 }
 0x48d   : > { %v8157_v37 = vpop.f32.mrf.mxu3  ;;  %v8133_v4 = vpop.f32.mrf.mxu1  ;;  %v8145_v63 = vadd.f32 %v8144_v51, %v8132_v53 }
 0x48f   : > { %v8158_v3 = vadd.f32 %v8157_v37, %v8145_v63 }
 0x494   : > { %v8146_v59 = vpop.f32.mrf.mxu2 }
 0x495   : > { %v8159_v22 = vpop.f32.mrf.mxu3 }
 0x4a4   : > { %v8170_v55 = vpop.f32.mrf.mxu0 }
 0x4a5   : > { %v8183_v56 = vpop.f32.mrf.mxu1  ;;  %v8171_v1 = vadd.f32 %v8170_v55, %v8158_v3 }
 0x4a7   : > { %v8184_v14 = vadd.f32 %v8183_v56, %v8171_v1 }
 0x4ac   : > { %v8196_v60 = vpop.f32.mrf.mxu2  ;;  %v8172_v0 = vpop.f32.mrf.mxu0 }
 0x4ad   : > { %v8209_v57 = vpop.f32.mrf.mxu3  ;;  %v8185_v36 = vpop.f32.mrf.mxu1  ;;  %v8197_v5 = vadd.f32 %v8196_v60, %v8184_v14 }
 0x4af   : > { %v8210_v47 = vadd.f32 %v8209_v57, %v8197_v5 }
 0x4b4   : > { %v8198_v44 = vpop.f32.mrf.mxu2 }
 0x4b5   : > { %v8211_v2 = vpop.f32.mrf.mxu3 }
 0x4c4   : > { %v8222_v11 = vpop.f32.mrf.mxu0 }
 0x4c5   : > { %v8235_v6 = vpop.f32.mrf.mxu1  ;;  %v8223_v7 = vadd.f32 %v8222_v11, %v8210_v47 }
 0x4c7   : > { %v8236_v8 = vadd.f32 %v8235_v6, %v8223_v7 }
 0x4cc   : > { %v8248_v9 = vpop.f32.mrf.mxu2  ;;  %v8224_v25 = vpop.f32.mrf.mxu0 }
 0x4cd   : > { %v8249_v16 = vadd.f32 %v8248_v9, %v8236_v8  ;;  %v8261_v13 = vpop.f32.mrf.mxu3  ;;  %v8237_v24 = vpop.f32.mrf.mxu1 }
 0x4cf   : > { %v8262_v62 = vadd.f32 %v8261_v13, %v8249_v16 }
 0x4d1   : > { %v8271_v40 = vrot.slane %v8262_v62, 2 }
 0x4d3   : > { %v8275_v31 = vsel %vm8274_vm1, %v8270_v12, %v8271_v40  ;;  %8284 = sbr.rel (%p13831_p5) target bundleno = 1650 (0x672), region = 52 }
 0x4d4   : > { %v8277_v32 = vsel %vm8276_vm2, %v17548_v50, %v8275_v31  ;;  %v8250_v21 = vpop.f32.mrf.mxu2 }
 0x4d5   : > { %v8279_v52 = vadd.f32 %v8277_v32, %v456_v30  ;;  %v8263_v35 = vpop.f32.mrf.mxu3 }
 0x4d7   : > { %8280 = vst [vmem:[#allocation2] sm:$0xff] %v8279_v52 }
 0x4d8   : > { %v13946_v34 = vld [vmem:[%s15972_s9 + $0xe0] sm:$0xf]  ;;  %v15530_v50 = vld [vmem:[%s15972_s9 + $0xec] sm:$0xf0]  ;;  %vm9602_vm3 = vcmask 582656  }
 0x4d9   : > { %v14074_v19 = vld [vmem:[%s15972_s9 + $0x1e0] sm:$0xf]  ;;  %v13947_v27 = vor.u32 %v15530_v50, %v13946_v34  ;;  %v15562_v46 = vld [vmem:[%s15972_s9 + $0x1ec] sm:$0xf0] }
 0x4da   : > { %v14202_v10 = vld [vmem:[%s15972_s9 + $0x2e0] sm:$0xf]  ;;  %v15594_v39 = vld [vmem:[%s15972_s9 + $0x2ec] sm:$0xf0]  ;;  %v14075_v48 = vor.u32 %v15562_v46, %v14074_v19 }
 0x4db   : > { %v14203_v20 = vor.u32 %v15594_v39, %v14202_v10  ;;  %v14330_v28 = vld [vmem:[%s15972_s9 + $0x3e0] sm:$0xf]  ;;  %v15626_v42 = vld [vmem:[%s15972_s9 + $0x3ec] sm:$0xf0]  ;;  %9082 = vmatpush.bf16.msra.mxu0 %v13947_v27 }
 0x4dc   : > { %v13930_v15 = vld [vmem:[%s15972_s9 + $0xc0] sm:$0xf]  ;;  %v14331_v43 = vor.u32 %v15626_v42, %v14330_v28  ;;  %v15526_v18 = vld [vmem:[%s15972_s9 + $0xcc] sm:$0xf0]  ;;  %9095 = vmatpush.bf16.msra.mxu1 %v14075_v48 }
 0x4dd   : > { %v14058_v61 = vld [vmem:[%s15972_s9 + $0x1c0] sm:$0xf]  ;;  %v15558_v17 = vld [vmem:[%s15972_s9 + $0x1cc] sm:$0xf0]  ;;  %9108 = vmatpush.bf16.msra.mxu2 %v14203_v20  ;;  %v13931_v54 = vor.u32 %v15526_v18, %v13930_v15 }
 0x4de   : > { %v14059_v26 = vor.u32 %v15558_v17, %v14058_v61  ;;  %v14186_v23 = vld [vmem:[%s15972_s9 + $0x2c0] sm:$0xf]  ;;  %v15590_v49 = vld [vmem:[%s15972_s9 + $0x2cc] sm:$0xf0]  ;;  %9121 = vmatpush.bf16.msra.mxu3 %v14331_v43 }
 0x4df   : > { %v14314_v29 = vld [vmem:[%s15972_s9 + $0x3c0] sm:$0xf]  ;;  %v14187_v41 = vor.u32 %v15590_v49, %v14186_v23  ;;  %v15622_v45 = vld [vmem:[%s15972_s9 + $0x3cc] sm:$0xf0]  ;;  %9083 = vmatpush.bf16.msra.mxu0 %v13931_v54 }
 0x4e0   : > { %v13914_v33 = vld [vmem:[%s15972_s9 + $0xa0] sm:$0xf]  ;;  %v15522_v51 = vld [vmem:[%s15972_s9 + $0xac] sm:$0xf0]  ;;  %v14315_v37 = vor.u32 %v15622_v45, %v14314_v29  ;;  %9096 = vmatpush.bf16.msra.mxu1 %v14059_v26 }
 0x4e1   : > { %v14042_v38 = vld [vmem:[%s15972_s9 + $0x1a0] sm:$0xf]  ;;  %v15554_v4 = vld [vmem:[%s15972_s9 + $0x1ac] sm:$0xf0]  ;;  %v13915_v22 = vor.u32 %v15522_v51, %v13914_v33  ;;  %9109 = vmatpush.bf16.msra.mxu2 %v14187_v41 }
 0x4e2   : > { %v14170_v59 = vld [vmem:[%s15972_s9 + $0x2a0] sm:$0xf]  ;;  %v15586_v55 = vld [vmem:[%s15972_s9 + $0x2ac] sm:$0xf0]  ;;  %v14043_v60 = vor.u32 %v15554_v4, %v14042_v38  ;;  %9122 = vmatpush.bf16.msra.mxu3 %v14315_v37 }
 0x4e3   : > { %v14298_v56 = vld [vmem:[%s15972_s9 + $0x3a0] sm:$0xf]  ;;  %v15618_v58 = vld [vmem:[%s15972_s9 + $0x3ac] sm:$0xf0]  ;;  %v14171_v57 = vor.u32 %v15586_v55, %v14170_v59  ;;  %9084 = vmatpush.bf16.msra.mxu0 %v13915_v22  ;;  %v15528_v59 = vld [vmem:[%s15972_s9 + $0xe4] sm:$0xf] }
 0x4e4   : > { %v13898_v0 = vld [vmem:[%s15972_s9 + $0x80] sm:$0xf]  ;;  %v15518_v36 = vld [vmem:[%s15972_s9 + $0x8c] sm:$0xf0]  ;;  %v14299_v63 = vor.u32 %v15618_v58, %v14298_v56  ;;  %9097 = vmatpush.bf16.msra.mxu1 %v14043_v60  ;;  %v13948_v22 = vld [vmem:[%s15972_s9 + $0xf0] sm:$0xf0] }
 0x4e5   : > { %v14026_v53 = vld [vmem:[%s15972_s9 + $0x180] sm:$0xf]  ;;  %v15550_v44 = vld [vmem:[%s15972_s9 + $0x18c] sm:$0xf0]  ;;  %v13899_v5 = vor.u32 %v15518_v36, %v13898_v0  ;;  %9110 = vmatpush.bf16.msra.mxu2 %v14171_v57  ;;  %v15560_v55 = vld [vmem:[%s15972_s9 + $0x1e4] sm:$0xf] }
 0x4e6   : > { %v14154_v2 = vld [vmem:[%s15972_s9 + $0x280] sm:$0xf]  ;;  %v15582_v3 = vld [vmem:[%s15972_s9 + $0x28c] sm:$0xf0]  ;;  %v14027_v47 = vor.u32 %v15550_v44, %v14026_v53  ;;  %9123 = vmatpush.bf16.msra.mxu3 %v14299_v63  ;;  %v14076_v58 = vld [vmem:[%s15972_s9 + $0x1f0] sm:$0xf0] }
 0x4e7   : > { %v14282_v1 = vld [vmem:[%s15972_s9 + $0x380] sm:$0xf]  ;;  %v15614_v14 = vld [vmem:[%s15972_s9 + $0x38c] sm:$0xf0]  ;;  %v14155_v11 = vor.u32 %v15582_v3, %v14154_v2  ;;  %9085 = vmatpush.bf16.msra.mxu0 %v13899_v5  ;;  %v15592_v60 = vld [vmem:[%s15972_s9 + $0x2e4] sm:$0xf]  ;;  %v13951_v2 = vor.u32 %v15528_v59, %v13948_v22 }
 0x4e8   : > { %v13882_v6 = vld [vmem:[%s15972_s9 + $0x60] sm:$0xf]  ;;  %v15514_v7 = vld [vmem:[%s15972_s9 + $0x6c] sm:$0xf0]  ;;  %v14283_v9 = vor.u32 %v15614_v14, %v14282_v1  ;;  %9098 = vmatpush.bf16.msra.mxu1 %v14027_v47  ;;  %v14204_v57 = vld [vmem:[%s15972_s9 + $0x2f0] sm:$0xf0]  ;;  %v14079_v14 = vor.u32 %v15560_v55, %v14076_v58 }
 0x4e9   : > { %v14010_v8 = vld [vmem:[%s15972_s9 + $0x160] sm:$0xf]  ;;  %v15546_v16 = vld [vmem:[%s15972_s9 + $0x16c] sm:$0xf0]  ;;  %v13883_v12 = vor.u32 %v15514_v7, %v13882_v6  ;;  %9111 = vmatpush.bf16.msra.mxu2 %v14155_v11  ;;  %v15624_v53 = vld [vmem:[%s15972_s9 + $0x3e4] sm:$0xf]  ;;  %v14207_v5 = vor.u32 %v15592_v60, %v14204_v57 }
 0x4ea   : > { %v14138_v13 = vld [vmem:[%s15972_s9 + $0x260] sm:$0xf]  ;;  %v15578_v25 = vld [vmem:[%s15972_s9 + $0x26c] sm:$0xf0]  ;;  %v14011_v40 = vor.u32 %v15546_v16, %v14010_v8  ;;  %9124 = vmatpush.bf16.msra.mxu3 %v14283_v9  ;;  %v14332_v63 = vld [vmem:[%s15972_s9 + $0x3f0] sm:$0xf0] }
 0x4eb   : > { %v14266_v24 = vld [vmem:[%s15972_s9 + $0x360] sm:$0xf]  ;;  %v15610_v62 = vld [vmem:[%s15972_s9 + $0x36c] sm:$0xf0]  ;;  %v14139_v30 = vor.u32 %v15578_v25, %v14138_v13  ;;  %9086 = vmatpush.bf16.msra.mxu0 %v13883_v12  ;;  %v15524_v3 = vld [vmem:[%s15972_s9 + $0xc4] sm:$0xf]  ;;  %v14335_v6 = vor.u32 %v15624_v53, %v14332_v63 }
 0x4ec   : > { %v13866_v31 = vld [vmem:[%s15972_s9 + $0x40] sm:$0xf]  ;;  %v15510_v32 = vld [vmem:[%s15972_s9 + $0x4c] sm:$0xf0]  ;;  %v14267_v52 = vor.u32 %v15610_v62, %v14266_v24  ;;  %9099 = vmatpush.bf16.msra.mxu1 %v14011_v40  ;;  %v13932_v1 = vld [vmem:[%s15972_s9 + $0xd0] sm:$0xf0] }
 0x4ed   : > { %v13994_v21 = vld [vmem:[%s15972_s9 + $0x140] sm:$0xf]  ;;  %v15542_v35 = vld [vmem:[%s15972_s9 + $0x14c] sm:$0xf0]  ;;  %v13867_v46 = vor.u32 %v15510_v32, %v13866_v31  ;;  %9112 = vmatpush.bf16.msra.mxu2 %v14139_v30  ;;  %v15556_v47 = vld [vmem:[%s15972_s9 + $0x1c4] sm:$0xf]  ;;  %v13935_v16 = vor.u32 %v15524_v3, %v13932_v1 }
 0x4ee   : > { %v14122_v34 = vld [vmem:[%s15972_s9 + $0x240] sm:$0xf]  ;;  %v15574_v50 = vld [vmem:[%s15972_s9 + $0x24c] sm:$0xf0]  ;;  %v13995_v10 = vor.u32 %v15542_v35, %v13994_v21  ;;  %9125 = vmatpush.bf16.msra.mxu3 %v14267_v52  ;;  %v14060_v11 = vld [vmem:[%s15972_s9 + $0x1d0] sm:$0xf0] }
 0x4ef   : > { %v14250_v19 = vld [vmem:[%s15972_s9 + $0x340] sm:$0xf]  ;;  %v15606_v27 = vld [vmem:[%s15972_s9 + $0x34c] sm:$0xf0]  ;;  %v14123_v39 = vor.u32 %v15574_v50, %v14122_v34  ;;  %9087 = vmatpush.bf16.msra.mxu0 %v13867_v46  ;;  %v15588_v7 = vld [vmem:[%s15972_s9 + $0x2c4] sm:$0xf]  ;;  %v14063_v32 = vor.u32 %v15556_v47, %v14060_v11 }
 0x4f0   : > { %v13850_v48 = vld [vmem:[%s15972_s9 + $0x20] sm:$0xf]  ;;  %v15506_v20 = vld [vmem:[%s15972_s9 + $0x2c] sm:$0xf0]  ;;  %v14251_v42 = vor.u32 %v15606_v27, %v14250_v19  ;;  %9100 = vmatpush.bf16.msra.mxu1 %v13995_v10  ;;  %v14188_v8 = vld [vmem:[%s15972_s9 + $0x2d0] sm:$0xf0] }
 0x4f1   : > { %v13978_v28 = vld [vmem:[%s15972_s9 + $0x120] sm:$0xf]  ;;  %v15538_v15 = vld [vmem:[%s15972_s9 + $0x12c] sm:$0xf0]  ;;  %v13851_v54 = vor.u32 %v15506_v20, %v13850_v48  ;;  %9113 = vmatpush.bf16.msra.mxu2 %v14123_v39  ;;  %v15620_v9 = vld [vmem:[%s15972_s9 + $0x3c4] sm:$0xf]  ;;  %v14191_v21 = vor.u32 %v15588_v7, %v14188_v8 }
 0x4f2   : > { %v14106_v43 = vld [vmem:[%s15972_s9 + $0x220] sm:$0xf]  ;;  %v15570_v18 = vld [vmem:[%s15972_s9 + $0x22c] sm:$0xf0]  ;;  %v13979_v49 = vor.u32 %v15538_v15, %v13978_v28  ;;  %9126 = vmatpush.bf16.msra.mxu3 %v14251_v42  ;;  %v14316_v13 = vld [vmem:[%s15972_s9 + $0x3d0] sm:$0xf0] }
 0x4f3   : > { %v14234_v61 = vld [vmem:[%s15972_s9 + $0x320] sm:$0xf]  ;;  %v15602_v17 = vld [vmem:[%s15972_s9 + $0x32c] sm:$0xf0]  ;;  %v14107_v29 = vor.u32 %v15570_v18, %v14106_v43  ;;  %9088 = vmatpush.bf16.msra.mxu0 %v13851_v54  ;;  %v15520_v25 = vld [vmem:[%s15972_s9 + $0xa4] sm:$0xf]  ;;  %v14319_v50 = vor.u32 %v15620_v9, %v14316_v13 }
 0x4f4   : > { %v13834_v26 = vld [vmem:[%s15972_s9] sm:$0xf]  ;;  %v15502_v23 = vld [vmem:[%s15972_s9 + $0xc] sm:$0xf0]  ;;  %v14235_v51 = vor.u32 %v15602_v17, %v14234_v61  ;;  %9101 = vmatpush.bf16.msra.mxu1 %v13979_v49  ;;  %v13916_v62 = vld [vmem:[%s15972_s9 + $0xb0] sm:$0xf0] }
 0x4f5   : > { %v13962_v41 = vld [vmem:[%s15972_s9 + $0x100] sm:$0xf]  ;;  %v15534_v45 = vld [vmem:[%s15972_s9 + $0x10c] sm:$0xf0]  ;;  %v13835_v56 = vor.u32 %v15502_v23, %v13834_v26  ;;  %9114 = vmatpush.bf16.msra.mxu2 %v14107_v29  ;;  %v15552_v52 = vld [vmem:[%s15972_s9 + $0x1a4] sm:$0xf]  ;;  %v13919_v28 = vor.u32 %v15520_v25, %v13916_v62 }
 0x4f6   : > { %v14090_v33 = vld [vmem:[%s15972_s9 + $0x200] sm:$0xf]  ;;  %v15566_v37 = vld [vmem:[%s15972_s9 + $0x20c] sm:$0xf0]  ;;  %v13963_v0 = vor.u32 %v15534_v45, %v13962_v41  ;;  %9127 = vmatpush.bf16.msra.mxu3 %v14235_v51  ;;  %v14044_v35 = vld [vmem:[%s15972_s9 + $0x1b0] sm:$0xf0] }
 0x4f7   : > { %v14218_v38 = vld [vmem:[%s15972_s9 + $0x300] sm:$0xf]  ;;  %v15598_v4 = vld [vmem:[%s15972_s9 + $0x30c] sm:$0xf0]  ;;  %v14091_v36 = vor.u32 %v15566_v37, %v14090_v33  ;;  %9089 = vmatpush.bf16.msra.mxu0 %v13835_v56  ;;  %v15584_v34 = vld [vmem:[%s15972_s9 + $0x2a4] sm:$0xf]  ;;  %v14047_v43 = vor.u32 %v15552_v52, %v14044_v35 }
 0x4f8   : > { %v14219_v44 = vor.u32 %v15598_v4, %v14218_v38  ;;  %9102 = vmatpush.bf16.msra.mxu1 %v13963_v0  ;;  %v8286_v24 = vld [vmem:[%s317_s26] sm:$0xf]  ;;  %v14172_v19 = vld [vmem:[%s15972_s9 + $0x2b0] sm:$0xf0]  ;;  %v15616_v39 = vld [vmem:[%s15972_s9 + $0x3a4] sm:$0xf] }
 0x4f9   : > { %9115 = vmatpush.bf16.msra.mxu2 %v14091_v36  ;;  %v8288_v12 = vperm.slane %v8286_v24, 0  ;;  %v8289_v40 = vperm.slane %v8286_v24, 1  ;;  %v8290_v30 = vperm.slane %v8286_v24, 2  ;;  %v8291_v31 = vperm.slane %v8286_v24, 3  ;;  %v14300_v48 = vld [vmem:[%s15972_s9 + $0x3b0] sm:$0xf0] }
 0x4fa   : > { %9128 = vmatpush.bf16.msra.mxu3 %v14219_v44  ;;  %v8285_v20 = vld [vmem:[#allocation2] sm:$0xff]  ;;  %v14175_v18 = vor.u32 %v15584_v34, %v14172_v19  ;;  %v15516_v61 = vld [vmem:[%s15972_s9 + $0x84] sm:$0xf]  ;;  %v13900_v17 = vld [vmem:[%s15972_s9 + $0x90] sm:$0xf0]  ;;  %v14303_v23 = vor.u32 %v15616_v39, %v14300_v48 }
 0x4fb   : > { %9134 = vmatpush.bf16.msrb.mxu0 %v13951_v2  ;;  %v8292_v27 = vrot.slane %v8289_v40, 6  ;;  %v8293_v46 = vrot.slane %v8290_v30, 4  ;;  %v8294_v10 = vrot.slane %v8291_v31, 2  ;;  %v15548_v54 = vld [vmem:[%s15972_s9 + $0x184] sm:$0xf]  ;;  %v13903_v37 = vor.u32 %v15516_v61, %v13900_v17 }
 0x4fc   : > { %9147 = vmatpush.bf16.msrb.mxu1 %v14079_v14  ;;  %v14028_v49 = vld [vmem:[%s15972_s9 + $0x190] sm:$0xf0]  ;;  %v15580_v29 = vld [vmem:[%s15972_s9 + $0x284] sm:$0xf] }
 0x4fd   : > { %9160 = vmatpush.bf16.msrb.mxu2 %v14207_v5  ;;  %v8295_v42 = vsel %vm8272_vm0, %v8288_v12, %v8292_v27  ;;  %v8296_v15 = vsel %vm8274_vm1, %v8293_v46, %v8294_v10  ;;  %v14156_v41 = vld [vmem:[%s15972_s9 + $0x290] sm:$0xf0]  ;;  %v15612_v33 = vld [vmem:[%s15972_s9 + $0x384] sm:$0xf]  ;;  %v14031_v38 = vor.u32 %v15548_v54, %v14028_v49  ;;  %v14082_v49 = vld [vmem:[%s15972_s9 + $0x1e8] sm:$0xf] }
 0x4fe   : > { %9173 = vmatpush.bf16.msrb.mxu3 %v14335_v6  ;;  %v8297_v26 = vsel %vm8276_vm2, %v8295_v42, %v8296_v15  ;;  %v14284_v51 = vld [vmem:[%s15972_s9 + $0x390] sm:$0xf0]  ;;  %v14159_v4 = vor.u32 %v15580_v29, %v14156_v41  ;;  %v15512_v59 = vld [vmem:[%s15972_s9 + $0x64] sm:$0xf]  ;;  %v15563_v41 = vld [vmem:[%s15972_s9 + $0x1f4] sm:$0xf0] }
 0x4ff   : > { %9135 = vmatpush.bf16.msrb.mxu0 %v13935_v16  ;;  %v8299_v45 = vadd.f32 %v8297_v26, %v8285_v20  ;;  %v13884_v22 = vld [vmem:[%s15972_s9 + $0x70] sm:$0xf0]  ;;  %v15544_v55 = vld [vmem:[%s15972_s9 + $0x164] sm:$0xf]  ;;  %v14287_v56 = vor.u32 %v15612_v33, %v14284_v51  ;;  %v13954_v26 = vld [vmem:[%s15972_s9 + $0xe8] sm:$0xf] }
 0x500   : > { %9148 = vmatpush.bf16.msrb.mxu1 %v14063_v32  ;;  %v14012_v58 = vld [vmem:[%s15972_s9 + $0x170] sm:$0xf0]  ;;  %v15576_v60 = vld [vmem:[%s15972_s9 + $0x264] sm:$0xf]  ;;  %v13887_v53 = vor.u32 %v15512_v59, %v13884_v22  ;;  %v15595_v33 = vld [vmem:[%s15972_s9 + $0x2f4] sm:$0xf0] }
 0x501   : > { %9161 = vmatpush.bf16.msrb.mxu2 %v14191_v21  ;;  %8301 = vst [vmem:[#allocation1] ss:$4 sm:$0xff] %v8299_v45  ;;  %v14140_v57 = vld [vmem:[%s15972_s9 + $0x270] sm:$0xf0]  ;;  %v15608_v0 = vld [vmem:[%s15972_s9 + $0x364] sm:$0xf]  ;;  %v14015_v2 = vor.u32 %v15544_v55, %v14012_v58  ;;  %v14083_v55 = vor.u32 %v15563_v41, %v14082_v49 }
 0x502   : > { %9174 = vmatpush.bf16.msrb.mxu3 %v14319_v50  ;;  %v14268_v36 = vld [vmem:[%s15972_s9 + $0x370] sm:$0xf0]  ;;  %v15508_v63 = vld [vmem:[%s15972_s9 + $0x44] sm:$0xf]  ;;  %v14143_v3 = vor.u32 %v15576_v60, %v14140_v57  ;;  %v14210_v45 = vld [vmem:[%s15972_s9 + $0x2e8] sm:$0xf] }
 0x503   : > { %9136 = vmatpush.bf16.msrb.mxu0 %v13919_v28  ;;  %v13868_v44 = vld [vmem:[%s15972_s9 + $0x50] sm:$0xf0]  ;;  %v15540_v1 = vld [vmem:[%s15972_s9 + $0x144] sm:$0xf]  ;;  %v14271_v47 = vor.u32 %v15608_v0, %v14268_v36  ;;  %v13938_v58 = vld [vmem:[%s15972_s9 + $0xc8] sm:$0xf] }
 0x504   : > { %9149 = vmatpush.bf16.msrb.mxu1 %v14047_v43  ;;  %v13996_v14 = vld [vmem:[%s15972_s9 + $0x150] sm:$0xf0]  ;;  %v15572_v5 = vld [vmem:[%s15972_s9 + $0x244] sm:$0xf]  ;;  %v13871_v62 = vor.u32 %v15508_v63, %v13868_v44  ;;  %v15527_v60 = vld [vmem:[%s15972_s9 + $0xd4] sm:$0xf0] }
 0x505   : > { %9162 = vmatpush.bf16.msrb.mxu2 %v14175_v18  ;;  %v14124_v11 = vld [vmem:[%s15972_s9 + $0x250] sm:$0xf0]  ;;  %v15604_v6 = vld [vmem:[%s15972_s9 + $0x344] sm:$0xf]  ;;  %v13999_v12 = vor.u32 %v15540_v1, %v13996_v14  ;;  %v14066_v0 = vld [vmem:[%s15972_s9 + $0x1c8] sm:$0xf] }
 0x506   : > { %9175 = vmatpush.bf16.msrb.mxu3 %v14303_v23  ;;  %v14252_v7 = vld [vmem:[%s15972_s9 + $0x350] sm:$0xf0]  ;;  %v14127_v31 = vor.u32 %v15572_v5, %v14124_v11  ;;  %v15504_v32 = vld [vmem:[%s15972_s9 + $0x24] sm:$0xf]  ;;  %v15531_v23 = vld [vmem:[%s15972_s9 + $0xf4] sm:$0xf0] }
 0x507   : > { %9137 = vmatpush.bf16.msrb.mxu0 %v13903_v37  ;;  %v13852_v21 = vld [vmem:[%s15972_s9 + $0x30] sm:$0xf0]  ;;  %v15536_v52 = vld [vmem:[%s15972_s9 + $0x124] sm:$0xf]  ;;  %v14255_v35 = vor.u32 %v15604_v6, %v14252_v7  ;;  %v13955_v22 = vor.u32 %v15531_v23, %v13954_v26  ;;  %v15559_v36 = vld [vmem:[%s15972_s9 + $0x1d4] sm:$0xf0] }
 0x508   : > { %9150 = vmatpush.bf16.msrb.mxu1 %v14031_v38  ;;  %v8304_v8 = vld.sshfl [vmem:[#allocation1 + $0x10] sm:$0xff pattern:$0x73625140]  ;;  %v8305_v9 = vld.sshfl [vmem:[#allocation1 + $0x18] sm:$0xff pattern:$0x73625140]  ;;  %v13855_v10 = vor.u32 %v15504_v32, %v13852_v21  ;;  %v14067_v1 = vor.u32 %v15559_v36, %v14066_v0 }
 0x509   : > { %9163 = vmatpush.bf16.msrb.mxu2 %v14159_v4  ;;  %v18462_v16 = vpack.c.bf16 %v8304_v8, %v8304_v8  ;;  %v18464_v13 = vpack.c.bf16 %v8305_v9, %v8305_v9  ;;  %v8302_v25 = vld.sshfl [vmem:[#allocation1] sm:$0xff pattern:$0x73625140]  ;;  %v8303_v24 = vld.sshfl [vmem:[#allocation1 + $0x8] sm:$0xff pattern:$0x73625140] }
 0x50a   : > { %9176 = vmatpush.bf16.msrb.mxu3 %v14287_v56  ;;  %v18466_v40 = vpack.c.bf16 %v8302_v25, %v8302_v25  ;;  %v18468_v30 = vpack.c.bf16 %v8303_v24, %v8303_v24  ;;  %v13980_v34 = vld [vmem:[%s15972_s9 + $0x130] sm:$0xf0]  ;;  %v15568_v50 = vld [vmem:[%s15972_s9 + $0x224] sm:$0xf]  ;;  %v14338_v38 = vld [vmem:[%s15972_s9 + $0x3e8] sm:$0xf]  ;;  %v14211_v56 = vor.u32 %v15595_v33, %v14210_v45 }
 0x50b   : > { %9138 = vmatpush.bf16.msrb.mxu0 %v13887_v53  ;;  %9116 = vmatmul.bf16.vlgmr.msra.gmra.mxu2 %v18462_v16  ;;  %v14108_v19 = vld [vmem:[%s15972_s9 + $0x230] sm:$0xf0]  ;;  %v15600_v27 = vld [vmem:[%s15972_s9 + $0x324] sm:$0xf]  ;;  %v13983_v20 = vor.u32 %v15536_v52, %v13980_v34  ;;  %v15627_v4 = vld [vmem:[%s15972_s9 + $0x3f4] sm:$0xf0] }
 0x50c   : > { %9151 = vmatpush.bf16.msrb.mxu1 %v14015_v2  ;;  %9129 = vmatmul.bf16.vlgmr.msra.gmra.mxu3 %v18464_v13  ;;  %v14236_v46 = vld [vmem:[%s15972_s9 + $0x330] sm:$0xf0]  ;;  %v15500_v39 = vld [vmem:[%s15972_s9 + $0x4] sm:$0xf]  ;;  %v14111_v28 = vor.u32 %v15568_v50, %v14108_v19  ;;  %v14339_v57 = vor.u32 %v15627_v4, %v14338_v38  ;;  %v14194_v53 = vld [vmem:[%s15972_s9 + $0x2c8] sm:$0xf] }
 0x50d   : > { %9164 = vmatpush.bf16.msrb.mxu2 %v14143_v3  ;;  %9090 = vmatmul.bf16.vlgmr.msra.gmra.mxu0 %v18466_v40  ;;  %v13836_v48 = vld [vmem:[%s15972_s9 + $0x10] sm:$0xf0]  ;;  %v15532_v42 = vld [vmem:[%s15972_s9 + $0x104] sm:$0xf]  ;;  %v14239_v18 = vor.u32 %v15600_v27, %v14236_v46  ;;  %v15591_v63 = vld [vmem:[%s15972_s9 + $0x2d4] sm:$0xf0]  ;;  %v13939_v3 = vor.u32 %v15527_v60, %v13938_v58 }
 0x50e   : > { %9177 = vmatpush.bf16.msrb.mxu3 %v14271_v47  ;;  %9103 = vmatmul.bf16.vlgmr.msra.gmra.mxu1 %v18468_v30  ;;  %v13964_v15 = vld [vmem:[%s15972_s9 + $0x110] sm:$0xf0]  ;;  %v15564_v43 = vld [vmem:[%s15972_s9 + $0x204] sm:$0xf]  ;;  %v13839_v29 = vor.u32 %v15500_v39, %v13836_v48  ;;  %v14322_v44 = vld [vmem:[%s15972_s9 + $0x3c8] sm:$0xf]  ;;  %v14195_v47 = vor.u32 %v15591_v63, %v14194_v53 }
 0x50f   : > { %9139 = vmatpush.bf16.msrb.mxu0 %v13871_v62  ;;  %v14092_v61 = vld [vmem:[%s15972_s9 + $0x210] sm:$0xf0]  ;;  %v15596_v17 = vld [vmem:[%s15972_s9 + $0x304] sm:$0xf]  ;;  %v13967_v51 = vor.u32 %v15532_v42, %v13964_v15  ;;  %v15623_v2 = vld [vmem:[%s15972_s9 + $0x3d4] sm:$0xf0] }
 0x510   : > { %9152 = vmatpush.bf16.msrb.mxu1 %v13999_v12  ;;  %v14220_v54 = vld [vmem:[%s15972_s9 + $0x310] sm:$0xf0]  ;;  %v14095_v37 = vor.u32 %v15564_v43, %v14092_v61  ;;  %v13922_v14 = vld [vmem:[%s15972_s9 + $0xa8] sm:$0xf]  ;;  %v15523_v5 = vld [vmem:[%s15972_s9 + $0xb4] sm:$0xf0]  ;;  %v14323_v11 = vor.u32 %v15623_v2, %v14322_v44 }
 0x511   : > { %9165 = vmatpush.bf16.msrb.mxu2 %v14127_v31  ;;  %v14223_v59 = vor.u32 %v15596_v17, %v14220_v54  ;;  %v14050_v6 = vld [vmem:[%s15972_s9 + $0x1a8] sm:$0xf]  ;;  %v15555_v7 = vld [vmem:[%s15972_s9 + $0x1b4] sm:$0xf0]  ;;  %v13923_v62 = vor.u32 %v15523_v5, %v13922_v14 }
 0x512   : > { %9178 = vmatpush.bf16.msrb.mxu3 %v14255_v35  ;;  %v14178_v8 = vld [vmem:[%s15972_s9 + $0x2a8] sm:$0xf]  ;;  %v15587_v9 = vld [vmem:[%s15972_s9 + $0x2b4] sm:$0xf0]  ;;  %v14051_v12 = vor.u32 %v15555_v7, %v14050_v6 }
 0x513   : > { %9140 = vmatpush.bf16.msrb.mxu0 %v13855_v10  ;;  %v14306_v25 = vld [vmem:[%s15972_s9 + $0x3a8] sm:$0xf]  ;;  %v15619_v24 = vld [vmem:[%s15972_s9 + $0x3b4] sm:$0xf0]  ;;  %v14179_v21 = vor.u32 %v15587_v9, %v14178_v8 }
 0x514   : > { %9153 = vmatpush.bf16.msrb.mxu1 %v13983_v20  ;;  %v13906_v31 = vld [vmem:[%s15972_s9 + $0x88] sm:$0xf]  ;;  %v15519_v32 = vld [vmem:[%s15972_s9 + $0x94] sm:$0xf0]  ;;  %v14307_v52 = vor.u32 %v15619_v24, %v14306_v25  ;;  %v15529_v25 = vld [vmem:[%s15972_s9 + $0xec] sm:$0xf] }
 0x515   : > { %9166 = vmatpush.bf16.msrb.mxu2 %v14111_v28  ;;  %v14034_v35 = vld [vmem:[%s15972_s9 + $0x188] sm:$0xf]  ;;  %v15551_v34 = vld [vmem:[%s15972_s9 + $0x194] sm:$0xf0]  ;;  %v13907_v10 = vor.u32 %v15519_v32, %v13906_v31  ;;  %v13956_v24 = vld [vmem:[%s15972_s9 + $0xf8] sm:$0xf0] }
 0x516   : > { %9179 = vmatpush.bf16.msrb.mxu3 %v14239_v18  ;;  %v14162_v50 = vld [vmem:[%s15972_s9 + $0x288] sm:$0xf]  ;;  %v15583_v19 = vld [vmem:[%s15972_s9 + $0x294] sm:$0xf0]  ;;  %v14035_v39 = vor.u32 %v15551_v34, %v14034_v35  ;;  %v15561_v31 = vld [vmem:[%s15972_s9 + $0x1ec] sm:$0xf] }
 0x517   : > { %9141 = vmatpush.bf16.msrb.mxu0 %v13839_v29  ;;  %v14290_v27 = vld [vmem:[%s15972_s9 + $0x388] sm:$0xf]  ;;  %v15615_v46 = vld [vmem:[%s15972_s9 + $0x394] sm:$0xf0]  ;;  %v14163_v28 = vor.u32 %v15583_v19, %v14162_v50  ;;  %v14212_v35 = vld [vmem:[%s15972_s9 + $0x2f8] sm:$0xf0]  ;;  %v13959_v50 = vor.u32 %v15529_v25, %v13956_v24 }
 0x518   : > { %9154 = vmatpush.bf16.msrb.mxu1 %v13967_v51  ;;  %v13890_v48 = vld [vmem:[%s15972_s9 + $0x68] sm:$0xf]  ;;  %v15515_v20 = vld [vmem:[%s15972_s9 + $0x74] sm:$0xf0]  ;;  %v14291_v42 = vor.u32 %v15615_v46, %v14290_v27  ;;  %v15625_v19 = vld [vmem:[%s15972_s9 + $0x3ec] sm:$0xf] }
 0x519   : > { %9167 = vmatpush.bf16.msrb.mxu2 %v14095_v37  ;;  %v14018_v15 = vld [vmem:[%s15972_s9 + $0x168] sm:$0xf]  ;;  %v15547_v43 = vld [vmem:[%s15972_s9 + $0x174] sm:$0xf0]  ;;  %v13891_v26 = vor.u32 %v15515_v20, %v13890_v48  ;;  %v14340_v27 = vld [vmem:[%s15972_s9 + $0x3f8] sm:$0xf0] }
 0x51a   : > { %9180 = vmatpush.bf16.msrb.mxu3 %v14223_v59  ;;  %v14146_v18 = vld [vmem:[%s15972_s9 + $0x268] sm:$0xf]  ;;  %v15579_v61 = vld [vmem:[%s15972_s9 + $0x274] sm:$0xf0]  ;;  %v14019_v23 = vor.u32 %v15547_v43, %v14018_v15  ;;  %v15525_v20 = vld [vmem:[%s15972_s9 + $0xcc] sm:$0xf]  ;;  %v14343_v15 = vor.u32 %v15625_v19, %v14340_v27 }
 0x51b   : > { %9186 = vmatpush.bf16.msra.mxu0 %v13955_v22  ;;  %v14274_v17 = vld [vmem:[%s15972_s9 + $0x368] sm:$0xf]  ;;  %v15611_v54 = vld [vmem:[%s15972_s9 + $0x374] sm:$0xf0]  ;;  %v14147_v41 = vor.u32 %v15579_v61, %v14146_v18  ;;  %v14068_v43 = vld [vmem:[%s15972_s9 + $0x1d8] sm:$0xf0] }
 0x51c   : > { %9199 = vmatpush.bf16.msra.mxu1 %v14083_v55  ;;  %9168 = vmatmul.bf16.vlgmr.msrb.gmra.mxu2 %v18462_v16  ;;  %v13874_v49 = vld [vmem:[%s15972_s9 + $0x48] sm:$0xf]  ;;  %v15511_v29 = vld [vmem:[%s15972_s9 + $0x54] sm:$0xf0]  ;;  %v14275_v45 = vor.u32 %v15611_v54, %v14274_v17  ;;  %v15589_v18 = vld [vmem:[%s15972_s9 + $0x2cc] sm:$0xf] }
 0x51d   : > { %9212 = vmatpush.bf16.msra.mxu2 %v14211_v56  ;;  %9181 = vmatmul.bf16.vlgmr.msrb.gmra.mxu3 %v18464_v13  ;;  %v14002_v33 = vld [vmem:[%s15972_s9 + $0x148] sm:$0xf]  ;;  %v15543_v51 = vld [vmem:[%s15972_s9 + $0x154] sm:$0xf0]  ;;  %v13875_v22 = vor.u32 %v15511_v29, %v13874_v49  ;;  %v14196_v61 = vld [vmem:[%s15972_s9 + $0x2d8] sm:$0xf0] }
 0x51e   : > { %9225 = vmatpush.bf16.msra.mxu3 %v14339_v57  ;;  %9142 = vmatmul.bf16.vlgmr.msrb.gmra.mxu0 %v18466_v40  ;;  %v14130_v37 = vld [vmem:[%s15972_s9 + $0x248] sm:$0xf]  ;;  %v15575_v38 = vld [vmem:[%s15972_s9 + $0x254] sm:$0xf0]  ;;  %v14003_v55 = vor.u32 %v15543_v51, %v14002_v33  ;;  %v15621_v17 = vld [vmem:[%s15972_s9 + $0x3cc] sm:$0xf]  ;;  %v14199_v49 = vor.u32 %v15589_v18, %v14196_v61 }
 0x51f   : > { %9187 = vmatpush.bf16.msra.mxu0 %v13939_v3  ;;  %9155 = vmatmul.bf16.vlgmr.msrb.gmra.mxu1 %v18468_v30  ;;  %v14258_v4 = vld [vmem:[%s15972_s9 + $0x348] sm:$0xf]  ;;  %v15607_v59 = vld [vmem:[%s15972_s9 + $0x354] sm:$0xf0]  ;;  %v14131_v60 = vor.u32 %v15575_v38, %v14130_v37  ;;  %v14324_v54 = vld [vmem:[%s15972_s9 + $0x3d8] sm:$0xf0] }
 0x520   : > { %9200 = vmatpush.bf16.msra.mxu1 %v14067_v1  ;;  %v13858_v56 = vld [vmem:[%s15972_s9 + $0x28] sm:$0xf]  ;;  %v15507_v58 = vld [vmem:[%s15972_s9 + $0x34] sm:$0xf0]  ;;  %v14259_v57 = vor.u32 %v15607_v59, %v14258_v4  ;;  %v15521_v29 = vld [vmem:[%s15972_s9 + $0xac] sm:$0xf]  ;;  %v14327_v33 = vor.u32 %v15621_v17, %v14324_v54 }
 0x521   : > { %9213 = vmatpush.bf16.msra.mxu2 %v14195_v47  ;;  %v13986_v0 = vld [vmem:[%s15972_s9 + $0x128] sm:$0xf]  ;;  %v15539_v36 = vld [vmem:[%s15972_s9 + $0x134] sm:$0xf0]  ;;  %v13859_v3 = vor.u32 %v15507_v58, %v13858_v56  ;;  %v14052_v51 = vld [vmem:[%s15972_s9 + $0x1b8] sm:$0xf0] }
 0x522   : > { %9226 = vmatpush.bf16.msra.mxu3 %v14323_v11  ;;  %v14114_v53 = vld [vmem:[%s15972_s9 + $0x228] sm:$0xf]  ;;  %v15571_v63 = vld [vmem:[%s15972_s9 + $0x234] sm:$0xf0]  ;;  %v13987_v5 = vor.u32 %v15539_v36, %v13986_v0  ;;  %v15585_v37 = vld [vmem:[%s15972_s9 + $0x2ac] sm:$0xf] }
 0x523   : > { %9188 = vmatpush.bf16.msra.mxu0 %v13923_v62  ;;  %v14242_v44 = vld [vmem:[%s15972_s9 + $0x328] sm:$0xf]  ;;  %v15603_v2 = vld [vmem:[%s15972_s9 + $0x334] sm:$0xf0]  ;;  %v14115_v7 = vor.u32 %v15571_v63, %v14114_v53  ;;  %v14180_v38 = vld [vmem:[%s15972_s9 + $0x2b8] sm:$0xf0] }
 0x524   : > { %9201 = vmatpush.bf16.msra.mxu1 %v14051_v12  ;;  %v13842_v1 = vld [vmem:[%s15972_s9 + $0x8] sm:$0xf]  ;;  %v15503_v14 = vld [vmem:[%s15972_s9 + $0x14] sm:$0xf0]  ;;  %v14243_v8 = vor.u32 %v15603_v2, %v14242_v44  ;;  %v15617_v4 = vld [vmem:[%s15972_s9 + $0x3ac] sm:$0xf]  ;;  %v14183_v56 = vor.u32 %v15585_v37, %v14180_v38 }
 0x525   : > { %9214 = vmatpush.bf16.msra.mxu2 %v14179_v21  ;;  %v13970_v47 = vld [vmem:[%s15972_s9 + $0x108] sm:$0xf]  ;;  %v15535_v11 = vld [vmem:[%s15972_s9 + $0x114] sm:$0xf0]  ;;  %v13843_v32 = vor.u32 %v15503_v14, %v13842_v1  ;;  %v14084_v21 = vld [vmem:[%s15972_s9 + $0x1f8] sm:$0xf0] }
 0x526   : > { %9227 = vmatpush.bf16.msra.mxu3 %v14307_v52  ;;  %v14098_v6 = vld [vmem:[%s15972_s9 + $0x208] sm:$0xf]  ;;  %v15567_v9 = vld [vmem:[%s15972_s9 + $0x214] sm:$0xf0]  ;;  %v15593_v52 = vld [vmem:[%s15972_s9 + $0x2ec] sm:$0xf]  ;;  %v13971_v34 = vor.u32 %v15535_v11, %v13970_v47 }
 0x527   : > { %9189 = vmatpush.bf16.msra.mxu0 %v13907_v10  ;;  %v14226_v62 = vld [vmem:[%s15972_s9 + $0x308] sm:$0xf]  ;;  %v15599_v12 = vld [vmem:[%s15972_s9 + $0x314] sm:$0xf0]  ;;  %v14099_v46 = vor.u32 %v15567_v9, %v14098_v6  ;;  %v14215_v48 = vor.u32 %v15593_v52, %v14212_v35  ;;  %v14308_v59 = vld [vmem:[%s15972_s9 + $0x3b8] sm:$0xf0] }
 0x528   : > { %9202 = vmatpush.bf16.msra.mxu1 %v14035_v39  ;;  %v14227_v10 = vor.u32 %v15599_v12, %v14226_v62  ;;  %v14087_v39 = vor.u32 %v15561_v31, %v14084_v21  ;;  %v15517_v58 = vld [vmem:[%s15972_s9 + $0x8c] sm:$0xf]  ;;  %v14311_v0 = vor.u32 %v15617_v4, %v14308_v59  ;;  %v14036_v36 = vld [vmem:[%s15972_s9 + $0x198] sm:$0xf0] }
 0x529   : > { %9215 = vmatpush.bf16.msra.mxu2 %v14163_v28  ;;  %v13940_v28 = vld [vmem:[%s15972_s9 + $0xd8] sm:$0xf0]  ;;  %v15581_v53 = vld [vmem:[%s15972_s9 + $0x28c] sm:$0xf] }
 0x52a   : > { %9228 = vmatpush.bf16.msra.mxu3 %v14291_v42  ;;  %v15557_v42 = vld [vmem:[%s15972_s9 + $0x1cc] sm:$0xf]  ;;  %v14164_v63 = vld [vmem:[%s15972_s9 + $0x298] sm:$0xf0] }
 0x52b   : > { %9190 = vmatpush.bf16.msra.mxu0 %v13891_v26  ;;  %v13943_v26 = vor.u32 %v15525_v20, %v13940_v28  ;;  %v15613_v44 = vld [vmem:[%s15972_s9 + $0x38c] sm:$0xf]  ;;  %v14292_v2 = vld [vmem:[%s15972_s9 + $0x398] sm:$0xf0]  ;;  %v14167_v14 = vor.u32 %v15581_v53, %v14164_v63  ;;  %v15640_v63 = vld [vmem:[%s18755_s4 + $0x60] sm:$0xff] }
 0x52c   : > { %9203 = vmatpush.bf16.msra.mxu1 %v14019_v23  ;;  %v14071_v23 = vor.u32 %v15557_v42, %v14068_v43  ;;  %v13892_v47 = vld [vmem:[%s15972_s9 + $0x78] sm:$0xf0]  ;;  %v15545_v11 = vld [vmem:[%s15972_s9 + $0x16c] sm:$0xf]  ;;  %v14295_v6 = vor.u32 %v15613_v44, %v14292_v2 }
 0x52d   : > { %9216 = vmatpush.bf16.msra.mxu2 %v14147_v41  ;;  %v13924_v41 = vld [vmem:[%s15972_s9 + $0xb8] sm:$0xf0]  ;;  %v15609_v25 = vld [vmem:[%s15972_s9 + $0x36c] sm:$0xf] }
 0x52e   : > { %9229 = vmatpush.bf16.msra.mxu3 %v14275_v45  ;;  %v15553_v45 = vld [vmem:[%s15972_s9 + $0x1ac] sm:$0xf]  ;;  %v14148_v9 = vld [vmem:[%s15972_s9 + $0x278] sm:$0xf0] }
 0x52f   : > { %9191 = vmatpush.bf16.msra.mxu0 %v13875_v22  ;;  %v13927_v22 = vor.u32 %v15521_v29, %v13924_v41  ;;  %v14276_v24 = vld [vmem:[%s15972_s9 + $0x378] sm:$0xf0]  ;;  %v15541_v52 = vld [vmem:[%s15972_s9 + $0x14c] sm:$0xf] }
 0x530   : > { %9204 = vmatpush.bf16.msra.mxu1 %v14003_v55  ;;  %v14055_v55 = vor.u32 %v15553_v45, %v14052_v51  ;;  %v13876_v21 = vld [vmem:[%s15972_s9 + $0x58] sm:$0xf0]  ;;  %v14279_v35 = vor.u32 %v15609_v25, %v14276_v24  ;;  %v15605_v27 = vld [vmem:[%s15972_s9 + $0x34c] sm:$0xf]  ;;  %v15648_v25 = vld [vmem:[%s18755_s4 + $0xa0] sm:$0xff] }
 0x531   : > { %9217 = vmatpush.bf16.msra.mxu2 %v14131_v60  ;;  %v13908_v60 = vld [vmem:[%s15972_s9 + $0x98] sm:$0xf0]  ;;  %v15505_v20 = vld [vmem:[%s15972_s9 + $0x2c] sm:$0xf] }
 0x532   : > { %9230 = vmatpush.bf16.msra.mxu3 %v14259_v57  ;;  %v15549_v57 = vld [vmem:[%s15972_s9 + $0x18c] sm:$0xf]  ;;  %v14132_v19 = vld [vmem:[%s15972_s9 + $0x258] sm:$0xf0] }
 0x533   : > { %9192 = vmatpush.bf16.msra.mxu0 %v13859_v3  ;;  %v13911_v3 = vor.u32 %v15517_v58, %v13908_v60  ;;  %v14039_v1 = vor.u32 %v15549_v57, %v14036_v36  ;;  %v13860_v28 = vld [vmem:[%s15972_s9 + $0x38] sm:$0xf0]  ;;  %v15537_v42 = vld [vmem:[%s15972_s9 + $0x12c] sm:$0xf]  ;;  %v15642_v36 = vld [vmem:[%s18755_s4 + $0x70] sm:$0xff] }
 0x534   : > { %9205 = vmatpush.bf16.msra.mxu1 %v13987_v5  ;;  %v15513_v5 = vld [vmem:[%s15972_s9 + $0x6c] sm:$0xf]  ;;  %v13988_v43 = vld [vmem:[%s15972_s9 + $0x138] sm:$0xf0] }
 0x535   : > { %9218 = vmatpush.bf16.msra.mxu2 %v14115_v7  ;;  %v14020_v7 = vld [vmem:[%s15972_s9 + $0x178] sm:$0xf0]  ;;  %v13895_v62 = vor.u32 %v15513_v5, %v13892_v47  ;;  %v15569_v18 = vld [vmem:[%s15972_s9 + $0x22c] sm:$0xf]  ;;  %v15636_v5 = vld [vmem:[%s18755_s4 + $0x40] sm:$0xff] }
 0x536   : > { %9231 = vmatpush.bf16.msra.mxu3 %v14243_v8  ;;  %v15577_v8 = vld [vmem:[%s15972_s9 + $0x26c] sm:$0xf]  ;;  %v14023_v12 = vor.u32 %v15545_v11, %v14020_v7  ;;  %v14116_v61 = vld [vmem:[%s15972_s9 + $0x238] sm:$0xf0]  ;;  %v15650_v11 = vld [vmem:[%s18755_s4 + $0xb0] sm:$0xff] }
 0x537   : > { %9193 = vmatpush.bf16.msra.mxu0 %v13843_v32  ;;  %v14151_v31 = vor.u32 %v15577_v8, %v14148_v9  ;;  %v15509_v32 = vld [vmem:[%s15972_s9 + $0x4c] sm:$0xf]  ;;  %v14244_v54 = vld [vmem:[%s15972_s9 + $0x338] sm:$0xf0] }
 0x538   : > { %9206 = vmatpush.bf16.msra.mxu1 %v13971_v34  ;;  %v14004_v34 = vld [vmem:[%s15972_s9 + $0x158] sm:$0xf0]  ;;  %v15601_v17 = vld [vmem:[%s15972_s9 + $0x32c] sm:$0xf] }
 0x539   : > { %9219 = vmatpush.bf16.msra.mxu2 %v14099_v46  ;;  %v14260_v46 = vld [vmem:[%s15972_s9 + $0x358] sm:$0xf0]  ;;  %v15501_v29 = vld [vmem:[%s15972_s9 + $0xc] sm:$0xf] }
 0x53a   : > { %9232 = vmatpush.bf16.msra.mxu3 %v14227_v10  ;;  %9194 = vmatmul.bf16.vlgmr.msra.gmra.mxu0 %v18466_v40  ;;  %v13879_v10 = vor.u32 %v15509_v32, %v13876_v21  ;;  %v13844_v41 = vld [vmem:[%s15972_s9 + $0x18] sm:$0xf0]  ;;  %v15533_v45 = vld [vmem:[%s15972_s9 + $0x10c] sm:$0xf] }
 0x53b   : > { %9238 = vmatpush.bf16.msrb.mxu0 %v13959_v50  ;;  %9207 = vmatmul.bf16.vlgmr.msra.gmra.mxu1 %v18468_v30  ;;  %v15573_v50 = vld [vmem:[%s15972_s9 + $0x24c] sm:$0xf]  ;;  %v13972_v51 = vld [vmem:[%s15972_s9 + $0x118] sm:$0xf0] }
 0x53c   : > { %9251 = vmatpush.bf16.msrb.mxu1 %v14087_v39  ;;  %9220 = vmatmul.bf16.vlgmr.msra.gmra.mxu2 %v18462_v16  ;;  %v14007_v39 = vor.u32 %v15541_v52, %v14004_v34  ;;  %v15565_v37 = vld [vmem:[%s15972_s9 + $0x20c] sm:$0xf]  ;;  %v14100_v38 = vld [vmem:[%s15972_s9 + $0x218] sm:$0xf0]  ;;  %v15646_v34 = vld [vmem:[%s18755_s4 + $0x90] sm:$0xff] }
 0x53d   : > { %9264 = vmatpush.bf16.msrb.mxu2 %v14215_v48  ;;  %9233 = vmatmul.bf16.vlgmr.msra.gmra.mxu3 %v18464_v13  ;;  %v14135_v48 = vor.u32 %v15573_v50, %v14132_v19  ;;  %v15597_v4 = vld [vmem:[%s15972_s9 + $0x30c] sm:$0xf]  ;;  %v14228_v59 = vld [vmem:[%s15972_s9 + $0x318] sm:$0xf0] }
 0x53e   : > { %9277 = vmatpush.bf16.msrb.mxu3 %v14343_v15  ;;  %v14263_v15 = vor.u32 %v15605_v27, %v14260_v46  ;;  %v14231_v58 = vor.u32 %v15597_v4, %v14228_v59  ;;  %v15635_v60 = vld [vmem:[%s18755_s4 + $0x38] sm:$0xff]  ;;  %v15633_v53 = vld [vmem:[%s18755_s4 + $0x28] sm:$0xff] }
 0x53f   : > { %9239 = vmatpush.bf16.msrb.mxu0 %v13943_v26  ;;  %v13863_v26 = vor.u32 %v15505_v20, %v13860_v28  ;;  %v15643_v57 = vld [vmem:[%s18755_s4 + $0x78] sm:$0xff]  ;;  %v15629_v44 = vld [vmem:[%s18755_s4 + $0x8] sm:$0xff]  ;;  %v15644_v20 = vld [vmem:[%s18755_s4 + $0x80] sm:$0xff] }
 0x540   : > { %9252 = vmatpush.bf16.msrb.mxu1 %v14071_v23  ;;  %v13991_v23 = vor.u32 %v15537_v42, %v13988_v43  ;;  %v15639_v2 = vld [vmem:[%s18755_s4 + $0x58] sm:$0xff]  ;;  %v15645_v27 = vld [vmem:[%s18755_s4 + $0x88] sm:$0xff] }
 0x541   : > { %9265 = vmatpush.bf16.msrb.mxu2 %v14199_v49  ;;  %v14119_v49 = vor.u32 %v15569_v18, %v14116_v61  ;;  %v15651_v47 = vld [vmem:[%s18755_s4 + $0xb8] sm:$0xff]  ;;  %v15658_v18 = vld [vmem:[%s18755_s4 + $0xf0] sm:$0xff] }
 0x542   : > { %9278 = vmatpush.bf16.msrb.mxu3 %v14327_v33  ;;  %v14247_v33 = vor.u32 %v15601_v17, %v14244_v54 }
 0x543   : > { %9240 = vmatpush.bf16.msrb.mxu0 %v13927_v22  ;;  %v13847_v22 = vor.u32 %v15501_v29, %v13844_v41  ;;  %v15656_v29 = vld [vmem:[%s18755_s4 + $0xe0] sm:$0xff]  ;;  %v15655_v41 = vld [vmem:[%s18755_s4 + $0xd8] sm:$0xff] }
 0x544   : > { %9253 = vmatpush.bf16.msrb.mxu1 %v14055_v55  ;;  %v13975_v55 = vor.u32 %v15533_v45, %v13972_v51  ;;  %v15654_v45 = vld [vmem:[%s18755_s4 + $0xd0] sm:$0xff] }
 0x545   : > { %9266 = vmatpush.bf16.msrb.mxu2 %v14183_v56  ;;  %v14103_v56 = vor.u32 %v15565_v37, %v14100_v38  ;;  %v15653_v37 = vld [vmem:[%s18755_s4 + $0xc8] sm:$0xff] }
 0x546   : > { %9279 = vmatpush.bf16.msrb.mxu3 %v14311_v0  ;;  %v15634_v0 = vld [vmem:[%s18755_s4 + $0x30] sm:$0xff] }
 0x547   : > { %9241 = vmatpush.bf16.msrb.mxu0 %v13911_v3  ;;  %v15628_v3 = vld [vmem:[%s18755_s4] sm:$0xff] }
 0x548   : > { %9254 = vmatpush.bf16.msrb.mxu1 %v14039_v1  ;;  %v15638_v1 = vld [vmem:[%s18755_s4 + $0x50] sm:$0xff] }
 0x549   : > { %9267 = vmatpush.bf16.msrb.mxu2 %v14167_v14  ;;  %v15637_v14 = vld [vmem:[%s18755_s4 + $0x48] sm:$0xff] }
 0x54a   : > { %9280 = vmatpush.bf16.msrb.mxu3 %v14295_v6  ;;  %v15649_v6 = vld [vmem:[%s18755_s4 + $0xa8] sm:$0xff] }
 0x54b   : > { %9242 = vmatpush.bf16.msrb.mxu0 %v13895_v62 }
 0x54c   : > { %9255 = vmatpush.bf16.msrb.mxu1 %v14023_v12 }
 0x54d   : > { %9268 = vmatpush.bf16.msrb.mxu2 %v14151_v31  ;;  %v15647_v31 = vld [vmem:[%s18755_s4 + $0x98] sm:$0xff] }
 0x54e   : > { %9281 = vmatpush.bf16.msrb.mxu3 %v14279_v35 }
 0x54f   : > { %9243 = vmatpush.bf16.msrb.mxu0 %v13879_v10 }
 0x550   : > { %9256 = vmatpush.bf16.msrb.mxu1 %v14007_v39 }
 0x551   : > { %9269 = vmatpush.bf16.msrb.mxu2 %v14135_v48 }
 0x552   : > { %9282 = vmatpush.bf16.msrb.mxu3 %v14263_v15  ;;  %v15659_v15 = vld [vmem:[%s18755_s4 + $0xf8] sm:$0xff] }
 0x553   : > { %9244 = vmatpush.bf16.msrb.mxu0 %v13863_v26  ;;  %v15657_v26 = vld [vmem:[%s18755_s4 + $0xe8] sm:$0xff] }
 0x554   : > { %9257 = vmatpush.bf16.msrb.mxu1 %v13991_v23 }
 0x555   : > { %9270 = vmatpush.bf16.msrb.mxu2 %v14119_v49 }
 0x556   : > { %9283 = vmatpush.bf16.msrb.mxu3 %v14247_v33 }
 0x557   : > { %9245 = vmatpush.bf16.msrb.mxu0 %v13847_v22  ;;  %v15652_v22 = vld [vmem:[%s18755_s4 + $0xc0] sm:$0xff] }
 0x558   : > { %9258 = vmatpush.bf16.msrb.mxu1 %v13975_v55 }
 0x559   : > { %9271 = vmatpush.bf16.msrb.mxu2 %v14103_v56 }
 0x55a   : > { %9284 = vmatpush.bf16.msrb.mxu3 %v14231_v58  ;;  %9246 = vmatmul.bf16.vlgmr.msrb.gmra.mxu0 %v18466_v40  ;;  %v15632_v40 = vld [vmem:[%s18755_s4 + $0x20] sm:$0xff] }
 0x55b   : > { %9550 = vmatpush.bf16.msra.mxu0 %v15635_v60  ;;  %9259 = vmatmul.bf16.vlgmr.msrb.gmra.mxu1 %v18468_v30  ;;  %v15631_v30 = vld [vmem:[%s18755_s4 + $0x18] sm:$0xff] }
 0x55c   : > { %9563 = vmatpush.bf16.msra.mxu1 %v15643_v57  ;;  %9272 = vmatmul.bf16.vlgmr.msrb.gmra.mxu2 %v18462_v16  ;;  %v15641_v16 = vld [vmem:[%s18755_s4 + $0x68] sm:$0xff] }
 0x55d   : > { %9285 = vmatmul.bf16.vlgmr.msrb.gmra.mxu3 %v18464_v13  ;;  %v15630_v13 = vld [vmem:[%s18755_s4 + $0x10] sm:$0xff]  ;;  %9576 = vmatpush.bf16.msra.mxu2 %v15651_v47 }
 0x55e   : > { %9589 = vmatpush.bf16.msra.mxu3 %v15659_v15 }
 0x55f   : > { %9551 = vmatpush.bf16.msra.mxu0 %v15634_v0 }
 0x560   : > { %9564 = vmatpush.bf16.msra.mxu1 %v15642_v36 }
 0x561   : > { %9577 = vmatpush.bf16.msra.mxu2 %v15650_v11 }
 0x562   : > { %9590 = vmatpush.bf16.msra.mxu3 %v15658_v18 }
 0x563   : > { %9552 = vmatpush.bf16.msra.mxu0 %v15633_v53 }
 0x564   : > { %9565 = vmatpush.bf16.msra.mxu1 %v15641_v16 }
 0x565   : > { %9578 = vmatpush.bf16.msra.mxu2 %v15649_v6 }
 0x566   : > { %9591 = vmatpush.bf16.msra.mxu3 %v15657_v26 }
 0x567   : > { %9553 = vmatpush.bf16.msra.mxu0 %v15632_v40 }
 0x568   : > { %9566 = vmatpush.bf16.msra.mxu1 %v15640_v63 }
 0x569   : > { %9579 = vmatpush.bf16.msra.mxu2 %v15648_v25 }
 0x56a   : > { %9592 = vmatpush.bf16.msra.mxu3 %v15656_v29 }
 0x56b   : > { %9554 = vmatpush.bf16.msra.mxu0 %v15631_v30 }
 0x56c   : > { %9567 = vmatpush.bf16.msra.mxu1 %v15639_v2 }
 0x56d   : > { %9580 = vmatpush.bf16.msra.mxu2 %v15647_v31 }
 0x56e   : > { %9593 = vmatpush.bf16.msra.mxu3 %v15655_v41 }
 0x56f   : > { %9555 = vmatpush.bf16.msra.mxu0 %v15630_v13 }
 0x570   : > { %9568 = vmatpush.bf16.msra.mxu1 %v15638_v1 }
 0x571   : > { %9581 = vmatpush.bf16.msra.mxu2 %v15646_v34 }
 0x572   : > { %9594 = vmatpush.bf16.msra.mxu3 %v15654_v45 }
 0x573   : > { %9556 = vmatpush.bf16.msra.mxu0 %v15629_v44 }
 0x574   : > { %9569 = vmatpush.bf16.msra.mxu1 %v15637_v14 }
 0x575   : > { %9582 = vmatpush.bf16.msra.mxu2 %v15645_v27 }
 0x576   : > { %9595 = vmatpush.bf16.msra.mxu3 %v15653_v37 }
 0x577   : > { %9557 = vmatpush.bf16.msra.mxu0 %v15628_v3 }
 0x578   : > { %9570 = vmatpush.bf16.msra.mxu1 %v15636_v5 }
 0x579   : > { %9583 = vmatpush.bf16.msra.mxu2 %v15644_v20 }
 0x57a   : > { %9596 = vmatpush.bf16.msra.mxu3 %v15652_v22 }
 0x58a   : > { %v9091_v7 = vpop.f32.mrf.mxu0 }
 0x58b   : > { %v9104_v8 = vpop.f32.mrf.mxu1 }
 0x58c   : > { %v9105_v9 = vadd.f32 %v9104_v8, %v9091_v7 }
 0x58e   : > { %v9117_v24 = vpop.f32.mrf.mxu2 }
 0x58f   : > { %v9118_v62 = vadd.f32 %v9117_v24, %v9105_v9  ;;  %v9130_v12 = vpop.f32.mrf.mxu3 }
 0x591   : > { %v9131_v32 = vadd.f32 %v9130_v12, %v9118_v62 }
 0x592   : > { %v9093_v21 = vpop.f32.mrf.mxu0 }
 0x593   : > { %v9106_v52 = vpop.f32.mrf.mxu1  ;;  %v9290_v35 = vpack.c.bf16 %v9131_v32, %v9131_v32 }
 0x595   : > { %9558 = vmatmul.bf16.vlgmr.msra.gmra.mxu0 %v9290_v35 }
 0x596   : > { %v9119_v50 = vpop.f32.mrf.mxu2 }
 0x597   : > { %v9132_v19 = vpop.f32.mrf.mxu3 }
 0x59b   : > { %v9143_v46 = vpop.f32.mrf.mxu0 }
 0x59c   : > { %v9156_v10 = vpop.f32.mrf.mxu1 }
 0x59d   : > { %v9157_v39 = vadd.f32 %v9156_v10, %v9143_v46 }
 0x59f   : > { %v9169_v48 = vpop.f32.mrf.mxu2 }
 0x5a0   : > { %v9170_v28 = vadd.f32 %v9169_v48, %v9157_v39  ;;  %v9182_v42 = vpop.f32.mrf.mxu3 }
 0x5a2   : > { %v9183_v43 = vadd.f32 %v9182_v42, %v9170_v28 }
 0x5a3   : > { %v9145_v17 = vpop.f32.mrf.mxu0 }
 0x5a4   : > { %v9291_v61 = vpack.c.bf16 %v9183_v43, %v9183_v43  ;;  %v9158_v54 = vpop.f32.mrf.mxu1 }
 0x5a6   : > { %9571 = vmatmul.bf16.vlgmr.msra.gmra.mxu1 %v9291_v61 }
 0x5a7   : > { %v9171_v23 = vpop.f32.mrf.mxu2 }
 0x5a8   : > { %v9184_v49 = vpop.f32.mrf.mxu3 }
 0x5b7   : > { %v9195_v33 = vpop.f32.mrf.mxu0 }
 0x5b8   : > { %v9208_v51 = vpop.f32.mrf.mxu1 }
 0x5b9   : > { %v9209_v38 = vadd.f32 %v9208_v51, %v9195_v33 }
 0x5bf   : > { %v9221_v4 = vpop.f32.mrf.mxu2  ;;  %v9197_v56 = vpop.f32.mrf.mxu0 }
 0x5c0   : > { %v9234_v59 = vpop.f32.mrf.mxu3  ;;  %v9222_v55 = vadd.f32 %v9221_v4, %v9209_v38  ;;  %v9210_v60 = vpop.f32.mrf.mxu1 }
 0x5c2   : > { %v9235_v58 = vadd.f32 %v9234_v59, %v9222_v55 }
 0x5c4   : > { %v9292_v57 = vpack.c.bf16 %v9235_v58, %v9235_v58 }
 0x5c6   : > { %9584 = vmatmul.bf16.vlgmr.msra.gmra.mxu2 %v9292_v57 }
 0x5c7   : > { %v9223_v0 = vpop.f32.mrf.mxu2 }
 0x5c8   : > { %v9236_v36 = vpop.f32.mrf.mxu3 }
 0x5d7   : > { %v9247_v53 = vpop.f32.mrf.mxu0 }
 0x5d8   : > { %v9260_v40 = vpop.f32.mrf.mxu1 }
 0x5d9   : > { %v9261_v30 = vadd.f32 %v9260_v40, %v9247_v53 }
 0x5df   : > { %v9273_v16 = vpop.f32.mrf.mxu2  ;;  %v9249_v44 = vpop.f32.mrf.mxu0 }
 0x5e0   : > { %v9274_v13 = vadd.f32 %v9273_v16, %v9261_v30  ;;  %v9286_v63 = vpop.f32.mrf.mxu3  ;;  %v9262_v2 = vpop.f32.mrf.mxu1 }
 0x5e2   : > { %v9287_v3 = vadd.f32 %v9286_v63, %v9274_v13 }
 0x5e4   : > { %v9293_v1 = vpack.c.bf16 %v9287_v3, %v9287_v3 }
 0x5e6   : > { %9597 = vmatmul.bf16.vlgmr.msra.gmra.mxu3 %v9293_v1 }
 0x5e7   : > { %v9275_v14 = vpop.f32.mrf.mxu2 }
 0x5e8   : > { %v9288_v5 = vpop.f32.mrf.mxu3 }
 0x612   : > { %v9559_v47 = vpop.f32.mrf.mxu0 }
 0x61a   : > { %v9561_v11 = vpop.f32.mrf.mxu0 }
 0x623   : > { %v9572_v6 = vpop.f32.mrf.mxu1 }
 0x624   : > { %v9573_v25 = vadd.f32 %v9572_v6, %v9559_v47 }
 0x62b   : > { %v9574_v7 = vpop.f32.mrf.mxu1 }
 0x649   : > { %v9585_v8 = vpop.f32.mrf.mxu2 }
 0x64a   : > { %v9586_v24 = vadd.f32 %v9585_v8, %v9573_v25 }
 0x651   : > { %v9587_v9 = vpop.f32.mrf.mxu2 }
 0x669   : > { %v9598_v62 = vpop.f32.mrf.mxu3 }
 0x66a   : > { %v9599_v12 = vadd.f32 %v9598_v62, %v9586_v24 }
 0x66c   : > { %9603 = vst.msk [vmem:[%s15977_s24] sm:$0x3] %vm9602_vm3, %v9599_v12 }
 0x671   : > { %v9600_v31 = vpop.f32.mrf.mxu3 }
 0x672 PF: > { %s18_s25 = sadd.s32 1, %s15831_s25   ;;  %s18765_s22 = sld [smem:[#allocation6_spill]] }
 0x673   : > { %p15_p6 = scmp.ge.s32.totalorder %s18_s25, 6   ;;  %s18766_s17 = sld [smem:[#allocation7_spill]] }
 0x674   : > { %s18767_s24 = sld [smem:[#allocation8_spill]]  ;;  %s18768_s18 = smov %s15807_s19 }
 0x675   : > { %s18769_s19 = smov %s15811_s20  ;;  %s18770_s20 = smov %s15934_s13 }
 0x676   : > { %s18771_s21 = smov %s15823_s23  ;;  %17 = sbr.rel (!%p15_p6) target bundleno = 5 (0x5), region = 98 }
 0x679   : > { %s18772_s23 = smov %s18766_s17 }
 0x67b   :  { %9623 = vsyncpa [#allocation4], 1 }
 0x67c   :  { %9625 = vsyncpa [#allocation4 + $0x1], 1 }

</bundles_post_ra>
